<compile_context>
chip_gen: v6e
topology: v6e:2x2x1
jax: 0.10.0
libtpu: 0.0.40
codegen_flags: <defaults>
</compile_context>

<pallas_src>
import functools

import jax
import jax.numpy as jnp
from jax import lax
from jax.experimental import pallas as pl
from jax.experimental.pallas import tpu as pltpu


def _encoder_kernel(adj_ref, h0_hbm, wps_ref, bp_ref, wn_ref, bn_ref,
                    lnw_ref, lnb_ref, o_ref, h_scr, p_scr, hs_scr, h0_sem,
                    *, ts):
    """grid = (num_layers, num_dest_tiles); both axes 'arbitrary' (sequential)."""
    l = pl.program_id(0)
    i = pl.program_id(1)
    tm, d = o_ref.shape
    n = h_scr.shape[0]

    # Seed the resident node-feature buffer once, straight from HBM (h0 stays
    # in HBM via memory_space=pl.ANY, so it never occupies a duplicated,
    # double-buffered VMEM window on top of h_scr).
    @pl.when(jnp.logical_and(l == 0, i == 0))
    def _():
        cp = pltpu.make_async_copy(h0_hbm, h_scr, h0_sem)
        cp.start()
        cp.wait()

    # Once per layer (dest tile 0): fused (N, D) x (D, 2D) bf16 matmul giving
    # the pool-MLP pre-activation and the self term, both resident in VMEM.
    # p is stored in bf16: rounding is monotone, so max-pooling bf16 p equals
    # rounding the f32 max — and h_neigh is consumed by a bf16 MXU dot anyway.
    @pl.when(i == 0)
    def _():
        h_bf = h_scr[...].astype(jnp.bfloat16)
        hc = jnp.dot(h_bf, wps_ref[...], preferred_element_type=jnp.float32)
        p_scr[...] = jnp.maximum(hc[:, :d] + bp_ref[...], 0.0).astype(jnp.bfloat16)
        hs_scr[...] = hc[:, d:]
        # TODO(synk): for very large N, chunk this dot over N (lax.fori_loop)
        # so the (N, 2D) f32 temporary never fully materializes (v7x VMEM).

    # ---- neighbor max-pool for this destination tile, blocked over sources --
    # adj in {0,1} and p >= 0 (ReLU) => a plain multiply is a valid mask
    # (1 VALU op/elem instead of compare+select).  Do NOT reuse this rewrite
    # for weighted adjacency or a non-ReLU pool activation.
    h_neigh = jnp.zeros((tm, d), jnp.bfloat16)
    for s in range(n // ts):                          # static, small trip count
        a_blk = adj_ref[:, s * ts:(s + 1) * ts]       # (TM, TS) bf16, lane-aligned
        p_blk = p_scr[s * ts:(s + 1) * ts, :]         # (TS, D)  bf16, >= 0
        masked = a_blk[:, :, None] * p_blk[None, :, :]
        h_neigh = jnp.maximum(h_neigh, jnp.max(masked, axis=1))

    # ---- combine + LayerNorm (single-pass stats, matches reference) + ReLU --
    row0 = pl.multiple_of(i * tm, tm)
    x = (hs_scr[pl.ds(row0, tm), :]
         + jnp.dot(h_neigh, wn_ref[...], preferred_element_type=jnp.float32)
         + bn_ref[...])

    mean = jnp.mean(x, axis=-1, keepdims=True)
    m2 = jnp.mean(x * x, axis=-1, keepdims=True)
    var = jnp.maximum(m2 - mean * mean, 0.0)
    y = (x - mean) * lax.rsqrt(var + 1e-5) * lnw_ref[...] + lnb_ref[...]
    h_new = jnp.maximum(y, 0.0)
    # TODO(synk): dropout omitted (training=False -> F.dropout is identity).

    h_scr[pl.ds(row0, tm), :] = h_new    # feeds the next layer
    # With tm == N the output block index is constant across the layer axis,
    # so this block stays resident and is flushed to HBM once at grid end.
    o_ref[...] = h_new


def encoder_forward_pallas(adj, h, params, *, tm=128, ts=128):
    """Run the whole Encoder (all layers) in one pallas_call."""
    n, d = h.shape
    num_layers = params["wps"].shape[0]
    assert n % tm == 0 and n % ts == 0 and tm % 8 == 0 and ts % 128 == 0

    wmap = lambda l, i: (l, 0, 0)
    in_specs = [
        pl.BlockSpec((tm, n), lambda l, i: (i, 0)),      # adj rows (resident if tm==n)
        pl.BlockSpec(memory_space=pl.ANY),               # h0 stays in HBM, DMA'd once
        pl.BlockSpec((pl.Squeezed(), d, 2 * d), wmap),   # [W_pool | W_self]
        pl.BlockSpec((pl.Squeezed(), 1, d), wmap),       # b_pool
        pl.BlockSpec((pl.Squeezed(), d, d), wmap),       # W_neigh
        pl.BlockSpec((pl.Squeezed(), 1, d), wmap),       # b_neigh
        pl.BlockSpec((pl.Squeezed(), 1, d), wmap),       # ln_w
        pl.BlockSpec((pl.Squeezed(), 1, d), wmap),       # ln_b
    ]
    out_spec = pl.BlockSpec((tm, d), lambda l, i: (i, 0))

    kernel = functools.partial(_encoder_kernel, ts=ts)
    return pl.pallas_call(
        kernel,
        out_shape=jax.ShapeDtypeStruct((n, d), jnp.float32),
        grid_spec=pltpu.PrefetchScalarGridSpec(
            num_scalar_prefetch=0,
            grid=(num_layers, n // tm),
            in_specs=in_specs,
            out_specs=out_spec,
            scratch_shapes=[
                pltpu.VMEM((n, d), jnp.float32),    # h (layer input / next output)
                pltpu.VMEM((n, d), jnp.bfloat16),   # p = relu(h @ W_pool + b_pool)
                pltpu.VMEM((n, d), jnp.float32),    # h @ W_self
                pltpu.SemaphoreType.DMA,            # h0 seed copy
            ],
        ),
        # layer axis is a carried dependency; dest axis reads the per-layer
        # scratch computed at i == 0, so keep both sequential.
        compiler_params=pltpu.CompilerParams(
            dimension_semantics=("arbitrary", "arbitrary")),
    )(adj, h, params["wps"], params["bp"], params["wn"],
      params["bn"], params["lnw"], params["lnb"])


# ------------------------- pure-JAX reference -------------------------------
def _encoder_ref(adj, h, sp):
    num_layers = sp["wps"].shape[0]
    d = sp["wn"].shape[-1]
    for l in range(num_layers):
        hb = h.astype(jnp.bfloat16)
        hc = jnp.dot(hb, sp["wps"][l], preferred_element_type=jnp.float32)
        p = jnp.maximum(hc[:, :d] + sp["bp"][l], 0.0)
        hs = hc[:, d:]
        masked = jnp.where(adj[:, :, None] > 0, p[None, :, :], 0.0)
        h_neigh = jnp.max(masked, axis=1)
        x = (hs
             + jnp.dot(h_neigh.astype(jnp.bfloat16), sp["wn"][l],
                       preferred_element_type=jnp.float32)
             + sp["bn"][l])
        mean = jnp.mean(x, axis=-1, keepdims=True)
        m2 = jnp.mean(x * x, axis=-1, keepdims=True)
        var = jnp.maximum(m2 - mean * mean, 0.0)
        y = (x - mean) * lax.rsqrt(var + 1e-5) * sp["lnw"][l] + sp["lnb"][l]
        h = jnp.maximum(y, 0.0)
    return h


# ------------------------------ setup ---------------------------------------
def make_stacked_params(key, num_layers, d):
    keys = jax.random.split(key, num_layers)
    wps, wn, bp, bn, lnw, lnb = [], [], [], [], [], []
    scale = 1.0 / float(d) ** 0.5
    for k in keys:
        ks = jax.random.split(k, 5)
        w_pool = jax.random.uniform(ks[0], (d, d), jnp.float32, -scale, scale)
        b_pool = jax.random.uniform(ks[1], (1, d), jnp.float32, -scale, scale)
        w_self = jax.random.uniform(ks[2], (d, d), jnp.float32, -scale, scale)
        w_neigh = jax.random.uniform(ks[3], (d, d), jnp.float32, -scale, scale)
        b_neigh = jax.random.uniform(ks[4], (1, d), jnp.float32, -scale, scale)
        wps.append(jnp.concatenate([w_pool, w_self], axis=1))   # (D, 2D)
        wn.append(w_neigh)
        bp.append(b_pool)
        bn.append(b_neigh)
        lnw.append(jnp.ones((1, d), jnp.float32))
        lnb.append(jnp.zeros((1, d), jnp.float32))
    return {
        "wps": jnp.stack(wps).astype(jnp.bfloat16),   # (L, D, 2D)
        "wn":  jnp.stack(wn).astype(jnp.bfloat16),    # (L, D, D)
        "bp":  jnp.stack(bp),                          # (L, 1, D) f32
        "bn":  jnp.stack(bn),
        "lnw": jnp.stack(lnw),
        "lnb": jnp.stack(lnb),
    }


if __name__ == "__main__":
    hidden_size = 64
    num_layers = 2
    d = 2 * hidden_size          # gsage layers operate on 2*hidden_size feats
    n = 128                      # number of graph nodes
    tm, ts = 128, 128            # destination-tile / source-block sizes

    root = jax.random.PRNGKey(0)
    k_h, k_adj, k_layers = jax.random.split(root, 3)

    # node features
    h0 = jax.random.normal(k_h, (n, d), jnp.float32)

    # deterministic adjacency: ring edges + a few random extras, no self loops,
    # stored in bfloat16 ({0,1} exactly representable) to halve N^2 traffic.
    idx = jnp.arange(n)
    adj = jnp.zeros((n, n), jnp.float32)
    adj = adj.at[idx, (idx + 1) % n].set(1.0)
    adj = adj.at[idx, (idx - 1) % n].set(1.0)
    extra = (jax.random.uniform(k_adj, (n, n)) < 0.05).astype(jnp.float32)
    adj = jnp.clip(adj + extra * (1.0 - jnp.eye(n)), 0.0, 1.0)
    adj = adj.astype(jnp.bfloat16)

    params = make_stacked_params(k_layers, num_layers, d)

    run = jax.jit(functools.partial(encoder_forward_pallas, tm=tm, ts=ts))
    out = jax.block_until_ready(run(adj, h0, params))

    ref = _encoder_ref(adj, h0, params)
    assert out.shape == (n, d)
    err = float(jnp.max(jnp.abs(out - ref)))
    assert jnp.allclose(out, ref, atol=2e-3, rtol=2e-3), err

    print("KERNEL_OK")
</pallas_src>

<mosaic_0001>
module attributes {stable_mosaic.version = 11 : i64} {
  func.func @_encoder_kernel(%arg0: i32, %arg1: i32, %arg2: memref<128x128xbf16, #tpu.memory_space<vmem>>, %arg3: memref<128x128xf32, #tpu.memory_space<any>>, %arg4: memref<1x128x256xbf16, #tpu.memory_space<vmem>>, %arg5: memref<1x1x128xf32, #tpu.memory_space<vmem>>, %arg6: memref<1x128x128xbf16, #tpu.memory_space<vmem>>, %arg7: memref<1x1x128xf32, #tpu.memory_space<vmem>>, %arg8: memref<1x1x128xf32, #tpu.memory_space<vmem>>, %arg9: memref<1x1x128xf32, #tpu.memory_space<vmem>>, %arg10: memref<128x128xf32, #tpu.memory_space<vmem>>, %arg11: memref<128x128xf32, #tpu.memory_space<vmem>>, %arg12: memref<128x128xbf16, #tpu.memory_space<vmem>>, %arg13: memref<128x128xf32, #tpu.memory_space<vmem>>, %arg14: memref<!tpu.dma_semaphore, #tpu.memory_space<semaphore_mem>>) attributes {dimension_semantics = [#tpu.dimension_semantics<arbitrary>, #tpu.dimension_semantics<arbitrary>], iteration_bounds = array<i64: 2, 1>, scalar_prefetch = 0 : i64, scratch_operands = 4 : i64, tpu.core_type = #tpu.core_type<tc>, window_params = [{transform_indices = @transform_0, window_bounds = array<i64: 128, 128>}, {}, {transform_indices = @transform_2, window_bounds = array<i64: 1, 128, 256>}, {transform_indices = @transform_3, window_bounds = array<i64: 1, 1, 128>}, {transform_indices = @transform_4, window_bounds = array<i64: 1, 128, 128>}, {transform_indices = @transform_5, window_bounds = array<i64: 1, 1, 128>}, {transform_indices = @transform_6, window_bounds = array<i64: 1, 1, 128>}, {transform_indices = @transform_7, window_bounds = array<i64: 1, 1, 128>}, {transform_indices = @transform_8, window_bounds = array<i64: 128, 128>}]} {
    %c0_i32 = arith.constant 0 : i32
    %0 = arith.cmpi eq, %arg0, %c0_i32 : i32
    %c0_i32_0 = arith.constant 0 : i32
    %1 = arith.cmpi eq, %arg1, %c0_i32_0 : i32
    %2 = arith.andi %0, %1 : i1
    %3 = arith.extui %2 : i1 to i32
    %c0_i32_1 = arith.constant 0 : i32
    %4 = arith.cmpi ne, %3, %c0_i32_1 : i32
    scf.if %4 {
      tpu.enqueue_dma source(%arg3 : memref<128x128xf32, #tpu.memory_space<any>>) target(%arg11 : memref<128x128xf32, #tpu.memory_space<vmem>>) target_semaphore(%arg14 : memref<!tpu.dma_semaphore, #tpu.memory_space<semaphore_mem>>)
      tpu.wait_dma2 semaphore(%arg14 : memref<!tpu.dma_semaphore, #tpu.memory_space<semaphore_mem>>) src(%arg3 : memref<128x128xf32, #tpu.memory_space<any>>) dst(%arg11 : memref<128x128xf32, #tpu.memory_space<vmem>>)
    } else {
    }
    %c0_i32_2 = arith.constant 0 : i32
    %5 = arith.cmpi eq, %arg1, %c0_i32_2 : i32
    %6 = arith.extui %5 : i1 to i32
    %c0_i32_3 = arith.constant 0 : i32
    %7 = arith.cmpi ne, %6, %c0_i32_3 : i32
    scf.if %7 {
      %c0_32 = arith.constant 0 : index
      %c0_33 = arith.constant 0 : index
      %63 = vector.load %arg11[%c0_32, %c0_33] : memref<128x128xf32, #tpu.memory_space<vmem>>, vector<128x128xf32>
      %64 = arith.truncf %63 : vector<128x128xf32> to vector<128x128xbf16>
      %c0_34 = arith.constant 0 : index
      %c0_35 = arith.constant 0 : index
      %c0_36 = arith.constant 0 : index
      %65 = vector.load %arg4[%c0_34, %c0_35, %c0_36] : memref<1x128x256xbf16, #tpu.memory_space<vmem>>, vector<1x128x256xbf16>
      %66 = vector.shape_cast %65 : vector<1x128x256xbf16> to vector<128x256xbf16>
      %cst_37 = arith.constant dense<0.000000e+00> : vector<128x256xf32>
      %67 = tpu.matmul %64, %66, %cst_37 {dimension_numbers = #tpu.dot_dimension_numbers<[1], [0], [0], [1], [0, 0, 1, 1], [], []>} : vector<128x128xbf16>, vector<128x256xbf16>, vector<128x256xf32> -> vector<128x256xf32>
      %68 = vector.extract_strided_slice %67 {offsets = [0, 0], sizes = [128, 128], strides = [1, 1]} : vector<128x256xf32> to vector<128x128xf32>
      %c0_38 = arith.constant 0 : index
      %c0_39 = arith.constant 0 : index
      %c0_40 = arith.constant 0 : index
      %69 = vector.load %arg5[%c0_38, %c0_39, %c0_40] : memref<1x1x128xf32, #tpu.memory_space<vmem>>, vector<1x1x128xf32>
      %70 = vector.shape_cast %69 : vector<1x1x128xf32> to vector<1x128xf32>
      %71 = vector.broadcast %70 : vector<1x128xf32> to vector<128x128xf32>
      %72 = arith.addf %68, %71 : vector<128x128xf32>
      %cst_41 = arith.constant 0.000000e+00 : f32
      %73 = vector.broadcast %cst_41 : f32 to vector<128x128xf32>
      %74 = arith.maximumf %72, %73 : vector<128x128xf32>
      %75 = arith.truncf %74 : vector<128x128xf32> to vector<128x128xbf16>
      %c0_42 = arith.constant 0 : index
      %c0_43 = arith.constant 0 : index
      %76 = vector.load %arg12[%c0_42, %c0_43] : memref<128x128xbf16, #tpu.memory_space<vmem>>, vector<128x128xbf16>
      tpu.vector_store %arg12[%c0_42, %c0_43], %75 {strides = array<i32>} : memref<128x128xbf16, #tpu.memory_space<vmem>>, vector<128x128xbf16>,
      %77 = vector.extract_strided_slice %67 {offsets = [0, 128], sizes = [128, 128], strides = [1, 1]} : vector<128x256xf32> to vector<128x128xf32>
      %c0_44 = arith.constant 0 : index
      %c0_45 = arith.constant 0 : index
      %78 = vector.load %arg13[%c0_44, %c0_45] : memref<128x128xf32, #tpu.memory_space<vmem>>, vector<128x128xf32>
      tpu.vector_store %arg13[%c0_44, %c0_45], %77 {strides = array<i32>} : memref<128x128xf32, #tpu.memory_space<vmem>>, vector<128x128xf32>,
    } else {
    }
    %cst = arith.constant 0.000000e+00 : bf16
    %8 = vector.broadcast %cst : bf16 to vector<128x128xbf16>
    %c0 = arith.constant 0 : index
    %c0_4 = arith.constant 0 : index
    %9 = vector.load %arg2[%c0, %c0_4] : memref<128x128xbf16, #tpu.memory_space<vmem>>, vector<128x128xbf16>
    %c0_5 = arith.constant 0 : index
    %c0_6 = arith.constant 0 : index
    %10 = vector.load %arg12[%c0_5, %c0_6] : memref<128x128xbf16, #tpu.memory_space<vmem>>, vector<128x128xbf16>
    %11 = vector.shape_cast %9 : vector<128x128xbf16> to vector<128x128x1xbf16>
    %12 = vector.shape_cast %10 : vector<128x128xbf16> to vector<1x128x128xbf16>
    %13 = vector.broadcast %11 : vector<128x128x1xbf16> to vector<128x128x128xbf16>
    %14 = vector.broadcast %12 : vector<1x128x128xbf16> to vector<128x128x128xbf16>
    %15 = arith.mulf %13, %14 : vector<128x128x128xbf16>
    %cst_7 = arith.constant dense<0xFF80> : vector<128x128xbf16>
    %16 = vector.multi_reduction <maximumf>, %15, %cst_7 [1] : vector<128x128x128xbf16> to vector<128x128xbf16>
    %17 = arith.maximumf %8, %16 : vector<128x128xbf16>
    %c128_i32 = arith.constant 128 : i32
    %18 = arith.muli %arg1, %c128_i32 : i32
    %19 = tpu.assume_multiple %18, 128 : i32
    %20 = arith.index_cast %19 : i32 to index
    %c0_8 = arith.constant 0 : index
    %21 = vector.load %arg13[%20, %c0_8] : memref<128x128xf32, #tpu.memory_space<vmem>>, vector<128x128xf32>
    %c0_9 = arith.constant 0 : index
    %c0_10 = arith.constant 0 : index
    %c0_11 = arith.constant 0 : index
    %22 = vector.load %arg6[%c0_9, %c0_10, %c0_11] : memref<1x128x128xbf16, #tpu.memory_space<vmem>>, vector<1x128x128xbf16>
    %23 = vector.shape_cast %22 : vector<1x128x128xbf16> to vector<128x128xbf16>
    %cst_12 = arith.constant dense<0.000000e+00> : vector<128x128xf32>
    %24 = tpu.matmul %17, %23, %cst_12 {dimension_numbers = #tpu.dot_dimension_numbers<[1], [0], [0], [1], [0, 0, 1, 1], [], []>} : vector<128x128xbf16>, vector<128x128xbf16>, vector<128x128xf32> -> vector<128x128xf32>
    %25 = arith.addf %21, %24 : vector<128x128xf32>
    %c0_13 = arith.constant 0 : index
    %c0_14 = arith.constant 0 : index
    %c0_15 = arith.constant 0 : index
    %26 = vector.load %arg7[%c0_13, %c0_14, %c0_15] : memref<1x1x128xf32, #tpu.memory_space<vmem>>, vector<1x1x128xf32>
    %27 = vector.shape_cast %26 : vector<1x1x128xf32> to vector<1x128xf32>
    %28 = vector.broadcast %27 : vector<1x128xf32> to vector<128x128xf32>
    %29 = arith.addf %25, %28 : vector<128x128xf32>
    %cst_16 = arith.constant dense<0.000000e+00> : vector<128xf32>
    %30 = vector.multi_reduction <add>, %29, %cst_16 [1] : vector<128x128xf32> to vector<128xf32>
    %31 = vector.shape_cast %30 : vector<128xf32> to vector<128x1xf32>
    %cst_17 = arith.constant 1.280000e+02 : f32
    %32 = vector.broadcast %cst_17 : f32 to vector<128x1xf32>
    %33 = arith.divf %31, %32 : vector<128x1xf32>
    %34 = arith.mulf %29, %29 : vector<128x128xf32>
    %cst_18 = arith.constant dense<0.000000e+00> : vector<128xf32>
    %35 = vector.multi_reduction <add>, %34, %cst_18 [1] : vector<128x128xf32> to vector<128xf32>
    %36 = vector.shape_cast %35 : vector<128xf32> to vector<128x1xf32>
    %cst_19 = arith.constant 1.280000e+02 : f32
    %37 = vector.broadcast %cst_19 : f32 to vector<128x1xf32>
    %38 = arith.divf %36, %37 : vector<128x1xf32>
    %39 = arith.mulf %33, %33 : vector<128x1xf32>
    %40 = arith.subf %38, %39 : vector<128x1xf32>
    %cst_20 = arith.constant 0.000000e+00 : f32
    %41 = vector.broadcast %cst_20 : f32 to vector<128x1xf32>
    %42 = arith.maximumf %40, %41 : vector<128x1xf32>
    %43 = vector.broadcast %33 : vector<128x1xf32> to vector<128x128xf32>
    %44 = arith.subf %29, %43 : vector<128x128xf32>
    %cst_21 = arith.constant 9.99999974E-6 : f32
    %45 = vector.broadcast %cst_21 : f32 to vector<128x1xf32>
    %46 = arith.addf %42, %45 : vector<128x1xf32>
    %47 = math.rsqrt %46 : vector<128x1xf32>
    %48 = vector.broadcast %47 : vector<128x1xf32> to vector<128x128xf32>
    %49 = arith.mulf %44, %48 : vector<128x128xf32>
    %c0_22 = arith.constant 0 : index
    %c0_23 = arith.constant 0 : index
    %c0_24 = arith.constant 0 : index
    %50 = vector.load %arg8[%c0_22, %c0_23, %c0_24] : memref<1x1x128xf32, #tpu.memory_space<vmem>>, vector<1x1x128xf32>
    %51 = vector.shape_cast %50 : vector<1x1x128xf32> to vector<1x128xf32>
    %52 = vector.broadcast %51 : vector<1x128xf32> to vector<128x128xf32>
    %53 = arith.mulf %49, %52 : vector<128x128xf32>
    %c0_25 = arith.constant 0 : index
    %c0_26 = arith.constant 0 : index
    %c0_27 = arith.constant 0 : index
    %54 = vector.load %arg9[%c0_25, %c0_26, %c0_27] : memref<1x1x128xf32, #tpu.memory_space<vmem>>, vector<1x1x128xf32>
    %55 = vector.shape_cast %54 : vector<1x1x128xf32> to vector<1x128xf32>
    %56 = vector.broadcast %55 : vector<1x128xf32> to vector<128x128xf32>
    %57 = arith.addf %53, %56 : vector<128x128xf32>
    %cst_28 = arith.constant 0.000000e+00 : f32
    %58 = vector.broadcast %cst_28 : f32 to vector<128x128xf32>
    %59 = arith.maximumf %57, %58 : vector<128x128xf32>
    %60 = arith.index_cast %19 : i32 to index
    %c0_29 = arith.constant 0 : index
    %61 = vector.load %arg11[%60, %c0_29] : memref<128x128xf32, #tpu.memory_space<vmem>>, vector<128x128xf32>
    tpu.vector_store %arg11[%60, %c0_29], %59 {strides = array<i32>} : memref<128x128xf32, #tpu.memory_space<vmem>>, vector<128x128xf32>,
    %c0_30 = arith.constant 0 : index
    %c0_31 = arith.constant 0 : index
    %62 = vector.load %arg10[%c0_30, %c0_31] : memref<128x128xf32, #tpu.memory_space<vmem>>, vector<128x128xf32>
    tpu.vector_store %arg10[%c0_30, %c0_31], %59 {strides = array<i32>} : memref<128x128xf32, #tpu.memory_space<vmem>>, vector<128x128xf32>,
    return
  }
  func.func @transform_0(%arg0: i32, %arg1: i32) -> (i32, i32) {
    %c0_i32 = arith.constant 0 : i32
    %c0_i32_0 = arith.constant 0 : i32
    return %arg1, %c0_i32 : i32, i32
  }
  func.func @transform_2(%arg0: i32, %arg1: i32) -> (i32, i32, i32) {
    %c0_i32 = arith.constant 0 : i32
    %c0_i32_0 = arith.constant 0 : i32
    %c0_i32_1 = arith.constant 0 : i32
    return %arg0, %c0_i32, %c0_i32_0 : i32, i32, i32
  }
  func.func @transform_3(%arg0: i32, %arg1: i32) -> (i32, i32, i32) {
    %c0_i32 = arith.constant 0 : i32
    %c0_i32_0 = arith.constant 0 : i32
    %c0_i32_1 = arith.constant 0 : i32
    return %arg0, %c0_i32, %c0_i32_0 : i32, i32, i32
  }
  func.func @transform_4(%arg0: i32, %arg1: i32) -> (i32, i32, i32) {
    %c0_i32 = arith.constant 0 : i32
    %c0_i32_0 = arith.constant 0 : i32
    %c0_i32_1 = arith.constant 0 : i32
    return %arg0, %c0_i32, %c0_i32_0 : i32, i32, i32
  }
  func.func @transform_5(%arg0: i32, %arg1: i32) -> (i32, i32, i32) {
    %c0_i32 = arith.constant 0 : i32
    %c0_i32_0 = arith.constant 0 : i32
    %c0_i32_1 = arith.constant 0 : i32
    return %arg0, %c0_i32, %c0_i32_0 : i32, i32, i32
  }
  func.func @transform_6(%arg0: i32, %arg1: i32) -> (i32, i32, i32) {
    %c0_i32 = arith.constant 0 : i32
    %c0_i32_0 = arith.constant 0 : i32
    %c0_i32_1 = arith.constant 0 : i32
    return %arg0, %c0_i32, %c0_i32_0 : i32, i32, i32
  }
  func.func @transform_7(%arg0: i32, %arg1: i32) -> (i32, i32, i32) {
    %c0_i32 = arith.constant 0 : i32
    %c0_i32_0 = arith.constant 0 : i32
    %c0_i32_1 = arith.constant 0 : i32
    return %arg0, %c0_i32, %c0_i32_0 : i32, i32, i32
  }
  func.func @transform_8(%arg0: i32, %arg1: i32) -> (i32, i32) {
    %c0_i32 = arith.constant 0 : i32
    %c0_i32_0 = arith.constant 0 : i32
    return %arg1, %c0_i32 : i32, i32
  }
}

</mosaic_0001>

<bundles_post_ra>
// kernel: encoder_forward_pallas.1
= control target key start
LH: loop header
LB: loop body
LE: loop exit
PB: predicated region body
PF: predicated region fallthrough
CT: control target
= control target key end

     0   :  { %s16562_s0 = inlined_call_operand.hbm [shape: bf16[128,128], index: 0, kind: input, shape index: {}]   ;;  %s16563_s1 = inlined_call_operand.hbm [shape: f32[128,128], index: 1, kind: input, shape index: {}]   ;;  %s16564_s2 = inlined_call_operand.hbm [shape: bf16[2,128,256], index: 2, kind: input, shape index: {}]   ;;  %s16565_s3 = inlined_call_operand.vmem [shape: f32[2,1,128], index: 3, kind: input, shape index: {}]   ;;  %s16566_s4 = inlined_call_operand.hbm [shape: bf16[2,128,128], index: 4, kind: input, shape index: {}]   ;;  %s16567_s5 = inlined_call_operand.hbm [shape: f32[2,1,128], index: 5, kind: input, shape index: {}]   ;;  %s16568_s6 = inlined_call_operand.vmem [shape: f32[2,1,128], index: 6, kind: input, shape index: {}]   ;;  %s16569_s7 = inlined_call_operand.vmem [shape: f32[2,1,128], index: 7, kind: input, shape index: {}]   ;;  %s16570_s8 = inlined_call_operand.hbm [shape: f32[128,128], index: 8, kind: output, shape index: {}]  }
   0x1   :  { %16701 = sst [smem:[#allocation165_spill]] %s16562_s0 }
   0x2   :  { %16702 = sst [smem:[#allocation166_spill]] %s16564_s2 }
   0x3   :  { %16703 = sst [smem:[#allocation167_spill]] %s16566_s4 }
   0x4   :  { %13 = vsyncpa [#allocation7], 0 }
   0x5   :  { %14 = vsyncpa [#allocation10], 0 }
   0x6   :  { %16 = vsyncpa [#allocation10 + $0x1], 0 }
   0x7   :  { %17 = vsyncpa [#allocation13], 0 }
   0x8   :  { %19 = vsyncpa [#allocation13 + $0x1], 0 }
   0x9   :  { %20 = vsyncpa [#allocation8], 0  ;;  %s10611_s27 = smov 0   ;;  %s10613_s28 = smov 0  }
   0xa   :  { %s10615_s29 = smov 0   ;;  %s10617_s30 = smov 0  }
   0xb   :  { %s10619_s9 = smov 0   ;;  %s10621_s10 = smov 0  }
   0xc LB: > { %16704 = sst [smem:[#allocation24_spill]] %s10539_s29  ;;  %s38_s11 = sadd.s32 1, %s10547_s9  ;;  %s10551_s10 = sphi %s10621_s10, %s26_s10   ;;  %s10547_s9 = sphi %s10619_s9, %s17609_s9   ;;  %s10543_s30 = sphi %s10617_s30, %s17608_s30   ;;  %s10539_s29 = sphi %s10615_s29, %s17604_s29   ;;  %s10535_s28 = sphi %s10613_s28, %s17607_s28   ;;  %s10531_s27 = sphi %s10611_s27, %s17606_s27  }
   0xd   : > { %s71_s12 = sadd.s32 1, %s10539_s29  ;;  %p40_p0 = scmp.ge.s32.totalorder %s38_s11, 2 }
   0xe   : > { %p78_p1 = scmp.ne.s32.totalorder %s10539_s29, %s10535_s28  ;;  %p79_p2 = scmp.eq.s32.totalorder %s10551_s10, 0 }
   0xf   : > { %s17611_s11 = smov (%p40_p0, %s38_s11), 0  ;;  %p10128_p4 = scmp.lt.s32.totalorder %s10551_s10, 2 }
  0x10   : > { %16705 = sst [smem:[#allocation25_spill]] %s17611_s11  ;;  %p80_p3 = por %p79_p2, %p78_p1 }
  0x11   : > { %s68_s13 = ssub.s32 %s10547_s9, %s17611_s11  ;;  %s280_s14 = sand.u32 1, %s10551_s10  }
  0x12   : > { %p69_p5 = scmp.eq.s32.totalorder %s68_s13, 0  ;;  %s10653_s15 = sand.u32 1, %s10539_s29  }
  0x13   : > { %s9983_s16 = sshll.u32 %s10547_s9, 11  ;;  %s9906_s18 = sshll.u32 %s10653_s15, 7 }
  0x14   : > { %s10657_s17 = scalar_select %p69_p5, %s10539_s29, %s71_s12  }
  0x15   : > { %s16707_s2 = sld [smem:[#allocation166_spill]]  ;;  %p10663_p6 = pnand %p10128_p4, %p80_p3 }
  0x16   : > { %16706 = sst [smem:[#allocation26_spill]] %s10657_s17  ;;  %s284_s23 = scalar_lea.vmem [#allocation9], %s9906_s18 }
  0x17   : > { %s291_s24 = sshll.u32 %s284_s23, 4  ;;  %s10667_s25 = scalar_lea.sflag [#allocation10], %s280_s14  ;;  %s292_s24 = int_to_ptr.vmem [resolvable:$true] %s291_s24 }
  0x18   : > { %p10329_p7 = pneg %p10663_p6  ;;  %s10340_s26 = scalar_lea.vmem %s292_s24, 2048 }
  0x19   : > { %p10341_p8 = scmp.ne.s32.totalorder %s292_s24, %s10340_s26  ;;  %s10553_s12 = smov [#allocation9]  }
  0x1a   : > { %s10345_s13 = sshll.u32 %s10553_s12, 4  ;;  %s10346_s13 = int_to_ptr.vmem [resolvable:$false] %s10345_s13 }
  0x1b   : > { %s290_s21 = scalar_lea.hbm %s16707_s2, %s9983_s16  ;;  %p10343_p9 = pnand %p10341_p8, %p10329_p7 }
  0x1c   : > { %s10347_s16 = scalar_lea.vmem %s10346_s13, 4096  ;;  %p10348_p11 = scmp.lt.s32.totalorder %s292_s24, %s10346_s13 }
  0x1d   : > { %p10344_p10 = pneg %p10343_p9  ;;  %p10349_p12 = scmp.lt.s32.totalorder %s10347_s16, %s10340_s26 }
  0x1f   : > { %p10350_p13 = por %p10349_p12, %p10348_p11 }
  0x21   : > { %p10351_p0 = pnand %p10350_p13, %p10344_p10 }
  0x23   : > { %10354 = shalt.err (!%p10351_p0)
}
  0x24   : > { %s10554_s18 = smov 128   ;;  %s10555_s14 = smov 8  }
  0x25   : > { %10120 = dma.hbm_to_vmem [thread:$0]  (!%p10663_p6), %s290_s21, 2048, %s292_s24, %s10667_s25, %s10554_s18, %s10554_s18, %s10555_s14  }
  0x26   : > { %s10678_s19 = sadd.s32 4294967295, %s10551_s10   ;;  %p84_p1 = scmp.ne.s32.totalorder %s10535_s28, %s10531_s27 }
  0x27   : > { %p16572_p2 = scmp.eq.s32.totalorder %s10678_s19, 0  ;;  %p9903_p3 = scmp.ge.s32.totalorder %s10551_s10, 1 }
  0x28   : > { %p251_p4 = scmp.lt.s32.totalorder %s10551_s10, 3  ;;  %s10556_s21 = smov [#allocation6]  }
  0x29   : > { %p10687_p5 = por %p16572_p2, %p84_p1  ;;  %s266_s24 = sshll.u32 %s10556_s21, 4  ;;  %s267_s24 = int_to_ptr.vmem [resolvable:$true] %s266_s24 }
  0x2a   : > { %p10691_p8 = pnand %p9903_p3, %p251_p4  ;;  %s9909_s26 = sshll.u32 %s10653_s15, 6 }
  0x2b   : > { %s9984_s12 = sshll.u32 %s10547_s9, 10  ;;  %s311_s13 = scalar_lea.vmem [#allocation11], %s9909_s26 }
  0x2c   : > { %p10113_p9 = pneg %p10691_p8  ;;  %s318_s16 = sshll.u32 %s311_s13, 4  ;;  %s319_s16 = int_to_ptr.vmem [resolvable:$true] %s318_s16 }
  0x2d   : > { %s16712_s4 = sld [smem:[#allocation167_spill]]  ;;  %s10366_s21 = scalar_lea.vmem %s267_s24, 1024 }
  0x2e   : > { %p10700_p10 = pnand %p10113_p9, %p16572_p2  ;;  %p10367_p12 = scmp.ne.s32.totalorder %s267_s24, %s10366_s21 }
  0x2f   : > { %p10374_p1 = scmp.lt.s32.totalorder %s267_s24, %s267_s24  ;;  %p10375_p3 = scmp.lt.s32.totalorder %s10366_s21, %s10366_s21 }
  0x30   : > { %p10357_p11 = pneg %p10700_p10 }
  0x31   : > { %p10376_p4 = por %p10375_p3, %p10374_p1 }
  0x32   : > { %p10369_p13 = pnand %p10367_p12, %p10357_p11 }
  0x33   : > { %s10708_s2 = scalar_lea.hbm %s16712_s4, %s9984_s12 }
  0x34   : > { %p10370_p0 = pneg %p10369_p13 }
  0x36   : > { %p10377_p9 = pnand %p10376_p4, %p10370_p0 }
  0x38   : > { %10380 = shalt.err (!%p10377_p9)
}
  0x39   : > { %s10557_s11 = smov 64   ;;  %s10558_s26 = smov 4  }
  0x3a   : > { %s16713_s0 = sld [smem:[#allocation165_spill]]  ;;  %s10394_s12 = scalar_lea.vmem %s319_s16, 1024 }
  0x3b   : > { %p10395_p2 = scmp.ne.s32.totalorder %s319_s16, %s10394_s12  ;;  %s10559_s14 = smov [#allocation11]  }
  0x3c   : > { %s10399_s21 = sshll.u32 %s10559_s14, 4  ;;  %s10400_s21 = int_to_ptr.vmem [resolvable:$false] %s10399_s21 }
  0x3d   : > { %p10397_p11 = pnand %p10395_p2, %p10329_p7  ;;  %s10401_s4 = scalar_lea.vmem %s10400_s21, 2048 }
  0x3e   : > { %p10402_p13 = scmp.lt.s32.totalorder %s319_s16, %s10400_s21  ;;  %p10403_p0 = scmp.lt.s32.totalorder %s10401_s4, %s10394_s12 }
  0x3f   : > { %p10398_p12 = pneg %p10397_p11 }
  0x40   : > { %10116 = dma.hbm_to_vmem [thread:$0]  (!%p10700_p10), %s16713_s0, 1024, %s267_s24, [#allocation7], %s10557_s11, %s10557_s11, %s10558_s26  }
  0x41   : > { %p10404_p1 = por %p10403_p0, %p10402_p13 }
  0x43   : > { %p10405_p3 = pnand %p10404_p1, %p10398_p12 }
  0x45   : > { %10408 = shalt.err (!%p10405_p3)
}
  0x46   : > { %10123 = dma.hbm_to_vmem [thread:$0]  (!%p10663_p6), %s10708_s2, 1024, %s319_s16, %s10667_s25, %s10557_s11, %s10557_s11, %s10558_s26  }
  0x47   : > { %s9912_s24 = sshll.u32 %s10547_s9, 4  ;;  %s331_s14 = scalar_lea.vmem [#allocation12], %s10653_s15 }
  0x48   : > { %s336_s18 = scalar_lea.hbm %s16567_s5, %s9912_s24  ;;  %s338_s21 = sshll.u32 %s331_s14, 4  ;;  %s339_s21 = int_to_ptr.vmem [resolvable:$true] %s338_s21 }
  0x49   : > { %s329_s4 = scalar_lea.sflag [#allocation13], %s10653_s15  ;;  %s10422_s12 = scalar_lea.vmem %s339_s21, 16 }
  0x4a   : > { %p10423_p2 = scmp.ne.s32.totalorder %s339_s21, %s10422_s12  ;;  %s10560_s0 = smov [#allocation12]  }
  0x4b   : > { %s10427_s17 = sshll.u32 %s10560_s0, 4  ;;  %s10428_s17 = int_to_ptr.vmem [resolvable:$false] %s10427_s17 }
  0x4c   : > { %p10425_p10 = pnand %p10423_p2, %p10329_p7  ;;  %s10429_s29 = scalar_lea.vmem %s10428_s17, 32 }
  0x4d   : > { %p10430_p9 = scmp.lt.s32.totalorder %s339_s21, %s10428_s17  ;;  %p10431_p11 = scmp.lt.s32.totalorder %s10429_s29, %s10422_s12 }
  0x4e   : > { %p10426_p4 = pneg %p10425_p10 }
  0x4f   : > { %p10432_p12 = por %p10431_p11, %p10430_p9 }
  0x51   : > { %p10433_p13 = pnand %p10432_p12, %p10426_p4 }
  0x53   : > { %10436 = shalt.err (!%p10433_p13)
}
  0x54   : > { %10126 = dma.hbm_to_vmem [thread:$0]  (!%p10663_p6), %s336_s18, 16, %s339_s21, %s329_s4  }
  0x55   : > { %359 = sbr.rel (%p10691_p8) target bundleno = 2734 (0xaae), region = 48 }
  0x5a   : > { %p16714_p0 = scmp.eq.s32.totalorder %s10678_s19, 0 }
  0x5c   : > { %10510 = dma.done.wait (%p16714_p0), [#allocation7], 1024   ;;  %p16715_p7 = pmov %p16714_p0 }
  0x5d   : > { %s365_s0 = sand.u32 1, %s10678_s19   ;;  %s10743_s2 = sand.u32 1, %s10535_s28  }
  0x5e   : > { %10512 = vsyncadd (%p16715_p7), [#allocation7], 4294966272  ;;  %s9915_s29 = sshll.u32 %s10743_s2, 7  ;;  %s366_s11 = scalar_lea.sflag [#allocation10], %s365_s0 }
  0x5f   : > { %s10746_s15 = scalar_lea.vmem [#allocation9], %s9915_s29 }
  0x60   : > { %10514 = dma.done.wait (%p10687_p5), %s366_s11, 3072  }
  0x61   : > { %10516 = vsyncadd (%p10687_p5), %s366_s11, 4294964224  ;;  %s9916_s17 = sshll.u32 %s10743_s2, 6  ;;  %s384_s25 = scalar_lea.sflag [#allocation13], %s10743_s2 }
  0x62   : > { %s10753_s22 = scalar_lea.vmem [#allocation11], %s9916_s17  ;;  %s386_s23 = scalar_lea.vmem [#allocation12], %s10743_s2 }
  0x63   : > { %10518 = dma.done.wait (%p10687_p5), %s384_s25, 16  }
  0x64   : > { %10520 = vsyncadd (%p10687_p5), %s384_s25, 4294967280  ;;  %p431_p6 = scmp.lt.s32.totalorder %s10543_s30, 1  ;;  %p442_p8 = scmp.eq.s32.totalorder %s10543_s30, 0 }
  0x65   : > { %s10561_s26 = smov [#allocation2]  }
  0x66   : > { %s10764_s16 = scalar_select %p431_p6, %s10543_s30, 1 }
  0x67   : > { %s455_s24 = sshll.u32 %s10561_s26, 4  ;;  %s456_s24 = int_to_ptr.vmem [resolvable:$true] %s455_s24 }
  0x68   : > { %s433_s18 = scalar_lea.vmem %s16565_s3, %s10764_s16  ;;  %s436_s21 = scalar_lea.vmem %s16568_s6, %s10764_s16 }
  0x69   : > { %s439_s0 = scalar_lea.vmem %s16569_s7, %s10764_s16  ;;  %s10447_s29 = scalar_lea.vmem %s456_s24, 2048 }
  0x6a   : > { %p10448_p5 = scmp.ne.s32.totalorder %s456_s24, %s10447_s29  ;;  %p10454_p2 = scmp.lt.s32.totalorder %s456_s24, %s456_s24 }
  0x6b   : > { %p10455_p10 = scmp.lt.s32.totalorder %s10447_s29, %s10447_s29 }
  0x6c   : > { %p10449_p1 = pnand %p10448_p5, %p442_p8 }
  0x6d   : > { %p10456_p4 = por %p10455_p10, %p10454_p2 }
  0x6e   : > { %p10450_p3 = pneg %p10449_p1 }
  0x70   : > { %p10457_p9 = pnand %p10456_p4, %p10450_p3 }
  0x72   : > { %10460 = shalt.err (!%p10457_p9)  }
  0x73   : > { %10107 = dma.hbm_to_vmem [thread:$0]  (%p442_p8), %s16563_s1, 2048, %s456_s24, [#allocation5] }
  0x74   : > { %10522 = dma.done.wait (%p442_p8), [#allocation5], 2048 }
  0x75   : > { %10524 = vsyncadd (%p442_p8), [#allocation5], 4294965248  ;;  %v908_v0 = vlaneseq  ;;  %v16574_v1 = vmov 0   ;;  %v10190_v3 = vld [vmem:[%s10746_s15 + $0x74] ss:$8 sps:$4 sm:$0xff]   ;;  %v10193_v5 = vld [vmem:[#allocation6] sm:$0xff]  }
  0x76   : > { %617 = vmatprep.mubr.bf16.mxu0 %v16574_v1  ;;  %v10192_v4 = vld [vmem:[%s10746_s15 + $0x70] ss:$8 sps:$4 sm:$0xff]   ;;  %585 = vmatprep.subr.bf16.mxu0 %v10190_v3  ;;  %v10194_v7 = vld [vmem:[%s10746_s15 + $0x64] ss:$8 sps:$4 sm:$0xff]   ;;  %v10196_v8 = vld [vmem:[%s10746_s15 + $0x60] ss:$8 sps:$4 sm:$0xff]   ;;  %v10799_v9 = vpack.i.b16 %v10193_v5, %v10193_v5 }
  0x77   : > { %v10790_v2 = vshrl.u32 %v908_v0, 7  ;;  %586 = vmatpush1.bf16.msra.mxu0 %v10192_v4  ;;  %v10197_v10 = vld [vmem:[%s10746_s15 + $0x54] ss:$8 sps:$4 sm:$0xff]   ;;  %v10199_v12 = vld [vmem:[%s10746_s15 + $0x50] ss:$8 sps:$4 sm:$0xff]   ;;  %v943_v15 = vshrl.u32 %v10193_v5, 16 }
  0x78   : > { %587 = vmatprep.subr.bf16.mxu0 %v10194_v7  ;;  %v10200_v13 = vld [vmem:[%s10746_s15 + $0x44] ss:$8 sps:$4 sm:$0xff]   ;;  %v10202_v14 = vld [vmem:[%s10746_s15 + $0x40] ss:$8 sps:$4 sm:$0xff]   ;;  %v10203_v16 = vld [vmem:[%s10746_s15 + $0x34] ss:$8 sps:$4 sm:$0xff]  }
  0x79   : > { %v10795_v6 = vsub.s32 0, %v10790_v2  ;;  %v10205_v17 = vld [vmem:[%s10746_s15 + $0x30] ss:$8 sps:$4 sm:$0xff]   ;;  %v10809_v18 = vpack.i.b16 %v943_v15, %v943_v15  ;;  %v10206_v19 = vld [vmem:[%s10746_s15 + $0x24] ss:$8 sps:$4 sm:$0xff]   ;;  %v10820_v29 = vsub.s32 1, %v10790_v2 }
  0x7a   : > { %v10208_v20 = vld [vmem:[%s10746_s15 + $0x20] ss:$8 sps:$4 sm:$0xff]   ;;  %v10209_v21 = vld [vmem:[%s10746_s15 + $0x14] ss:$8 sps:$4 sm:$0xff]   ;;  %v10211_v23 = vld [vmem:[%s10746_s15 + $0x10] ss:$8 sps:$4 sm:$0xff]  }
  0x7b   : > { %16716 = vst [vmem:[#allocation27_spill] sm:$0xff] %v10795_v6  ;;  %v911_v11 = vrot.slane %v10799_v9, %v10795_v6  ;;  %588 = vmatpush1.bf16.msra.mxu0 %v10196_v8  ;;  %v949_v22 = vrot.slane %v10809_v18, %v10795_v6  ;;  %v10212_v24 = vld [vmem:[%s10746_s15 + $0x4] ss:$8 sps:$4 sm:$0xff]   ;;  %v10214_v25 = vld [vmem:[%s10746_s15] ss:$8 sps:$4 sm:$0xff]   ;;  %16717 = vst [vmem:[#allocation28_spill] sm:$0xff] %v10820_v29  ;;  %v984_v32 = vrot.slane %v10799_v9, %v10820_v29 }
  0x7c   : > { %589 = vmatprep.subr.bf16.mxu0 %v10197_v10  ;;  %v465_v26 = vld [vmem:[#allocation2] sm:$0xff]  ;;  %v466_v27 = vld [vmem:[#allocation2 + $0x8] sm:$0xff]  ;;  %v467_v30 = vld [vmem:[#allocation2 + $0x10] sm:$0xff]  ;;  %v1019_v39 = vrot.slane %v10809_v18, %v10820_v29  ;;  %v10831_v44 = vsub.s32 2, %v10790_v2  ;;  %v10841_v56 = vsub.s32 3, %v10790_v2  ;;  %v10856_v63 = vsub.s32 4, %v10790_v2 }
  0x7d   : > { %921 = vbcast.lane.c.b16.xlu1 %v911_v11, 288  ;;  %913 = vbcast.lane.c.b16.xlu0 %v911_v11, 256  ;;  %v481_v28 = vpack.c.bf16 %v466_v27, %v465_v26  ;;  %v468_v31 = vld [vmem:[#allocation2 + $0x18] sm:$0xff]  ;;  %v469_v34 = vld [vmem:[#allocation2 + $0x20] sm:$0xff]  ;;  %v470_v35 = vld [vmem:[#allocation2 + $0x28] sm:$0xff]  ;;  %vm9099_vm0 = vcmask 1041409  }
  0x7e   : > { %v482_v33 = vpack.c.bf16 %v468_v31, %v467_v30  ;;  %v483_v36 = vpack.c.bf16 %v470_v35, %v469_v34  ;;  %v471_v37 = vld [vmem:[#allocation2 + $0x30] sm:$0xff]  ;;  %v472_v38 = vld [vmem:[#allocation2 + $0x38] sm:$0xff]  ;;  %v473_v41 = vld [vmem:[#allocation2 + $0x40] sm:$0xff]  ;;  %16718 = vst [vmem:[#allocation29_spill] sm:$0xff] %v10831_v44  ;;  %v1054_v47 = vrot.slane %v10799_v9, %v10831_v44  ;;  %v1089_v54 = vrot.slane %v10809_v18, %v10831_v44  ;;  %s10563_s16 = smov [#allocation14]   ;;  %p10130_p11 = scmp.eq.s32.totalorder %s10678_s19, 1 }
  0x7f   : > { %590 = vmatpush1.bf16.msra.mxu0 %v10199_v12  ;;  %v484_v40 = vpack.c.bf16 %v472_v38, %v471_v37  ;;  %v474_v42 = vld [vmem:[#allocation2 + $0x48] sm:$0xff]  ;;  %v475_v45 = vld [vmem:[#allocation2 + $0x50] sm:$0xff]  ;;  %v476_v46 = vld [vmem:[#allocation2 + $0x58] sm:$0xff]  ;;  %16719 = vst [vmem:[#allocation30_spill] sm:$0xff] %v10841_v56  ;;  %v1124_v57 = vrot.slane %v10799_v9, %v10841_v56  ;;  %v1159_v58 = vrot.slane %v10809_v18, %v10841_v56  ;;  %vm9101_vm1 = vcmask 1042434   ;;  %s9747_s26 = sshll.u32 %s10563_s16, 4  ;;  %s9748_s26 = int_to_ptr.vmem [resolvable:$true] %s9747_s26 }
  0x80   : > { %591 = vmatprep.subr.bf16.mxu0 %v10200_v13  ;;  %v485_v43 = vpack.c.bf16 %v474_v42, %v473_v41  ;;  %v486_v48 = vpack.c.bf16 %v476_v46, %v475_v45  ;;  %v477_v49 = vld [vmem:[#allocation2 + $0x60] sm:$0xff]  ;;  %v478_v50 = vld [vmem:[#allocation2 + $0x68] sm:$0xff]  ;;  %v479_v52 = vld [vmem:[#allocation2 + $0x70] sm:$0xff]  ;;  %16720 = vst [vmem:[#allocation31_spill] sm:$0xff] %v10856_v63  ;;  %v1194_v4 = vrot.slane %v10799_v9, %v10856_v63  ;;  %vm9103_vm2 = vcmask 1043459   ;;  %s10461_s24 = scalar_lea.vmem %s9748_s26, 2048  ;;  %p10468_p7 = scmp.lt.s32.totalorder %s9748_s26, %s9748_s26 }
  0x81   : > { %925 = vbcast.lane.c.b16.xlu1 %v911_v11, 304  ;;  %917 = vbcast.lane.c.b16.xlu0 %v911_v11, 272  ;;  %v487_v51 = vpack.c.bf16 %v478_v50, %v477_v49  ;;  %v480_v53 = vld [vmem:[#allocation2 + $0x78] sm:$0xff]  ;;  %v1229_v15 = vrot.slane %v10809_v18, %v10856_v63  ;;  %vm9105_vm3 = vcmask 1044484   ;;  %vm9107_vm4 = vcmask 1045509   ;;  %p10462_p12 = scmp.ne.s32.totalorder %s9748_s26, %s10461_s24  ;;  %p10469_p6 = scmp.lt.s32.totalorder %s10461_s24, %s10461_s24 }
  0x82   : > { %v488_v55 = vpack.c.bf16 %v480_v53, %v479_v52  ;;  %vm9109_vm5 = vcmask 1046534   ;;  %vm9111_vm6 = vcmask 1047559  }
  0x83   : > { %592 = vmatpush1.bf16.msra.mxu0 %v10202_v14  ;;  %p10463_p13 = pnand %p10462_p12, %p10130_p11  ;;  %p10470_p8 = por %p10469_p6, %p10468_p7 }
  0x84   : > { %593 = vmatprep.subr.bf16.mxu0 %v10203_v16 }
  0x85   : > { %933 = vbcast.lane.c.b16.xlu1 %v911_v11, 336  ;;  %929 = vbcast.lane.c.b16.xlu0 %v911_v11, 320  ;;  %p10464_p0 = pneg %p10463_p13 }
  0x87   : > { %594 = vmatpush1.bf16.msra.mxu0 %v10205_v17  ;;  %p10471_p5 = pnand %p10470_p8, %p10464_p0 }
  0x88   : > { %595 = vmatprep.subr.bf16.mxu0 %v10206_v19 }
  0x89   : > { %941 = vbcast.lane.c.b16.xlu1 %v911_v11, 368  ;;  %937 = vbcast.lane.c.b16.xlu0 %v911_v11, 352 }
  0x8b   : > { %596 = vmatpush1.bf16.msra.mxu0 %v10208_v20 }
  0x8c   : > { %597 = vmatprep.subr.bf16.mxu0 %v10209_v21 }
  0x8d   : > { %955 = vbcast.lane.c.b16.xlu1 %v949_v22, 272  ;;  %951 = vbcast.lane.c.b16.xlu0 %v949_v22, 256 }
  0x8f   : > { %598 = vmatpush1.bf16.msra.mxu0 %v10211_v23  ;;  %v10895_v23 = vsub.s32 5, %v10790_v2 }
  0x90   : > { %599 = vmatprep.subr.bf16.mxu0 %v10212_v24 }
  0x91   : > { %963 = vbcast.lane.c.b16.xlu1 %v949_v22, 304  ;;  %959 = vbcast.lane.c.b16.xlu0 %v949_v22, 288  ;;  %16727 = vst [vmem:[#allocation38_spill] sm:$0xff] %v10895_v23  ;;  %v1264_v26 = vrot.slane %v10799_v9, %v10895_v23 }
  0x93   : > { %600 = vmatpush1.bf16.msra.mxu0 %v10214_v25 }
  0x95   : > { %971 = vbcast.lane.c.b16.xlu1 %v949_v22, 336  ;;  %967 = vbcast.lane.c.b16.xlu0 %v949_v22, 320 }
  0x96   : > { %618 = vmatmul.mubr.bf16.vlgmr.msra.gmra.mxu0 %v481_v28 }
  0x97   : > { %627 = vmatprep.mubr.bf16.mxu0 %v16574_v1 }
  0x99   : > { %979 = vbcast.lane.c.b16.xlu1 %v949_v22, 368  ;;  %975 = vbcast.lane.c.b16.xlu0 %v949_v22, 352 }
  0x9d   : > { %990 = vbcast.lane.c.b16.xlu1 %v984_v32, 272  ;;  %986 = vbcast.lane.c.b16.xlu0 %v984_v32, 256 }
  0x9e   : > { %628 = vmatmul.mubr.bf16.gmra.mxu0 %v482_v33 }
  0x9f   : > { %637 = vmatprep.mubr.bf16.mxu0 %v16574_v1 }
  0xa1   : > { %998 = vbcast.lane.c.b16.xlu1 %v984_v32, 304  ;;  %994 = vbcast.lane.c.b16.xlu0 %v984_v32, 288 }
  0xa5   : > { %1006 = vbcast.lane.c.b16.xlu1 %v984_v32, 336  ;;  %1002 = vbcast.lane.c.b16.xlu0 %v984_v32, 320 }
  0xa6   : > { %638 = vmatmul.mubr.bf16.gmra.mxu0 %v483_v36  ;;  %v1299_v36 = vrot.slane %v10809_v18, %v10895_v23 }
  0xa7   : > { %647 = vmatprep.mubr.bf16.mxu0 %v16574_v1 }
  0xa9   : > { %1014 = vbcast.lane.c.b16.xlu1 %v984_v32, 368  ;;  %1010 = vbcast.lane.c.b16.xlu0 %v984_v32, 352 }
  0xad   : > { %1025 = vbcast.lane.c.b16.xlu1 %v1019_v39, 272  ;;  %1021 = vbcast.lane.c.b16.xlu0 %v1019_v39, 256 }
  0xae   : > { %648 = vmatmul.mubr.bf16.gmra.mxu0 %v484_v40 }
  0xaf   : > { %657 = vmatprep.mubr.bf16.mxu0 %v16574_v1 }
  0xb1   : > { %1033 = vbcast.lane.c.b16.xlu1 %v1019_v39, 304  ;;  %1029 = vbcast.lane.c.b16.xlu0 %v1019_v39, 288 }
  0xb5   : > { %1041 = vbcast.lane.c.b16.xlu1 %v1019_v39, 336  ;;  %1037 = vbcast.lane.c.b16.xlu0 %v1019_v39, 320 }
  0xb6   : > { %658 = vmatmul.mubr.bf16.gmra.mxu0 %v485_v43  ;;  %v10934_v43 = vsub.s32 6, %v10790_v2 }
  0xb7   : > { %667 = vmatprep.mubr.bf16.mxu0 %v16574_v1 }
  0xb8   : > { %16734 = vst [vmem:[#allocation45_spill] sm:$0xff] %v10934_v43 }
  0xb9   : > { %1049 = vbcast.lane.c.b16.xlu1 %v1019_v39, 368  ;;  %1045 = vbcast.lane.c.b16.xlu0 %v1019_v39, 352 }
  0xbd   : > { %1060 = vbcast.lane.c.b16.xlu1 %v1054_v47, 272  ;;  %1056 = vbcast.lane.c.b16.xlu0 %v1054_v47, 256 }
  0xbe   : > { %668 = vmatmul.mubr.bf16.gmra.mxu0 %v486_v48 }
  0xbf   : > { %677 = vmatprep.mubr.bf16.mxu0 %v16574_v1 }
  0xc1   : > { %1068 = vbcast.lane.c.b16.xlu1 %v1054_v47, 304  ;;  %1064 = vbcast.lane.c.b16.xlu0 %v1054_v47, 288 }
  0xc5   : > { %1076 = vbcast.lane.c.b16.xlu1 %v1054_v47, 336  ;;  %1072 = vbcast.lane.c.b16.xlu0 %v1054_v47, 320 }
  0xc6   : > { %678 = vmatmul.mubr.bf16.gmra.mxu0 %v487_v51 }
  0xc7   : > { %687 = vmatprep.mubr.bf16.mxu0 %v16574_v1 }
  0xc9   : > { %1084 = vbcast.lane.c.b16.xlu1 %v1054_v47, 368  ;;  %1080 = vbcast.lane.c.b16.xlu0 %v1054_v47, 352  ;;  %v1334_v47 = vrot.slane %v10799_v9, %v10934_v43 }
  0xcd   : > { %1095 = vbcast.lane.c.b16.xlu1 %v1089_v54, 272  ;;  %1091 = vbcast.lane.c.b16.xlu0 %v1089_v54, 256 }
  0xce   : > { %688 = vmatmul.mubr.bf16.gmra.mxu0 %v488_v55 }
  0xd1   : > { %1103 = vbcast.lane.c.b16.xlu1 %v1089_v54, 304  ;;  %1099 = vbcast.lane.c.b16.xlu0 %v1089_v54, 288 }
  0xd5   : > { %1111 = vbcast.lane.c.b16.xlu1 %v1089_v54, 336  ;;  %1107 = vbcast.lane.c.b16.xlu0 %v1089_v54, 320 }
  0xd9   : > { %1119 = vbcast.lane.c.b16.xlu1 %v1089_v54, 368  ;;  %1115 = vbcast.lane.c.b16.xlu0 %v1089_v54, 352 }
  0xdd   : > { %1130 = vbcast.lane.c.b16.xlu1 %v1124_v57, 272  ;;  %1126 = vbcast.lane.c.b16.xlu0 %v1124_v57, 256 }
  0xe1   : > { %1138 = vbcast.lane.c.b16.xlu1 %v1124_v57, 304  ;;  %1134 = vbcast.lane.c.b16.xlu0 %v1124_v57, 288 }
  0xe5   : > { %1146 = vbcast.lane.c.b16.xlu1 %v1124_v57, 336  ;;  %1142 = vbcast.lane.c.b16.xlu0 %v1124_v57, 320 }
  0xe9   : > { %1154 = vbcast.lane.c.b16.xlu1 %v1124_v57, 368  ;;  %1150 = vbcast.lane.c.b16.xlu0 %v1124_v57, 352  ;;  %v1369_v57 = vrot.slane %v10809_v18, %v10934_v43  ;;  %v10980_v43 = vld [vmem:[%s433_s18] ss:$0 sm:$0xff] }
  0xed   : > { %1165 = vbcast.lane.c.b16.xlu1 %v1159_v58, 272  ;;  %1161 = vbcast.lane.c.b16.xlu0 %v1159_v58, 256 }
  0xef   : > { %v10847_v59 = vpop.permute.xlu1 %921  ;;  %v10849_v60 = vpop.permute.xlu0 %913 }
  0xf1   : > { %1173 = vbcast.lane.c.b16.xlu1 %v1159_v58, 304  ;;  %1169 = vbcast.lane.c.b16.xlu0 %v1159_v58, 288 }
  0xf3   : > { %v10851_v61 = vpop.permute.xlu1 %925  ;;  %v10853_v62 = vpop.permute.xlu0 %917 }
  0xf5   : > { %1181 = vbcast.lane.c.b16.xlu1 %v1159_v58, 336  ;;  %1177 = vbcast.lane.c.b16.xlu0 %v1159_v58, 320 }
  0xf7   : > { %v10858_v0 = vpop.permute.xlu1 %933  ;;  %v10860_v3 = vpop.permute.xlu0 %929 }
  0xf8   : > { %16721 = vst [vmem:[#allocation32_spill] sm:$0xff] %v10858_v0 }
  0xf9   : > { %1189 = vbcast.lane.c.b16.xlu1 %v1159_v58, 368  ;;  %1185 = vbcast.lane.c.b16.xlu0 %v1159_v58, 352 }
  0xfb   : > { %v10864_v5 = vpop.permute.xlu1 %941  ;;  %v10866_v7 = vpop.permute.xlu0 %937 }
  0xfc   : > { %16722 = vst [vmem:[#allocation33_spill] sm:$0xff] %v10864_v5  ;;  %16723 = vst [vmem:[#allocation34_spill] sm:$0xff] %v10866_v7 }
  0xfd   : > { %1200 = vbcast.lane.c.b16.xlu1 %v1194_v4, 272  ;;  %1196 = vbcast.lane.c.b16.xlu0 %v1194_v4, 256 }
  0xff   : > { %v10868_v8 = vpop.permute.xlu1 %955  ;;  %v10870_v10 = vpop.permute.xlu0 %951 }
 0x101   : > { %1208 = vbcast.lane.c.b16.xlu1 %v1194_v4, 304  ;;  %1204 = vbcast.lane.c.b16.xlu0 %v1194_v4, 288 }
 0x103   : > { %v10872_v11 = vpop.permute.xlu1 %963  ;;  %v10874_v12 = vpop.permute.xlu0 %959 }
 0x105   : > { %1216 = vbcast.lane.c.b16.xlu1 %v1194_v4, 336  ;;  %1212 = vbcast.lane.c.b16.xlu0 %v1194_v4, 320 }
 0x107   : > { %v10876_v13 = vpop.permute.xlu1 %971  ;;  %v10878_v14 = vpop.permute.xlu0 %967 }
 0x108   : > { %16724 = vst [vmem:[#allocation35_spill] sm:$0xff] %v10876_v13 }
 0x109   : > { %1224 = vbcast.lane.c.b16.xlu1 %v1194_v4, 368  ;;  %1220 = vbcast.lane.c.b16.xlu0 %v1194_v4, 352 }
 0x10b   : > { %v10882_v16 = vpop.permute.xlu1 %979  ;;  %v10884_v17 = vpop.permute.xlu0 %975 }
 0x10c   : > { %16725 = vst [vmem:[#allocation36_spill] sm:$0xff] %v10882_v16  ;;  %16726 = vst [vmem:[#allocation37_spill] sm:$0xff] %v10884_v17 }
 0x10d   : > { %1235 = vbcast.lane.c.b16.xlu1 %v1229_v15, 272  ;;  %1231 = vbcast.lane.c.b16.xlu0 %v1229_v15, 256 }
 0x10f   : > { %v10886_v19 = vpop.permute.xlu1 %990  ;;  %v10888_v20 = vpop.permute.xlu0 %986 }
 0x111   : > { %1243 = vbcast.lane.c.b16.xlu1 %v1229_v15, 304  ;;  %1239 = vbcast.lane.c.b16.xlu0 %v1229_v15, 288 }
 0x113   : > { %v10890_v21 = vpop.permute.xlu1 %998  ;;  %v10892_v22 = vpop.permute.xlu0 %994 }
 0x115   : > { %1251 = vbcast.lane.c.b16.xlu1 %v1229_v15, 336  ;;  %1247 = vbcast.lane.c.b16.xlu0 %v1229_v15, 320 }
 0x117   : > { %v10897_v24 = vpop.permute.xlu1 %1006  ;;  %v10899_v25 = vpop.permute.xlu0 %1002 }
 0x118   : > { %16728 = vst [vmem:[#allocation39_spill] sm:$0xff] %v10897_v24 }
 0x119   : > { %1259 = vbcast.lane.c.b16.xlu1 %v1229_v15, 368  ;;  %1255 = vbcast.lane.c.b16.xlu0 %v1229_v15, 352 }
 0x11b   : > { %v10903_v27 = vpop.permute.xlu1 %1014  ;;  %v10905_v28 = vpop.permute.xlu0 %1010 }
 0x11c   : > { %16729 = vst [vmem:[#allocation40_spill] sm:$0xff] %v10903_v27  ;;  %16730 = vst [vmem:[#allocation41_spill] sm:$0xff] %v10905_v28 }
 0x11d   : > { %1270 = vbcast.lane.c.b16.xlu1 %v1264_v26, 272  ;;  %1266 = vbcast.lane.c.b16.xlu0 %v1264_v26, 256 }
 0x11f   : > { %v10907_v30 = vpop.permute.xlu1 %1025  ;;  %v10909_v31 = vpop.permute.xlu0 %1021 }
 0x121   : > { %1278 = vbcast.lane.c.b16.xlu1 %v1264_v26, 304  ;;  %1274 = vbcast.lane.c.b16.xlu0 %v1264_v26, 288 }
 0x123   : > { %v10911_v32 = vpop.permute.xlu1 %1033  ;;  %v10913_v33 = vpop.permute.xlu0 %1029 }
 0x125   : > { %1286 = vbcast.lane.c.b16.xlu1 %v1264_v26, 336  ;;  %1282 = vbcast.lane.c.b16.xlu0 %v1264_v26, 320 }
 0x127   : > { %v10915_v34 = vpop.permute.xlu1 %1041  ;;  %v10917_v35 = vpop.permute.xlu0 %1037 }
 0x128   : > { %16731 = vst [vmem:[#allocation42_spill] sm:$0xff] %v10915_v34 }
 0x129   : > { %1294 = vbcast.lane.c.b16.xlu1 %v1264_v26, 368  ;;  %1290 = vbcast.lane.c.b16.xlu0 %v1264_v26, 352 }
 0x12b   : > { %v10921_v37 = vpop.permute.xlu1 %1049  ;;  %v10923_v38 = vpop.permute.xlu0 %1045 }
 0x12c   : > { %16732 = vst [vmem:[#allocation43_spill] sm:$0xff] %v10921_v37  ;;  %16733 = vst [vmem:[#allocation44_spill] sm:$0xff] %v10923_v38 }
 0x12d   : > { %1305 = vbcast.lane.c.b16.xlu1 %v1299_v36, 272  ;;  %1301 = vbcast.lane.c.b16.xlu0 %v1299_v36, 256 }
 0x12f   : > { %v10925_v39 = vpop.permute.xlu1 %1060  ;;  %v10927_v40 = vpop.permute.xlu0 %1056 }
 0x131   : > { %1313 = vbcast.lane.c.b16.xlu1 %v1299_v36, 304  ;;  %1309 = vbcast.lane.c.b16.xlu0 %v1299_v36, 288 }
 0x133   : > { %v10929_v41 = vpop.permute.xlu1 %1068  ;;  %v10931_v42 = vpop.permute.xlu0 %1064 }
 0x135   : > { %1321 = vbcast.lane.c.b16.xlu1 %v1299_v36, 336  ;;  %1317 = vbcast.lane.c.b16.xlu0 %v1299_v36, 320 }
 0x137   : > { %v10936_v45 = vpop.permute.xlu1 %1076  ;;  %v10938_v46 = vpop.permute.xlu0 %1072 }
 0x138   : > { %16735 = vst [vmem:[#allocation46_spill] sm:$0xff] %v10936_v45  ;;  %16736 = vst [vmem:[#allocation47_spill] sm:$0xff] %v10938_v46 }
 0x139   : > { %1329 = vbcast.lane.c.b16.xlu1 %v1299_v36, 368  ;;  %1325 = vbcast.lane.c.b16.xlu0 %v1299_v36, 352 }
 0x13b   : > { %v10942_v48 = vpop.permute.xlu1 %1084  ;;  %v10944_v49 = vpop.permute.xlu0 %1080 }
 0x13c   : > { %16737 = vst [vmem:[#allocation48_spill] sm:$0xff] %v10942_v48  ;;  %16738 = vst [vmem:[#allocation49_spill] sm:$0xff] %v10944_v49 }
 0x13d   : > { %1340 = vbcast.lane.c.b16.xlu1 %v1334_v47, 272  ;;  %1336 = vbcast.lane.c.b16.xlu0 %v1334_v47, 256 }
 0x13f   : > { %v10946_v50 = vpop.permute.xlu1 %1095  ;;  %v10948_v51 = vpop.permute.xlu0 %1091 }
 0x141   : > { %1348 = vbcast.lane.c.b16.xlu1 %v1334_v47, 304  ;;  %1344 = vbcast.lane.c.b16.xlu0 %v1334_v47, 288 }
 0x143   : > { %v10950_v52 = vpop.permute.xlu1 %1103  ;;  %v10952_v53 = vpop.permute.xlu0 %1099 }
 0x145   : > { %1356 = vbcast.lane.c.b16.xlu1 %v1334_v47, 336  ;;  %1352 = vbcast.lane.c.b16.xlu0 %v1334_v47, 320 }
 0x147   : > { %v10954_v54 = vpop.permute.xlu1 %1111  ;;  %v10956_v55 = vpop.permute.xlu0 %1107 }
 0x148   : > { %16739 = vst [vmem:[#allocation50_spill] sm:$0xff] %v10954_v54  ;;  %16740 = vst [vmem:[#allocation51_spill] sm:$0xff] %v10956_v55 }
 0x149   : > { %1364 = vbcast.lane.c.b16.xlu1 %v1334_v47, 368  ;;  %1360 = vbcast.lane.c.b16.xlu0 %v1334_v47, 352  ;;  %v10973_v47 = vsub.s32 7, %v10790_v2 }
 0x14b   : > { %v10960_v58 = vpop.permute.xlu1 %1119  ;;  %v10962_v4 = vpop.permute.xlu0 %1115  ;;  %16743 = vst [vmem:[#allocation54_spill] sm:$0xff] %v10973_v47  ;;  %v1404_v48 = vrot.slane %v10799_v9, %v10973_v47 }
 0x14c   : > { %16741 = vst [vmem:[#allocation52_spill] sm:$0xff] %v10960_v58  ;;  %16742 = vst [vmem:[#allocation53_spill] sm:$0xff] %v10962_v4 }
 0x14d   : > { %1375 = vbcast.lane.c.b16.xlu1 %v1369_v57, 272  ;;  %1371 = vbcast.lane.c.b16.xlu0 %v1369_v57, 256 }
 0x14f   : > { %v10964_v15 = vpop.permute.xlu1 %1130  ;;  %v10966_v26 = vpop.permute.xlu0 %1126 }
 0x151   : > { %1383 = vbcast.lane.c.b16.xlu1 %v1369_v57, 304  ;;  %1379 = vbcast.lane.c.b16.xlu0 %v1369_v57, 288 }
 0x153   : > { %v10968_v36 = vpop.permute.xlu1 %1138  ;;  %v10970_v1 = vpop.permute.xlu0 %1134 }
 0x155   : > { %1391 = vbcast.lane.c.b16.xlu1 %v1369_v57, 336  ;;  %1387 = vbcast.lane.c.b16.xlu0 %v1369_v57, 320 }
 0x156   : > { %v619_v56 = vpop.f32.mrf.mxu0 }
 0x157   : > { %v10982_v23 = vpop.permute.xlu1 %1146  ;;  %v10984_v63 = vpop.permute.xlu0 %1142  ;;  %v705_v58 = vadd.f32 %v10980_v43, %v619_v56 }
 0x158   : > { %16744 = vst [vmem:[#allocation55_spill] sm:$0xff] %v10982_v23  ;;  %16745 = vst [vmem:[#allocation56_spill] sm:$0xff] %v10984_v63  ;;  %v10989_v2 = vpop.f32.mrf.mxu0 }
 0x159   : > { %1399 = vbcast.lane.c.b16.xlu1 %v1369_v57, 368  ;;  %1395 = vbcast.lane.c.b16.xlu0 %v1369_v57, 352  ;;  %16746 = vst [vmem:[#allocation57_spill] sm:$0xff] %v10989_v2  ;;  %v721_v5 = vmax.f32 %v705_v58, 0.0 }
 0x15a   : > { %v623_v16 = vpop.f32.mrf.mxu0 }
 0x15b   : > { %v10991_v37 = vpop.permute.xlu1 %1154  ;;  %v10993_v27 = vpop.permute.xlu0 %1150  ;;  %v706_v4 = vadd.f32 %v10980_v43, %v623_v16 }
 0x15c   : > { %16747 = vst [vmem:[#allocation58_spill] sm:$0xff] %v10991_v37  ;;  %16748 = vst [vmem:[#allocation59_spill] sm:$0xff] %v10993_v27  ;;  %v10996_v49 = vpop.f32.mrf.mxu0 }
 0x15d   : > { %1410 = vbcast.lane.c.b16.xlu1 %v1404_v48, 272  ;;  %1406 = vbcast.lane.c.b16.xlu0 %v1404_v48, 256  ;;  %16749 = vst [vmem:[#allocation60_spill] sm:$0xff] %v10996_v49  ;;  %v722_v57 = vmax.f32 %v706_v4, 0.0 }
 0x15e   : > { %v629_v9 = vpop.f32.mrf.mxu0 }
 0x15f   : > { %v10998_v38 = vpop.permute.xlu1 %1165  ;;  %v11000_v56 = vpop.permute.xlu0 %1161  ;;  %v10005_v28 = vpack.c.bf16 %v722_v57, %v721_v5  ;;  %v707_v2 = vadd.f32 %v10980_v43, %v629_v9 }
 0x160   : > { %v11003_v37 = vpop.f32.mrf.mxu0 }
 0x161   : > { %1418 = vbcast.lane.c.b16.xlu1 %v1404_v48, 304  ;;  %1414 = vbcast.lane.c.b16.xlu0 %v1404_v48, 288  ;;  %16750 = vst [vmem:[#allocation61_spill] sm:$0xff] %v11003_v37  ;;  %10006 = vst [vmem:[#allocation3] sm:$0xff] %v10005_v28   ;;  %v723_v49 = vmax.f32 %v707_v2, 0.0  ;;  %v1439_v28 = vrot.slane %v10809_v18, %v10973_v47 }
 0x162   : > { %v633_v16 = vpop.f32.mrf.mxu0 }
 0x163   : > { %v11005_v58 = vpop.permute.xlu1 %1173  ;;  %v11007_v27 = vpop.permute.xlu0 %1169  ;;  %v708_v4 = vadd.f32 %v10980_v43, %v633_v16 }
 0x164   : > { %v11010_v17 = vpop.f32.mrf.mxu0 }
 0x165   : > { %1426 = vbcast.lane.c.b16.xlu1 %v1404_v48, 336  ;;  %1422 = vbcast.lane.c.b16.xlu0 %v1404_v48, 320  ;;  %16751 = vst [vmem:[#allocation62_spill] sm:$0xff] %v11010_v17  ;;  %v724_v5 = vmax.f32 %v708_v4, 0.0 }
 0x166   : > { %v639_v9 = vpop.f32.mrf.mxu0 }
 0x167   : > { %v11012_v57 = vpop.permute.xlu1 %1181  ;;  %v11014_v7 = vpop.permute.xlu0 %1177  ;;  %v10010_v37 = vpack.c.bf16 %v724_v5, %v723_v49  ;;  %v709_v2 = vadd.f32 %v10980_v43, %v639_v9 }
 0x168   : > { %16752 = vst [vmem:[#allocation63_spill] sm:$0xff] %v11012_v57  ;;  %16753 = vst [vmem:[#allocation64_spill] sm:$0xff] %v11014_v7  ;;  %v11019_v23 = vpop.f32.mrf.mxu0 }
 0x169   : > { %1434 = vbcast.lane.c.b16.xlu1 %v1404_v48, 368  ;;  %1430 = vbcast.lane.c.b16.xlu0 %v1404_v48, 352  ;;  %16754 = vst [vmem:[#allocation65_spill] sm:$0xff] %v11019_v23  ;;  %10042 = vst [vmem:[#allocation3 + $0x8] sm:$0xff] %v10010_v37   ;;  %v725_v57 = vmax.f32 %v709_v2, 0.0  ;;  %v10219_v37 = vld [vmem:[#allocation6 + $0x8] sm:$0xff]  }
 0x16a   : > { %v643_v4 = vpop.f32.mrf.mxu0  ;;  %v11039_v54 = vpack.i.b16 %v10219_v37, %v10219_v37 }
 0x16b   : > { %v11021_v16 = vpop.permute.xlu1 %1189  ;;  %v11023_v17 = vpop.permute.xlu0 %1185  ;;  %v710_v49 = vadd.f32 %v10980_v43, %v643_v4 }
 0x16c   : > { %16755 = vst [vmem:[#allocation66_spill] sm:$0xff] %v11021_v16  ;;  %16756 = vst [vmem:[#allocation67_spill] sm:$0xff] %v11023_v17  ;;  %v11026_v5 = vpop.f32.mrf.mxu0 }
 0x16d   : > { %1445 = vbcast.lane.c.b16.xlu1 %v1439_v28, 272  ;;  %1441 = vbcast.lane.c.b16.xlu0 %v1439_v28, 256  ;;  %16757 = vst [vmem:[#allocation68_spill] sm:$0xff] %v11026_v5  ;;  %v726_v9 = vmax.f32 %v710_v49, 0.0  ;;  %16759 = vst [vmem:[#allocation70_spill] sm:$0xff] %v11039_v54 }
 0x16e   : > { %v649_v47 = vpop.f32.mrf.mxu0 }
 0x16f   : > { %v11028_v48 = vpop.permute.xlu1 %1200  ;;  %v11030_v18 = vpop.permute.xlu0 %1196  ;;  %v10015_v23 = vpack.c.bf16 %v726_v9, %v725_v57  ;;  %v711_v4 = vadd.f32 %v10980_v43, %v649_v47 }
 0x170   : > { %v11032_v16 = vpop.f32.mrf.mxu0 }
 0x171   : > { %1453 = vbcast.lane.c.b16.xlu1 %v1439_v28, 304  ;;  %1449 = vbcast.lane.c.b16.xlu0 %v1439_v28, 288  ;;  %16758 = vst [vmem:[#allocation69_spill] sm:$0xff] %v11032_v16  ;;  %10043 = vst [vmem:[#allocation3 + $0x10] sm:$0xff] %v10015_v23   ;;  %v727_v9 = vmax.f32 %v711_v4, 0.0  ;;  %v1477_v23 = vrot.slane %v11039_v54, %v10795_v6 }
 0x172   : > { %v653_v5 = vpop.f32.mrf.mxu0 }
 0x173   : > { %v11034_v17 = vpop.permute.xlu1 %1208  ;;  %v11036_v2 = vpop.permute.xlu0 %1204  ;;  %v712_v16 = vadd.f32 %v10980_v43, %v653_v5 }
 0x174   : > { %v11041_v49 = vpop.f32.mrf.mxu0 }
 0x175   : > { %1461 = vbcast.lane.c.b16.xlu1 %v1439_v28, 336  ;;  %1457 = vbcast.lane.c.b16.xlu0 %v1439_v28, 320  ;;  %16760 = vst [vmem:[#allocation71_spill] sm:$0xff] %v11041_v49  ;;  %v728_v47 = vmax.f32 %v712_v16, 0.0 }
 0x176   : > { %v659_v34 = vpop.f32.mrf.mxu0 }
 0x177   : > { %v11043_v45 = vpop.permute.xlu1 %1216  ;;  %v11045_v57 = vpop.permute.xlu0 %1212  ;;  %v10020_v49 = vpack.c.bf16 %v728_v47, %v727_v9 }
 0x178   : > { %16761 = vst [vmem:[#allocation72_spill] sm:$0xff] %v11043_v45  ;;  %16762 = vst [vmem:[#allocation73_spill] sm:$0xff] %v11045_v57  ;;  %v11050_v24 = vpop.f32.mrf.mxu0  ;;  %v713_v57 = vadd.f32 %v10980_v43, %v659_v34 }
 0x179   : > { %1469 = vbcast.lane.c.b16.xlu1 %v1439_v28, 368  ;;  %1465 = vbcast.lane.c.b16.xlu0 %v1439_v28, 352  ;;  %16763 = vst [vmem:[#allocation74_spill] sm:$0xff] %v11050_v24  ;;  %10044 = vst [vmem:[#allocation3 + $0x18] sm:$0xff] %v10020_v49  }
 0x17a   : > { %v663_v45 = vpop.f32.mrf.mxu0  ;;  %v729_v16 = vmax.f32 %v713_v57, 0.0 }
 0x17b   : > { %v11052_v13 = vpop.permute.xlu1 %1224  ;;  %v11054_v0 = vpop.permute.xlu0 %1220  ;;  %v714_v24 = vadd.f32 %v10980_v43, %v663_v45 }
 0x17c   : > { %16764 = vst [vmem:[#allocation75_spill] sm:$0xff] %v11052_v13  ;;  %16765 = vst [vmem:[#allocation76_spill] sm:$0xff] %v11054_v0  ;;  %v11057_v5 = vpop.f32.mrf.mxu0  ;;  %v1509_v13 = vshrl.u32 %v10219_v37, 16 }
 0x17d   : > { %1483 = vbcast.lane.c.b16.xlu1 %v1477_v23, 272  ;;  %1479 = vbcast.lane.c.b16.xlu0 %v1477_v23, 256  ;;  %16766 = vst [vmem:[#allocation77_spill] sm:$0xff] %v11057_v5  ;;  %v730_v47 = vmax.f32 %v714_v24, 0.0 }
 0x17e   : > { %v669_v28 = vpop.f32.mrf.mxu0  ;;  %v11071_v55 = vpack.i.b16 %v1509_v13, %v1509_v13 }
 0x17f   : > { %v11059_v4 = vpop.permute.xlu1 %1235  ;;  %v11061_v7 = vpop.permute.xlu0 %1231  ;;  %v10025_v5 = vpack.c.bf16 %v730_v47, %v729_v16  ;;  %v715_v63 = vadd.f32 %v10980_v43, %v669_v28 }
 0x180   : > { %v11064_v9 = vpop.f32.mrf.mxu0  ;;  %16768 = vst [vmem:[#allocation79_spill] sm:$0xff] %v11071_v55  ;;  %v11082_v16 = vrot.slane %v11071_v55, %v10795_v6  ;;  %v11095_v6 = vld [vmem:[#allocation3] sm:$0xff]  }
 0x181   : > { %1491 = vbcast.lane.c.b16.xlu1 %v1477_v23, 304  ;;  %1487 = vbcast.lane.c.b16.xlu0 %v1477_v23, 288  ;;  %16767 = vst [vmem:[#allocation78_spill] sm:$0xff] %v11064_v9  ;;  %10045 = vst [vmem:[#allocation3 + $0x20] sm:$0xff] %v10025_v5   ;;  %v731_v46 = vmax.f32 %v715_v63, 0.0 }
 0x182   : > { %v673_v0 = vpop.f32.mrf.mxu0 }
 0x183   : > { %v11066_v34 = vpop.permute.xlu1 %1243  ;;  %v11068_v49 = vpop.permute.xlu0 %1239  ;;  %v716_v45 = vadd.f32 %v10980_v43, %v673_v0 }
 0x184   : > { %v11073_v57 = vpop.f32.mrf.mxu0 }
 0x185   : > { %1499 = vbcast.lane.c.b16.xlu1 %v1477_v23, 336  ;;  %1495 = vbcast.lane.c.b16.xlu0 %v1477_v23, 320  ;;  %16769 = vst [vmem:[#allocation80_spill] sm:$0xff] %v11073_v57  ;;  %v732_v28 = vmax.f32 %v716_v45, 0.0 }
 0x186   : > { %v679_v9 = vpop.f32.mrf.mxu0 }
 0x187   : > { %v11076_v37 = vpop.permute.xlu1 %1251  ;;  %v11078_v24 = vpop.permute.xlu0 %1247  ;;  %v717_v0 = vadd.f32 %v10980_v43, %v679_v9 }
 0x188   : > { %16770 = vst [vmem:[#allocation81_spill] sm:$0xff] %v11076_v37  ;;  %16771 = vst [vmem:[#allocation82_spill] sm:$0xff] %v11078_v24  ;;  %v11084_v13 = vpop.f32.mrf.mxu0  ;;  %v10030_v37 = vpack.c.bf16 %v732_v28, %v731_v46  ;;  %v11111_v28 = vrot.slane %v11071_v55, %v10820_v29  ;;  %v5497_v55 = vmul.bf16 %v11095_v6, %v10888_v20 }
 0x189   : > { %1507 = vbcast.lane.c.b16.xlu1 %v1477_v23, 368  ;;  %1503 = vbcast.lane.c.b16.xlu0 %v1477_v23, 352  ;;  %16772 = vst [vmem:[#allocation83_spill] sm:$0xff] %v11084_v13  ;;  %v11097_v23 = vld [vmem:[#allocation3 + $0x8] sm:$0xff]   ;;  %v733_v9 = vmax.f32 %v717_v0, 0.0  ;;  %v5513_v20 = vmul.bf16 %v11095_v6, %v10927_v40 }
 0x18a   : > { %v683_v57 = vpop.f32.mrf.mxu0  ;;  %10046 = vst [vmem:[#allocation3 + $0x28] sm:$0xff] %v10030_v37   ;;  %16777 = vst [vmem:[#allocation88_spill] sm:$0xff] %v11111_v28  ;;  %v5481_v37 = vmul.bf16 %v11095_v6, %v10849_v60  ;;  %v5482_v0 = vmul.bf16 %v11097_v23, %v10853_v62  ;;  %v5498_v60 = vmul.bf16 %v11097_v23, %v10886_v19 }
 0x18b   : > { %v11086_v47 = vpop.permute.xlu1 %1259  ;;  %v11088_v5 = vpop.permute.xlu0 %1255  ;;  %v718_v63 = vadd.f32 %v10980_v43, %v683_v57  ;;  %v11107_v57 = vrot.slane %v11039_v54, %v10820_v29  ;;  %v5490_v29 = vmul.bf16 %v11097_v23, %v10868_v8  ;;  %v5514_v28 = vmul.bf16 %v11097_v23, %v10925_v39  ;;  %v11142_v8 = vld [vmem:[#allocation3 + $0x10] sm:$0xff]  }
 0x18c   : > { %16773 = vst [vmem:[#allocation84_spill] sm:$0xff] %v11086_v47  ;;  %16774 = vst [vmem:[#allocation85_spill] sm:$0xff] %v11088_v5  ;;  %v11093_v24 = vpop.f32.mrf.mxu0  ;;  %v5505_v19 = vmul.bf16 %v11095_v6, %v10909_v31  ;;  %v5529_v39 = vmul.bf16 %v11095_v6, %v10966_v26  ;;  %v5545_v31 = vmul.bf16 %v11095_v6, %v11030_v18 }
 0x18d   : > { %1521 = vbcast.lane.c.b16.xlu1 %v11082_v16, 272  ;;  %16775 = vst [vmem:[#allocation86_spill] sm:$0xff] %v11093_v24  ;;  %1517 = vbcast.lane.c.b16.xlu0 %v11082_v16, 256  ;;  %v734_v47 = vmax.f32 %v718_v63, 0.0  ;;  %v5489_v24 = vmul.bf16 %v11095_v6, %v10870_v10  ;;  %v5506_v10 = vmul.bf16 %v11097_v23, %v10907_v30 }
 0x18e   : > { %v689_v46 = vpop.f32.mrf.mxu0  ;;  %v5521_v30 = vmul.bf16 %v11095_v6, %v10948_v51  ;;  %v5491_v18 = vmul.bf16 %v11142_v8, %v10874_v12  ;;  %v5553_v12 = vmul.bf16 %v11095_v6, %v11061_v7  ;;  %v5547_v7 = vmul.bf16 %v11142_v8, %v11036_v2 }
 0x18f   : > { %v11100_v45 = vpop.permute.xlu1 %1270  ;;  %v11102_v13 = vpop.permute.xlu0 %1266  ;;  %v10035_v62 = vpack.c.bf16 %v734_v47, %v733_v9  ;;  %v6505_v47 = vmax.bf16 %v5482_v0, %v5481_v37  ;;  %v6522_v51 = vmax.bf16 %v5490_v29, %v5489_v24  ;;  %v6556_v26 = vmax.bf16 %v5506_v10, %v5505_v19 }
 0x190   : > { %16776 = vst [vmem:[#allocation87_spill] sm:$0xff] %v11102_v13  ;;  %v11126_v13 = vrot.slane %v11039_v54, %v10831_v44  ;;  %v5522_v54 = vmul.bf16 %v11097_v23, %v10946_v50  ;;  %v5530_v44 = vmul.bf16 %v11097_v23, %v10964_v15  ;;  %v5537_v50 = vmul.bf16 %v11095_v6, %v11000_v56 }
 0x191   : > { %1529 = vbcast.lane.c.b16.xlu1 %v11082_v16, 304  ;;  %1525 = vbcast.lane.c.b16.xlu0 %v11082_v16, 288  ;;  %10047 = vst [vmem:[#allocation3 + $0x30] sm:$0xff] %v10035_v62   ;;  %v5538_v15 = vmul.bf16 %v11097_v23, %v10998_v38  ;;  %v5546_v62 = vmul.bf16 %v11097_v23, %v11028_v48 }
 0x192   : > { %16780 = vst [vmem:[#allocation91_spill] sm:$0xff] %v11126_v13  ;;  %v11144_v13 = vpop.f32.mrf.mxu0  ;;  %v6573_v56 = vmax.bf16 %v5514_v28, %v5513_v20  ;;  %v5483_v38 = vmul.bf16 %v11142_v8, %v10847_v59  ;;  %v5499_v29 = vmul.bf16 %v11142_v8, %v10892_v22  ;;  %v5515_v48 = vmul.bf16 %v11142_v8, %v10931_v42  ;;  %v11181_v59 = vld [vmem:[#allocation3 + $0x18] sm:$0xff]  }
 0x193   : > { %v11120_v63 = vpop.permute.xlu1 %1278  ;;  %v11122_v5 = vpop.permute.xlu0 %1274  ;;  %16781 = vst [vmem:[#allocation92_spill] sm:$0xff] %v11144_v13  ;;  %v6539_v13 = vmax.bf16 %v5498_v60, %v5497_v55  ;;  %v5507_v55 = vmul.bf16 %v11142_v8, %v10913_v33  ;;  %v5554_v24 = vmul.bf16 %v11097_v23, %v11059_v4  ;;  %v5531_v42 = vmul.bf16 %v11142_v8, %v10970_v1 }
 0x194   : > { %16778 = vst [vmem:[#allocation89_spill] sm:$0xff] %v11120_v63  ;;  %16779 = vst [vmem:[#allocation90_spill] sm:$0xff] %v11122_v5  ;;  %v6590_v5 = vmax.bf16 %v5522_v54, %v5521_v30  ;;  %v6607_v63 = vmax.bf16 %v5530_v44, %v5529_v39  ;;  %v693_v37 = vpop.f32.mrf.mxu0  ;;  %v6624_v54 = vmax.bf16 %v5538_v15, %v5537_v50  ;;  %v11214_v50 = vld [vmem:[#allocation3 + $0x20] sm:$0xff]  }
 0x195   : > { %1537 = vbcast.lane.c.b16.xlu1 %v11082_v16, 336  ;;  %1533 = vbcast.lane.c.b16.xlu0 %v11082_v16, 320  ;;  %v5523_v44 = vmul.bf16 %v11142_v8, %v10952_v53  ;;  %v6641_v28 = vmax.bf16 %v5546_v62, %v5545_v31  ;;  %v719_v53 = vadd.f32 %v10980_v43, %v689_v46 }
 0x196   : > { %v720_v0 = vadd.f32 %v10980_v43, %v693_v37  ;;  %v5539_v4 = vmul.bf16 %v11142_v8, %v11007_v27  ;;  %v6506_v60 = vmax.bf16 %v6505_v47, %v5483_v38  ;;  %v6523_v10 = vmax.bf16 %v6522_v51, %v5491_v18 }
 0x197   : > { %v11162_v40 = vpop.permute.xlu1 %1286  ;;  %v11164_v9 = vpop.permute.xlu0 %1282  ;;  %v6540_v19 = vmax.bf16 %v6539_v13, %v5499_v29  ;;  %v6557_v20 = vmax.bf16 %v6556_v26, %v5507_v55  ;;  %v6574_v30 = vmax.bf16 %v6573_v56, %v5515_v48  ;;  %v6591_v1 = vmax.bf16 %v6590_v5, %v5523_v44  ;;  %v16782_v55 = vld [vmem:[#allocation47_spill] sm:$0xff] }
 0x198   : > { %v5484_v43 = vmul.bf16 %v11181_v59, %v10851_v61  ;;  %v5492_v27 = vmul.bf16 %v11181_v59, %v10872_v11  ;;  %v6658_v46 = vmax.bf16 %v5554_v24, %v5553_v12  ;;  %v5500_v13 = vmul.bf16 %v11181_v59, %v10890_v21  ;;  %v16783_v24 = vld [vmem:[#allocation51_spill] sm:$0xff] }
 0x199   : > { %1545 = vbcast.lane.c.b16.xlu1 %v11082_v16, 368  ;;  %1541 = vbcast.lane.c.b16.xlu0 %v11082_v16, 352  ;;  %v5555_v16 = vmul.bf16 %v11142_v8, %v11068_v49  ;;  %v6608_v49 = vmax.bf16 %v6607_v63, %v5531_v42  ;;  %v735_v5 = vmax.f32 %v719_v53, 0.0  ;;  %v736_v15 = vmax.f32 %v720_v0, 0.0  ;;  %v11251_v53 = vld [vmem:[#allocation3 + $0x28] sm:$0xff]  }
 0x19a   : > { %v6625_v47 = vmax.bf16 %v6624_v54, %v5539_v4  ;;  %v6642_v61 = vmax.bf16 %v6641_v28, %v5547_v7  ;;  %v5508_v11 = vmul.bf16 %v11181_v59, %v10911_v32  ;;  %v5516_v51 = vmul.bf16 %v11181_v59, %v10929_v41 }
 0x19b   : > { %v11188_v22 = vpop.permute.xlu1 %1294  ;;  %v11190_v33 = vpop.permute.xlu0 %1290  ;;  %v6659_v31 = vmax.bf16 %v6658_v46, %v5555_v16  ;;  %v5524_v26 = vmul.bf16 %v11181_v59, %v10950_v52  ;;  %v5532_v63 = vmul.bf16 %v11181_v59, %v10968_v36  ;;  %v5540_v21 = vmul.bf16 %v11181_v59, %v11005_v58  ;;  %v16786_v16 = vld [vmem:[#allocation73_spill] sm:$0xff] }
 0x19c   : > { %v5548_v62 = vmul.bf16 %v11181_v59, %v11034_v17  ;;  %v6507_v56 = vmax.bf16 %v6506_v60, %v5484_v43  ;;  %v6524_v32 = vmax.bf16 %v6523_v10, %v5492_v27  ;;  %v5556_v38 = vmul.bf16 %v11181_v59, %v11066_v34  ;;  %v16785_v60 = vld [vmem:[#allocation64_spill] sm:$0xff]  ;;  %v16787_v27 = vld [vmem:[#allocation82_spill] sm:$0xff] }
 0x19d   : > { %1556 = vbcast.lane.c.b16.xlu1 %v11107_v57, 272  ;;  %1552 = vbcast.lane.c.b16.xlu0 %v11107_v57, 256  ;;  %v6541_v36 = vmax.bf16 %v6540_v19, %v5500_v13  ;;  %v5485_v58 = vmul.bf16 %v11214_v50, %v10860_v3  ;;  %v5493_v37 = vmul.bf16 %v11214_v50, %v10878_v14  ;;  %v16784_v3 = vld [vmem:[#allocation56_spill] sm:$0xff] }
 0x19e   : > { %v10040_v18 = vpack.c.bf16 %v736_v15, %v735_v5  ;;  %v6558_v17 = vmax.bf16 %v6557_v20, %v5508_v11  ;;  %v5501_v29 = vmul.bf16 %v11214_v50, %v10899_v25  ;;  %v5509_v34 = vmul.bf16 %v11214_v50, %v10917_v35  ;;  %v16788_v15 = vld [vmem:[#allocation87_spill] sm:$0xff] }
 0x19f   : > { %v11208_v2 = vpop.permute.xlu1 %1305  ;;  %v11210_v39 = vpop.permute.xlu0 %1301  ;;  %v5517_v48 = vmul.bf16 %v11214_v50, %v16782_v55  ;;  %v6575_v54 = vmax.bf16 %v6574_v30, %v5516_v51  ;;  %v6592_v44 = vmax.bf16 %v6591_v1, %v5524_v26  ;;  %v5525_v12 = vmul.bf16 %v11214_v50, %v16783_v24  ;;  %v16791_v26 = vld [vmem:[#allocation39_spill] sm:$0xff] }
 0x1a0   : > { %v5533_v42 = vmul.bf16 %v11214_v50, %v16784_v3  ;;  %10048 = vst [vmem:[#allocation3 + $0x38] sm:$0xff] %v10040_v18   ;;  %v6609_v14 = vmax.bf16 %v6608_v49, %v5532_v63  ;;  %v6626_v28 = vmax.bf16 %v6625_v47, %v5540_v21  ;;  %v6643_v25 = vmax.bf16 %v6642_v61, %v5548_v62  ;;  %v16789_v61 = vld [vmem:[#allocation32_spill] sm:$0xff]  ;;  %v16792_v21 = vld [vmem:[#allocation42_spill] sm:$0xff]  ;;  %v16795_v18 = vld [vmem:[#allocation55_spill] sm:$0xff] }
 0x1a1   : > { %1564 = vbcast.lane.c.b16.xlu1 %v11107_v57, 304  ;;  %1560 = vbcast.lane.c.b16.xlu0 %v11107_v57, 288  ;;  %v6660_v35 = vmax.bf16 %v6659_v31, %v5556_v38  ;;  %v5541_v7 = vmul.bf16 %v11214_v50, %v16785_v60  ;;  %v5549_v10 = vmul.bf16 %v11214_v50, %v16786_v16  ;;  %v16790_v31 = vld [vmem:[#allocation35_spill] sm:$0xff]  ;;  %v16793_v38 = vld [vmem:[#allocation46_spill] sm:$0xff]  ;;  %v16799_v3 = vld [vmem:[#allocation72_spill] sm:$0xff] }
 0x1a2   : > { %v6508_v19 = vmax.bf16 %v6507_v56, %v5485_v58  ;;  %v6525_v20 = vmax.bf16 %v6524_v32, %v5493_v37  ;;  %v6542_v30 = vmax.bf16 %v6541_v36, %v5501_v29  ;;  %v6559_v1 = vmax.bf16 %v6558_v17, %v5509_v34  ;;  %v16794_v58 = vld [vmem:[#allocation50_spill] sm:$0xff]  ;;  %v11288_v29 = vld [vmem:[#allocation3 + $0x30] sm:$0xff]   ;;  %v16798_v24 = vld [vmem:[#allocation63_spill] sm:$0xff] }
 0x1a3   : > { %v11232_v41 = vpop.permute.xlu1 %1313  ;;  %v11234_v52 = vpop.permute.xlu0 %1309  ;;  %v6576_v43 = vmax.bf16 %v6575_v54, %v5517_v48  ;;  %v5557_v46 = vmul.bf16 %v11214_v50, %v16787_v27  ;;  %v6593_v49 = vmax.bf16 %v6592_v44, %v5525_v12  ;;  %v6610_v13 = vmax.bf16 %v6609_v14, %v5533_v42  ;;  %v16796_v48 = vld [vmem:[#allocation89_spill] sm:$0xff]  ;;  %v16797_v54 = vld [vmem:[#allocation90_spill] sm:$0xff] }
 0x1a4   : > { %v5562_v5 = vmul.bf16 %v11097_v23, %v11100_v45  ;;  %v5561_v47 = vmul.bf16 %v11095_v6, %v16788_v15  ;;  %v5486_v11 = vmul.bf16 %v11251_v53, %v16789_v61  ;;  %v5494_v51 = vmul.bf16 %v11251_v53, %v16790_v31  ;;  %v16800_v14 = vld [vmem:[#allocation81_spill] sm:$0xff] }
 0x1a5   : > { %1572 = vbcast.lane.c.b16.xlu1 %v11107_v57, 336  ;;  %1568 = vbcast.lane.c.b16.xlu0 %v11107_v57, 320  ;;  %v5502_v63 = vmul.bf16 %v11251_v53, %v16791_v26  ;;  %v5510_v62 = vmul.bf16 %v11251_v53, %v16792_v21  ;;  %v6627_v32 = vmax.bf16 %v6626_v28, %v5541_v7  ;;  %v16801_v7 = vld [vmem:[#allocation88_spill] sm:$0xff]  ;;  %v16802_v26 = vld [vmem:[#allocation34_spill] sm:$0xff] }
 0x1a6   : > { %v5518_v36 = vmul.bf16 %v11251_v53, %v16793_v38  ;;  %v5526_v37 = vmul.bf16 %v11251_v53, %v16794_v58  ;;  %v5534_v17 = vmul.bf16 %v11251_v53, %v16795_v18  ;;  %v6644_v34 = vmax.bf16 %v6643_v25, %v5549_v10  ;;  %v16803_v38 = vld [vmem:[#allocation37_spill] sm:$0xff] }
 0x1a7   : > { %v11254_v0 = vpop.permute.xlu1 %1321  ;;  %v11256_v4 = vpop.permute.xlu0 %1317  ;;  %v6661_v55 = vmax.bf16 %v6660_v35, %v5557_v46  ;;  %v5563_v44 = vmul.bf16 %v11142_v8, %v16797_v54  ;;  %v5542_v12 = vmul.bf16 %v11251_v53, %v16798_v24  ;;  %v5550_v42 = vmul.bf16 %v11251_v53, %v16799_v3  ;;  %v16810_v24 = vld [vmem:[#allocation76_spill] sm:$0xff] }
 0x1a8   : > { %v5558_v28 = vmul.bf16 %v11251_v53, %v16800_v14  ;;  %v6675_v60 = vmax.bf16 %v5562_v5, %v5561_v47  ;;  %v6509_v25 = vmax.bf16 %v6508_v19, %v5486_v11  ;;  %v6526_v35 = vmax.bf16 %v6525_v20, %v5494_v51  ;;  %v16804_v47 = vld [vmem:[#allocation41_spill] sm:$0xff]  ;;  %v16805_v20 = vld [vmem:[#allocation44_spill] sm:$0xff] }
 0x1a9   : > { %1580 = vbcast.lane.c.b16.xlu1 %v11107_v57, 368  ;;  %1576 = vbcast.lane.c.b16.xlu0 %v11107_v57, 352  ;;  %v5564_v57 = vmul.bf16 %v11181_v59, %v16796_v48  ;;  %v6543_v16 = vmax.bf16 %v6542_v30, %v5502_v63  ;;  %v6560_v10 = vmax.bf16 %v6559_v1, %v5510_v62  ;;  %v16806_v1 = vld [vmem:[#allocation49_spill] sm:$0xff]  ;;  %v16809_v48 = vld [vmem:[#allocation67_spill] sm:$0xff] }
 0x1aa   : > { %v6577_v15 = vmax.bf16 %v6576_v43, %v5518_v36  ;;  %v6594_v61 = vmax.bf16 %v6593_v49, %v5526_v37  ;;  %v6611_v31 = vmax.bf16 %v6610_v13, %v5534_v17  ;;  %v5487_v21 = vmul.bf16 %v11288_v29, %v16802_v26  ;;  %v16807_v43 = vld [vmem:[#allocation53_spill] sm:$0xff]  ;;  %v16808_v13 = vld [vmem:[#allocation59_spill] sm:$0xff] }
 0x1ab   : > { %v11278_v45 = vpop.permute.xlu1 %1329  ;;  %v11280_v56 = vpop.permute.xlu0 %1325  ;;  %v5495_v5 = vmul.bf16 %v11288_v29, %v16803_v38  ;;  %v5503_v19 = vmul.bf16 %v11288_v29, %v16804_v47  ;;  %v5511_v30 = vmul.bf16 %v11288_v29, %v16805_v20  ;;  %v5519_v11 = vmul.bf16 %v11288_v29, %v16806_v1  ;;  %v11320_v36 = vld [vmem:[#allocation3 + $0x38] sm:$0xff]   ;;  %v16813_v20 = vld [vmem:[#allocation36_spill] sm:$0xff] }
 0x1ac   : > { %v6628_v51 = vmax.bf16 %v6627_v32, %v5542_v12  ;;  %v6645_v63 = vmax.bf16 %v6644_v34, %v5550_v42  ;;  %v5527_v49 = vmul.bf16 %v11288_v29, %v16807_v43  ;;  %v5535_v62 = vmul.bf16 %v11288_v29, %v16808_v13  ;;  %v16812_v38 = vld [vmem:[#allocation33_spill] sm:$0xff]  ;;  %v16814_v43 = vld [vmem:[#allocation40_spill] sm:$0xff] }
 0x1ad   : > { %1591 = vbcast.lane.c.b16.xlu1 %v16801_v7, 272  ;;  %1587 = vbcast.lane.c.b16.xlu0 %v16801_v7, 256  ;;  %v6662_v58 = vmax.bf16 %v6661_v55, %v5558_v28  ;;  %v6676_v37 = vmax.bf16 %v6675_v60, %v5563_v44  ;;  %v5566_v18 = vmul.bf16 %v11251_v53, %v11162_v40  ;;  %v16811_v55 = vld [vmem:[#allocation85_spill] sm:$0xff] }
 0x1ae   : > { %v5565_v17 = vmul.bf16 %v11214_v50, %v11164_v9  ;;  %v5543_v54 = vmul.bf16 %v11288_v29, %v16809_v48  ;;  %v5551_v12 = vmul.bf16 %v11288_v29, %v16810_v24  ;;  %v5559_v44 = vmul.bf16 %v11288_v29, %v16811_v55  ;;  %v16815_v48 = vld [vmem:[#allocation43_spill] sm:$0xff]  ;;  %v16823_v40 = vld [vmem:[#allocation29_spill] sm:$0xff] }
 0x1af   : > { %v11302_v27 = vpop.permute.xlu1 %1340  ;;  %v11304_v46 = vpop.permute.xlu0 %1336  ;;  %v6510_v3 = vmax.bf16 %v6509_v25, %v5487_v21  ;;  %v6527_v42 = vmax.bf16 %v6526_v35, %v5495_v5  ;;  %v6544_v14 = vmax.bf16 %v6543_v16, %v5503_v19  ;;  %v6561_v28 = vmax.bf16 %v6560_v10, %v5511_v30  ;;  %v16817_v5 = vld [vmem:[#allocation52_spill] sm:$0xff] }
 0x1b0   : > { %v6578_v9 = vmax.bf16 %v6577_v15, %v5519_v11  ;;  %v6595_v60 = vmax.bf16 %v6594_v61, %v5527_v49  ;;  %v6612_v26 = vmax.bf16 %v6611_v31, %v5535_v62  ;;  %v5488_v47 = vmul.bf16 %v11320_v36, %v16812_v38  ;;  %v16816_v31 = vld [vmem:[#allocation48_spill] sm:$0xff]  ;;  %v16818_v11 = vld [vmem:[#allocation58_spill] sm:$0xff]  ;;  %v16820_v62 = vld [vmem:[#allocation75_spill] sm:$0xff] }
 0x1b1   : > { %1599 = vbcast.lane.c.b16.xlu1 %v16801_v7, 304  ;;  %1595 = vbcast.lane.c.b16.xlu0 %v16801_v7, 288  ;;  %v5496_v1 = vmul.bf16 %v11320_v36, %v16813_v20  ;;  %v5504_v13 = vmul.bf16 %v11320_v36, %v16814_v43  ;;  %v5512_v25 = vmul.bf16 %v11320_v36, %v16815_v48  ;;  %v16819_v49 = vld [vmem:[#allocation66_spill] sm:$0xff] }
 0x1b2   : > { %v5570_v35 = vmul.bf16 %v11097_v23, %v11208_v2  ;;  %v5569_v16 = vmul.bf16 %v11095_v6, %v11210_v39  ;;  %v6629_v61 = vmax.bf16 %v6628_v51, %v5543_v54  ;;  %v5520_v21 = vmul.bf16 %v11320_v36, %v16816_v31  ;;  %v16821_v54 = vld [vmem:[#allocation84_spill] sm:$0xff] }
 0x1b3   : > { %v11328_v32 = vpop.permute.xlu1 %1348  ;;  %v11330_v34 = vpop.permute.xlu0 %1344  ;;  %v5528_v19 = vmul.bf16 %v11320_v36, %v16817_v5  ;;  %v6677_v30 = vmax.bf16 %v6676_v37, %v5564_v57  ;;  %v5536_v2 = vmul.bf16 %v11320_v36, %v16818_v11  ;;  %v5544_v39 = vmul.bf16 %v11320_v36, %v16819_v49 }
 0x1b4   : > { %v5552_v24 = vmul.bf16 %v11320_v36, %v16820_v62  ;;  %v5571_v55 = vmul.bf16 %v11142_v8, %v11234_v52  ;;  %v6646_v51 = vmax.bf16 %v6645_v63, %v5551_v12  ;;  %v5560_v38 = vmul.bf16 %v11320_v36, %v16821_v54 }
 0x1b5   : > { %1607 = vbcast.lane.c.b16.xlu1 %v16801_v7, 336  ;;  %1603 = vbcast.lane.c.b16.xlu0 %v16801_v7, 320  ;;  %v6511_v20 = vmax.bf16 %v6510_v3, %v5488_v47  ;;  %v6528_v43 = vmax.bf16 %v6527_v42, %v5496_v1  ;;  %v6663_v57 = vmax.bf16 %v6662_v58, %v5559_v44 }
 0x1b6   : > { %v6545_v37 = vmax.bf16 %v6544_v14, %v5504_v13  ;;  %v6562_v48 = vmax.bf16 %v6561_v28, %v5512_v25  ;;  %v6692_v31 = vmax.bf16 %v5570_v35, %v5569_v16  ;;  %v6579_v49 = vmax.bf16 %v6578_v9, %v5520_v21  ;;  %v16822_v13 = vld [vmem:[#allocation91_spill] sm:$0xff] }
 0x1b7   : > { %v11352_v10 = vpop.permute.xlu1 %1356  ;;  %v11354_v15 = vpop.permute.xlu0 %1352  ;;  %v6596_v52 = vmax.bf16 %v6595_v60, %v5528_v19  ;;  %v6678_v63 = vmax.bf16 %v6677_v30, %v5565_v17  ;;  %v5572_v12 = vmul.bf16 %v11181_v59, %v11232_v41  ;;  %v6613_v3 = vmax.bf16 %v6612_v26, %v5536_v2 }
 0x1b8   : > { %v6630_v42 = vmax.bf16 %v6629_v61, %v5544_v39  ;;  %v6647_v47 = vmax.bf16 %v6646_v51, %v5552_v24  ;;  %v6693_v1 = vmax.bf16 %v6692_v31, %v5571_v55  ;;  %v6664_v58 = vmax.bf16 %v6663_v57, %v5560_v38 }
 0x1b9   : > { %1615 = vbcast.lane.c.b16.xlu1 %v16801_v7, 368  ;;  %1611 = vbcast.lane.c.b16.xlu0 %v16801_v7, 352  ;;  %v6512_v44 = vunpack.i.l.bf16 %v6511_v20  ;;  %v6513_v14 = vunpack.i.h.bf16 %v6511_v20  ;;  %v6529_v28 = vunpack.i.l.bf16 %v6528_v43  ;;  %v6530_v7 = vunpack.i.h.bf16 %v6528_v43 }
 0x1ba   : > { %v6546_v25 = vunpack.i.l.bf16 %v6545_v37  ;;  %v6547_v35 = vunpack.i.h.bf16 %v6545_v37  ;;  %v6563_v16 = vunpack.i.l.bf16 %v6562_v48  ;;  %v6564_v41 = vunpack.i.h.bf16 %v6562_v48 }
 0x1bb   : > { %v11372_v5 = vpop.permute.xlu1 %1364  ;;  %v11374_v11 = vpop.permute.xlu0 %1360  ;;  %v6580_v60 = vunpack.i.l.bf16 %v6579_v49  ;;  %v6581_v26 = vunpack.i.h.bf16 %v6579_v49  ;;  %v6597_v61 = vunpack.i.l.bf16 %v6596_v52  ;;  %v6598_v21 = vunpack.i.h.bf16 %v6596_v52 }
 0x1bc   : > { %v6614_v19 = vunpack.i.l.bf16 %v6613_v3  ;;  %v6615_v30 = vunpack.i.h.bf16 %v6613_v3  ;;  %v6631_v2 = vunpack.i.l.bf16 %v6630_v42  ;;  %v6632_v39 = vunpack.i.h.bf16 %v6630_v42 }
 0x1bd   : > { %1626 = vbcast.lane.c.b16.xlu1 %v16822_v13, 272  ;;  %1622 = vbcast.lane.c.b16.xlu0 %v16822_v13, 256  ;;  %v6648_v62 = vunpack.i.l.bf16 %v6647_v47  ;;  %v6649_v24 = vunpack.i.h.bf16 %v6647_v47  ;;  %v6665_v55 = vunpack.i.l.bf16 %v6664_v58  ;;  %v6666_v51 = vunpack.i.h.bf16 %v6664_v58 }
 0x1be   : > { %v6514_v54 = vmax.f32 %v6512_v44, %v6513_v14  ;;  %v6531_v38 = vmax.f32 %v6529_v28, %v6530_v7  ;;  %v6548_v20 = vmax.f32 %v6546_v25, %v6547_v35  ;;  %v6565_v37 = vmax.f32 %v6563_v16, %v6564_v41  ;;  %v16825_v35 = vld [vmem:[#allocation30_spill] sm:$0xff] }
 0x1bf   : > { %v11380_v17 = vpop.permute.xlu1 %1375  ;;  %v11382_v9 = vpop.permute.xlu0 %1371  ;;  %v5573_v48 = vmul.bf16 %v11214_v50, %v11256_v4  ;;  %v6694_v31 = vmax.bf16 %v6693_v1, %v5572_v12  ;;  %v6582_v49 = vmax.f32 %v6580_v60, %v6581_v26  ;;  %v5567_v52 = vmul.bf16 %v11288_v29, %v11190_v33  ;;  %v16826_v16 = vld [vmem:[#allocation70_spill] sm:$0xff] }
 0x1c0   : > { %v6679_v3 = vmax.bf16 %v6678_v63, %v5566_v18  ;;  %v6599_v42 = vmax.f32 %v6597_v61, %v6598_v21  ;;  %v6616_v47 = vmax.f32 %v6614_v19, %v6615_v30  ;;  %v6633_v58 = vmax.f32 %v6631_v2, %v6632_v39  ;;  %v16824_v18 = vld [vmem:[#allocation79_spill] sm:$0xff] }
 0x1c1   : > { %1634 = vbcast.lane.c.b16.xlu1 %v16822_v13, 304  ;;  %1630 = vbcast.lane.c.b16.xlu0 %v16822_v13, 288  ;;  %v6650_v44 = vmax.f32 %v6648_v62, %v6649_v24  ;;  %v6667_v14 = vmax.f32 %v6665_v55, %v6666_v51  ;;  %v6515_v28 = vrot.slane %v6514_v54, 4  ;;  %v6532_v7 = vrot.slane %v6531_v38, 4 }
 0x1c2   : > { %v6549_v25 = vrot.slane %v6548_v20, 4  ;;  %v6566_v33 = vrot.slane %v6565_v37, 4  ;;  %v6695_v1 = vmax.bf16 %v6694_v31, %v5573_v48  ;;  %v11405_v63 = vrot.slane %v16824_v18, %v16823_v40 }
 0x1c3   : > { %v11386_v43 = vpop.permute.xlu1 %1383  ;;  %v11388_v57 = vpop.permute.xlu0 %1379  ;;  %v11409_v41 = vrot.slane %v16826_v16, %v16825_v35  ;;  %v6583_v60 = vrot.slane %v6582_v49, 4  ;;  %v5568_v26 = vmul.bf16 %v11320_v36, %v11188_v22  ;;  %v6680_v61 = vmax.bf16 %v6679_v3, %v5567_v52 }
 0x1c4   : > { %v5574_v21 = vmul.bf16 %v11251_v53, %v11254_v0  ;;  %v6600_v19 = vrot.slane %v6599_v42, 4  ;;  %v6617_v30 = vrot.slane %v6616_v47, 4  ;;  %v6634_v2 = vrot.slane %v6633_v58, 4 }
 0x1c5   : > { %1642 = vbcast.lane.c.b16.xlu1 %v16822_v13, 336  ;;  %1638 = vbcast.lane.c.b16.xlu0 %v16822_v13, 320  ;;  %v6651_v39 = vrot.slane %v6650_v44, 4  ;;  %v6668_v62 = vrot.slane %v6667_v14, 4  ;;  %v6516_v24 = vmax.f32 %v6514_v54, %v6515_v28  ;;  %v11416_v55 = vmax.f32 %v6531_v38, %v6532_v7 }
 0x1c6   : > { %v11418_v51 = vmax.f32 %v6548_v20, %v6549_v25  ;;  %v11425_v31 = vmax.f32 %v6565_v37, %v6566_v33  ;;  %v5575_v0 = vmul.bf16 %v11288_v29, %v11280_v56  ;;  %v6696_v52 = vmax.bf16 %v6695_v1, %v5574_v21 }
 0x1c7   : > { %v11399_v4 = vpop.permute.xlu1 %1391  ;;  %v11401_v12 = vpop.permute.xlu0 %1387  ;;  %v5578_v3 = vmul.bf16 %v11097_v23, %v11302_v27  ;;  %v11431_v54 = vmax.f32 %v6582_v49, %v6583_v60  ;;  %v11433_v38 = vmax.bf16 %v6680_v61, %v5568_v26  ;;  %v11439_v20 = vrot.slane %v16824_v18, %v16825_v35 }
 0x1c8   : > { %v11441_v37 = vmax.f32 %v6599_v42, %v6600_v19  ;;  %v11443_v28 = vmax.f32 %v6616_v47, %v6617_v30  ;;  %v11445_v56 = vmax.f32 %v6633_v58, %v6634_v2  ;;  %v11447_v7 = vmax.f32 %v6650_v44, %v6651_v39 }
 0x1c9   : > { %1650 = vbcast.lane.c.b16.xlu1 %v16822_v13, 368  ;;  %1646 = vbcast.lane.c.b16.xlu0 %v16822_v13, 352  ;;  %v5577_v13 = vmul.bf16 %v11095_v6, %v11304_v46  ;;  %v11450_v27 = vmax.f32 %v6667_v14, %v6668_v62  ;;  %v6517_v49 = vrot.slane %v6516_v24, 2  ;;  %v6534_v25 = vrot.slane %v11416_v55, 2 }
 0x1ca   : > { %v6551_v46 = vrot.slane %v11418_v51, 2  ;;  %v6568_v47 = vrot.slane %v11425_v31, 2  ;;  %v6697_v1 = vmax.bf16 %v6696_v52, %v5575_v0  ;;  %v5579_v44 = vmul.bf16 %v11142_v8, %v11330_v34 }
 0x1cb   : > { %v11421_v48 = vpop.permute.xlu1 %1399  ;;  %v11423_v22 = vpop.permute.xlu0 %1395  ;;  %v6709_v58 = vmax.bf16 %v5578_v3, %v5577_v13  ;;  %v6682_v60 = vunpack.i.l.bf16 %v11433_v38  ;;  %v6683_v14 = vunpack.i.h.bf16 %v11433_v38  ;;  %v5576_v26 = vmul.bf16 %v11320_v36, %v11278_v45 }
 0x1cc   : > { %v5580_v61 = vmul.bf16 %v11181_v59, %v11328_v32  ;;  %v5581_v19 = vmul.bf16 %v11214_v50, %v11354_v15  ;;  %v5586_v30 = vmul.bf16 %v11097_v23, %v11380_v17  ;;  %v5585_v34 = vmul.bf16 %v11095_v6, %v11382_v9 }
 0x1cd   : > { %1661 = vbcast.lane.c.b16.xlu1 %v11405_v63, 272  ;;  %1657 = vbcast.lane.c.b16.xlu0 %v11405_v63, 256  ;;  %v6710_v21 = vmax.bf16 %v6709_v58, %v5579_v44  ;;  %v6585_v2 = vrot.slane %v11431_v54, 2  ;;  %v6602_v39 = vrot.slane %v11441_v37, 2  ;;  %v6619_v45 = vrot.slane %v11443_v28, 2 }
 0x1ce   : > { %v5587_v32 = vmul.bf16 %v11142_v8, %v11388_v57  ;;  %v6698_v0 = vmax.bf16 %v6697_v1, %v5576_v26  ;;  %v5582_v17 = vmul.bf16 %v11251_v53, %v11352_v10  ;;  %v6726_v52 = vmax.bf16 %v5586_v30, %v5585_v34 }
 0x1cf   : > { %v1411_v33 = vpop.permute.xlu1 %1410  ;;  %v1407_v42 = vpop.permute.xlu0 %1406  ;;  %v6711_v9 = vmax.bf16 %v6710_v21, %v5580_v61  ;;  %v5583_v3 = vmul.bf16 %v11288_v29, %v11374_v11  ;;  %v5588_v38 = vmul.bf16 %v11181_v59, %v11386_v43  ;;  %v5589_v1 = vmul.bf16 %v11214_v50, %v11401_v12 }
 0x1d0   : > { %v5594_v13 = vmul.bf16 %v11097_v23, %v1411_v33  ;;  %v5593_v57 = vmul.bf16 %v11095_v6, %v1407_v42  ;;  %v6727_v44 = vmax.bf16 %v6726_v52, %v5587_v32  ;;  %v6653_v10 = vrot.slane %v11447_v7, 2 }
 0x1d1   : > { %1669 = vbcast.lane.c.b16.xlu1 %v11405_v63, 304  ;;  %1665 = vbcast.lane.c.b16.xlu0 %v11405_v63, 288  ;;  %v6712_v58 = vmax.bf16 %v6711_v9, %v5581_v19  ;;  %v6670_v11 = vrot.slane %v11450_v27, 2  ;;  %v11491_v61 = vmax.f32 %v6516_v24, %v6517_v49  ;;  %v6699_v21 = vunpack.i.l.bf16 %v6698_v0 }
 0x1d2   : > { %v6743_v43 = vmax.bf16 %v5594_v13, %v5593_v57  ;;  %v6700_v19 = vunpack.i.h.bf16 %v6698_v0  ;;  %v6728_v34 = vmax.bf16 %v6727_v44, %v5588_v38  ;;  %v5584_v12 = vmul.bf16 %v11320_v36, %v11372_v5 }
 0x1d3   : > { %v1419_v15 = vpop.permute.xlu1 %1418  ;;  %v1415_v62 = vpop.permute.xlu0 %1414  ;;  %v6713_v30 = vmax.bf16 %v6712_v58, %v5582_v17  ;;  %v5590_v24 = vmul.bf16 %v11251_v53, %v11399_v4  ;;  %v5591_v13 = vmul.bf16 %v11288_v29, %v11423_v22  ;;  %v6684_v0 = vmax.f32 %v6682_v60, %v6683_v14 }
 0x1d4   : > { %v5595_v26 = vmul.bf16 %v11142_v8, %v1415_v62  ;;  %v5596_v32 = vmul.bf16 %v11181_v59, %v1419_v15  ;;  %v6729_v49 = vmax.bf16 %v6728_v34, %v5589_v1  ;;  %v6535_v17 = vmax.f32 %v11416_v55, %v6534_v25 }
 0x1d5   : > { %1677 = vbcast.lane.c.b16.xlu1 %v11405_v63, 336  ;;  %1673 = vbcast.lane.c.b16.xlu0 %v11405_v63, 320  ;;  %v6714_v52 = vmax.bf16 %v6713_v30, %v5583_v3  ;;  %v11505_v5 = vmax.f32 %v11418_v51, %v6551_v46  ;;  %v11509_v57 = vmax.f32 %v11425_v31, %v6568_v47  ;;  %v6685_v31 = vrot.slane %v6684_v0, 4 }
 0x1d6   : > { %v6744_v62 = vmax.bf16 %v6743_v43, %v5595_v26  ;;  %v6701_v4 = vmax.f32 %v6699_v21, %v6700_v19  ;;  %v6730_v44 = vmax.bf16 %v6729_v49, %v5590_v24  ;;  %v11512_v22 = vmax.f32 %v11431_v54, %v6585_v2 }
 0x1d7   : > { %v1427_v33 = vpop.permute.xlu1 %1426  ;;  %v1423_v42 = vpop.permute.xlu0 %1422  ;;  %v6715_v58 = vmax.bf16 %v6714_v52, %v5584_v12  ;;  %v11520_v47 = vmax.f32 %v11441_v37, %v6602_v39  ;;  %v11523_v54 = vmax.f32 %v11447_v7, %v6653_v10  ;;  %v6519_v26 = vrot.slane %v11491_v61, 1 }
 0x1d8   : > { %v5597_v9 = vmul.bf16 %v11214_v50, %v1423_v42  ;;  %v6745_v15 = vmax.bf16 %v6744_v62, %v5596_v32  ;;  %v5598_v60 = vmul.bf16 %v11251_v53, %v1427_v33  ;;  %v6731_v14 = vmax.bf16 %v6730_v44, %v5591_v13 }
 0x1d9   : > { %1685 = vbcast.lane.c.b16.xlu1 %v11405_v63, 368  ;;  %1681 = vbcast.lane.c.b16.xlu0 %v11405_v63, 352  ;;  %v6716_v25 = vunpack.i.l.bf16 %v6715_v58  ;;  %v6717_v46 = vunpack.i.h.bf16 %v6715_v58  ;;  %v5592_v63 = vmul.bf16 %v11320_v36, %v11421_v48  ;;  %v6702_v43 = vrot.slane %v6701_v4, 4 }
 0x1da   : > { %v6746_v55 = vmax.bf16 %v6745_v15, %v5597_v9  ;;  %v6536_v39 = vrot.slane %v6535_v17, 1  ;;  %v6671_v12 = vmax.f32 %v11450_v27, %v6670_v11  ;;  %v6553_v32 = vrot.slane %v11505_v5, 1 }
 0x1db   : > { %v1435_v38 = vpop.permute.xlu1 %1434  ;;  %v1431_v3 = vpop.permute.xlu0 %1430  ;;  %v6718_v33 = vmax.f32 %v6716_v25, %v6717_v46  ;;  %v6732_v42 = vmax.bf16 %v6731_v14, %v5592_v63  ;;  %v6570_v62 = vrot.slane %v11509_v57, 1  ;;  %v6686_v24 = vmax.f32 %v6684_v0, %v6685_v31 }
 0x1dc   : > { %v5599_v51 = vmul.bf16 %v11288_v29, %v1431_v3  ;;  %v6747_v2 = vmax.bf16 %v6746_v55, %v5598_v60  ;;  %v5600_v21 = vmul.bf16 %v11320_v36, %v1435_v38  ;;  %v6587_v27 = vrot.slane %v11512_v22, 1 }
 0x1dd   : > { %1696 = vbcast.lane.c.b16.xlu1 %v11409_v41, 272  ;;  %1692 = vbcast.lane.c.b16.xlu0 %v11409_v41, 256  ;;  %v6719_v7 = vrot.slane %v6718_v33, 4  ;;  %v6733_v10 = vunpack.i.l.bf16 %v6732_v42  ;;  %v6734_v34 = vunpack.i.h.bf16 %v6732_v42  ;;  %v6537_v11 = vmax.f32 %v6535_v17, %v6536_v39 }
 0x1de   : > { %v6748_v19 = vmax.bf16 %v6747_v2, %v5599_v51  ;;  %v6655_v55 = vrot.slane %v11523_v54, 1  ;;  %v6687_v25 = vrot.slane %v6686_v24, 2  ;;  %v6672_v46 = vrot.slane %v6671_v12, 1 }
 0x1df   : > { %v1446_v1 = vpop.permute.xlu1 %1445  ;;  %v1442_v48 = vpop.permute.xlu0 %1441  ;;  %v6735_v49 = vmax.f32 %v6733_v10, %v6734_v34  ;;  %v6720_v44 = vmax.f32 %v6718_v33, %v6719_v7 }
 0x1e0   : > { %v5602_v30 = vmul.bf16 %v11097_v23, %v1446_v1  ;;  %v5601_v37 = vmul.bf16 %v11095_v6, %v1442_v48  ;;  %v6749_v9 = vmax.bf16 %v6748_v19, %v5600_v21  ;;  %v6520_v23 = vmax.f32 %v11491_v61, %v6519_v26 }
 0x1e1   : > { %1704 = vbcast.lane.c.b16.xlu1 %v11409_v41, 304  ;;  %1700 = vbcast.lane.c.b16.xlu0 %v11409_v41, 288  ;;  %v6703_v6 = vmax.f32 %v6701_v4, %v6702_v43  ;;  %v6736_v60 = vrot.slane %v6735_v49, 4  ;;  %v6554_v26 = vmax.f32 %v11505_v5, %v6553_v32  ;;  %v11545_v43 = vmax.f32 %v11509_v57, %v6570_v62 }
 0x1e2   : > { %v6750_v15 = vunpack.i.l.bf16 %v6749_v9  ;;  %v6751_v38 = vunpack.i.h.bf16 %v6749_v9  ;;  %v6760_v3 = vmax.bf16 %v5602_v30, %v5601_v37  ;;  %v6521_v63 = vpack.i.bf16 %v6520_v23, %v6520_v23 }
 0x1e3   : > { %v1454_v52 = vpop.permute.xlu1 %1453  ;;  %v1450_v13 = vpop.permute.xlu0 %1449  ;;  %v6704_v31 = vrot.slane %v6703_v6, 2  ;;  %v6721_v33 = vrot.slane %v6720_v44, 2  ;;  %v6688_v37 = vmax.f32 %v6686_v24, %v6687_v25  ;;  %v11551_v39 = vmax.f32 %v6671_v12, %v6672_v46 }
 0x1e4   : > { %v5603_v58 = vmul.bf16 %v11142_v8, %v1450_v13  ;;  %v6752_v0 = vmax.f32 %v6750_v15, %v6751_v38  ;;  %v5604_v61 = vmul.bf16 %v11181_v59, %v1454_v52  ;;  %v6737_v8 = vmax.f32 %v6735_v49, %v6736_v60 }
 0x1e5   : > { %1712 = vbcast.lane.c.b16.xlu1 %v11409_v41, 336  ;;  %1708 = vbcast.lane.c.b16.xlu0 %v11409_v41, 320  ;;  %v6538_v59 = vpack.i.bf16 %v6537_v11, %v6537_v11  ;;  %v16827_v5 = vmov 0   ;;  %v6705_v10 = vmax.f32 %v6703_v6, %v6704_v31  ;;  %v6555_v9 = vpack.i.bf16 %v6554_v26, %v6554_v26 }
 0x1e6   : > { %v6761_v4 = vmax.bf16 %v6760_v3, %v5603_v58  ;;  %v6753_v17 = vrot.slane %v6752_v0, 4  ;;  %v6738_v42 = vrot.slane %v6737_v8, 2  ;;  %v8681_v57 = vmax.bf16 %v16827_v5, %v6521_v63 }
 0x1e7   : > { %v1462_v51 = vpop.permute.xlu1 %1461  ;;  %v1458_v14 = vpop.permute.xlu0 %1457  ;;  %v6722_v52 = vmax.f32 %v6720_v44, %v6721_v33  ;;  %v6689_v6 = vrot.slane %v6688_v37, 1  ;;  %v6620_v15 = vmax.f32 %v11443_v28, %v6619_v45  ;;  %v6706_v58 = vrot.slane %v6705_v10, 1 }
 0x1e8   : > { %v5605_v2 = vmul.bf16 %v11214_v50, %v1458_v14  ;;  %v6762_v1 = vmax.bf16 %v6761_v4, %v5604_v61  ;;  %v6754_v48 = vmax.f32 %v6752_v0, %v6753_v17  ;;  %v5606_v21 = vmul.bf16 %v11251_v53, %v1462_v51 }
 0x1e9   : > { %1720 = vbcast.lane.c.b16.xlu1 %v11409_v41, 368  ;;  %1716 = vbcast.lane.c.b16.xlu0 %v11409_v41, 352  ;;  %v6656_v50 = vmax.f32 %v11523_v54, %v6655_v55  ;;  %v6572_v53 = vpack.i.bf16 %v11545_v43, %v11545_v43  ;;  %v8682_v41 = vmax.bf16 %v16827_v5, %v6538_v59  ;;  %v8971_v3 = vunpack.c.l.b16 %v8681_v57  ;;  %v16828_v57 = vld [vmem:[#allocation31_spill] sm:$0xff] }
 0x1ea   : > { %v6763_v19 = vmax.bf16 %v6762_v1, %v5605_v2  ;;  %v6755_v34 = vrot.slane %v6754_v48, 2  ;;  %v6739_v54 = vmax.f32 %v6737_v8, %v6738_v42  ;;  %v6604_v11 = vrot.slane %v11520_v47, 1 }
 0x1eb   : > { %v1470_v30 = vpop.permute.xlu1 %1469  ;;  %v1466_v7 = vpop.permute.xlu0 %1465  ;;  %v6657_v49 = vpack.i.bf16 %v6656_v50, %v6656_v50  ;;  %v8972_v44 = vunpack.c.l.b16 %v8682_v41  ;;  %v6723_v60 = vrot.slane %v6722_v52, 1  ;;  %v6588_v55 = vmax.f32 %v11512_v22, %v6587_v27 }
 0x1ec   : > { %v5607_v32 = vmul.bf16 %v11288_v29, %v1466_v7  ;;  %v6764_v62 = vmax.bf16 %v6763_v19, %v5606_v21  ;;  %v5608_v12 = vmul.bf16 %v11320_v36, %v1470_v30  ;;  %v6636_v29 = vrot.slane %v11445_v56, 2 }
 0x1ed   : > { %1731 = vbcast.lane.c.b16.xlu1 %v11439_v20, 272  ;;  %1727 = vbcast.lane.c.b16.xlu0 %v11439_v20, 256  ;;  %v6756_v38 = vmax.f32 %v6754_v48, %v6755_v34  ;;  %v8683_v0 = vmax.bf16 %v16827_v5, %v6555_v9  ;;  %v6740_v51 = vrot.slane %v6739_v54, 1  ;;  %v6690_v25 = vmax.f32 %v6688_v37, %v6689_v6 }
 0x1ee   : > { %v6765_v24 = vmax.bf16 %v6764_v62, %v5607_v32  ;;  %v6637_v45 = vmax.f32 %v11445_v56, %v6636_v29  ;;  %v6674_v46 = vpack.i.bf16 %v11551_v39, %v11551_v39  ;;  %v6621_v8 = vrot.slane %v6620_v15, 1 }
 0x1ef   : > { %v11561_v23 = vpop.permute.xlu1 %1483  ;;  %v11564_v13 = vpop.permute.xlu0 %1479  ;;  %v6757_v22 = vrot.slane %v6756_v38, 1  ;;  %v11584_v27 = vmax.bf16 %v16827_v5, %v6657_v49  ;;  %v6707_v14 = vmax.f32 %v6705_v10, %v6706_v58  ;;  %v6605_v17 = vmax.f32 %v11520_v47, %v6604_v11 }
 0x1f0   : > { %v6766_v36 = vmax.bf16 %v6765_v24, %v5608_v12  ;;  %v6589_v56 = vpack.i.bf16 %v6588_v55, %v6588_v55  ;;  %v6724_v2 = vmax.f32 %v6722_v52, %v6723_v60  ;;  %v8684_v1 = vmax.bf16 %v16827_v5, %v6572_v53 }
 0x1f1   : > { %1739 = vbcast.lane.c.b16.xlu1 %v11439_v20, 304  ;;  %1735 = vbcast.lane.c.b16.xlu0 %v11439_v20, 288  ;;  %v8973_v26 = vunpack.c.l.b16 %v8683_v0  ;;  %v6638_v33 = vrot.slane %v6637_v45, 1  ;;  %v6741_v42 = vmax.f32 %v6739_v54, %v6740_v51  ;;  %v9100_v48 = vsel %vm9099_vm0, %v8972_v44, %v8971_v3 }
 0x1f2   : > { %v6767_v61 = vunpack.i.l.bf16 %v6766_v36  ;;  %v6768_v4 = vunpack.i.h.bf16 %v6766_v36  ;;  %v6691_v21 = vpack.i.bf16 %v6690_v25, %v6690_v25  ;;  %v8690_v47 = vmax.bf16 %v16827_v5, %v6674_v46 }
 0x1f3   : > { %v11576_v28 = vpop.permute.xlu1 %1491  ;;  %v11581_v63 = vpop.permute.xlu0 %1487  ;;  %v6622_v30 = vmax.f32 %v6620_v15, %v6621_v8  ;;  %v6758_v37 = vmax.f32 %v6756_v38, %v6757_v22  ;;  %v6708_v50 = vpack.i.bf16 %v6707_v14, %v6707_v14  ;;  %v11598_v7 = vrot.slane %v16826_v16, %v16828_v57 }
 0x1f4   : > { %v6769_v31 = vmax.f32 %v6767_v61, %v6768_v4  ;;  %v6606_v10 = vpack.i.bf16 %v6605_v17, %v6605_v17  ;;  %v8979_v34 = vunpack.c.l.b16 %v11584_v27  ;;  %v6725_v32 = vpack.i.bf16 %v6724_v2, %v6724_v2 }
 0x1f5   : > { %1747 = vbcast.lane.c.b16.xlu1 %v11439_v20, 336  ;;  %1743 = vbcast.lane.c.b16.xlu0 %v11439_v20, 320  ;;  %v8685_v62 = vmax.bf16 %v16827_v5, %v6589_v56  ;;  %v9102_v9 = vsel %vm9101_vm1, %v8973_v26, %v9100_v48  ;;  %v6639_v41 = vmax.f32 %v6637_v45, %v6638_v33  ;;  %v8974_v12 = vunpack.c.l.b16 %v8684_v1 }
 0x1f6   : > { %v6770_v43 = vrot.slane %v6769_v31, 4  ;;  %v6742_v52 = vpack.i.bf16 %v6741_v42, %v6741_v42  ;;  %v8980_v24 = vunpack.c.l.b16 %v8690_v47  ;;  %v6623_v6 = vpack.i.bf16 %v6622_v30, %v6622_v30 }
 0x1f7   : > { %v11590_v59 = vpop.permute.xlu1 %1499  ;;  %v11594_v19 = vpop.permute.xlu0 %1495  ;;  %v6759_v49 = vpack.i.bf16 %v6758_v37, %v6758_v37  ;;  %v8691_v15 = vmax.bf16 %v16827_v5, %v6691_v21  ;;  %v8686_v3 = vmax.bf16 %v16827_v5, %v6606_v10  ;;  %v8692_v58 = vmax.bf16 %v16827_v5, %v6708_v50 }
 0x1f8   : > { %v6771_v39 = vmax.f32 %v6769_v31, %v6770_v43  ;;  %v8693_v36 = vmax.bf16 %v16827_v5, %v6725_v32  ;;  %v8975_v11 = vunpack.c.l.b16 %v8685_v62  ;;  %v6640_v60 = vpack.i.bf16 %v6639_v41, %v6639_v41 }
 0x1f9   : > { %1755 = vbcast.lane.c.b16.xlu1 %v11439_v20, 368  ;;  %1751 = vbcast.lane.c.b16.xlu0 %v11439_v20, 352  ;;  %v9104_v20 = vsel %vm9103_vm2, %v8974_v12, %v9102_v9  ;;  %v8694_v0 = vmax.bf16 %v16827_v5, %v6742_v52  ;;  %v8687_v61 = vmax.bf16 %v16827_v5, %v6623_v6  ;;  %v8981_v45 = vunpack.c.l.b16 %v8691_v15 }
 0x1fa   : > { %v6772_v54 = vrot.slane %v6771_v39, 2  ;;  %v8695_v4 = vmax.bf16 %v16827_v5, %v6759_v49  ;;  %v9106_v51 = vsel %vm9105_vm3, %v8975_v11, %v9104_v20  ;;  %v8976_v8 = vunpack.c.l.b16 %v8686_v3  ;;  %v16829_v3 = vld [vmem:[#allocation38_spill] sm:$0xff] }
 0x1fb   : > { %v11605_v53 = vpop.permute.xlu1 %1507  ;;  %v11607_v29 = vpop.permute.xlu0 %1503  ;;  %v8982_v22 = vunpack.c.l.b16 %v8692_v58  ;;  %v9113_v27 = vsel %vm9099_vm0, %v8980_v24, %v8979_v34  ;;  %v8983_v14 = vunpack.c.l.b16 %v8693_v36  ;;  %v8688_v56 = vmax.bf16 %v16827_v5, %v6640_v60 }
 0x1fc   : > { %v6773_v38 = vmax.f32 %v6771_v39, %v6772_v54  ;;  %v8984_v2 = vunpack.c.l.b16 %v8694_v0  ;;  %v9108_v1 = vsel %vm9107_vm4, %v8976_v8, %v9106_v51  ;;  %v8977_v26 = vunpack.c.l.b16 %v8687_v61 }
 0x1fd   : > { %1766 = vbcast.lane.c.b16.xlu1 %v11598_v7, 272  ;;  %1762 = vbcast.lane.c.b16.xlu0 %v11598_v7, 256  ;;  %v8985_v43 = vunpack.c.l.b16 %v8695_v4  ;;  %v9114_v33 = vsel %vm9101_vm1, %v8981_v45, %v9113_v27  ;;  %v8978_v50 = vunpack.c.l.b16 %v8688_v56  ;;  %v1795_v52 = vrot.slane %v16824_v18, %v16828_v57 }
 0x1fe   : > { %v6774_v55 = vrot.slane %v6773_v38, 1  ;;  %v9115_v21 = vsel %vm9103_vm2, %v8982_v22, %v9114_v33  ;;  %v9110_v47 = vsel %vm9109_vm5, %v8977_v26, %v9108_v1  ;;  %v1830_v58 = vrot.slane %v16826_v16, %v16829_v3 }
 0x1ff   : > { %v11616_v44 = vpop.permute.xlu1 %1521  ;;  %v11622_v25 = vpop.permute.xlu0 %1517  ;;  %v9116_v30 = vsel %vm9105_vm3, %v8983_v14, %v9115_v21  ;;  %v9112_v62 = vsel %vm9111_vm6, %v8978_v50, %v9110_v47  ;;  %v1865_v45 = vrot.slane %v16824_v18, %v16829_v3 }
 0x200   : > { %v6775_v46 = vmax.f32 %v6773_v38, %v6774_v55  ;;  %v9117_v10 = vsel %vm9107_vm4, %v8984_v2, %v9116_v30  ;;  %v16830_v2 = vld [vmem:[#allocation45_spill] sm:$0xff] }
 0x201   : > { %1774 = vbcast.lane.c.b16.xlu1 %v11598_v7, 304  ;;  %1770 = vbcast.lane.c.b16.xlu0 %v11598_v7, 288  ;;  %v9118_v34 = vsel %vm9109_vm5, %v8985_v43, %v9117_v10  ;;  %v1900_v1 = vrot.slane %v16826_v16, %v16830_v2 }
 0x202   : > { %v6776_v17 = vpack.i.bf16 %v6775_v46, %v6775_v46 }
 0x203   : > { %v11627_v31 = vpop.permute.xlu1 %1529  ;;  %v11632_v42 = vpop.permute.xlu0 %1525 }
 0x204   : > { %v8696_v48 = vmax.bf16 %v16827_v5, %v6776_v17  ;;  %v11789_v5 = vld [vmem:[#allocation3 + $0x18] sm:$0xff]  }
 0x205   : > { %1782 = vbcast.lane.c.b16.xlu1 %v11598_v7, 336  ;;  %1778 = vbcast.lane.c.b16.xlu0 %v11598_v7, 320 }
 0x206   : > { %v8986_v39 = vunpack.c.l.b16 %v8696_v48 }
 0x207   : > { %v11640_v37 = vpop.permute.xlu1 %1537  ;;  %v11644_v32 = vpop.permute.xlu0 %1533 }
 0x208   : > { %v9119_v9 = vsel %vm9111_vm6, %v8986_v39, %v9118_v34  ;;  %v1935_v39 = vrot.slane %v16824_v18, %v16830_v2 }
 0x209   : > { %1790 = vbcast.lane.c.b16.xlu1 %v11598_v7, 368  ;;  %v9218_v41 = vpack.c.b16 %v9119_v9, %v9112_v62  ;;  %1786 = vbcast.lane.c.b16.xlu0 %v11598_v7, 352 }
 0x20b   : > { %v11652_v54 = vpop.permute.xlu1 %1545  ;;  %10081 = vmatprep.mubr.bf16.mxu1 %v9218_v41  ;;  %v11654_v12 = vpop.permute.xlu0 %1541 }
 0x20d   : > { %1801 = vbcast.lane.c.b16.xlu1 %v1795_v52, 272  ;;  %1797 = vbcast.lane.c.b16.xlu0 %v1795_v52, 256 }
 0x20f   : > { %v11656_v24 = vpop.permute.xlu1 %1556  ;;  %v11658_v6 = vpop.permute.xlu0 %1552 }
 0x211   : > { %1809 = vbcast.lane.c.b16.xlu1 %v1795_v52, 304  ;;  %1805 = vbcast.lane.c.b16.xlu0 %v1795_v52, 288 }
 0x213   : > { %v11660_v49 = vpop.permute.xlu1 %1564  ;;  %v11662_v15 = vpop.permute.xlu0 %1560 }
 0x215   : > { %1817 = vbcast.lane.c.b16.xlu1 %v1795_v52, 336  ;;  %1813 = vbcast.lane.c.b16.xlu0 %v1795_v52, 320 }
 0x217   : > { %v11664_v7 = vpop.permute.xlu1 %1572  ;;  %v11666_v38 = vpop.permute.xlu0 %1568 }
 0x219   : > { %1825 = vbcast.lane.c.b16.xlu1 %v1795_v52, 368  ;;  %1821 = vbcast.lane.c.b16.xlu0 %v1795_v52, 352 }
 0x21b   : > { %v11670_v20 = vpop.permute.xlu1 %1580  ;;  %v11672_v36 = vpop.permute.xlu0 %1576 }
 0x21d   : > { %1836 = vbcast.lane.c.b16.xlu1 %v1830_v58, 272  ;;  %1832 = vbcast.lane.c.b16.xlu0 %v1830_v58, 256 }
 0x21f   : > { %v11674_v11 = vpop.permute.xlu1 %1591  ;;  %v11676_v60 = vpop.permute.xlu0 %1587 }
 0x221   : > { %1844 = vbcast.lane.c.b16.xlu1 %v1830_v58, 304  ;;  %1840 = vbcast.lane.c.b16.xlu0 %v1830_v58, 288 }
 0x223   : > { %v11678_v55 = vpop.permute.xlu1 %1599  ;;  %v11680_v0 = vpop.permute.xlu0 %1595 }
 0x225   : > { %1852 = vbcast.lane.c.b16.xlu1 %v1830_v58, 336  ;;  %1848 = vbcast.lane.c.b16.xlu0 %v1830_v58, 320 }
 0x227   : > { %v11682_v61 = vpop.permute.xlu1 %1607  ;;  %v11684_v4 = vpop.permute.xlu0 %1603 }
 0x229   : > { %1860 = vbcast.lane.c.b16.xlu1 %v1830_v58, 368  ;;  %1856 = vbcast.lane.c.b16.xlu0 %v1830_v58, 352 }
 0x22b   : > { %v11688_v51 = vpop.permute.xlu1 %1615  ;;  %v11690_v46 = vpop.permute.xlu0 %1611 }
 0x22d   : > { %1871 = vbcast.lane.c.b16.xlu1 %v1865_v45, 272  ;;  %1867 = vbcast.lane.c.b16.xlu0 %v1865_v45, 256 }
 0x22f   : > { %v11692_v8 = vpop.permute.xlu1 %1626  ;;  %v11694_v22 = vpop.permute.xlu0 %1622 }
 0x231   : > { %1879 = vbcast.lane.c.b16.xlu1 %v1865_v45, 304  ;;  %1875 = vbcast.lane.c.b16.xlu0 %v1865_v45, 288 }
 0x233   : > { %v11696_v27 = vpop.permute.xlu1 %1634  ;;  %v11698_v14 = vpop.permute.xlu0 %1630 }
 0x235   : > { %1887 = vbcast.lane.c.b16.xlu1 %v1865_v45, 336  ;;  %1883 = vbcast.lane.c.b16.xlu0 %v1865_v45, 320 }
 0x237   : > { %v11700_v17 = vpop.permute.xlu1 %1642  ;;  %v11702_v56 = vpop.permute.xlu0 %1638 }
 0x239   : > { %1895 = vbcast.lane.c.b16.xlu1 %v1865_v45, 368  ;;  %1891 = vbcast.lane.c.b16.xlu0 %v1865_v45, 352 }
 0x23b   : > { %v11706_v26 = vpop.permute.xlu1 %1650  ;;  %v11708_v43 = vpop.permute.xlu0 %1646 }
 0x23c   : > { %16831 = vst [vmem:[#allocation47_spill] sm:$0xff] %v11706_v26  ;;  %v10227_v26 = vld [vmem:[%s10753_s22 + $0x28] sm:$0xff]  }
 0x23d   : > { %1906 = vbcast.lane.c.b16.xlu1 %v1900_v1, 272  ;;  %1902 = vbcast.lane.c.b16.xlu0 %v1900_v1, 256 }
 0x23f   : > { %v11710_v33 = vpop.permute.xlu1 %1661  ;;  %v11712_v48 = vpop.permute.xlu0 %1657 }
 0x241   : > { %1914 = vbcast.lane.c.b16.xlu1 %v1900_v1, 304  ;;  %1910 = vbcast.lane.c.b16.xlu0 %v1900_v1, 288 }
 0x243   : > { %v11714_v21 = vpop.permute.xlu1 %1669  ;;  %v11716_v47 = vpop.permute.xlu0 %1665 }
 0x245   : > { %1922 = vbcast.lane.c.b16.xlu1 %v1900_v1, 336  ;;  %1918 = vbcast.lane.c.b16.xlu0 %v1900_v1, 320 }
 0x247   : > { %v11718_v30 = vpop.permute.xlu1 %1677  ;;  %v11720_v50 = vpop.permute.xlu0 %1673 }
 0x248   : > { %16832 = vst [vmem:[#allocation51_spill] sm:$0xff] %v11718_v30  ;;  %v10226_v30 = vld [vmem:[%s10753_s22 + $0x30] sm:$0xff]  }
 0x249   : > { %1930 = vbcast.lane.c.b16.xlu1 %v1900_v1, 368  ;;  %1926 = vbcast.lane.c.b16.xlu0 %v1900_v1, 352  ;;  %v16838_v1 = vld [vmem:[#allocation54_spill] sm:$0xff] }
 0x24a   : > { %v1970_v2 = vrot.slane %v16826_v16, %v16838_v1 }
 0x24b   : > { %v11724_v10 = vpop.permute.xlu1 %1685  ;;  %v11726_v34 = vpop.permute.xlu0 %1681 }
 0x24c   : > { %16833 = vst [vmem:[#allocation56_spill] sm:$0xff] %v11724_v10  ;;  %16834 = vst [vmem:[#allocation64_spill] sm:$0xff] %v11726_v34 }
 0x24d   : > { %1941 = vbcast.lane.c.b16.xlu1 %v1935_v39, 272  ;;  %1937 = vbcast.lane.c.b16.xlu0 %v1935_v39, 256 }
 0x24f   : > { %v11728_v62 = vpop.permute.xlu1 %1696  ;;  %v11730_v9 = vpop.permute.xlu0 %1692 }
 0x251   : > { %1949 = vbcast.lane.c.b16.xlu1 %v1935_v39, 304  ;;  %1945 = vbcast.lane.c.b16.xlu0 %v1935_v39, 288 }
 0x253   : > { %v11732_v41 = vpop.permute.xlu1 %1704  ;;  %v11734_v52 = vpop.permute.xlu0 %1700 }
 0x254   : > { %16835 = vst [vmem:[#allocation73_spill] sm:$0xff] %v11732_v41 }
 0x255   : > { %1957 = vbcast.lane.c.b16.xlu1 %v1935_v39, 336  ;;  %1953 = vbcast.lane.c.b16.xlu0 %v1935_v39, 320 }
 0x257   : > { %v11736_v58 = vpop.permute.xlu1 %1712  ;;  %v11738_v45 = vpop.permute.xlu0 %1708 }
 0x258   : > { %16836 = vst [vmem:[#allocation82_spill] sm:$0xff] %v11736_v58  ;;  %16837 = vst [vmem:[#allocation87_spill] sm:$0xff] %v11738_v45 }
 0x259   : > { %1965 = vbcast.lane.c.b16.xlu1 %v1935_v39, 368  ;;  %1961 = vbcast.lane.c.b16.xlu0 %v1935_v39, 352 }
 0x25b   : > { %v11742_v3 = vpop.permute.xlu1 %1720  ;;  %v11744_v57 = vpop.permute.xlu0 %1716 }
 0x25c   : > { %16839 = vst [vmem:[#allocation32_spill] sm:$0xff] %v11742_v3  ;;  %16840 = vst [vmem:[#allocation35_spill] sm:$0xff] %v11744_v57  ;;  %v2005_v57 = vrot.slane %v16824_v18, %v16838_v1  ;;  %v10224_v1 = vld [vmem:[#allocation6 + $0x10] sm:$0xff]  }
 0x25d   : > { %1976 = vbcast.lane.c.b16.xlu1 %v1970_v2, 272  ;;  %1972 = vbcast.lane.c.b16.xlu0 %v1970_v2, 256  ;;  %v11785_v41 = vpack.i.b16 %v10224_v1, %v10224_v1 }
 0x25f   : > { %v11746_v35 = vpop.permute.xlu1 %1731  ;;  %v11748_v40 = vpop.permute.xlu0 %1727 }
 0x260   : > { %16841 = vst [vmem:[#allocation39_spill] sm:$0xff] %v11746_v35  ;;  %16842 = vst [vmem:[#allocation42_spill] sm:$0xff] %v11748_v40  ;;  %v11767_v35 = vld [vmem:[#allocation3 + $0x8] sm:$0xff]  }
 0x261   : > { %1984 = vbcast.lane.c.b16.xlu1 %v1970_v2, 304  ;;  %1980 = vbcast.lane.c.b16.xlu0 %v1970_v2, 288 }
 0x263   : > { %v11750_v58 = vpop.permute.xlu1 %1739  ;;  %v11752_v10 = vpop.permute.xlu0 %1735 }
 0x264   : > { %16843 = vst [vmem:[#allocation46_spill] sm:$0xff] %v11750_v58  ;;  %16844 = vst [vmem:[#allocation50_spill] sm:$0xff] %v11752_v10  ;;  %v10225_v10 = vld [vmem:[%s10753_s22 + $0x38] sm:$0xff]  }
 0x265   : > { %1992 = vbcast.lane.c.b16.xlu1 %v1970_v2, 336  ;;  %1988 = vbcast.lane.c.b16.xlu0 %v1970_v2, 320 }
 0x266   : > { %10065 = vmatprep.subr.bf16.mxu1 %v10225_v10 }
 0x267   : > { %v11754_v16 = vpop.permute.xlu1 %1747  ;;  %v11756_v39 = vpop.permute.xlu0 %1743  ;;  %10066 = vmatpush3.bf16.msra.mxu1 %v10225_v10 }
 0x268   : > { %16845 = vst [vmem:[#allocation55_spill] sm:$0xff] %v11754_v16  ;;  %16846 = vst [vmem:[#allocation89_spill] sm:$0xff] %v11756_v39  ;;  %v5610_v16 = vmul.bf16 %v11767_v35, %v11561_v23  ;;  %v11771_v39 = vld [vmem:[#allocation3] sm:$0xff]   ;;  %10067 = vmatprep.subr.bf16.mxu1 %v10226_v30 }
 0x269   : > { %2000 = vbcast.lane.c.b16.xlu1 %v1970_v2, 368  ;;  %1996 = vbcast.lane.c.b16.xlu0 %v1970_v2, 352  ;;  %v5609_v18 = vmul.bf16 %v11771_v39, %v11564_v13 }
 0x26b   : > { %v11760_v3 = vpop.permute.xlu1 %1755  ;;  %v11762_v40 = vpop.permute.xlu0 %1751  ;;  %v6777_v23 = vmax.bf16 %v5610_v16, %v5609_v18  ;;  %v16855_v16 = vld [vmem:[#allocation27_spill] sm:$0xff]  ;;  %10068 = vmatpush3.bf16.msra.mxu1 %v10226_v30 }
 0x26c   : > { %16847 = vst [vmem:[#allocation90_spill] sm:$0xff] %v11760_v3  ;;  %16848 = vst [vmem:[#allocation63_spill] sm:$0xff] %v11762_v40  ;;  %v11777_v3 = vld [vmem:[#allocation3 + $0x10] sm:$0xff]   ;;  %v2043_v18 = vrot.slane %v11785_v41, %v16855_v16  ;;  %10069 = vmatprep.subr.bf16.mxu1 %v10227_v26 }
 0x26d   : > { %2011 = vbcast.lane.c.b16.xlu1 %v2005_v57, 272  ;;  %2007 = vbcast.lane.c.b16.xlu0 %v2005_v57, 256  ;;  %v5611_v40 = vmul.bf16 %v11777_v3, %v11581_v63  ;;  %v5612_v63 = vmul.bf16 %v11789_v5, %v11576_v28 }
 0x26f   : > { %v11764_v58 = vpop.permute.xlu1 %1766  ;;  %v11775_v2 = vpop.permute.xlu0 %1762  ;;  %v6778_v13 = vmax.bf16 %v6777_v23, %v5611_v40  ;;  %10070 = vmatpush3.bf16.msra.mxu1 %v10227_v26 }
 0x270   : > { %16849 = vst [vmem:[#allocation72_spill] sm:$0xff] %v11764_v58  ;;  %16850 = vst [vmem:[#allocation81_spill] sm:$0xff] %v11775_v2 }
 0x271   : > { %2019 = vbcast.lane.c.b16.xlu1 %v2005_v57, 304  ;;  %2015 = vbcast.lane.c.b16.xlu0 %v2005_v57, 288  ;;  %v6779_v23 = vmax.bf16 %v6778_v13, %v5612_v63 }
 0x273   : > { %v11781_v58 = vpop.permute.xlu1 %1774  ;;  %v11783_v45 = vpop.permute.xlu0 %1770 }
 0x274   : > { %16851 = vst [vmem:[#allocation88_spill] sm:$0xff] %v11781_v58  ;;  %16852 = vst [vmem:[#allocation34_spill] sm:$0xff] %v11783_v45  ;;  %v11797_v58 = vld [vmem:[#allocation3 + $0x20] sm:$0xff]   ;;  %v5617_v45 = vmul.bf16 %v11771_v39, %v11622_v25 }
 0x275   : > { %2027 = vbcast.lane.c.b16.xlu1 %v2005_v57, 336  ;;  %2023 = vbcast.lane.c.b16.xlu0 %v2005_v57, 320  ;;  %v5613_v40 = vmul.bf16 %v11797_v58, %v11594_v19  ;;  %v5621_v30 = vmul.bf16 %v11797_v58, %v11644_v32  ;;  %v5627_v32 = vmul.bf16 %v11777_v3, %v11662_v15 }
 0x277   : > { %v11787_v2 = vpop.permute.xlu1 %1782  ;;  %v11793_v10 = vpop.permute.xlu0 %1778  ;;  %v6780_v19 = vmax.bf16 %v6779_v23, %v5613_v40  ;;  %v11822_v40 = vld [vmem:[#allocation3 + $0x30] sm:$0xff]   ;;  %v5620_v23 = vmul.bf16 %v11789_v5, %v11627_v31  ;;  %v10229_v31 = vld [vmem:[%s10753_s22 + $0x18] sm:$0xff]  }
 0x278   : > { %16853 = vst [vmem:[#allocation37_spill] sm:$0xff] %v11787_v2  ;;  %16854 = vst [vmem:[#allocation41_spill] sm:$0xff] %v11793_v10  ;;  %v5618_v2 = vmul.bf16 %v11767_v35, %v11616_v44  ;;  %v5619_v10 = vmul.bf16 %v11777_v3, %v11632_v42  ;;  %v11815_v44 = vld [vmem:[#allocation3 + $0x28] sm:$0xff]   ;;  %v2075_v42 = vshrl.u32 %v10224_v1, 16 }
 0x279   : > { %2035 = vbcast.lane.c.b16.xlu1 %v2005_v57, 368  ;;  %2031 = vbcast.lane.c.b16.xlu0 %v2005_v57, 352  ;;  %v5614_v57 = vmul.bf16 %v11815_v44, %v11590_v59  ;;  %v5622_v15 = vmul.bf16 %v11815_v44, %v11640_v37  ;;  %v5629_v37 = vmul.bf16 %v11797_v58, %v11666_v38 }
 0x27a   : > { %v6794_v13 = vmax.bf16 %v5618_v2, %v5617_v45  ;;  %v5615_v45 = vmul.bf16 %v11822_v40, %v11607_v29  ;;  %v5625_v29 = vmul.bf16 %v11771_v39, %v11658_v6  ;;  %v5635_v38 = vmul.bf16 %v11777_v3, %v11680_v0 }
 0x27b   : > { %v11805_v28 = vpop.permute.xlu1 %1790  ;;  %v11809_v34 = vpop.permute.xlu0 %1786  ;;  %v6781_v2 = vmax.bf16 %v6780_v19, %v5614_v57  ;;  %v11838_v19 = vpack.i.b16 %v2075_v42, %v2075_v42  ;;  %v5631_v0 = vmul.bf16 %v11822_v40, %v11672_v36 }
 0x27c   : > { %16856 = vst [vmem:[#allocation44_spill] sm:$0xff] %v11805_v28  ;;  %16857 = vst [vmem:[#allocation49_spill] sm:$0xff] %v11809_v34  ;;  %v6795_v25 = vmax.bf16 %v6794_v13, %v5619_v10  ;;  %v10228_v34 = vld [vmem:[%s10753_s22 + $0x20] sm:$0xff]   ;;  %v5626_v13 = vmul.bf16 %v11767_v35, %v11656_v24 }
 0x27d   : > { %2049 = vbcast.lane.c.b16.xlu1 %v2043_v18, 272  ;;  %2045 = vbcast.lane.c.b16.xlu0 %v2043_v18, 256  ;;  %v6782_v57 = vmax.bf16 %v6781_v2, %v5615_v45  ;;  %v2081_v45 = vrot.slane %v11838_v19, %v16855_v16 }
 0x27e   : > { %v6796_v10 = vmax.bf16 %v6795_v25, %v5620_v23  ;;  %10071 = vmatprep.subr.bf16.mxu1 %v10228_v34  ;;  %v11845_v23 = vld [vmem:[#allocation3 + $0x38] sm:$0xff]   ;;  %v6811_v42 = vmax.bf16 %v5626_v13, %v5625_v29 }
 0x27f   : > { %v11813_v63 = vpop.permute.xlu1 %1801  ;;  %v11819_v28 = vpop.permute.xlu0 %1797  ;;  %v5616_v24 = vmul.bf16 %v11845_v23, %v11605_v53  ;;  %10072 = vmatpush3.bf16.msra.mxu1 %v10228_v34  ;;  %v5623_v53 = vmul.bf16 %v11822_v40, %v11654_v12  ;;  %v5634_v12 = vmul.bf16 %v11767_v35, %v11674_v11 }
 0x280   : > { %v6797_v6 = vmax.bf16 %v6796_v10, %v5621_v30  ;;  %10073 = vmatprep.subr.bf16.mxu1 %v10229_v31  ;;  %v5628_v30 = vmul.bf16 %v11789_v5, %v11660_v49 }
 0x281   : > { %2057 = vbcast.lane.c.b16.xlu1 %v2043_v18, 304  ;;  %2053 = vbcast.lane.c.b16.xlu0 %v2043_v18, 288  ;;  %v6783_v2 = vmax.bf16 %v6782_v57, %v5616_v24  ;;  %v5624_v24 = vmul.bf16 %v11845_v23, %v11652_v54  ;;  %v5642_v54 = vmul.bf16 %v11767_v35, %v11692_v8 }
 0x282   : > { %v6798_v34 = vmax.bf16 %v6797_v6, %v5622_v15 }
 0x283   : > { %v11828_v59 = vpop.permute.xlu1 %1809  ;;  %v11832_v1 = vpop.permute.xlu0 %1805  ;;  %10074 = vmatpush3.bf16.msra.mxu1 %v10229_v31  ;;  %v6784_v10 = vunpack.i.l.bf16 %v6783_v2  ;;  %v6785_v13 = vunpack.i.h.bf16 %v6783_v2 }
 0x284   : > { %16858 = vst [vmem:[#allocation53_spill] sm:$0xff] %v11828_v59  ;;  %16859 = vst [vmem:[#allocation59_spill] sm:$0xff] %v11832_v1  ;;  %v6799_v31 = vmax.bf16 %v6798_v34, %v5623_v53  ;;  %v5641_v53 = vmul.bf16 %v11771_v39, %v11694_v22  ;;  %v5636_v22 = vmul.bf16 %v11789_v5, %v11678_v55 }
 0x285   : > { %2065 = vbcast.lane.c.b16.xlu1 %v2043_v18, 336  ;;  %2061 = vbcast.lane.c.b16.xlu0 %v2043_v18, 320  ;;  %v6786_v49 = vmax.f32 %v6784_v10, %v6785_v13  ;;  %v10230_v13 = vld [vmem:[%s10753_s22 + $0x10] sm:$0xff]  }
 0x286   : > { %v6800_v11 = vmax.bf16 %v6799_v31, %v5624_v24  ;;  %10075 = vmatprep.subr.bf16.mxu1 %v10230_v13  ;;  %v6845_v24 = vmax.bf16 %v5642_v54, %v5641_v53 }
 0x287   : > { %v11843_v25 = vpop.permute.xlu1 %1817  ;;  %v11849_v26 = vpop.permute.xlu0 %1813  ;;  %v6787_v15 = vrot.slane %v6786_v49, 4  ;;  %10076 = vmatpush3.bf16.msra.mxu1 %v10230_v13 }
 0x288   : > { %16860 = vst [vmem:[#allocation67_spill] sm:$0xff] %v11843_v25  ;;  %v6812_v25 = vmax.bf16 %v6811_v42, %v5627_v32  ;;  %v5633_v32 = vmul.bf16 %v11771_v39, %v11676_v60  ;;  %v5630_v60 = vmul.bf16 %v11815_v44, %v11664_v7  ;;  %v5643_v7 = vmul.bf16 %v11777_v3, %v11698_v14 }
 0x289   : > { %2073 = vbcast.lane.c.b16.xlu1 %v2043_v18, 368  ;;  %2069 = vbcast.lane.c.b16.xlu0 %v2043_v18, 352  ;;  %v6801_v8 = vunpack.i.l.bf16 %v6800_v11  ;;  %v6802_v31 = vunpack.i.h.bf16 %v6800_v11  ;;  %v5637_v14 = vmul.bf16 %v11797_v58, %v11684_v4  ;;  %v10232_v11 = vld [vmem:[%s10753_s22] sm:$0xff]   ;;  %v5650_v4 = vmul.bf16 %v11767_v35, %v11710_v33 }
 0x28a   : > { %v6813_v18 = vmax.bf16 %v6812_v25, %v5628_v30  ;;  %v6828_v2 = vmax.bf16 %v5634_v12, %v5633_v32  ;;  %v16862_v12 = vld [vmem:[#allocation28_spill] sm:$0xff]  ;;  %v6788_v32 = vmax.f32 %v6786_v49, %v6787_v15  ;;  %v6846_v55 = vmax.bf16 %v6845_v24, %v5643_v7 }
 0x28b   : > { %v11855_v59 = vpop.permute.xlu1 %1825  ;;  %v11857_v1 = vpop.permute.xlu0 %1821  ;;  %v11901_v36 = vrot.slane %v11785_v41, %v16862_v12  ;;  %v6803_v16 = vmax.f32 %v6801_v8, %v6802_v31  ;;  %v5644_v49 = vmul.bf16 %v11789_v5, %v11696_v27  ;;  %v5649_v15 = vmul.bf16 %v11771_v39, %v11712_v48 }
 0x28c   : > { %16861 = vst [vmem:[#allocation76_spill] sm:$0xff] %v11855_v59  ;;  %v6814_v6 = vmax.bf16 %v6813_v18, %v5629_v37  ;;  %v6829_v30 = vmax.bf16 %v6828_v2, %v5635_v38  ;;  %v10231_v37 = vld [vmem:[%s10753_s22 + $0x8] sm:$0xff]   ;;  %v5632_v59 = vmul.bf16 %v11845_v23, %v11670_v20  ;;  %v5645_v20 = vmul.bf16 %v11797_v58, %v11702_v56 }
 0x28d   : > { %2087 = vbcast.lane.c.b16.xlu1 %v2081_v45, 272  ;;  %2083 = vbcast.lane.c.b16.xlu0 %v2081_v45, 256  ;;  %v5651_v27 = vmul.bf16 %v11777_v3, %v11716_v47  ;;  %v5638_v33 = vmul.bf16 %v11815_v44, %v11682_v61  ;;  %v6862_v13 = vmax.bf16 %v5650_v4, %v5649_v15 }
 0x28e   : > { %v6815_v34 = vmax.bf16 %v6814_v6, %v5630_v60  ;;  %v6830_v38 = vmax.bf16 %v6829_v30, %v5636_v22  ;;  %10077 = vmatprep.subr.bf16.mxu1 %v10231_v37  ;;  %v5639_v56 = vmul.bf16 %v11822_v40, %v11690_v46 }
 0x28f   : > { %v11865_v29 = vpop.permute.xlu1 %1836  ;;  %v11867_v57 = vpop.permute.xlu0 %1832  ;;  %10078 = vmatpush3.bf16.msra.mxu1 %v10231_v37  ;;  %v6863_v22 = vmax.bf16 %v6862_v13, %v5651_v27  ;;  %v16863_v13 = vld [vmem:[#allocation47_spill] sm:$0xff] }
 0x290   : > { %v6816_v6 = vmax.bf16 %v6815_v34, %v5631_v0  ;;  %v6831_v53 = vmax.bf16 %v6830_v38, %v5637_v14  ;;  %10079 = vmatprep.subr.bf16.mxu1 %v10232_v11  ;;  %v6847_v34 = vmax.bf16 %v6846_v55, %v5644_v49  ;;  %v5652_v14 = vmul.bf16 %v11789_v5, %v11714_v21 }
 0x291   : > { %2095 = vbcast.lane.c.b16.xlu1 %v2081_v45, 304  ;;  %2091 = vbcast.lane.c.b16.xlu0 %v2081_v45, 288  ;;  %v5647_v55 = vmul.bf16 %v11822_v40, %v11708_v43  ;;  %v5653_v49 = vmul.bf16 %v11797_v58, %v11720_v50  ;;  %v11957_v21 = vrot.slane %v11838_v19, %v16862_v12 }
 0x292   : > { %v6817_v54 = vmax.bf16 %v6816_v6, %v5632_v59  ;;  %v6804_v59 = vrot.slane %v6803_v16, 4  ;;  %v6832_v8 = vmax.bf16 %v6831_v53, %v5638_v33  ;;  %v6848_v31 = vmax.bf16 %v6847_v34, %v5645_v20 }
 0x293   : > { %v11877_v25 = vpop.permute.xlu1 %1844  ;;  %v11879_v42 = vpop.permute.xlu0 %1840  ;;  %10080 = vmatpush3.bf16.msra.mxu1 %v10232_v11  ;;  %v5646_v6 = vmul.bf16 %v11815_v44, %v11700_v17  ;;  %v5640_v17 = vmul.bf16 %v11845_v23, %v11688_v51  ;;  %v5658_v50 = vmul.bf16 %v11767_v35, %v11728_v62  ;;  %v5657_v20 = vmul.bf16 %v11771_v39, %v11730_v9  ;;  %v16864_v62 = vld [vmem:[#allocation51_spill] sm:$0xff] }
 0x294   : > { %v6818_v37 = vunpack.i.l.bf16 %v6817_v54  ;;  %v6819_v7 = vunpack.i.h.bf16 %v6817_v54  ;;  %v6833_v38 = vmax.bf16 %v6832_v8, %v5639_v56 }
 0x295   : > { %2103 = vbcast.lane.c.b16.xlu1 %v2081_v45, 336  ;;  %2099 = vbcast.lane.c.b16.xlu0 %v2081_v45, 320 }
 0x296   : > { %v6820_v46 = vmax.f32 %v6818_v37, %v6819_v7  ;;  %v6834_v53 = vmax.bf16 %v6833_v38, %v5640_v17  ;;  %v5648_v37 = vmul.bf16 %v11845_v23, %v16863_v13  ;;  %v5654_v7 = vmul.bf16 %v11815_v44, %v16864_v62  ;;  %v16869_v17 = vld [vmem:[#allocation73_spill] sm:$0xff] }
 0x297   : > { %v11889_v10 = vpop.permute.xlu1 %1852  ;;  %v11895_v18 = vpop.permute.xlu0 %1848 }
 0x298   : > { %v6821_v43 = vrot.slane %v6820_v46, 4  ;;  %v6835_v56 = vunpack.i.l.bf16 %v6834_v53  ;;  %v6836_v8 = vunpack.i.h.bf16 %v6834_v53 }
 0x299   : > { %2111 = vbcast.lane.c.b16.xlu1 %v2081_v45, 368  ;;  %2107 = vbcast.lane.c.b16.xlu0 %v2081_v45, 352  ;;  %v6789_v45 = vrot.slane %v6788_v32, 2 }
 0x29a   : > { %v6822_v9 = vmax.f32 %v6820_v46, %v6821_v43 }
 0x29b   : > { %v11905_v60 = vpop.permute.xlu1 %1860  ;;  %v11908_v2 = vpop.permute.xlu0 %1856  ;;  %v6790_v48 = vmax.f32 %v6788_v32, %v6789_v45  ;;  %v6805_v32 = vmax.f32 %v6803_v16, %v6804_v59  ;;  %v6849_v45 = vmax.bf16 %v6848_v31, %v5646_v6  ;;  %v6864_v16 = vmax.bf16 %v6863_v22, %v5652_v14 }
 0x29c   : > { %v6879_v31 = vmax.bf16 %v5658_v50, %v5657_v20 }
 0x29d   : > { %2122 = vbcast.lane.c.b16.xlu1 %v11901_v36, 272  ;;  %2118 = vbcast.lane.c.b16.xlu0 %v11901_v36, 256  ;;  %v6791_v61 = vrot.slane %v6790_v48, 1  ;;  %v6806_v54 = vrot.slane %v6805_v32, 2  ;;  %v6850_v51 = vmax.bf16 %v6849_v45, %v5647_v55  ;;  %v6865_v27 = vmax.bf16 %v6864_v16, %v5653_v49 }
 0x29e   : > { %v16866_v55 = vmov 0   ;;  %v6823_v49 = vrot.slane %v6822_v9, 2  ;;  %v11987_v16 = vmax.f32 %v6835_v56, %v6836_v8  ;;  %v16884_v56 = vld [vmem:[#allocation35_spill] sm:$0xff] }
 0x29f   : > { %v11920_v0 = vpop.permute.xlu1 %1871  ;;  %v11926_v30 = vpop.permute.xlu0 %1867  ;;  %v6792_v15 = vmax.f32 %v6790_v48, %v6791_v61  ;;  %v5659_v48 = vmul.bf16 %v11777_v3, %v11734_v52  ;;  %v6807_v59 = vmax.f32 %v6805_v32, %v6806_v54  ;;  %v6851_v61 = vmax.bf16 %v6850_v51, %v5648_v37  ;;  %v16865_v52 = vld [vmem:[#allocation64_spill] sm:$0xff]  ;;  %v16870_v51 = vld [vmem:[#allocation87_spill] sm:$0xff] }
 0x2a0   : > { %v5655_v6 = vmul.bf16 %v11822_v40, %v16865_v52  ;;  %v6866_v14 = vmax.bf16 %v6865_v27, %v5654_v7  ;;  %16868 = vst [vmem:[#allocation33_spill] sm:$0xff] %v11987_v16  ;;  %v5661_v27 = vmul.bf16 %v11797_v58, %v16870_v51  ;;  %v12004_v7 = vmax.f32 %v6822_v9, %v6823_v49  ;;  %v16883_v37 = vld [vmem:[#allocation32_spill] sm:$0xff]  ;;  %v16886_v16 = vld [vmem:[#allocation53_spill] sm:$0xff] }
 0x2a1   : > { %2130 = vbcast.lane.c.b16.xlu1 %v11901_v36, 304  ;;  %2126 = vbcast.lane.c.b16.xlu0 %v11901_v36, 288  ;;  %v6880_v38 = vmax.bf16 %v6879_v31, %v5659_v48  ;;  %v6808_v46 = vrot.slane %v6807_v59, 1  ;;  %v6852_v43 = vunpack.i.l.bf16 %v6851_v61  ;;  %v6853_v53 = vunpack.i.h.bf16 %v6851_v61 }
 0x2a2   : > { %v6867_v50 = vmax.bf16 %v6866_v14, %v5655_v6  ;;  %16873 = vst [vmem:[#allocation40_spill] sm:$0xff] %v12004_v7  ;;  %v5682_v52 = vmul.bf16 %v11767_v35, %v11813_v63  ;;  %v5681_v6 = vmul.bf16 %v11771_v39, %v11819_v28  ;;  %v5689_v51 = vmul.bf16 %v11771_v39, %v11867_v57 }
 0x2a3   : > { %v11934_v47 = vpop.permute.xlu1 %1879  ;;  %v11936_v24 = vpop.permute.xlu0 %1875  ;;  %v12002_v62 = vmax.f32 %v6807_v59, %v6808_v46  ;;  %v12009_v31 = vmax.f32 %v6852_v43, %v6853_v53  ;;  %v16876_v46 = vld [vmem:[#allocation72_spill] sm:$0xff]  ;;  %v16878_v43 = vld [vmem:[#allocation81_spill] sm:$0xff]  ;;  %v16879_v53 = vld [vmem:[#allocation59_spill] sm:$0xff]  ;;  %v5691_v57 = vmul.bf16 %v11777_v3, %v11879_v42 }
 0x2a4   : > { %v5674_v49 = vmul.bf16 %v11767_v35, %v16876_v46  ;;  %v5673_v63 = vmul.bf16 %v11771_v39, %v16878_v43  ;;  %v5683_v28 = vmul.bf16 %v11777_v3, %v16879_v53  ;;  %v5697_v46 = vmul.bf16 %v11771_v39, %v11926_v30 }
 0x2a5   : > { %2138 = vbcast.lane.c.b16.xlu1 %v11901_v36, 336  ;;  %2134 = vbcast.lane.c.b16.xlu0 %v11901_v36, 320  ;;  %16872 = vst [vmem:[#allocation36_spill] sm:$0xff] %v12002_v62  ;;  %16874 = vst [vmem:[#allocation43_spill] sm:$0xff] %v12009_v31  ;;  %v5699_v42 = vmul.bf16 %v11777_v3, %v11936_v24  ;;  %v5684_v24 = vmul.bf16 %v11789_v5, %v16886_v16 }
 0x2a6   : > { %v5692_v16 = vmul.bf16 %v11789_v5, %v11877_v25 }
 0x2a7   : > { %v11944_v11 = vpop.permute.xlu1 %1887  ;;  %v11950_v4 = vpop.permute.xlu0 %1883 }
 0x2a9   : > { %2146 = vbcast.lane.c.b16.xlu1 %v11901_v36, 368  ;;  %2142 = vbcast.lane.c.b16.xlu0 %v11901_v36, 352  ;;  %v6793_v36 = vpack.i.bf16 %v6792_v15, %v6792_v15  ;;  %v5660_v15 = vmul.bf16 %v11789_v5, %v16869_v17  ;;  %v16877_v17 = vld [vmem:[#allocation29_spill] sm:$0xff] }
 0x2ab   : > { %v11964_v34 = vpop.permute.xlu1 %1895  ;;  %v11966_v33 = vpop.permute.xlu0 %1891  ;;  %v11984_v45 = vmax.bf16 %v16866_v55, %v6793_v36  ;;  %v6881_v48 = vmax.bf16 %v6880_v38, %v5660_v15  ;;  %v16871_v36 = vld [vmem:[#allocation56_spill] sm:$0xff]  ;;  %v16875_v38 = vld [vmem:[#allocation39_spill] sm:$0xff]  ;;  %v12026_v15 = vrot.slane %v11785_v41, %v16877_v17  ;;  %v16885_v55 = vld [vmem:[#allocation50_spill] sm:$0xff] }
 0x2ac   : > { %v5656_v13 = vmul.bf16 %v11845_v23, %v16871_v36  ;;  %v5666_v9 = vmul.bf16 %v11767_v35, %v16875_v38  ;;  %v16881_v36 = vld [vmem:[#allocation34_spill] sm:$0xff]  ;;  %v5698_v38 = vmul.bf16 %v11767_v35, %v11920_v0  ;;  %v5667_v30 = vmul.bf16 %v11777_v3, %v16885_v55 }
 0x2ad   : > { %2157 = vbcast.lane.c.b16.xlu1 %v11957_v21, 272  ;;  %2153 = vbcast.lane.c.b16.xlu0 %v11957_v21, 256  ;;  %16867 = vst [vmem:[#allocation85_spill] sm:$0xff] %v11984_v45  ;;  %v6882_v59 = vmax.bf16 %v6881_v48, %v5661_v27  ;;  %v16880_v27 = vld [vmem:[#allocation42_spill] sm:$0xff]  ;;  %v5685_v55 = vmul.bf16 %v11797_v58, %v11849_v26 }
 0x2ae   : > { %v12011_v61 = vmax.bf16 %v6867_v50, %v5656_v13  ;;  %v5690_v50 = vmul.bf16 %v11767_v35, %v11865_v29  ;;  %v5665_v48 = vmul.bf16 %v11771_v39, %v16880_v27  ;;  %v5675_v13 = vmul.bf16 %v11777_v3, %v16881_v36  ;;  %v16882_v36 = vld [vmem:[#allocation82_spill] sm:$0xff] }
 0x2af   : > { %v11976_v22 = vpop.permute.xlu1 %1906  ;;  %v11980_v32 = vpop.permute.xlu0 %1902  ;;  %v6930_v29 = vmax.bf16 %v5682_v52, %v5681_v6  ;;  %v5662_v0 = vmul.bf16 %v11815_v44, %v16882_v36  ;;  %v5663_v52 = vmul.bf16 %v11822_v40, %v16884_v56  ;;  %v6964_v62 = vmax.bf16 %v5698_v38, %v5697_v46  ;;  %v16889_v38 = vld [vmem:[#allocation41_spill] sm:$0xff] }
 0x2b0   : > { %v5705_v53 = vmul.bf16 %v11771_v39, %v11980_v32  ;;  %v6947_v12 = vmax.bf16 %v5690_v50, %v5689_v51  ;;  %v6896_v45 = vmax.bf16 %v5666_v9, %v5665_v48  ;;  %v16888_v48 = vld [vmem:[#allocation46_spill] sm:$0xff]  ;;  %v5677_v46 = vmul.bf16 %v11797_v58, %v16889_v38 }
 0x2b1   : > { %2165 = vbcast.lane.c.b16.xlu1 %v11957_v21, 304  ;;  %2161 = vbcast.lane.c.b16.xlu0 %v11957_v21, 288  ;;  %v6931_v6 = vmax.bf16 %v6930_v29, %v5683_v28  ;;  %v6883_v36 = vmax.bf16 %v6882_v59, %v5662_v0  ;;  %v16887_v28 = vld [vmem:[#allocation88_spill] sm:$0xff]  ;;  %v5700_v29 = vmul.bf16 %v11789_v5, %v11934_v47 }
 0x2b2   : > { %v6948_v7 = vmax.bf16 %v6947_v12, %v5691_v57  ;;  %v5676_v50 = vmul.bf16 %v11789_v5, %v16887_v28  ;;  %v5693_v26 = vmul.bf16 %v11797_v58, %v11895_v18 }
 0x2b3   : > { %v11991_v54 = vpop.permute.xlu1 %1914  ;;  %v11993_v20 = vpop.permute.xlu0 %1910  ;;  %v6932_v9 = vmax.bf16 %v6931_v6, %v5684_v24  ;;  %v6884_v47 = vmax.bf16 %v6883_v36, %v5663_v52 }
 0x2b4   : > { %v5707_v32 = vmul.bf16 %v11777_v3, %v11993_v20  ;;  %v6965_v20 = vmax.bf16 %v6964_v62, %v5699_v42  ;;  %v6897_v62 = vmax.bf16 %v6896_v45, %v5667_v30  ;;  %v5708_v25 = vmul.bf16 %v11789_v5, %v11991_v54 }
 0x2b5   : > { %2173 = vbcast.lane.c.b16.xlu1 %v11957_v21, 336  ;;  %2169 = vbcast.lane.c.b16.xlu0 %v11957_v21, 320  ;;  %v5701_v42 = vmul.bf16 %v11797_v58, %v11950_v4  ;;  %v6933_v6 = vmax.bf16 %v6932_v9, %v5685_v55  ;;  %v5687_v9 = vmul.bf16 %v11822_v40, %v11857_v1 }
 0x2b6   : > { %v6966_v45 = vmax.bf16 %v6965_v20, %v5700_v29  ;;  %v5695_v1 = vmul.bf16 %v11822_v40, %v11908_v2 }
 0x2b7   : > { %v12007_v8 = vpop.permute.xlu1 %1922  ;;  %v12017_v14 = vpop.permute.xlu0 %1918 }
 0x2b9   : > { %2181 = vbcast.lane.c.b16.xlu1 %v11957_v21, 368  ;;  %2177 = vbcast.lane.c.b16.xlu0 %v11957_v21, 352  ;;  %v5706_v21 = vmul.bf16 %v11767_v35, %v11976_v22  ;;  %v6913_v22 = vmax.bf16 %v5674_v49, %v5673_v63 }
 0x2bb   : > { %v12045_v43 = vpop.permute.xlu1 %1930  ;;  %v12053_v27 = vpop.permute.xlu0 %1926  ;;  %v6914_v31 = vmax.bf16 %v6913_v22, %v5675_v13  ;;  %v6981_v49 = vmax.bf16 %v5706_v21, %v5705_v53  ;;  %v5668_v13 = vmul.bf16 %v11789_v5, %v16888_v48  ;;  %v6949_v53 = vmax.bf16 %v6948_v7, %v5692_v16  ;;  %v16890_v7 = vld [vmem:[#allocation89_spill] sm:$0xff] }
 0x2bc   : > { %v5669_v54 = vmul.bf16 %v11797_v58, %v16890_v7 }
 0x2bd   : > { %2192 = vbcast.lane.c.b16.xlu1 %v12026_v15, 272  ;;  %2188 = vbcast.lane.c.b16.xlu0 %v12026_v15, 256  ;;  %v6982_v12 = vmax.bf16 %v6981_v49, %v5707_v32  ;;  %v6915_v21 = vmax.bf16 %v6914_v31, %v5676_v50  ;;  %v5709_v31 = vmul.bf16 %v11797_v58, %v12017_v14  ;;  %v16892_v50 = vld [vmem:[#allocation37_spill] sm:$0xff] }
 0x2be   : > { %v6898_v32 = vmax.bf16 %v6897_v62, %v5668_v13  ;;  %v6950_v52 = vmax.bf16 %v6949_v53, %v5693_v26  ;;  %v12105_v14 = vrot.slane %v11838_v19, %v16877_v17  ;;  %v5678_v20 = vmul.bf16 %v11815_v44, %v16892_v50  ;;  %v16893_v62 = vld [vmem:[#allocation49_spill] sm:$0xff] }
 0x2bf   : > { %v1942_v56 = vpop.permute.xlu1 %1941  ;;  %v1938_v63 = vpop.permute.xlu0 %1937  ;;  %v6983_v18 = vmax.bf16 %v6982_v12, %v5708_v25  ;;  %v6916_v49 = vmax.bf16 %v6915_v21, %v5677_v46  ;;  %v5694_v12 = vmul.bf16 %v11815_v44, %v11889_v10  ;;  %v5679_v38 = vmul.bf16 %v11822_v40, %v16893_v62  ;;  %v16894_v25 = vld [vmem:[#allocation55_spill] sm:$0xff] }
 0x2c0   : > { %v5714_v51 = vmul.bf16 %v11767_v35, %v1942_v56  ;;  %v5713_v59 = vmul.bf16 %v11771_v39, %v1938_v63  ;;  %v16891_v63 = vld [vmem:[#allocation67_spill] sm:$0xff]  ;;  %v6899_v13 = vmax.bf16 %v6898_v32, %v5669_v54  ;;  %v5702_v46 = vmul.bf16 %v11815_v44, %v11944_v11 }
 0x2c1   : > { %2200 = vbcast.lane.c.b16.xlu1 %v12026_v15, 304  ;;  %2196 = vbcast.lane.c.b16.xlu0 %v12026_v15, 288  ;;  %v5686_v28 = vmul.bf16 %v11815_v44, %v16891_v63  ;;  %v6984_v48 = vmax.bf16 %v6983_v18, %v5709_v31  ;;  %v6917_v21 = vmax.bf16 %v6916_v49, %v5678_v20  ;;  %v6869_v32 = vunpack.i.l.bf16 %v12011_v61 }
 0x2c2   : > { %v6998_v30 = vmax.bf16 %v5714_v51, %v5713_v59  ;;  %v6967_v51 = vmax.bf16 %v6966_v45, %v5701_v42  ;;  %v6951_v26 = vmax.bf16 %v6950_v52, %v5694_v12  ;;  %v5710_v10 = vmul.bf16 %v11815_v44, %v12007_v8  ;;  %v16898_v52 = vld [vmem:[#allocation44_spill] sm:$0xff] }
 0x2c3   : > { %v1950_v57 = vpop.permute.xlu1 %1949  ;;  %v1946_v0 = vpop.permute.xlu0 %1945  ;;  %v6934_v16 = vmax.bf16 %v6933_v6, %v5686_v28  ;;  %v16895_v45 = vmul.bf16 %v11845_v23, %v16883_v37  ;;  %v5711_v8 = vmul.bf16 %v11822_v40, %v12053_v27  ;;  %v16896_v6 = vld [vmem:[#allocation63_spill] sm:$0xff]  ;;  %v6918_v37 = vmax.bf16 %v6917_v21, %v5679_v38 }
 0x2c4   : > { %v5715_v22 = vmul.bf16 %v11777_v3, %v1946_v0  ;;  %v5716_v4 = vmul.bf16 %v11789_v5, %v1950_v57  ;;  %v5703_v0 = vmul.bf16 %v11822_v40, %v11966_v33  ;;  %v6968_v42 = vmax.bf16 %v6967_v51, %v5702_v46 }
 0x2c5   : > { %2208 = vbcast.lane.c.b16.xlu1 %v12026_v15, 336  ;;  %2204 = vbcast.lane.c.b16.xlu0 %v12026_v15, 320  ;;  %v12133_v2 = vmax.bf16 %v6884_v47, %v16895_v45  ;;  %v5671_v33 = vmul.bf16 %v11822_v40, %v16896_v6  ;;  %v16897_v47 = vld [vmem:[#allocation76_spill] sm:$0xff]  ;;  %v6870_v27 = vunpack.i.h.bf16 %v12011_v61  ;;  %v5696_v20 = vmul.bf16 %v11845_v23, %v11905_v60 }
 0x2c6   : > { %v6999_v56 = vmax.bf16 %v6998_v30, %v5715_v22  ;;  %v6935_v30 = vmax.bf16 %v6934_v16, %v5687_v9  ;;  %v6985_v22 = vmax.bf16 %v6984_v48, %v5710_v10  ;;  %v6969_v49 = vmax.bf16 %v6968_v42, %v5703_v0  ;;  %v16899_v48 = vld [vmem:[#allocation90_spill] sm:$0xff] }
 0x2c7   : > { %v1958_v24 = vpop.permute.xlu1 %1957  ;;  %v1954_v36 = vpop.permute.xlu0 %1953  ;;  %v5704_v9 = vmul.bf16 %v11845_v23, %v11964_v34  ;;  %v5712_v46 = vmul.bf16 %v11845_v23, %v12045_v43 }
 0x2c8   : > { %v5717_v59 = vmul.bf16 %v11797_v58, %v1954_v36  ;;  %v7000_v55 = vmax.bf16 %v6999_v56, %v5716_v4  ;;  %v5718_v11 = vmul.bf16 %v11815_v44, %v1958_v24  ;;  %v5688_v4 = vmul.bf16 %v11845_v23, %v16897_v47 }
 0x2c9   : > { %2216 = vbcast.lane.c.b16.xlu1 %v12026_v15, 368  ;;  %2212 = vbcast.lane.c.b16.xlu0 %v12026_v15, 352  ;;  %v5670_v15 = vmul.bf16 %v11815_v44, %v16894_v25  ;;  %v6952_v56 = vmax.bf16 %v6951_v26, %v5695_v1  ;;  %v5680_v36 = vmul.bf16 %v11845_v23, %v16898_v52  ;;  %v16900_v25 = vld [vmem:[#allocation30_spill] sm:$0xff] }
 0x2ca   : > { %v7001_v29 = vmax.bf16 %v7000_v55, %v5717_v59  ;;  %v6936_v50 = vmax.bf16 %v6935_v30, %v5688_v4  ;;  %v6986_v51 = vmax.bf16 %v6985_v22, %v5711_v8  ;;  %v6886_v59 = vunpack.i.l.bf16 %v12133_v2 }
 0x2cb   : > { %v1966_v57 = vpop.permute.xlu1 %1965  ;;  %v1962_v53 = vpop.permute.xlu0 %1961  ;;  %v6900_v31 = vmax.bf16 %v6899_v13, %v5670_v15  ;;  %v5672_v13 = vmul.bf16 %v11845_v23, %v16899_v48  ;;  %v6919_v62 = vmax.bf16 %v6918_v37, %v5680_v36  ;;  %v6953_v38 = vmax.bf16 %v6952_v56, %v5696_v20 }
 0x2cc   : > { %v5719_v18 = vmul.bf16 %v11822_v40, %v1962_v53  ;;  %v7002_v7 = vmax.bf16 %v7001_v29, %v5718_v11  ;;  %v6970_v29 = vmax.bf16 %v6969_v49, %v5704_v9  ;;  %v5720_v21 = vmul.bf16 %v11845_v23, %v1966_v57 }
 0x2cd   : > { %2227 = vbcast.lane.c.b16.xlu1 %v12105_v14, 272  ;;  %2223 = vbcast.lane.c.b16.xlu0 %v12105_v14, 256  ;;  %v6901_v55 = vmax.bf16 %v6900_v31, %v5671_v33  ;;  %v6937_v34 = vunpack.i.l.bf16 %v6936_v50  ;;  %v6938_v10 = vunpack.i.h.bf16 %v6936_v50  ;;  %v6987_v53 = vmax.bf16 %v6986_v51, %v5712_v46 }
 0x2ce   : > { %v7003_v16 = vmax.bf16 %v7002_v7, %v5719_v18  ;;  %v12166_v15 = vrot.slane %v11785_v41, %v16900_v25  ;;  %v6920_v45 = vunpack.i.l.bf16 %v6919_v62  ;;  %v6921_v30 = vunpack.i.h.bf16 %v6919_v62 }
 0x2cf   : > { %v1977_v54 = vpop.permute.xlu1 %1976  ;;  %v1973_v24 = vpop.permute.xlu0 %1972  ;;  %v6902_v0 = vmax.bf16 %v6901_v55, %v5672_v13  ;;  %v6954_v8 = vunpack.i.l.bf16 %v6953_v38  ;;  %v6955_v22 = vunpack.i.h.bf16 %v6953_v38  ;;  %v6971_v33 = vunpack.i.l.bf16 %v6970_v29  ;;  %v16901_v55 = vld [vmem:[#allocation40_spill] sm:$0xff]  ;;  %v16902_v38 = vld [vmem:[#allocation33_spill] sm:$0xff] }
 0x2d0   : > { %v5722_v63 = vmul.bf16 %v11767_v35, %v1977_v54  ;;  %v5721_v28 = vmul.bf16 %v11771_v39, %v1973_v24  ;;  %v7004_v43 = vmax.bf16 %v7003_v16, %v5720_v21  ;;  %v6972_v31 = vunpack.i.h.bf16 %v6970_v29 }
 0x2d1   : > { %2235 = vbcast.lane.c.b16.xlu1 %v12105_v14, 304  ;;  %2231 = vbcast.lane.c.b16.xlu0 %v12105_v14, 288  ;;  %v6887_v54 = vunpack.i.h.bf16 %v12133_v2  ;;  %v6939_v37 = vmax.f32 %v6937_v34, %v6938_v10  ;;  %v6988_v47 = vunpack.i.l.bf16 %v6987_v53  ;;  %v6989_v4 = vunpack.i.h.bf16 %v6987_v53  ;;  %v16904_v34 = vld [vmem:[#allocation43_spill] sm:$0xff] }
 0x2d2   : > { %v7015_v1 = vmax.bf16 %v5722_v63, %v5721_v28  ;;  %v7005_v56 = vunpack.i.l.bf16 %v7004_v43  ;;  %v7006_v24 = vunpack.i.h.bf16 %v7004_v43  ;;  %v6903_v52 = vunpack.i.l.bf16 %v6902_v0 }
 0x2d3   : > { %v1985_v12 = vpop.permute.xlu1 %1984  ;;  %v1981_v60 = vpop.permute.xlu0 %1980  ;;  %v6904_v36 = vunpack.i.h.bf16 %v6902_v0  ;;  %v6922_v50 = vmax.f32 %v6920_v45, %v6921_v30  ;;  %v6956_v20 = vmax.f32 %v6954_v8, %v6955_v22  ;;  %v6825_v9 = vrot.slane %v16901_v55, 1 }
 0x2d4   : > { %v5723_v26 = vmul.bf16 %v11777_v3, %v1981_v60  ;;  %v5724_v42 = vmul.bf16 %v11789_v5, %v1985_v12  ;;  %v6973_v16 = vmax.f32 %v6971_v33, %v6972_v31  ;;  %v6888_v48 = vmax.f32 %v6886_v59, %v6887_v54 }
 0x2d5   : > { %2243 = vbcast.lane.c.b16.xlu1 %v12105_v14, 336  ;;  %2239 = vbcast.lane.c.b16.xlu0 %v12105_v14, 320  ;;  %v6940_v13 = vrot.slane %v6939_v37, 4  ;;  %v6990_v62 = vmax.f32 %v6988_v47, %v6989_v4  ;;  %v16903_v46 = vrot.slane %v16902_v38, 4  ;;  %v7007_v29 = vmax.f32 %v7005_v56, %v7006_v24 }
 0x2d6   : > { %v7016_v11 = vmax.bf16 %v7015_v1, %v5723_v26  ;;  %v6855_v10 = vrot.slane %v16904_v34, 4  ;;  %v6905_v53 = vmax.f32 %v6903_v52, %v6904_v36  ;;  %v6923_v0 = vrot.slane %v6922_v50, 4 }
 0x2d7   : > { %v1993_v57 = vpop.permute.xlu1 %1992  ;;  %v1989_v6 = vpop.permute.xlu0 %1988  ;;  %v6839_v60 = vmax.f32 %v16902_v38, %v16903_v46  ;;  %v6957_v61 = vrot.slane %v6956_v20, 4  ;;  %v6941_v45 = vmax.f32 %v6939_v37, %v6940_v13  ;;  %v6991_v30 = vrot.slane %v6990_v62, 4 }
 0x2d8   : > { %v5725_v18 = vmul.bf16 %v11797_v58, %v1989_v6  ;;  %v7017_v7 = vmax.bf16 %v7016_v11, %v5724_v42  ;;  %v5726_v49 = vmul.bf16 %v11815_v44, %v1993_v57  ;;  %v6889_v57 = vrot.slane %v6888_v48, 4 }
 0x2d9   : > { %2251 = vbcast.lane.c.b16.xlu1 %v12105_v14, 368  ;;  %2247 = vbcast.lane.c.b16.xlu0 %v12105_v14, 352  ;;  %v6871_v14 = vmax.f32 %v6869_v32, %v6870_v27  ;;  %v6974_v27 = vrot.slane %v6973_v16, 4  ;;  %v6840_v8 = vrot.slane %v6839_v60, 2  ;;  %v7008_v22 = vrot.slane %v7007_v29, 4 }
 0x2da   : > { %v7018_v63 = vmax.bf16 %v7017_v7, %v5725_v18  ;;  %v6856_v18 = vmax.f32 %v16904_v34, %v6855_v10  ;;  %v6906_v7 = vrot.slane %v6905_v53, 4  ;;  %v6924_v54 = vmax.f32 %v6922_v50, %v6923_v0 }
 0x2db   : > { %v2001_v28 = vpop.permute.xlu1 %2000  ;;  %v1997_v51 = vpop.permute.xlu0 %1996  ;;  %v6872_v11 = vrot.slane %v6871_v14, 4  ;;  %v7009_v52 = vmax.f32 %v7007_v29, %v7008_v22  ;;  %v6841_v46 = vmax.f32 %v6839_v60, %v6840_v8 }
 0x2dc   : > { %v5727_v2 = vmul.bf16 %v11822_v40, %v1997_v51  ;;  %v7019_v12 = vmax.bf16 %v7018_v63, %v5726_v49  ;;  %v5728_v21 = vmul.bf16 %v11845_v23, %v2001_v28  ;;  %v6890_v49 = vmax.f32 %v6888_v48, %v6889_v57 }
 0x2dd   : > { %2262 = vbcast.lane.c.b16.xlu1 %v12166_v15, 272  ;;  %2258 = vbcast.lane.c.b16.xlu0 %v12166_v15, 256  ;;  %v6873_v37 = vmax.f32 %v6871_v14, %v6872_v11  ;;  %v6942_v63 = vrot.slane %v6941_v45, 2  ;;  %v6992_v28 = vmax.f32 %v6990_v62, %v6991_v30  ;;  %v6857_v29 = vrot.slane %v6856_v18, 2 }
 0x2de   : > { %v7020_v1 = vmax.bf16 %v7019_v12, %v5727_v2  ;;  %v6907_v2 = vmax.f32 %v6905_v53, %v6906_v7  ;;  %v6891_v0 = vrot.slane %v6890_v49, 2  ;;  %v6842_v11 = vrot.slane %v6841_v46, 1 }
 0x2df   : > { %v2012_v26 = vpop.permute.xlu1 %2011  ;;  %v2008_v32 = vpop.permute.xlu0 %2007 }
 0x2e0   : > { %v7021_v59 = vmax.bf16 %v7020_v1, %v5728_v21  ;;  %v5730_v43 = vmul.bf16 %v11767_v35, %v2012_v26  ;;  %v5729_v42 = vmul.bf16 %v11771_v39, %v2008_v32  ;;  %v6958_v35 = vmax.f32 %v6956_v20, %v6957_v61 }
 0x2e1   : > { %2270 = vbcast.lane.c.b16.xlu1 %v12166_v15, 304  ;;  %2266 = vbcast.lane.c.b16.xlu0 %v12166_v15, 288  ;;  %v6975_v39 = vmax.f32 %v6973_v16, %v6974_v27  ;;  %v6925_v16 = vrot.slane %v6924_v54, 2  ;;  %v6993_v21 = vrot.slane %v6992_v28, 2  ;;  %v6943_v1 = vmax.f32 %v6941_v45, %v6942_v63 }
 0x2e2   : > { %v7022_v6 = vunpack.i.l.bf16 %v7021_v59  ;;  %v7023_v33 = vunpack.i.h.bf16 %v7021_v59  ;;  %v7032_v56 = vmax.bf16 %v5730_v43, %v5729_v42  ;;  %v6959_v12 = vrot.slane %v6958_v35, 2 }
 0x2e3   : > { %v2020_v31 = vpop.permute.xlu1 %2019  ;;  %v2016_v47 = vpop.permute.xlu0 %2015  ;;  %v6976_v14 = vrot.slane %v6975_v39, 2  ;;  %v7010_v26 = vrot.slane %v7009_v52, 2  ;;  %v6908_v61 = vrot.slane %v6907_v2, 2  ;;  %v6926_v59 = vmax.f32 %v6924_v54, %v6925_v16 }
 0x2e4   : > { %v7024_v4 = vmax.f32 %v7022_v6, %v7023_v33  ;;  %v5731_v24 = vmul.bf16 %v11777_v3, %v2016_v47  ;;  %v5732_v51 = vmul.bf16 %v11789_v5, %v2020_v31  ;;  %v12198_v3 = vrot.slane %v11838_v19, %v16900_v25 }
 0x2e5   : > { %2278 = vbcast.lane.c.b16.xlu1 %v12166_v15, 336  ;;  %2274 = vbcast.lane.c.b16.xlu0 %v12166_v15, 320  ;;  %v6874_v5 = vrot.slane %v6873_v37, 2  ;;  %v6960_v32 = vmax.f32 %v6958_v35, %v6959_v12  ;;  %v6977_v43 = vmax.f32 %v6975_v39, %v6976_v14  ;;  %v6994_v45 = vmax.f32 %v6992_v28, %v6993_v21 }
 0x2e6   : > { %v7025_v36 = vrot.slane %v7024_v4, 4  ;;  %v7033_v50 = vmax.bf16 %v7032_v56, %v5731_v24  ;;  %v7011_v30 = vmax.f32 %v7009_v52, %v7010_v26  ;;  %v6892_v33 = vmax.f32 %v6890_v49, %v6891_v0 }
 0x2e7   : > { %v2028_v20 = vpop.permute.xlu1 %2027  ;;  %v2024_v13 = vpop.permute.xlu0 %2023  ;;  %v6875_v57 = vmax.f32 %v6873_v37, %v6874_v5  ;;  %v6909_v31 = vmax.f32 %v6907_v2, %v6908_v61  ;;  %v6961_v7 = vrot.slane %v6960_v32, 1  ;;  %v6927_v35 = vrot.slane %v6926_v59, 1 }
 0x2e8   : > { %v7026_v48 = vmax.f32 %v7024_v4, %v7025_v36  ;;  %v5733_v62 = vmul.bf16 %v11797_v58, %v2024_v13  ;;  %v7034_v38 = vmax.bf16 %v7033_v50, %v5732_v51  ;;  %v5734_v34 = vmul.bf16 %v11815_v44, %v2028_v20  ;;  %v16905_v20 = vld [vmem:[#allocation36_spill] sm:$0xff] }
 0x2e9   : > { %2286 = vbcast.lane.c.b16.xlu1 %v12166_v15, 368  ;;  %2282 = vbcast.lane.c.b16.xlu0 %v12166_v15, 352  ;;  %v6858_v15 = vmax.f32 %v6856_v18, %v6857_v29  ;;  %v6944_v44 = vrot.slane %v6943_v1, 1  ;;  %v6826_v18 = vmax.f32 %v16901_v55, %v6825_v9  ;;  %v6978_v47 = vrot.slane %v6977_v43, 1 }
 0x2ea   : > { %v7035_v10 = vmax.bf16 %v7034_v38, %v5733_v62  ;;  %v7027_v27 = vrot.slane %v7026_v48, 2  ;;  %v6843_v4 = vmax.f32 %v6841_v46, %v6842_v11  ;;  %v6876_v56 = vrot.slane %v6875_v57, 1 }
 0x2eb   : > { %v2036_v53 = vpop.permute.xlu1 %2035  ;;  %v2032_v58 = vpop.permute.xlu0 %2031  ;;  %v6995_v24 = vrot.slane %v6994_v45, 1  ;;  %v6945_v37 = vmax.f32 %v6943_v1, %v6944_v44  ;;  %v7012_v49 = vrot.slane %v7011_v30, 1  ;;  %v6893_v36 = vrot.slane %v6892_v33, 1 }
 0x2ec   : > { %v5735_v60 = vmul.bf16 %v11822_v40, %v2032_v58  ;;  %v7036_v42 = vmax.bf16 %v7035_v10, %v5734_v34  ;;  %v5736_v8 = vmul.bf16 %v11845_v23, %v2036_v53  ;;  %v7028_v40 = vmax.f32 %v7026_v48, %v7027_v27  ;;  %v16906_v58 = vld [vmem:[#allocation31_spill] sm:$0xff] }
 0x2ed   : > { %2297 = vbcast.lane.c.b16.xlu1 %v12198_v3, 272  ;;  %2293 = vbcast.lane.c.b16.xlu0 %v12198_v3, 256  ;;  %v6859_v23 = vrot.slane %v6858_v15, 1  ;;  %v6962_v51 = vmax.f32 %v6960_v32, %v6961_v7  ;;  %v6910_v50 = vrot.slane %v6909_v31, 1  ;;  %v6810_v2 = vpack.i.bf16 %v16905_v20, %v16905_v20 }
 0x2ee   : > { %v7037_v22 = vmax.bf16 %v7036_v42, %v5735_v60  ;;  %v7029_v55 = vrot.slane %v7028_v40, 1  ;;  %v6928_v16 = vmax.f32 %v6926_v59, %v6927_v35  ;;  %v6979_v12 = vmax.f32 %v6977_v43, %v6978_v47 }
 0x2ef   : > { %v12208_v6 = vpop.permute.xlu1 %2049  ;;  %v12210_v54 = vpop.permute.xlu0 %2045  ;;  %v6827_v14 = vpack.i.bf16 %v6826_v18, %v6826_v18  ;;  %v6844_v48 = vpack.i.bf16 %v6843_v4, %v6843_v4  ;;  %v6860_v62 = vmax.f32 %v6858_v15, %v6859_v23  ;;  %v6996_v38 = vmax.f32 %v6994_v45, %v6995_v24 }
 0x2f0   : > { %v7038_v39 = vmax.bf16 %v7037_v22, %v5736_v8  ;;  %v6877_v46 = vmax.f32 %v6875_v57, %v6876_v56  ;;  %v6946_v29 = vpack.i.bf16 %v6945_v37, %v6945_v37  ;;  %v7013_v5 = vmax.f32 %v7011_v30, %v7012_v49 }
 0x2f1   : > { %2305 = vbcast.lane.c.b16.xlu1 %v12198_v3, 304  ;;  %2301 = vbcast.lane.c.b16.xlu0 %v12198_v3, 288  ;;  %v6963_v26 = vpack.i.bf16 %v6962_v51, %v6962_v51  ;;  %v6894_v10 = vmax.f32 %v6892_v33, %v6893_v36  ;;  %v6911_v53 = vmax.f32 %v6909_v31, %v6910_v50  ;;  %v16907_v43 = vmov 0  }
 0x2f2   : > { %v7039_v63 = vunpack.i.l.bf16 %v7038_v39  ;;  %v7040_v28 = vunpack.i.h.bf16 %v7038_v39  ;;  %v7030_v0 = vmax.f32 %v7028_v40, %v7029_v55  ;;  %v6929_v61 = vpack.i.bf16 %v6928_v16, %v6928_v16 }
 0x2f3   : > { %v12217_v52 = vpop.permute.xlu1 %2057  ;;  %v12219_v9 = vpop.permute.xlu0 %2053  ;;  %v6980_v32 = vpack.i.bf16 %v6979_v12, %v6979_v12  ;;  %v12232_v59 = vrot.slane %v11785_v41, %v16906_v58  ;;  %v8698_v60 = vmax.bf16 %v16907_v43, %v6810_v2  ;;  %v8699_v42 = vmax.bf16 %v16907_v43, %v6827_v14 }
 0x2f4   : > { %v7041_v13 = vmax.f32 %v7039_v63, %v7040_v28  ;;  %v6861_v11 = vpack.i.bf16 %v6860_v62, %v6860_v62  ;;  %v6997_v15 = vpack.i.bf16 %v6996_v38, %v6996_v38  ;;  %v6878_v57 = vpack.i.bf16 %v6877_v46, %v6877_v46  ;;  %v16908_v62 = vld [vmem:[#allocation85_spill] sm:$0xff] }
 0x2f5   : > { %2313 = vbcast.lane.c.b16.xlu1 %v12198_v3, 336  ;;  %2309 = vbcast.lane.c.b16.xlu0 %v12198_v3, 320  ;;  %v8706_v45 = vmax.bf16 %v16907_v43, %v6946_v29  ;;  %v7014_v44 = vpack.i.bf16 %v7013_v5, %v7013_v5  ;;  %v8700_v22 = vmax.bf16 %v16907_v43, %v6844_v48  ;;  %v8988_v39 = vunpack.c.l.b16 %v8698_v60 }
 0x2f6   : > { %v7042_v21 = vrot.slane %v7041_v13, 4  ;;  %v8707_v33 = vmax.bf16 %v16907_v43, %v6963_v26  ;;  %v6895_v7 = vpack.i.bf16 %v6894_v10, %v6894_v10  ;;  %v7031_v40 = vpack.i.bf16 %v7030_v0, %v7030_v0 }
 0x2f7   : > { %v12225_v1 = vpop.permute.xlu1 %2065  ;;  %v12227_v34 = vpop.permute.xlu0 %2061  ;;  %v8705_v18 = vmax.bf16 %v16907_v43, %v6929_v61  ;;  %v8708_v35 = vmax.bf16 %v16907_v43, %v6980_v32  ;;  %v6912_v47 = vpack.i.bf16 %v6911_v53, %v6911_v53  ;;  %v8989_v4 = vunpack.c.l.b16 %v8699_v42 }
 0x2f8   : > { %v7043_v27 = vmax.f32 %v7041_v13, %v7042_v21  ;;  %v8701_v23 = vmax.bf16 %v16907_v43, %v6861_v11  ;;  %v8709_v56 = vmax.bf16 %v16907_v43, %v6997_v15  ;;  %v8996_v24 = vunpack.c.l.b16 %v8706_v45 }
 0x2f9   : > { %2321 = vbcast.lane.c.b16.xlu1 %v12198_v3, 368  ;;  %2317 = vbcast.lane.c.b16.xlu0 %v12198_v3, 352  ;;  %v8702_v63 = vmax.bf16 %v16907_v43, %v6878_v57  ;;  %v8710_v28 = vmax.bf16 %v16907_v43, %v7014_v44  ;;  %v8997_v36 = vunpack.c.l.b16 %v8707_v33  ;;  %v8703_v55 = vmax.bf16 %v16907_v43, %v6895_v7 }
 0x2fa   : > { %v7044_v30 = vrot.slane %v7043_v27, 2  ;;  %v8711_v50 = vmax.bf16 %v16907_v43, %v7031_v40  ;;  %v8990_v20 = vunpack.c.l.b16 %v8700_v22  ;;  %v8995_v2 = vunpack.c.l.b16 %v8705_v18 }
 0x2fb   : > { %v12238_v8 = vpop.permute.xlu1 %2073  ;;  %v12242_v31 = vpop.permute.xlu0 %2069  ;;  %v8704_v12 = vmax.bf16 %v16907_v43, %v6912_v47  ;;  %v8998_v13 = vunpack.c.l.b16 %v8708_v35  ;;  %v8991_v14 = vunpack.c.l.b16 %v8701_v23  ;;  %v8999_v48 = vunpack.c.l.b16 %v8709_v56 }
 0x2fc   : > { %v7045_v3 = vmax.f32 %v7043_v27, %v7044_v30  ;;  %v16909_v38 = vunpack.c.l.b16 %v16908_v62  ;;  %v8992_v21 = vunpack.c.l.b16 %v8702_v63  ;;  %v9000_v26 = vunpack.c.l.b16 %v8710_v28 }
 0x2fd   : > { %2332 = vbcast.lane.c.b16.xlu1 %v12232_v59, 272  ;;  %2328 = vbcast.lane.c.b16.xlu0 %v12232_v59, 256  ;;  %v9127_v10 = vsel %vm9099_vm0, %v8996_v24, %v8995_v2  ;;  %v8993_v0 = vunpack.c.l.b16 %v8703_v55  ;;  %v9001_v61 = vunpack.c.l.b16 %v8711_v50  ;;  %v8994_v42 = vunpack.c.l.b16 %v8704_v12 }
 0x2fe   : > { %v7046_v49 = vrot.slane %v7045_v3, 1  ;;  %v9120_v46 = vsel %vm9099_vm0, %v8988_v39, %v16909_v38  ;;  %v9128_v27 = vsel %vm9101_vm1, %v8997_v36, %v9127_v10  ;;  %v2361_v47 = vrot.slane %v11838_v19, %v16906_v58  ;;  %v16910_v36 = vld [vmem:[#allocation38_spill] sm:$0xff] }
 0x2ff   : > { %v12250_v37 = vpop.permute.xlu1 %2087  ;;  %v12254_v51 = vpop.permute.xlu0 %2083  ;;  %v9121_v32 = vsel %vm9101_vm1, %v8989_v4, %v9120_v46  ;;  %v9129_v15 = vsel %vm9103_vm2, %v8998_v13, %v9128_v27  ;;  %v2396_v55 = vrot.slane %v11785_v41, %v16910_v36  ;;  %v2431_v62 = vrot.slane %v11838_v19, %v16910_v36 }
 0x300   : > { %v7047_v16 = vmax.f32 %v7045_v3, %v7046_v49  ;;  %v9122_v11 = vsel %vm9103_vm2, %v8990_v20, %v9121_v32  ;;  %v9130_v45 = vsel %vm9105_vm3, %v8999_v48, %v9129_v15  ;;  %v16911_v32 = vld [vmem:[#allocation45_spill] sm:$0xff] }
 0x301   : > { %2340 = vbcast.lane.c.b16.xlu1 %v12232_v59, 304  ;;  %2336 = vbcast.lane.c.b16.xlu0 %v12232_v59, 288  ;;  %v9123_v57 = vsel %vm9105_vm3, %v8991_v14, %v9122_v11  ;;  %v9131_v33 = vsel %vm9107_vm4, %v9000_v26, %v9130_v45  ;;  %v2466_v27 = vrot.slane %v11785_v41, %v16911_v32 }
 0x302   : > { %v7048_v5 = vpack.i.bf16 %v7047_v16, %v7047_v16  ;;  %v9124_v22 = vsel %vm9107_vm4, %v8992_v21, %v9123_v57  ;;  %v9132_v18 = vsel %vm9109_vm5, %v9001_v61, %v9131_v33  ;;  %v2501_v33 = vrot.slane %v11838_v19, %v16911_v32 }
 0x303   : > { %v12264_v29 = vpop.permute.xlu1 %2095  ;;  %v12267_v53 = vpop.permute.xlu0 %2091  ;;  %v9125_v40 = vsel %vm9109_vm5, %v8993_v0, %v9124_v22 }
 0x304   : > { %v8712_v60 = vmax.bf16 %v16907_v43, %v7048_v5  ;;  %v9126_v35 = vsel %vm9111_vm6, %v8994_v42, %v9125_v40 }
 0x305   : > { %2348 = vbcast.lane.c.b16.xlu1 %v12232_v59, 336  ;;  %2344 = vbcast.lane.c.b16.xlu0 %v12232_v59, 320 }
 0x306   : > { %v9002_v30 = vunpack.c.l.b16 %v8712_v60 }
 0x307   : > { %v12278_v44 = vpop.permute.xlu1 %2103  ;;  %v12282_v7 = vpop.permute.xlu0 %2099 }
 0x308   : > { %v9133_v3 = vsel %vm9111_vm6, %v9002_v30, %v9132_v18 }
 0x309   : > { %2356 = vbcast.lane.c.b16.xlu1 %v12232_v59, 368  ;;  %2352 = vbcast.lane.c.b16.xlu0 %v12232_v59, 352  ;;  %v9219_v39 = vpack.c.b16 %v9133_v3, %v9126_v35 }
 0x30b   : > { %v12292_v4 = vpop.permute.xlu1 %2111  ;;  %v12294_v23 = vpop.permute.xlu0 %2107  ;;  %10082 = vmatmul.mubr.bf16.vlgmr.msra.gmra.mxu1 %v9219_v39 }
 0x30d   : > { %2367 = vbcast.lane.c.b16.xlu1 %v2361_v47, 272  ;;  %2363 = vbcast.lane.c.b16.xlu0 %v2361_v47, 256 }
 0x30f   : > { %v12296_v56 = vpop.permute.xlu1 %2122  ;;  %v12298_v24 = vpop.permute.xlu0 %2118 }
 0x311   : > { %2375 = vbcast.lane.c.b16.xlu1 %v2361_v47, 304  ;;  %2371 = vbcast.lane.c.b16.xlu0 %v2361_v47, 288 }
 0x313   : > { %v12300_v49 = vpop.permute.xlu1 %2130  ;;  %v12302_v63 = vpop.permute.xlu0 %2126 }
 0x315   : > { %2383 = vbcast.lane.c.b16.xlu1 %v2361_v47, 336  ;;  %2379 = vbcast.lane.c.b16.xlu0 %v2361_v47, 320 }
 0x317   : > { %v12304_v59 = vpop.permute.xlu1 %2138  ;;  %v12306_v28 = vpop.permute.xlu0 %2134 }
 0x319   : > { %2391 = vbcast.lane.c.b16.xlu1 %v2361_v47, 368  ;;  %2387 = vbcast.lane.c.b16.xlu0 %v2361_v47, 352 }
 0x31b   : > { %v12310_v50 = vpop.permute.xlu1 %2146  ;;  %v12312_v20 = vpop.permute.xlu0 %2142 }
 0x31d   : > { %2402 = vbcast.lane.c.b16.xlu1 %v2396_v55, 272  ;;  %2398 = vbcast.lane.c.b16.xlu0 %v2396_v55, 256 }
 0x31f   : > { %v12314_v2 = vpop.permute.xlu1 %2157  ;;  %v12316_v16 = vpop.permute.xlu0 %2153 }
 0x321   : > { %2410 = vbcast.lane.c.b16.xlu1 %v2396_v55, 304  ;;  %2406 = vbcast.lane.c.b16.xlu0 %v2396_v55, 288 }
 0x323   : > { %v12318_v12 = vpop.permute.xlu1 %2165  ;;  %v12320_v13 = vpop.permute.xlu0 %2161 }
 0x325   : > { %2418 = vbcast.lane.c.b16.xlu1 %v2396_v55, 336  ;;  %2414 = vbcast.lane.c.b16.xlu0 %v2396_v55, 320 }
 0x327   : > { %v12322_v14 = vpop.permute.xlu1 %2173  ;;  %v12324_v48 = vpop.permute.xlu0 %2169 }
 0x329   : > { %2426 = vbcast.lane.c.b16.xlu1 %v2396_v55, 368  ;;  %2422 = vbcast.lane.c.b16.xlu0 %v2396_v55, 352 }
 0x32b   : > { %v12328_v38 = vpop.permute.xlu1 %2181  ;;  %v12330_v46 = vpop.permute.xlu0 %2177 }
 0x32d   : > { %2437 = vbcast.lane.c.b16.xlu1 %v2431_v62, 272  ;;  %2433 = vbcast.lane.c.b16.xlu0 %v2431_v62, 256 }
 0x32f   : > { %v12332_v5 = vpop.permute.xlu1 %2192  ;;  %v12334_v21 = vpop.permute.xlu0 %2188 }
 0x331   : > { %2445 = vbcast.lane.c.b16.xlu1 %v2431_v62, 304  ;;  %2441 = vbcast.lane.c.b16.xlu0 %v2431_v62, 288 }
 0x333   : > { %v12336_v26 = vpop.permute.xlu1 %2200  ;;  %v12338_v10 = vpop.permute.xlu0 %2196 }
 0x335   : > { %2453 = vbcast.lane.c.b16.xlu1 %v2431_v62, 336  ;;  %2449 = vbcast.lane.c.b16.xlu0 %v2431_v62, 320 }
 0x337   : > { %v12340_v0 = vpop.permute.xlu1 %2208  ;;  %v12342_v61 = vpop.permute.xlu0 %2204 }
 0x339   : > { %2461 = vbcast.lane.c.b16.xlu1 %v2431_v62, 368  ;;  %2457 = vbcast.lane.c.b16.xlu0 %v2431_v62, 352 }
 0x33b   : > { %v12346_v60 = vpop.permute.xlu1 %2216  ;;  %v12348_v42 = vpop.permute.xlu0 %2212 }
 0x33c   : > { %16912 = vst [vmem:[#allocation48_spill] sm:$0xff] %v12346_v60 }
 0x33d   : > { %2472 = vbcast.lane.c.b16.xlu1 %v2466_v27, 272  ;;  %2468 = vbcast.lane.c.b16.xlu0 %v2466_v27, 256 }
 0x33f   : > { %v12350_v11 = vpop.permute.xlu1 %2227  ;;  %v12352_v15 = vpop.permute.xlu0 %2223 }
 0x341   : > { %2480 = vbcast.lane.c.b16.xlu1 %v2466_v27, 304  ;;  %2476 = vbcast.lane.c.b16.xlu0 %v2466_v27, 288 }
 0x343   : > { %v12354_v57 = vpop.permute.xlu1 %2235  ;;  %v12356_v45 = vpop.permute.xlu0 %2231 }
 0x345   : > { %2488 = vbcast.lane.c.b16.xlu1 %v2466_v27, 336  ;;  %2484 = vbcast.lane.c.b16.xlu0 %v2466_v27, 320 }
 0x347   : > { %v12358_v30 = vpop.permute.xlu1 %2243  ;;  %v12360_v22 = vpop.permute.xlu0 %2239 }
 0x348   : > { %16913 = vst [vmem:[#allocation52_spill] sm:$0xff] %v12358_v30  ;;  %v12458_v30 = vld [vmem:[#allocation3 + $0x30] sm:$0xff]  }
 0x349   : > { %2496 = vbcast.lane.c.b16.xlu1 %v2466_v27, 368  ;;  %2492 = vbcast.lane.c.b16.xlu0 %v2466_v27, 352  ;;  %v16919_v27 = vld [vmem:[#allocation54_spill] sm:$0xff] }
 0x34a   : > { %v2536_v32 = vrot.slane %v11785_v41, %v16919_v27 }
 0x34b   : > { %v12364_v40 = vpop.permute.xlu1 %2251  ;;  %v12366_v18 = vpop.permute.xlu0 %2247 }
 0x34c   : > { %16914 = vst [vmem:[#allocation58_spill] sm:$0xff] %v12364_v40  ;;  %16915 = vst [vmem:[#allocation66_spill] sm:$0xff] %v12366_v18  ;;  %v12434_v18 = vld [vmem:[#allocation3 + $0x20] sm:$0xff]  }
 0x34d   : > { %2507 = vbcast.lane.c.b16.xlu1 %v2501_v33, 272  ;;  %2503 = vbcast.lane.c.b16.xlu0 %v2501_v33, 256 }
 0x34f   : > { %v12368_v35 = vpop.permute.xlu1 %2262  ;;  %v12370_v3 = vpop.permute.xlu0 %2258 }
 0x351   : > { %2515 = vbcast.lane.c.b16.xlu1 %v2501_v33, 304  ;;  %2511 = vbcast.lane.c.b16.xlu0 %v2501_v33, 288 }
 0x353   : > { %v12372_v47 = vpop.permute.xlu1 %2270  ;;  %v12374_v39 = vpop.permute.xlu0 %2266 }
 0x354   : > { %16916 = vst [vmem:[#allocation75_spill] sm:$0xff] %v12372_v47 }
 0x355   : > { %2523 = vbcast.lane.c.b16.xlu1 %v2501_v33, 336  ;;  %2519 = vbcast.lane.c.b16.xlu0 %v2501_v33, 320 }
 0x357   : > { %v12376_v55 = vpop.permute.xlu1 %2278  ;;  %v12378_v62 = vpop.permute.xlu0 %2274 }
 0x358   : > { %16917 = vst [vmem:[#allocation84_spill] sm:$0xff] %v12376_v55  ;;  %16918 = vst [vmem:[#allocation91_spill] sm:$0xff] %v12378_v62 }
 0x359   : > { %2531 = vbcast.lane.c.b16.xlu1 %v2501_v33, 368  ;;  %2527 = vbcast.lane.c.b16.xlu0 %v2501_v33, 352 }
 0x35b   : > { %v12382_v36 = vpop.permute.xlu1 %2286  ;;  %v12384_v58 = vpop.permute.xlu0 %2282 }
 0x35c   : > { %16920 = vst [vmem:[#allocation79_spill] sm:$0xff] %v12382_v36  ;;  %16921 = vst [vmem:[#allocation70_spill] sm:$0xff] %v12384_v58  ;;  %v2571_v58 = vrot.slane %v11838_v19, %v16919_v27 }
 0x35d   : > { %2542 = vbcast.lane.c.b16.xlu1 %v2536_v32, 272  ;;  %2538 = vbcast.lane.c.b16.xlu0 %v2536_v32, 256 }
 0x35f   : > { %v12386_v25 = vpop.permute.xlu1 %2297  ;;  %v12388_v17 = vpop.permute.xlu0 %2293 }
 0x360   : > { %16922 = vst [vmem:[#allocation47_spill] sm:$0xff] %v12386_v25  ;;  %16923 = vst [vmem:[#allocation51_spill] sm:$0xff] %v12388_v17  ;;  %v12408_v25 = vld [vmem:[#allocation3] sm:$0xff]  }
 0x361   : > { %2550 = vbcast.lane.c.b16.xlu1 %v2536_v32, 304  ;;  %2546 = vbcast.lane.c.b16.xlu0 %v2536_v32, 288 }
 0x363   : > { %v12390_v55 = vpop.permute.xlu1 %2305  ;;  %v12392_v40 = vpop.permute.xlu0 %2301 }
 0x364   : > { %16924 = vst [vmem:[#allocation64_spill] sm:$0xff] %v12390_v55  ;;  %16925 = vst [vmem:[#allocation73_spill] sm:$0xff] %v12392_v40  ;;  %v12404_v55 = vld [vmem:[#allocation3 + $0x8] sm:$0xff]  }
 0x365   : > { %2558 = vbcast.lane.c.b16.xlu1 %v2536_v32, 336  ;;  %2554 = vbcast.lane.c.b16.xlu0 %v2536_v32, 320  ;;  %v5738_v40 = vmul.bf16 %v12404_v55, %v12208_v6 }
 0x367   : > { %v12394_v41 = vpop.permute.xlu1 %2313  ;;  %v12396_v33 = vpop.permute.xlu0 %2309 }
 0x368   : > { %16926 = vst [vmem:[#allocation87_spill] sm:$0xff] %v12394_v41  ;;  %16927 = vst [vmem:[#allocation56_spill] sm:$0xff] %v12396_v33  ;;  %v5737_v41 = vmul.bf16 %v12408_v25, %v12210_v54 }
 0x369   : > { %2566 = vbcast.lane.c.b16.xlu1 %v2536_v32, 368  ;;  %2562 = vbcast.lane.c.b16.xlu0 %v2536_v32, 352  ;;  %v12416_v32 = vld [vmem:[#allocation3 + $0x10] sm:$0xff]  }
 0x36a   : > { %v5739_v27 = vmul.bf16 %v12416_v32, %v12219_v9 }
 0x36b   : > { %v12400_v36 = vpop.permute.xlu1 %2321  ;;  %v12402_v17 = vpop.permute.xlu0 %2317 }
 0x36c   : > { %16928 = vst [vmem:[#allocation39_spill] sm:$0xff] %v12400_v36  ;;  %16929 = vst [vmem:[#allocation72_spill] sm:$0xff] %v12402_v17  ;;  %v10233_v36 = vld [vmem:[#allocation6 + $0x18] sm:$0xff]   ;;  %v7049_v17 = vmax.bf16 %v5738_v40, %v5737_v41  ;;  %v5741_v40 = vmul.bf16 %v12434_v18, %v12227_v34  ;;  %v5747_v34 = vmul.bf16 %v12416_v32, %v12267_v53 }
 0x36d   : > { %2577 = vbcast.lane.c.b16.xlu1 %v2571_v58, 272  ;;  %2573 = vbcast.lane.c.b16.xlu0 %v2571_v58, 256  ;;  %v12424_v54 = vpack.i.b16 %v10233_v36, %v10233_v36 }
 0x36e   : > { %v7050_v47 = vmax.bf16 %v7049_v17, %v5739_v27  ;;  %v16937_v17 = vld [vmem:[#allocation27_spill] sm:$0xff] }
 0x36f   : > { %v12412_v33 = vpop.permute.xlu1 %2332  ;;  %v12414_v19 = vpop.permute.xlu0 %2328  ;;  %16934 = vst [vmem:[#allocation82_spill] sm:$0xff] %v12424_v54  ;;  %v2609_v27 = vrot.slane %v12424_v54, %v16937_v17 }
 0x370   : > { %16930 = vst [vmem:[#allocation81_spill] sm:$0xff] %v12412_v33  ;;  %16931 = vst [vmem:[#allocation59_spill] sm:$0xff] %v12414_v19  ;;  %v12426_v33 = vld [vmem:[#allocation3 + $0x18] sm:$0xff]  }
 0x371   : > { %2585 = vbcast.lane.c.b16.xlu1 %v2571_v58, 304  ;;  %2581 = vbcast.lane.c.b16.xlu0 %v2571_v58, 288  ;;  %v5740_v19 = vmul.bf16 %v12426_v33, %v12217_v52  ;;  %v5746_v52 = vmul.bf16 %v12404_v55, %v12250_v37 }
 0x373   : > { %v12420_v62 = vpop.permute.xlu1 %2340  ;;  %v12422_v6 = vpop.permute.xlu0 %2336  ;;  %v7051_v41 = vmax.bf16 %v7050_v47, %v5740_v19  ;;  %v12450_v47 = vld [vmem:[#allocation3 + $0x28] sm:$0xff]  }
 0x374   : > { %16932 = vst [vmem:[#allocation42_spill] sm:$0xff] %v12420_v62  ;;  %16933 = vst [vmem:[#allocation34_spill] sm:$0xff] %v12422_v6 }
 0x375   : > { %2593 = vbcast.lane.c.b16.xlu1 %v2571_v58, 336  ;;  %2589 = vbcast.lane.c.b16.xlu0 %v2571_v58, 320  ;;  %v7052_v6 = vmax.bf16 %v7051_v41, %v5741_v40  ;;  %v2641_v41 = vshrl.u32 %v10233_v36, 16  ;;  %v5749_v36 = vmul.bf16 %v12434_v18, %v12282_v7 }
 0x377   : > { %v12430_v43 = vpop.permute.xlu1 %2348  ;;  %v12432_v9 = vpop.permute.xlu0 %2344 }
 0x378   : > { %16935 = vst [vmem:[#allocation32_spill] sm:$0xff] %v12430_v43  ;;  %16936 = vst [vmem:[#allocation35_spill] sm:$0xff] %v12432_v9  ;;  %v5745_v43 = vmul.bf16 %v12408_v25, %v12254_v51  ;;  %v5743_v51 = vmul.bf16 %v12458_v30, %v12242_v31  ;;  %v12472_v31 = vpack.i.b16 %v2641_v41, %v2641_v41 }
 0x379   : > { %2601 = vbcast.lane.c.b16.xlu1 %v2571_v58, 368  ;;  %2597 = vbcast.lane.c.b16.xlu0 %v2571_v58, 352  ;;  %v5742_v58 = vmul.bf16 %v12450_v47, %v12225_v1  ;;  %v5748_v1 = vmul.bf16 %v12426_v33, %v12264_v29 }
 0x37a   : > { %v2647_v7 = vrot.slane %v12472_v31, %v16937_v17  ;;  %v16963_v17 = vld [vmem:[#allocation79_spill] sm:$0xff] }
 0x37b   : > { %v12440_v62 = vpop.permute.xlu1 %2356  ;;  %v12446_v9 = vpop.permute.xlu0 %2352  ;;  %v7053_v40 = vmax.bf16 %v7052_v6, %v5742_v58  ;;  %v12476_v6 = vld [vmem:[#allocation3 + $0x38] sm:$0xff]  }
 0x37c   : > { %16938 = vst [vmem:[#allocation50_spill] sm:$0xff] %v12440_v62  ;;  %16939 = vst [vmem:[#allocation53_spill] sm:$0xff] %v12446_v9  ;;  %v7066_v62 = vmax.bf16 %v5746_v52, %v5745_v43  ;;  %v5754_v52 = vmul.bf16 %v12404_v55, %v12296_v56  ;;  %v5744_v29 = vmul.bf16 %v12476_v6, %v12238_v8 }
 0x37d   : > { %2615 = vbcast.lane.c.b16.xlu1 %v2609_v27, 272  ;;  %2611 = vbcast.lane.c.b16.xlu0 %v2609_v27, 256  ;;  %v7054_v43 = vmax.bf16 %v7053_v40, %v5743_v51  ;;  %v5750_v8 = vmul.bf16 %v12450_v47, %v12278_v44 }
 0x37e   : > { %v7067_v53 = vmax.bf16 %v7066_v62, %v5747_v34  ;;  %v5755_v34 = vmul.bf16 %v12416_v32, %v12302_v63 }
 0x37f   : > { %v12454_v19 = vpop.permute.xlu1 %2367  ;;  %v12456_v37 = vpop.permute.xlu0 %2363 }
 0x380   : > { %16940 = vst [vmem:[#allocation88_spill] sm:$0xff] %v12456_v37  ;;  %v5753_v37 = vmul.bf16 %v12408_v25, %v12298_v24  ;;  %v7068_v62 = vmax.bf16 %v7067_v53, %v5748_v1  ;;  %v7055_v24 = vmax.bf16 %v7054_v43, %v5744_v29  ;;  %v5756_v43 = vmul.bf16 %v12426_v33, %v12300_v49 }
 0x381   : > { %2623 = vbcast.lane.c.b16.xlu1 %v2609_v27, 304  ;;  %2619 = vbcast.lane.c.b16.xlu0 %v2609_v27, 288  ;;  %v5761_v49 = vmul.bf16 %v12408_v25, %v12316_v16 }
 0x382   : > { %v7083_v51 = vmax.bf16 %v5754_v52, %v5753_v37  ;;  %v7069_v40 = vmax.bf16 %v7068_v62, %v5749_v36  ;;  %v7056_v63 = vunpack.i.l.bf16 %v7055_v24  ;;  %v5751_v37 = vmul.bf16 %v12458_v30, %v12294_v23 }
 0x383   : > { %v12462_v9 = vpop.permute.xlu1 %2375  ;;  %v12466_v60 = vpop.permute.xlu0 %2371 }
 0x384   : > { %v7084_v41 = vmax.bf16 %v7083_v51, %v5755_v34  ;;  %v7070_v52 = vmax.bf16 %v7069_v40, %v5750_v8  ;;  %v5762_v34 = vmul.bf16 %v12404_v55, %v12314_v2  ;;  %v5763_v51 = vmul.bf16 %v12416_v32, %v12320_v13 }
 0x385   : > { %2631 = vbcast.lane.c.b16.xlu1 %v2609_v27, 336  ;;  %2627 = vbcast.lane.c.b16.xlu0 %v2609_v27, 320  ;;  %v5752_v40 = vmul.bf16 %v12476_v6, %v12292_v4  ;;  %v5758_v2 = vmul.bf16 %v12450_v47, %v12304_v59  ;;  %v5769_v13 = vmul.bf16 %v12408_v25, %v12334_v21 }
 0x386   : > { %v7085_v36 = vmax.bf16 %v7084_v41, %v5756_v43  ;;  %v7100_v8 = vmax.bf16 %v5762_v34, %v5761_v49  ;;  %v5759_v43 = vmul.bf16 %v12458_v30, %v12312_v20  ;;  %v5771_v59 = vmul.bf16 %v12416_v32, %v12338_v10  ;;  %v16942_v34 = vld [vmem:[#allocation28_spill] sm:$0xff] }
 0x387   : > { %v12482_v56 = vpop.permute.xlu1 %2383  ;;  %v12484_v58 = vpop.permute.xlu0 %2379  ;;  %v2682_v21 = vrot.slane %v12424_v54, %v16942_v34 }
 0x388   : > { %16941 = vst [vmem:[#allocation46_spill] sm:$0xff] %v12482_v56  ;;  %v7057_v56 = vunpack.i.h.bf16 %v7055_v24  ;;  %v7071_v24 = vmax.bf16 %v7070_v52, %v5751_v37  ;;  %v7101_v37 = vmax.bf16 %v7100_v8, %v5763_v51  ;;  %v5765_v51 = vmul.bf16 %v12434_v18, %v12324_v48 }
 0x389   : > { %2639 = vbcast.lane.c.b16.xlu1 %v2609_v27, 368  ;;  %2635 = vbcast.lane.c.b16.xlu0 %v2609_v27, 352  ;;  %v5757_v27 = vmul.bf16 %v12434_v18, %v12306_v28  ;;  %v5777_v48 = vmul.bf16 %v12408_v25, %v12352_v15 }
 0x38a   : > { %v7058_v29 = vmax.f32 %v7056_v63, %v7057_v56  ;;  %v7072_v16 = vmax.bf16 %v7071_v24, %v5752_v40  ;;  %v5770_v63 = vmul.bf16 %v12404_v55, %v12332_v5  ;;  %v5764_v5 = vmul.bf16 %v12426_v33, %v12318_v12 }
 0x38b   : > { %v12488_v53 = vpop.permute.xlu1 %2391  ;;  %v12492_v1 = vpop.permute.xlu0 %2387  ;;  %v7086_v23 = vmax.bf16 %v7085_v36, %v5757_v27  ;;  %v5760_v12 = vmul.bf16 %v12476_v6, %v12310_v50 }
 0x38c   : > { %v7059_v56 = vrot.slane %v7058_v29, 4  ;;  %v7073_v49 = vunpack.i.l.bf16 %v7072_v16  ;;  %v7074_v24 = vunpack.i.h.bf16 %v7072_v16  ;;  %v7117_v20 = vmax.bf16 %v5770_v63, %v5769_v13 }
 0x38d   : > { %2653 = vbcast.lane.c.b16.xlu1 %v2647_v7, 272  ;;  %2649 = vbcast.lane.c.b16.xlu0 %v2647_v7, 256  ;;  %v7087_v4 = vmax.bf16 %v7086_v23, %v5758_v2  ;;  %v7102_v40 = vmax.bf16 %v7101_v37, %v5764_v5  ;;  %v5772_v16 = vmul.bf16 %v12426_v33, %v12336_v26 }
 0x38e   : > { %v7060_v36 = vmax.f32 %v7058_v29, %v7059_v56  ;;  %v7118_v2 = vmax.bf16 %v7117_v20, %v5771_v59  ;;  %v7075_v8 = vmax.f32 %v7073_v49, %v7074_v24  ;;  %v5779_v37 = vmul.bf16 %v12416_v32, %v12356_v45 }
 0x38f   : > { %v12500_v62 = vpop.permute.xlu1 %2402  ;;  %v12502_v44 = vpop.permute.xlu0 %2398  ;;  %v7088_v23 = vmax.bf16 %v7087_v4, %v5759_v43  ;;  %v7103_v13 = vmax.bf16 %v7102_v40, %v5765_v51  ;;  %v5773_v4 = vmul.bf16 %v12434_v18, %v12342_v61  ;;  %v5766_v26 = vmul.bf16 %v12450_v47, %v12322_v14 }
 0x390   : > { %v7061_v56 = vrot.slane %v7060_v36, 2  ;;  %v7119_v50 = vmax.bf16 %v7118_v2, %v5772_v16  ;;  %v7076_v15 = vrot.slane %v7075_v8, 4  ;;  %v5767_v20 = vmul.bf16 %v12458_v30, %v12330_v46 }
 0x391   : > { %2661 = vbcast.lane.c.b16.xlu1 %v2647_v7, 304  ;;  %2657 = vbcast.lane.c.b16.xlu0 %v2647_v7, 288  ;;  %v7089_v63 = vmax.bf16 %v7088_v23, %v5760_v12  ;;  %v7104_v61 = vmax.bf16 %v7103_v13, %v5766_v26  ;;  %v5786_v26 = vmul.bf16 %v12404_v55, %v12368_v35  ;;  %v16944_v35 = vld [vmem:[#allocation52_spill] sm:$0xff] }
 0x392   : > { %v7120_v51 = vmax.bf16 %v7119_v50, %v5773_v4  ;;  %v7077_v14 = vmax.f32 %v7075_v8, %v7076_v15 }
 0x393   : > { %v12510_v28 = vpop.permute.xlu1 %2410  ;;  %v12514_v41 = vpop.permute.xlu0 %2406  ;;  %v7090_v49 = vunpack.i.l.bf16 %v7089_v63  ;;  %v7091_v24 = vunpack.i.h.bf16 %v7089_v63  ;;  %v7105_v16 = vmax.bf16 %v7104_v61, %v5767_v20  ;;  %v5781_v63 = vmul.bf16 %v12434_v18, %v12360_v22  ;;  %v16943_v20 = vld [vmem:[#allocation48_spill] sm:$0xff] }
 0x394   : > { %v7078_v50 = vrot.slane %v7077_v14, 2  ;;  %v5785_v22 = vmul.bf16 %v12408_v25, %v12370_v3  ;;  %v5776_v61 = vmul.bf16 %v12476_v6, %v16943_v20  ;;  %v16950_v20 = vld [vmem:[#allocation91_spill] sm:$0xff] }
 0x395   : > { %2669 = vbcast.lane.c.b16.xlu1 %v2647_v7, 336  ;;  %2665 = vbcast.lane.c.b16.xlu0 %v2647_v7, 320  ;;  %v7092_v12 = vmax.f32 %v7090_v49, %v7091_v24  ;;  %v5787_v24 = vmul.bf16 %v12416_v32, %v12374_v39  ;;  %v16945_v39 = vld [vmem:[#allocation66_spill] sm:$0xff] }
 0x397   : > { %v12524_v52 = vpop.permute.xlu1 %2418  ;;  %v12528_v27 = vpop.permute.xlu0 %2414 }
 0x399   : > { %2677 = vbcast.lane.c.b16.xlu1 %v2647_v7, 368  ;;  %2673 = vbcast.lane.c.b16.xlu0 %v2647_v7, 352  ;;  %v5778_v7 = vmul.bf16 %v12404_v55, %v12350_v11  ;;  %v7062_v11 = vmax.f32 %v7060_v36, %v7061_v56  ;;  %v5774_v36 = vmul.bf16 %v12450_v47, %v12340_v0 }
 0x39a   : > { %v5780_v56 = vmul.bf16 %v12426_v33, %v12354_v57  ;;  %v5768_v0 = vmul.bf16 %v12476_v6, %v12328_v38  ;;  %v12580_v57 = vrot.slane %v12472_v31, %v16942_v34 }
 0x39b   : > { %v12536_v10 = vpop.permute.xlu1 %2426  ;;  %v12538_v29 = vpop.permute.xlu0 %2422  ;;  %v7134_v5 = vmax.bf16 %v5778_v7, %v5777_v48  ;;  %v7063_v2 = vrot.slane %v7062_v11, 1  ;;  %v5775_v7 = vmul.bf16 %v12458_v30, %v12348_v42  ;;  %v7121_v48 = vmax.bf16 %v7120_v51, %v5774_v36 }
 0x39c   : > { %v7106_v42 = vmax.bf16 %v7105_v16, %v5768_v0  ;;  %v5782_v51 = vmul.bf16 %v12450_v47, %v16944_v35  ;;  %v7151_v36 = vmax.bf16 %v5786_v26, %v5785_v22  ;;  %v16951_v35 = vld [vmem:[#allocation58_spill] sm:$0xff] }
 0x39d   : > { %2688 = vbcast.lane.c.b16.xlu1 %v2682_v21, 272  ;;  %2684 = vbcast.lane.c.b16.xlu0 %v2682_v21, 256  ;;  %v7135_v45 = vmax.bf16 %v7134_v5, %v5779_v37  ;;  %v7064_v4 = vmax.f32 %v7062_v11, %v7063_v2  ;;  %v7093_v37 = vrot.slane %v7092_v12, 4  ;;  %v7122_v5 = vmax.bf16 %v7121_v48, %v5775_v7 }
 0x39e   : > { %v7079_v11 = vmax.f32 %v7077_v14, %v7078_v50  ;;  %v7108_v2 = vunpack.i.h.bf16 %v7106_v42  ;;  %v5783_v7 = vmul.bf16 %v12458_v30, %v16945_v39 }
 0x39f   : > { %v12548_v43 = vpop.permute.xlu1 %2437  ;;  %v12554_v59 = vpop.permute.xlu0 %2433  ;;  %v7136_v13 = vmax.bf16 %v7135_v45, %v5780_v56  ;;  %v7094_v3 = vmax.f32 %v7092_v12, %v7093_v37  ;;  %v7107_v45 = vunpack.i.l.bf16 %v7106_v42  ;;  %v7123_v16 = vmax.bf16 %v7122_v5, %v5776_v61  ;;  %v16949_v37 = vld [vmem:[#allocation75_spill] sm:$0xff] }
 0x3a0   : > { %v7080_v12 = vrot.slane %v7079_v11, 1  ;;  %v5788_v42 = vmul.bf16 %v12426_v33, %v16949_v37  ;;  %v16955_v37 = vld [vmem:[#allocation88_spill] sm:$0xff] }
 0x3a1   : > { %2696 = vbcast.lane.c.b16.xlu1 %v2682_v21, 304  ;;  %2692 = vbcast.lane.c.b16.xlu0 %v2682_v21, 288  ;;  %v7137_v38 = vmax.bf16 %v7136_v13, %v5781_v63  ;;  %v7152_v63 = vmax.bf16 %v7151_v36, %v5787_v24  ;;  %v16946_v13 = vmov 0   ;;  %v12609_v50 = vmax.f32 %v7107_v45, %v7108_v2 }
 0x3a2   : > { %v7124_v22 = vunpack.i.l.bf16 %v7123_v16  ;;  %v7125_v5 = vunpack.i.h.bf16 %v7123_v16  ;;  %v12624_v2 = vmax.f32 %v7079_v11, %v7080_v12  ;;  %v16956_v12 = vld [vmem:[#allocation47_spill] sm:$0xff] }
 0x3a3   : > { %v12560_v23 = vpop.permute.xlu1 %2445  ;;  %v12562_v40 = vpop.permute.xlu0 %2441  ;;  %v7138_v48 = vmax.bf16 %v7137_v38, %v5782_v51  ;;  %16948 = vst [vmem:[#allocation89_spill] sm:$0xff] %v12609_v50  ;;  %v7153_v61 = vmax.bf16 %v7152_v63, %v5788_v42  ;;  %v5784_v51 = vmul.bf16 %v12476_v6, %v16951_v35  ;;  %v5810_v63 = vmul.bf16 %v12404_v55, %v12454_v19 }
 0x3a4   : > { %16952 = vst [vmem:[#allocation67_spill] sm:$0xff] %v12624_v2  ;;  %v5809_v42 = vmul.bf16 %v12408_v25, %v16955_v37  ;;  %v16960_v37 = vld [vmem:[#allocation51_spill] sm:$0xff] }
 0x3a5   : > { %2704 = vbcast.lane.c.b16.xlu1 %v2682_v21, 336  ;;  %2700 = vbcast.lane.c.b16.xlu0 %v2682_v21, 320  ;;  %v7139_v38 = vmax.bf16 %v7138_v48, %v5783_v7  ;;  %v12631_v7 = vmax.f32 %v7124_v22, %v7125_v5  ;;  %v16958_v22 = vld [vmem:[#allocation29_spill] sm:$0xff] }
 0x3a6   : > { %v12648_v5 = vrot.slane %v12424_v54, %v16958_v22 }
 0x3a7   : > { %v12568_v46 = vpop.permute.xlu1 %2453  ;;  %v12574_v8 = vpop.permute.xlu0 %2449  ;;  %16954 = vst [vmem:[#allocation49_spill] sm:$0xff] %v12631_v7  ;;  %v12633_v48 = vmax.bf16 %v7139_v38, %v5784_v51  ;;  %v16959_v38 = vld [vmem:[#allocation59_spill] sm:$0xff]  ;;  %v5811_v51 = vmul.bf16 %v12416_v32, %v12466_v60  ;;  %v5825_v60 = vmul.bf16 %v12408_v25, %v12554_v59  ;;  %v16965_v7 = vld [vmem:[#allocation73_spill] sm:$0xff] }
 0x3a8   : > { %v5801_v19 = vmul.bf16 %v12408_v25, %v16959_v38  ;;  %v5826_v38 = vmul.bf16 %v12404_v55, %v12548_v43  ;;  %v5795_v59 = vmul.bf16 %v12416_v32, %v16965_v7  ;;  %v5813_v7 = vmul.bf16 %v12434_v18, %v12484_v58 }
 0x3a9   : > { %2712 = vbcast.lane.c.b16.xlu1 %v2682_v21, 368  ;;  %2708 = vbcast.lane.c.b16.xlu0 %v2682_v21, 352  ;;  %v7065_v21 = vpack.i.bf16 %v7064_v4, %v7064_v4  ;;  %v7095_v4 = vrot.slane %v7094_v3, 2  ;;  %v5821_v58 = vmul.bf16 %v12434_v18, %v12528_v27 }
 0x3aa   : > { %v7236_v50 = vmax.bf16 %v5826_v38, %v5825_v60  ;;  %v16968_v38 = vld [vmem:[#allocation35_spill] sm:$0xff] }
 0x3ab   : > { %v12586_v15 = vpop.permute.xlu1 %2461  ;;  %v12588_v49 = vpop.permute.xlu0 %2457  ;;  %v12606_v0 = vmax.bf16 %v16946_v13, %v7065_v21  ;;  %v5789_v21 = vmul.bf16 %v12434_v18, %v16950_v20  ;;  %v12626_v36 = vmax.f32 %v7094_v3, %v7095_v4  ;;  %v5794_v3 = vmul.bf16 %v12404_v55, %v16956_v12  ;;  %v16957_v4 = vld [vmem:[#allocation81_spill] sm:$0xff] }
 0x3ac   : > { %v5802_v35 = vmul.bf16 %v12404_v55, %v16957_v4  ;;  %v5793_v12 = vmul.bf16 %v12408_v25, %v16960_v37  ;;  %v16961_v4 = vld [vmem:[#allocation34_spill] sm:$0xff]  ;;  %v5805_v60 = vmul.bf16 %v12434_v18, %v16968_v38 }
 0x3ad   : > { %2723 = vbcast.lane.c.b16.xlu1 %v12580_v57, 272  ;;  %2719 = vbcast.lane.c.b16.xlu0 %v12580_v57, 256  ;;  %16947 = vst [vmem:[#allocation41_spill] sm:$0xff] %v12606_v0  ;;  %16953 = vst [vmem:[#allocation37_spill] sm:$0xff] %v12626_v36  ;;  %v7154_v11 = vmax.bf16 %v7153_v61, %v5789_v21  ;;  %v5818_v21 = vmul.bf16 %v12404_v55, %v12500_v62  ;;  %v16964_v0 = vld [vmem:[#allocation70_spill] sm:$0xff] }
 0x3ae   : > { %v5817_v61 = vmul.bf16 %v12408_v25, %v12502_v44  ;;  %v5803_v45 = vmul.bf16 %v12416_v32, %v16961_v4  ;;  %v7202_v62 = vmax.bf16 %v5810_v63, %v5809_v42  ;;  %v5819_v44 = vmul.bf16 %v12416_v32, %v12514_v41  ;;  %v16962_v4 = vld [vmem:[#allocation84_spill] sm:$0xff] }
 0x3af   : > { %v12598_v56 = vpop.permute.xlu1 %2472  ;;  %v12602_v14 = vpop.permute.xlu0 %2468  ;;  %v5790_v43 = vmul.bf16 %v12450_v47, %v16962_v4  ;;  %v5791_v63 = vmul.bf16 %v12458_v30, %v16964_v0  ;;  %v5827_v41 = vmul.bf16 %v12416_v32, %v12562_v40  ;;  %v7168_v2 = vmax.bf16 %v5794_v3, %v5793_v12  ;;  %v16967_v3 = vld [vmem:[#allocation64_spill] sm:$0xff] }
 0x3b0   : > { %v5833_v37 = vmul.bf16 %v12408_v25, %v12602_v14  ;;  %v7203_v42 = vmax.bf16 %v7202_v62, %v5811_v51  ;;  %v7219_v13 = vmax.bf16 %v5818_v21, %v5817_v61  ;;  %v5812_v40 = vmul.bf16 %v12426_v33, %v12462_v9  ;;  %v16966_v51 = vld [vmem:[#allocation42_spill] sm:$0xff] }
 0x3b1   : > { %2731 = vbcast.lane.c.b16.xlu1 %v12580_v57, 304  ;;  %2727 = vbcast.lane.c.b16.xlu0 %v12580_v57, 288  ;;  %v7155_v4 = vmax.bf16 %v7154_v11, %v5790_v43  ;;  %v5804_v21 = vmul.bf16 %v12426_v33, %v16966_v51  ;;  %v5820_v9 = vmul.bf16 %v12426_v33, %v12510_v28 }
 0x3b2   : > { %v7220_v54 = vmax.bf16 %v7219_v13, %v5819_v44  ;;  %v5796_v12 = vmul.bf16 %v12426_v33, %v16967_v3  ;;  %v5828_v62 = vmul.bf16 %v12426_v33, %v12560_v23 }
 0x3b3   : > { %v12613_v26 = vpop.permute.xlu1 %2480  ;;  %v12615_v24 = vpop.permute.xlu0 %2476  ;;  %v7156_v23 = vmax.bf16 %v7155_v4, %v5791_v63 }
 0x3b4   : > { %v5835_v14 = vmul.bf16 %v12416_v32, %v12615_v24  ;;  %v7237_v24 = vmax.bf16 %v7236_v50, %v5827_v41  ;;  %v7169_v50 = vmax.bf16 %v7168_v2, %v5795_v59  ;;  %v5836_v28 = vmul.bf16 %v12426_v33, %v12613_v26 }
 0x3b5   : > { %2739 = vbcast.lane.c.b16.xlu1 %v12580_v57, 336  ;;  %2735 = vbcast.lane.c.b16.xlu0 %v12580_v57, 320  ;;  %v5829_v41 = vmul.bf16 %v12434_v18, %v12574_v8 }
 0x3b6   : > { %v7238_v2 = vmax.bf16 %v7237_v24, %v5828_v62 }
 0x3b7   : > { %v12629_v39 = vpop.permute.xlu1 %2488  ;;  %v12639_v20 = vpop.permute.xlu0 %2484 }
 0x3b9   : > { %2747 = vbcast.lane.c.b16.xlu1 %v12580_v57, 368  ;;  %2743 = vbcast.lane.c.b16.xlu0 %v12580_v57, 352  ;;  %v5834_v57 = vmul.bf16 %v12404_v55, %v12598_v56  ;;  %v7185_v56 = vmax.bf16 %v5802_v35, %v5801_v19 }
 0x3bb   : > { %v12667_v16 = vpop.permute.xlu1 %2496  ;;  %v12675_v34 = vpop.permute.xlu0 %2492  ;;  %v7186_v36 = vmax.bf16 %v7185_v56, %v5803_v45  ;;  %v7253_v35 = vmax.bf16 %v5834_v57, %v5833_v37  ;;  %v7204_v45 = vmax.bf16 %v7203_v42, %v5812_v40  ;;  %v7221_v37 = vmax.bf16 %v7220_v54, %v5820_v9  ;;  %v16969_v54 = vld [vmem:[#allocation56_spill] sm:$0xff] }
 0x3bc   : > { %v5797_v26 = vmul.bf16 %v12434_v18, %v16969_v54 }
 0x3bd   : > { %2758 = vbcast.lane.c.b16.xlu1 %v12648_v5, 272  ;;  %2754 = vbcast.lane.c.b16.xlu0 %v12648_v5, 256  ;;  %v7254_v13 = vmax.bf16 %v7253_v35, %v5835_v14  ;;  %v7187_v57 = vmax.bf16 %v7186_v36, %v5804_v21  ;;  %v7205_v42 = vmax.bf16 %v7204_v45, %v5813_v7  ;;  %v16971_v21 = vld [vmem:[#allocation32_spill] sm:$0xff] }
 0x3be   : > { %v5837_v36 = vmul.bf16 %v12434_v18, %v12639_v20  ;;  %v7170_v14 = vmax.bf16 %v7169_v50, %v5796_v12  ;;  %v7222_v63 = vmax.bf16 %v7221_v37, %v5821_v58  ;;  %v12727_v20 = vrot.slane %v12472_v31, %v16958_v22  ;;  %v16972_v50 = vld [vmem:[#allocation53_spill] sm:$0xff] }
 0x3bf   : > { %v2508_v0 = vpop.permute.xlu1 %2507  ;;  %v2504_v19 = vpop.permute.xlu0 %2503  ;;  %v7255_v27 = vmax.bf16 %v7254_v13, %v5836_v28  ;;  %v7188_v35 = vmax.bf16 %v7187_v57, %v5805_v60  ;;  %v5806_v24 = vmul.bf16 %v12450_v47, %v16971_v21  ;;  %v5815_v45 = vmul.bf16 %v12458_v30, %v12492_v1  ;;  %v16973_v28 = vld [vmem:[#allocation87_spill] sm:$0xff] }
 0x3c0   : > { %v5842_v61 = vmul.bf16 %v12404_v55, %v2508_v0  ;;  %v5841_v11 = vmul.bf16 %v12408_v25, %v2504_v19  ;;  %v16970_v19 = vld [vmem:[#allocation46_spill] sm:$0xff]  ;;  %v5822_v13 = vmul.bf16 %v12450_v47, %v12524_v52  ;;  %v7171_v12 = vmax.bf16 %v7170_v14, %v5797_v26 }
 0x3c1   : > { %2766 = vbcast.lane.c.b16.xlu1 %v12648_v5, 304  ;;  %2762 = vbcast.lane.c.b16.xlu0 %v12648_v5, 288  ;;  %v5814_v51 = vmul.bf16 %v12450_v47, %v16970_v19  ;;  %v7256_v3 = vmax.bf16 %v7255_v27, %v5837_v36  ;;  %v5807_v38 = vmul.bf16 %v12458_v30, %v16972_v50  ;;  %v7141_v14 = vunpack.i.l.bf16 %v12633_v48 }
 0x3c2   : > { %v7270_v59 = vmax.bf16 %v5842_v61, %v5841_v11  ;;  %v7239_v61 = vmax.bf16 %v7238_v2, %v5829_v41  ;;  %v5830_v60 = vmul.bf16 %v12450_v47, %v12568_v46  ;;  %v7189_v57 = vmax.bf16 %v7188_v35, %v5806_v24 }
 0x3c3   : > { %v2516_v44 = vpop.permute.xlu1 %2515  ;;  %v2512_v43 = vpop.permute.xlu0 %2511  ;;  %v7206_v9 = vmax.bf16 %v7205_v42, %v5814_v51  ;;  %v5823_v1 = vmul.bf16 %v12458_v30, %v12538_v29  ;;  %v7223_v58 = vmax.bf16 %v7222_v63, %v5822_v13  ;;  %v5838_v52 = vmul.bf16 %v12450_v47, %v12629_v39  ;;  %v16975_v42 = vld [vmem:[#allocation72_spill] sm:$0xff]  ;;  %v16976_v51 = vld [vmem:[#allocation50_spill] sm:$0xff] }
 0x3c4   : > { %v5843_v56 = vmul.bf16 %v12416_v32, %v2512_v43  ;;  %v5844_v8 = vmul.bf16 %v12426_v33, %v2516_v44  ;;  %v5831_v43 = vmul.bf16 %v12458_v30, %v12588_v49  ;;  %v7240_v41 = vmax.bf16 %v7239_v61, %v5830_v60 }
 0x3c5   : > { %2774 = vbcast.lane.c.b16.xlu1 %v12648_v5, 336  ;;  %2770 = vbcast.lane.c.b16.xlu0 %v12648_v5, 320  ;;  %v16974_v2 = vmul.bf16 %v12476_v6, %v16963_v17  ;;  %v5839_v39 = vmul.bf16 %v12458_v30, %v12675_v34  ;;  %v5799_v49 = vmul.bf16 %v12458_v30, %v16975_v42  ;;  %v7142_v34 = vunpack.i.h.bf16 %v12633_v48 }
 0x3c6   : > { %v7271_v0 = vmax.bf16 %v7270_v59, %v5843_v56  ;;  %v7207_v59 = vmax.bf16 %v7206_v9, %v5815_v45  ;;  %v7257_v56 = vmax.bf16 %v7256_v3, %v5838_v52  ;;  %v7190_v17 = vmax.bf16 %v7189_v57, %v5807_v38  ;;  %v16977_v9 = vld [vmem:[#allocation39_spill] sm:$0xff]  ;;  %v16978_v52 = vld [vmem:[#allocation30_spill] sm:$0xff] }
 0x3c7   : > { %v2524_v40 = vpop.permute.xlu1 %2523  ;;  %v2520_v4 = vpop.permute.xlu0 %2519  ;;  %v12755_v29 = vmax.bf16 %v7156_v23, %v16974_v2  ;;  %v5816_v23 = vmul.bf16 %v12476_v6, %v12488_v53  ;;  %v5808_v63 = vmul.bf16 %v12476_v6, %v16976_v51  ;;  %v5824_v21 = vmul.bf16 %v12476_v6, %v12536_v10 }
 0x3c8   : > { %v5845_v11 = vmul.bf16 %v12434_v18, %v2520_v4  ;;  %v7272_v7 = vmax.bf16 %v7271_v0, %v5844_v8  ;;  %v5846_v46 = vmul.bf16 %v12450_v47, %v2524_v40  ;;  %v7224_v8 = vmax.bf16 %v7223_v58, %v5823_v1 }
 0x3c9   : > { %2782 = vbcast.lane.c.b16.xlu1 %v12648_v5, 368  ;;  %2778 = vbcast.lane.c.b16.xlu0 %v12648_v5, 352  ;;  %v5798_v5 = vmul.bf16 %v12450_v47, %v16973_v28  ;;  %v7241_v40 = vmax.bf16 %v7240_v41, %v5831_v43  ;;  %v7208_v4 = vmax.bf16 %v7207_v59, %v5816_v23  ;;  %v7158_v53 = vunpack.i.l.bf16 %v12755_v29 }
 0x3ca   : > { %v7273_v62 = vmax.bf16 %v7272_v7, %v5845_v11  ;;  %v7258_v24 = vmax.bf16 %v7257_v56, %v5839_v39  ;;  %v5832_v11 = vmul.bf16 %v12476_v6, %v12586_v15  ;;  %v5800_v13 = vmul.bf16 %v12476_v6, %v16977_v9 }
 0x3cb   : > { %v2532_v44 = vpop.permute.xlu1 %2531  ;;  %v2528_v37 = vpop.permute.xlu0 %2527  ;;  %v7172_v36 = vmax.bf16 %v7171_v12, %v5798_v5  ;;  %v7191_v3 = vmax.bf16 %v7190_v17, %v5808_v63  ;;  %v7225_v12 = vmax.bf16 %v7224_v8, %v5824_v21  ;;  %v5840_v50 = vmul.bf16 %v12476_v6, %v12667_v16 }
 0x3cc   : > { %v5847_v27 = vmul.bf16 %v12458_v30, %v2528_v37  ;;  %v7274_v54 = vmax.bf16 %v7273_v62, %v5846_v46  ;;  %v7242_v38 = vmax.bf16 %v7241_v40, %v5832_v11  ;;  %v5848_v60 = vmul.bf16 %v12476_v6, %v2532_v44  ;;  %v16979_v37 = vld [vmem:[#allocation82_spill] sm:$0xff] }
 0x3cd   : > { %2793 = vbcast.lane.c.b16.xlu1 %v12727_v20, 272  ;;  %2789 = vbcast.lane.c.b16.xlu0 %v12727_v20, 256  ;;  %v7173_v61 = vmax.bf16 %v7172_v36, %v5799_v49  ;;  %v7209_v15 = vunpack.i.l.bf16 %v7208_v4  ;;  %v7210_v1 = vunpack.i.h.bf16 %v7208_v4  ;;  %v7259_v58 = vmax.bf16 %v7258_v24, %v5840_v50 }
 0x3ce   : > { %v7275_v7 = vmax.bf16 %v7274_v54, %v5847_v27  ;;  %v12788_v28 = vrot.slane %v16979_v37, %v16978_v52  ;;  %v7192_v46 = vunpack.i.l.bf16 %v7191_v3  ;;  %v7193_v2 = vunpack.i.h.bf16 %v7191_v3 }
 0x3cf   : > { %v2543_v26 = vpop.permute.xlu1 %2542  ;;  %v2539_v0 = vpop.permute.xlu0 %2538  ;;  %v7174_v5 = vmax.bf16 %v7173_v61, %v5800_v13  ;;  %v7226_v59 = vunpack.i.l.bf16 %v7225_v12  ;;  %v7227_v39 = vunpack.i.h.bf16 %v7225_v12  ;;  %v7243_v42 = vunpack.i.l.bf16 %v7242_v38  ;;  %v16980_v61 = vld [vmem:[#allocation37_spill] sm:$0xff] }
 0x3d0   : > { %v5850_v35 = vmul.bf16 %v12404_v55, %v2543_v26  ;;  %v5849_v19 = vmul.bf16 %v12408_v25, %v2539_v0  ;;  %v7276_v16 = vmax.bf16 %v7275_v7, %v5848_v60  ;;  %v7244_v49 = vunpack.i.h.bf16 %v7242_v38  ;;  %v16981_v12 = vld [vmem:[#allocation89_spill] sm:$0xff] }
 0x3d1   : > { %2801 = vbcast.lane.c.b16.xlu1 %v12727_v20, 304  ;;  %2797 = vbcast.lane.c.b16.xlu0 %v12727_v20, 288  ;;  %v7159_v54 = vunpack.i.h.bf16 %v12755_v29  ;;  %v7211_v26 = vmax.f32 %v7209_v15, %v7210_v1  ;;  %v7260_v17 = vunpack.i.l.bf16 %v7259_v58  ;;  %v7261_v23 = vunpack.i.h.bf16 %v7259_v58  ;;  %v16983_v15 = vld [vmem:[#allocation49_spill] sm:$0xff] }
 0x3d2   : > { %v7287_v62 = vmax.bf16 %v5850_v35, %v5849_v19  ;;  %v7277_v8 = vunpack.i.l.bf16 %v7276_v16  ;;  %v7278_v0 = vunpack.i.h.bf16 %v7276_v16  ;;  %v7175_v51 = vunpack.i.l.bf16 %v7174_v5 }
 0x3d3   : > { %v2551_v45 = vpop.permute.xlu1 %2550  ;;  %v2547_v10 = vpop.permute.xlu0 %2546  ;;  %v7176_v63 = vunpack.i.h.bf16 %v7174_v5  ;;  %v7194_v4 = vmax.f32 %v7192_v46, %v7193_v2  ;;  %v7228_v21 = vmax.f32 %v7226_v59, %v7227_v39  ;;  %v7097_v11 = vrot.slane %v16980_v61, 1 }
 0x3d4   : > { %v5851_v57 = vmul.bf16 %v12416_v32, %v2547_v10  ;;  %v5852_v43 = vmul.bf16 %v12426_v33, %v2551_v45  ;;  %v7245_v7 = vmax.f32 %v7243_v42, %v7244_v49  ;;  %v7160_v9 = vmax.f32 %v7158_v53, %v7159_v54 }
 0x3d5   : > { %2809 = vbcast.lane.c.b16.xlu1 %v12727_v20, 336  ;;  %2805 = vbcast.lane.c.b16.xlu0 %v12727_v20, 320  ;;  %v7212_v13 = vrot.slane %v7211_v26, 4  ;;  %v7262_v3 = vmax.f32 %v7260_v17, %v7261_v23  ;;  %v16982_v50 = vrot.slane %v16981_v12, 4  ;;  %v7279_v38 = vmax.f32 %v7277_v8, %v7278_v0 }
 0x3d6   : > { %v7288_v41 = vmax.bf16 %v7287_v62, %v5851_v57  ;;  %v7127_v1 = vrot.slane %v16983_v15, 4  ;;  %v7177_v58 = vmax.f32 %v7175_v51, %v7176_v63  ;;  %v7195_v5 = vrot.slane %v7194_v4, 4 }
 0x3d7   : > { %v2559_v44 = vpop.permute.xlu1 %2558  ;;  %v2555_v56 = vpop.permute.xlu0 %2554  ;;  %v7111_v10 = vmax.f32 %v16981_v12, %v16982_v50  ;;  %v7229_v48 = vrot.slane %v7228_v21, 4  ;;  %v7213_v46 = vmax.f32 %v7211_v26, %v7212_v13  ;;  %v7263_v2 = vrot.slane %v7262_v3, 4 }
 0x3d8   : > { %v5853_v36 = vmul.bf16 %v12434_v18, %v2555_v56  ;;  %v7289_v27 = vmax.bf16 %v7288_v41, %v5852_v43  ;;  %v5854_v40 = vmul.bf16 %v12450_v47, %v2559_v44  ;;  %v7161_v44 = vrot.slane %v7160_v9, 4 }
 0x3d9   : > { %2817 = vbcast.lane.c.b16.xlu1 %v12727_v20, 368  ;;  %2813 = vbcast.lane.c.b16.xlu0 %v12727_v20, 352  ;;  %v7143_v20 = vmax.f32 %v7141_v14, %v7142_v34  ;;  %v7246_v34 = vrot.slane %v7245_v7, 4  ;;  %v7112_v59 = vrot.slane %v7111_v10, 2  ;;  %v7280_v39 = vrot.slane %v7279_v38, 4 }
 0x3da   : > { %v7290_v35 = vmax.bf16 %v7289_v27, %v5853_v36  ;;  %v7128_v36 = vmax.f32 %v16983_v15, %v7127_v1  ;;  %v7178_v27 = vrot.slane %v7177_v58, 4  ;;  %v7196_v54 = vmax.f32 %v7194_v4, %v7195_v5 }
 0x3db   : > { %v2567_v19 = vpop.permute.xlu1 %2566  ;;  %v2563_v24 = vpop.permute.xlu0 %2562  ;;  %v7144_v41 = vrot.slane %v7143_v20, 4  ;;  %v7281_v51 = vmax.f32 %v7279_v38, %v7280_v39  ;;  %v7113_v50 = vmax.f32 %v7111_v10, %v7112_v59 }
 0x3dc   : > { %v5855_v29 = vmul.bf16 %v12458_v30, %v2563_v24  ;;  %v7291_v45 = vmax.bf16 %v7290_v35, %v5854_v40  ;;  %v5856_v60 = vmul.bf16 %v12476_v6, %v2567_v19  ;;  %v7162_v40 = vmax.f32 %v7160_v9, %v7161_v44 }
 0x3dd   : > { %2828 = vbcast.lane.c.b16.xlu1 %v12788_v28, 272  ;;  %2824 = vbcast.lane.c.b16.xlu0 %v12788_v28, 256  ;;  %v7145_v26 = vmax.f32 %v7143_v20, %v7144_v41  ;;  %v7214_v35 = vrot.slane %v7213_v46, 2  ;;  %v7264_v19 = vmax.f32 %v7262_v3, %v7263_v2  ;;  %v7129_v38 = vrot.slane %v7128_v36, 2 }
 0x3de   : > { %v7292_v62 = vmax.bf16 %v7291_v45, %v5855_v29  ;;  %v7179_v29 = vmax.f32 %v7177_v58, %v7178_v27  ;;  %v7163_v5 = vrot.slane %v7162_v40, 2  ;;  %v7114_v41 = vrot.slane %v7113_v50, 1 }
 0x3df   : > { %v2578_v57 = vpop.permute.xlu1 %2577  ;;  %v2574_v14 = vpop.permute.xlu0 %2573 }
 0x3e0   : > { %v7293_v53 = vmax.bf16 %v7292_v62, %v5856_v60  ;;  %v5858_v16 = vmul.bf16 %v12404_v55, %v2578_v57  ;;  %v5857_v43 = vmul.bf16 %v12408_v25, %v2574_v14  ;;  %v7230_v55 = vmax.f32 %v7228_v21, %v7229_v48 }
 0x3e1   : > { %2836 = vbcast.lane.c.b16.xlu1 %v12788_v28, 304  ;;  %2832 = vbcast.lane.c.b16.xlu0 %v12788_v28, 288  ;;  %v7247_v25 = vmax.f32 %v7245_v7, %v7246_v34  ;;  %v7197_v7 = vrot.slane %v7196_v54, 2  ;;  %v7265_v60 = vrot.slane %v7264_v19, 2  ;;  %v7215_v62 = vmax.f32 %v7213_v46, %v7214_v35 }
 0x3e2   : > { %v7294_v56 = vunpack.i.l.bf16 %v7293_v53  ;;  %v7295_v42 = vunpack.i.h.bf16 %v7293_v53  ;;  %v7304_v8 = vmax.bf16 %v5858_v16, %v5857_v43  ;;  %v7231_v45 = vrot.slane %v7230_v55, 2 }
 0x3e3   : > { %v2586_v49 = vpop.permute.xlu1 %2585  ;;  %v2582_v17 = vpop.permute.xlu0 %2581  ;;  %v7248_v20 = vrot.slane %v7247_v25, 2  ;;  %v7282_v57 = vrot.slane %v7281_v51, 2  ;;  %v7180_v48 = vrot.slane %v7179_v29, 2  ;;  %v7198_v53 = vmax.f32 %v7196_v54, %v7197_v7 }
 0x3e4   : > { %v7296_v23 = vmax.f32 %v7294_v56, %v7295_v42  ;;  %v5859_v0 = vmul.bf16 %v12416_v32, %v2582_v17  ;;  %v5860_v24 = vmul.bf16 %v12426_v33, %v2586_v49  ;;  %v12820_v32 = vrot.slane %v12472_v31, %v16978_v52 }
 0x3e5   : > { %2844 = vbcast.lane.c.b16.xlu1 %v12788_v28, 336  ;;  %2840 = vbcast.lane.c.b16.xlu0 %v12788_v28, 320  ;;  %v7146_v33 = vrot.slane %v7145_v26, 2  ;;  %v7232_v14 = vmax.f32 %v7230_v55, %v7231_v45  ;;  %v7249_v16 = vmax.f32 %v7247_v25, %v7248_v20  ;;  %v7266_v46 = vmax.f32 %v7264_v19, %v7265_v60 }
 0x3e6   : > { %v7297_v63 = vrot.slane %v7296_v23, 4  ;;  %v7305_v4 = vmax.bf16 %v7304_v8, %v5859_v0  ;;  %v7283_v2 = vmax.f32 %v7281_v51, %v7282_v57  ;;  %v7164_v42 = vmax.f32 %v7162_v40, %v7163_v5 }
 0x3e7   : > { %v2594_v21 = vpop.permute.xlu1 %2593  ;;  %v2590_v13 = vpop.permute.xlu0 %2589  ;;  %v7147_v44 = vmax.f32 %v7145_v26, %v7146_v33  ;;  %v7181_v49 = vmax.f32 %v7179_v29, %v7180_v48  ;;  %v7233_v27 = vrot.slane %v7232_v14, 1  ;;  %v7199_v55 = vrot.slane %v7198_v53, 1 }
 0x3e8   : > { %v7298_v9 = vmax.f32 %v7296_v23, %v7297_v63  ;;  %v5861_v3 = vmul.bf16 %v12434_v18, %v2590_v13  ;;  %v7306_v12 = vmax.bf16 %v7305_v4, %v5860_v24  ;;  %v5862_v15 = vmul.bf16 %v12450_v47, %v2594_v21  ;;  %v16984_v21 = vld [vmem:[#allocation67_spill] sm:$0xff] }
 0x3e9   : > { %2852 = vbcast.lane.c.b16.xlu1 %v12788_v28, 368  ;;  %2848 = vbcast.lane.c.b16.xlu0 %v12788_v28, 352  ;;  %v7130_v28 = vmax.f32 %v7128_v36, %v7129_v38  ;;  %v7216_v47 = vrot.slane %v7215_v62, 1  ;;  %v7098_v36 = vmax.f32 %v16980_v61, %v7097_v11  ;;  %v7250_v17 = vrot.slane %v7249_v16, 1 }
 0x3ea   : > { %v7307_v1 = vmax.bf16 %v7306_v12, %v5861_v3  ;;  %v7299_v34 = vrot.slane %v7298_v9, 2  ;;  %v7115_v23 = vmax.f32 %v7113_v50, %v7114_v41  ;;  %v7148_v8 = vrot.slane %v7147_v44, 1 }
 0x3eb   : > { %v2602_v58 = vpop.permute.xlu1 %2601  ;;  %v2598_v18 = vpop.permute.xlu0 %2597  ;;  %v7267_v0 = vrot.slane %v7266_v46, 1  ;;  %v7217_v26 = vmax.f32 %v7215_v62, %v7216_v47  ;;  %v7284_v40 = vrot.slane %v7283_v2, 1  ;;  %v7165_v63 = vrot.slane %v7164_v42, 1 }
 0x3ec   : > { %v5863_v10 = vmul.bf16 %v12458_v30, %v2598_v18  ;;  %v7308_v43 = vmax.bf16 %v7307_v1, %v5862_v15  ;;  %v5864_v59 = vmul.bf16 %v12476_v6, %v2602_v58  ;;  %v7300_v30 = vmax.f32 %v7298_v9, %v7299_v34  ;;  %v16985_v18 = vld [vmem:[#allocation31_spill] sm:$0xff] }
 0x3ed   : > { %2863 = vbcast.lane.c.b16.xlu1 %v12820_v32, 272  ;;  %2859 = vbcast.lane.c.b16.xlu0 %v12820_v32, 256  ;;  %v7131_v6 = vrot.slane %v7130_v28, 1  ;;  %v7234_v24 = vmax.f32 %v7232_v14, %v7233_v27  ;;  %v7182_v4 = vrot.slane %v7181_v49, 1  ;;  %v7082_v29 = vpack.i.bf16 %v16984_v21, %v16984_v21 }
 0x3ee   : > { %v7309_v39 = vmax.bf16 %v7308_v43, %v5863_v10  ;;  %v7301_v61 = vrot.slane %v7300_v30, 1  ;;  %v7200_v7 = vmax.f32 %v7198_v53, %v7199_v55  ;;  %v7251_v45 = vmax.f32 %v7249_v16, %v7250_v17 }
 0x3ef   : > { %v12830_v56 = vpop.permute.xlu1 %2615  ;;  %v12832_v54 = vpop.permute.xlu0 %2611  ;;  %v7099_v20 = vpack.i.bf16 %v7098_v36, %v7098_v36  ;;  %v7116_v9 = vpack.i.bf16 %v7115_v23, %v7115_v23  ;;  %v7132_v3 = vmax.f32 %v7130_v28, %v7131_v6  ;;  %v7268_v12 = vmax.f32 %v7266_v46, %v7267_v0 }
 0x3f0   : > { %v7310_v25 = vmax.bf16 %v7309_v39, %v5864_v59  ;;  %v7149_v50 = vmax.f32 %v7147_v44, %v7148_v8  ;;  %v7218_v38 = vpack.i.bf16 %v7217_v26, %v7217_v26  ;;  %v7285_v33 = vmax.f32 %v7283_v2, %v7284_v40 }
 0x3f1   : > { %2871 = vbcast.lane.c.b16.xlu1 %v12820_v32, 304  ;;  %2867 = vbcast.lane.c.b16.xlu0 %v12820_v32, 288  ;;  %v7235_v57 = vpack.i.bf16 %v7234_v24, %v7234_v24  ;;  %v7166_v1 = vmax.f32 %v7164_v42, %v7165_v63  ;;  %v7183_v58 = vmax.f32 %v7181_v49, %v7182_v4  ;;  %v16986_v16 = vmov 0  }
 0x3f2   : > { %v7311_v35 = vunpack.i.l.bf16 %v7310_v25  ;;  %v7312_v19 = vunpack.i.h.bf16 %v7310_v25  ;;  %v7302_v5 = vmax.f32 %v7300_v30, %v7301_v61  ;;  %v7201_v48 = vpack.i.bf16 %v7200_v7, %v7200_v7 }
 0x3f3   : > { %v12839_v51 = vpop.permute.xlu1 %2623  ;;  %v12841_v11 = vpop.permute.xlu0 %2619  ;;  %v7252_v14 = vpack.i.bf16 %v7251_v45, %v7251_v45  ;;  %v12854_v53 = vrot.slane %v16979_v37, %v16985_v18  ;;  %v8714_v10 = vmax.bf16 %v16986_v16, %v7082_v29  ;;  %v8715_v43 = vmax.bf16 %v16986_v16, %v7099_v20 }
 0x3f4   : > { %v7313_v13 = vmax.f32 %v7311_v35, %v7312_v19  ;;  %v7133_v41 = vpack.i.bf16 %v7132_v3, %v7132_v3  ;;  %v7269_v28 = vpack.i.bf16 %v7268_v12, %v7268_v12  ;;  %v7150_v44 = vpack.i.bf16 %v7149_v50, %v7149_v50  ;;  %v16987_v3 = vld [vmem:[#allocation41_spill] sm:$0xff] }
 0x3f5   : > { %2879 = vbcast.lane.c.b16.xlu1 %v12820_v32, 336  ;;  %2875 = vbcast.lane.c.b16.xlu0 %v12820_v32, 320  ;;  %v8722_v46 = vmax.bf16 %v16986_v16, %v7218_v38  ;;  %v7286_v47 = vpack.i.bf16 %v7285_v33, %v7285_v33  ;;  %v8716_v39 = vmax.bf16 %v16986_v16, %v7116_v9  ;;  %v9004_v25 = vunpack.c.l.b16 %v8714_v10 }
 0x3f6   : > { %v7314_v60 = vrot.slane %v7313_v13, 4  ;;  %v8723_v42 = vmax.bf16 %v16986_v16, %v7235_v57  ;;  %v7167_v27 = vpack.i.bf16 %v7166_v1, %v7166_v1  ;;  %v7303_v30 = vpack.i.bf16 %v7302_v5, %v7302_v5 }
 0x3f7   : > { %v12847_v62 = vpop.permute.xlu1 %2631  ;;  %v12849_v15 = vpop.permute.xlu0 %2627  ;;  %v8721_v36 = vmax.bf16 %v16986_v16, %v7201_v48  ;;  %v8724_v55 = vmax.bf16 %v16986_v16, %v7252_v14  ;;  %v7184_v17 = vpack.i.bf16 %v7183_v58, %v7183_v58  ;;  %v9005_v23 = vunpack.c.l.b16 %v8715_v43 }
 0x3f8   : > { %v7315_v34 = vmax.f32 %v7313_v13, %v7314_v60  ;;  %v8717_v6 = vmax.bf16 %v16986_v16, %v7133_v41  ;;  %v8725_v8 = vmax.bf16 %v16986_v16, %v7269_v28  ;;  %v9012_v0 = vunpack.c.l.b16 %v8722_v46 }
 0x3f9   : > { %2887 = vbcast.lane.c.b16.xlu1 %v12820_v32, 368  ;;  %2883 = vbcast.lane.c.b16.xlu0 %v12820_v32, 352  ;;  %v8718_v35 = vmax.bf16 %v16986_v16, %v7150_v44  ;;  %v8726_v19 = vmax.bf16 %v16986_v16, %v7286_v47  ;;  %v9013_v63 = vunpack.c.l.b16 %v8723_v42  ;;  %v8719_v61 = vmax.bf16 %v16986_v16, %v7167_v27 }
 0x3fa   : > { %v7316_v2 = vrot.slane %v7315_v34, 2  ;;  %v8727_v4 = vmax.bf16 %v16986_v16, %v7303_v30  ;;  %v9006_v21 = vunpack.c.l.b16 %v8716_v39  ;;  %v9011_v29 = vunpack.c.l.b16 %v8721_v36 }
 0x3fb   : > { %v12860_v59 = vpop.permute.xlu1 %2639  ;;  %v12864_v49 = vpop.permute.xlu0 %2635  ;;  %v8720_v45 = vmax.bf16 %v16986_v16, %v7184_v17  ;;  %v9014_v13 = vunpack.c.l.b16 %v8724_v55  ;;  %v9007_v20 = vunpack.c.l.b16 %v8717_v6  ;;  %v9015_v9 = vunpack.c.l.b16 %v8725_v8 }
 0x3fc   : > { %v7317_v32 = vmax.f32 %v7315_v34, %v7316_v2  ;;  %v16988_v12 = vunpack.c.l.b16 %v16987_v3  ;;  %v9008_v60 = vunpack.c.l.b16 %v8718_v35  ;;  %v9016_v57 = vunpack.c.l.b16 %v8726_v19 }
 0x3fd   : > { %2898 = vbcast.lane.c.b16.xlu1 %v12854_v53, 272  ;;  %2894 = vbcast.lane.c.b16.xlu0 %v12854_v53, 256  ;;  %v9141_v1 = vsel %vm9099_vm0, %v9012_v0, %v9011_v29  ;;  %v9009_v5 = vunpack.c.l.b16 %v8719_v61  ;;  %v9017_v48 = vunpack.c.l.b16 %v8727_v4  ;;  %v9010_v43 = vunpack.c.l.b16 %v8720_v45 }
 0x3fe   : > { %v7318_v40 = vrot.slane %v7317_v32, 1  ;;  %v9134_v50 = vsel %vm9099_vm0, %v9004_v25, %v16988_v12  ;;  %v9142_v34 = vsel %vm9101_vm1, %v9013_v63, %v9141_v1  ;;  %v2927_v17 = vrot.slane %v12472_v31, %v16985_v18  ;;  %v16989_v63 = vld [vmem:[#allocation38_spill] sm:$0xff] }
 0x3ff   : > { %v12872_v26 = vpop.permute.xlu1 %2653  ;;  %v12876_v24 = vpop.permute.xlu0 %2649  ;;  %v9135_v14 = vsel %vm9101_vm1, %v9005_v23, %v9134_v50  ;;  %v9143_v28 = vsel %vm9103_vm2, %v9014_v13, %v9142_v34  ;;  %v2962_v61 = vrot.slane %v16979_v37, %v16989_v63  ;;  %v2997_v3 = vrot.slane %v12472_v31, %v16989_v63 }
 0x400   : > { %v7319_v7 = vmax.f32 %v7317_v32, %v7318_v40  ;;  %v9136_v41 = vsel %vm9103_vm2, %v9006_v21, %v9135_v14  ;;  %v9144_v46 = vsel %vm9105_vm3, %v9015_v9, %v9143_v28  ;;  %v16990_v14 = vld [vmem:[#allocation45_spill] sm:$0xff] }
 0x401   : > { %2906 = vbcast.lane.c.b16.xlu1 %v12854_v53, 304  ;;  %2902 = vbcast.lane.c.b16.xlu0 %v12854_v53, 288  ;;  %v9137_v44 = vsel %vm9105_vm3, %v9007_v20, %v9136_v41  ;;  %v9145_v42 = vsel %vm9107_vm4, %v9016_v57, %v9144_v46  ;;  %v3032_v34 = vrot.slane %v16979_v37, %v16990_v14 }
 0x402   : > { %v7320_v33 = vpack.i.bf16 %v7319_v7, %v7319_v7  ;;  %v9138_v39 = vsel %vm9107_vm4, %v9008_v60, %v9137_v44  ;;  %v9146_v36 = vsel %vm9109_vm5, %v9017_v48, %v9145_v42  ;;  %v3067_v42 = vrot.slane %v12472_v31, %v16990_v14 }
 0x403   : > { %v12886_v38 = vpop.permute.xlu1 %2661  ;;  %v12889_v58 = vpop.permute.xlu0 %2657  ;;  %v9139_v30 = vsel %vm9109_vm5, %v9009_v5, %v9138_v39 }
 0x404   : > { %v8728_v10 = vmax.bf16 %v16986_v16, %v7320_v33  ;;  %v9140_v55 = vsel %vm9111_vm6, %v9010_v43, %v9139_v30 }
 0x405   : > { %2914 = vbcast.lane.c.b16.xlu1 %v12854_v53, 336  ;;  %2910 = vbcast.lane.c.b16.xlu0 %v12854_v53, 320 }
 0x406   : > { %v9018_v2 = vunpack.c.l.b16 %v8728_v10 }
 0x407   : > { %v12900_v47 = vpop.permute.xlu1 %2669  ;;  %v12904_v27 = vpop.permute.xlu0 %2665 }
 0x408   : > { %v9147_v32 = vsel %vm9111_vm6, %v9018_v2, %v9146_v36 }
 0x409   : > { %2922 = vbcast.lane.c.b16.xlu1 %v12854_v53, 368  ;;  %2918 = vbcast.lane.c.b16.xlu0 %v12854_v53, 352  ;;  %v9220_v25 = vpack.c.b16 %v9147_v32, %v9140_v55 }
 0x40b   : > { %v12914_v23 = vpop.permute.xlu1 %2677  ;;  %v12916_v6 = vpop.permute.xlu0 %2673  ;;  %10085 = vmatprep.mubr.bf16.mxu1 %v9220_v25 }
 0x40d   : > { %2933 = vbcast.lane.c.b16.xlu1 %v2927_v17, 272  ;;  %2929 = vbcast.lane.c.b16.xlu0 %v2927_v17, 256 }
 0x40f   : > { %v12918_v8 = vpop.permute.xlu1 %2688  ;;  %v12920_v0 = vpop.permute.xlu0 %2684 }
 0x411   : > { %2941 = vbcast.lane.c.b16.xlu1 %v2927_v17, 304  ;;  %2937 = vbcast.lane.c.b16.xlu0 %v2927_v17, 288 }
 0x413   : > { %v12922_v40 = vpop.permute.xlu1 %2696  ;;  %v12924_v35 = vpop.permute.xlu0 %2692 }
 0x415   : > { %2949 = vbcast.lane.c.b16.xlu1 %v2927_v17, 336  ;;  %2945 = vbcast.lane.c.b16.xlu0 %v2927_v17, 320 }
 0x417   : > { %v12926_v53 = vpop.permute.xlu1 %2704  ;;  %v12928_v19 = vpop.permute.xlu0 %2700 }
 0x419   : > { %2957 = vbcast.lane.c.b16.xlu1 %v2927_v17, 368  ;;  %2953 = vbcast.lane.c.b16.xlu0 %v2927_v17, 352 }
 0x41b   : > { %v12932_v4 = vpop.permute.xlu1 %2712  ;;  %v12934_v21 = vpop.permute.xlu0 %2708 }
 0x41d   : > { %2968 = vbcast.lane.c.b16.xlu1 %v2962_v61, 272  ;;  %2964 = vbcast.lane.c.b16.xlu0 %v2962_v61, 256 }
 0x41f   : > { %v12936_v29 = vpop.permute.xlu1 %2723  ;;  %v12938_v7 = vpop.permute.xlu0 %2719 }
 0x421   : > { %2976 = vbcast.lane.c.b16.xlu1 %v2962_v61, 304  ;;  %2972 = vbcast.lane.c.b16.xlu0 %v2962_v61, 288 }
 0x423   : > { %v12940_v45 = vpop.permute.xlu1 %2731  ;;  %v12942_v13 = vpop.permute.xlu0 %2727 }
 0x425   : > { %2984 = vbcast.lane.c.b16.xlu1 %v2962_v61, 336  ;;  %2980 = vbcast.lane.c.b16.xlu0 %v2962_v61, 320 }
 0x427   : > { %v12944_v20 = vpop.permute.xlu1 %2739  ;;  %v12946_v9 = vpop.permute.xlu0 %2735 }
 0x429   : > { %2992 = vbcast.lane.c.b16.xlu1 %v2962_v61, 368  ;;  %2988 = vbcast.lane.c.b16.xlu0 %v2962_v61, 352 }
 0x42b   : > { %v12950_v12 = vpop.permute.xlu1 %2747  ;;  %v12952_v50 = vpop.permute.xlu0 %2743 }
 0x42d   : > { %3003 = vbcast.lane.c.b16.xlu1 %v2997_v3, 272  ;;  %2999 = vbcast.lane.c.b16.xlu0 %v2997_v3, 256 }
 0x42f   : > { %v12954_v33 = vpop.permute.xlu1 %2758  ;;  %v12956_v60 = vpop.permute.xlu0 %2754 }
 0x431   : > { %3011 = vbcast.lane.c.b16.xlu1 %v2997_v3, 304  ;;  %3007 = vbcast.lane.c.b16.xlu0 %v2997_v3, 288 }
 0x433   : > { %v12958_v57 = vpop.permute.xlu1 %2766  ;;  %v12960_v1 = vpop.permute.xlu0 %2762 }
 0x435   : > { %3019 = vbcast.lane.c.b16.xlu1 %v2997_v3, 336  ;;  %3015 = vbcast.lane.c.b16.xlu0 %v2997_v3, 320 }
 0x437   : > { %v12962_v5 = vpop.permute.xlu1 %2774  ;;  %v12964_v48 = vpop.permute.xlu0 %2770 }
 0x439   : > { %3027 = vbcast.lane.c.b16.xlu1 %v2997_v3, 368  ;;  %3023 = vbcast.lane.c.b16.xlu0 %v2997_v3, 352 }
 0x43b   : > { %v12968_v10 = vpop.permute.xlu1 %2782  ;;  %v12970_v43 = vpop.permute.xlu0 %2778 }
 0x43c   : > { %16991 = vst [vmem:[#allocation55_spill] sm:$0xff] %v12968_v10 }
 0x43d   : > { %3038 = vbcast.lane.c.b16.xlu1 %v3032_v34, 272  ;;  %3034 = vbcast.lane.c.b16.xlu0 %v3032_v34, 256 }
 0x43f   : > { %v12972_v41 = vpop.permute.xlu1 %2793  ;;  %v12974_v28 = vpop.permute.xlu0 %2789 }
 0x441   : > { %3046 = vbcast.lane.c.b16.xlu1 %v3032_v34, 304  ;;  %3042 = vbcast.lane.c.b16.xlu0 %v3032_v34, 288 }
 0x443   : > { %v12976_v44 = vpop.permute.xlu1 %2801  ;;  %v12978_v46 = vpop.permute.xlu0 %2797 }
 0x445   : > { %3054 = vbcast.lane.c.b16.xlu1 %v3032_v34, 336  ;;  %3050 = vbcast.lane.c.b16.xlu0 %v3032_v34, 320 }
 0x447   : > { %v12980_v2 = vpop.permute.xlu1 %2809  ;;  %v12982_v39 = vpop.permute.xlu0 %2805 }
 0x448   : > { %16992 = vst [vmem:[#allocation63_spill] sm:$0xff] %v12980_v2  ;;  %v13080_v2 = vld [vmem:[#allocation3 + $0x30] sm:$0xff]  }
 0x449   : > { %3062 = vbcast.lane.c.b16.xlu1 %v3032_v34, 368  ;;  %3058 = vbcast.lane.c.b16.xlu0 %v3032_v34, 352  ;;  %v16998_v34 = vld [vmem:[#allocation54_spill] sm:$0xff] }
 0x44a   : > { %v3102_v14 = vrot.slane %v16979_v37, %v16998_v34 }
 0x44b   : > { %v12986_v30 = vpop.permute.xlu1 %2817  ;;  %v12988_v36 = vpop.permute.xlu0 %2813 }
 0x44c   : > { %16993 = vst [vmem:[#allocation76_spill] sm:$0xff] %v12986_v30  ;;  %16994 = vst [vmem:[#allocation44_spill] sm:$0xff] %v12988_v36  ;;  %v13056_v36 = vld [vmem:[#allocation3 + $0x20] sm:$0xff]  }
 0x44d   : > { %3073 = vbcast.lane.c.b16.xlu1 %v3067_v42, 272  ;;  %3069 = vbcast.lane.c.b16.xlu0 %v3067_v42, 256 }
 0x44f   : > { %v12990_v55 = vpop.permute.xlu1 %2828  ;;  %v12992_v32 = vpop.permute.xlu0 %2824 }
 0x451   : > { %3081 = vbcast.lane.c.b16.xlu1 %v3067_v42, 304  ;;  %3077 = vbcast.lane.c.b16.xlu0 %v3067_v42, 288 }
 0x453   : > { %v12994_v17 = vpop.permute.xlu1 %2836  ;;  %v12996_v25 = vpop.permute.xlu0 %2832 }
 0x454   : > { %16995 = vst [vmem:[#allocation90_spill] sm:$0xff] %v12994_v17 }
 0x455   : > { %3089 = vbcast.lane.c.b16.xlu1 %v3067_v42, 336  ;;  %3085 = vbcast.lane.c.b16.xlu0 %v3067_v42, 320 }
 0x457   : > { %v12998_v61 = vpop.permute.xlu1 %2844  ;;  %v13000_v3 = vpop.permute.xlu0 %2840 }
 0x458   : > { %16996 = vst [vmem:[#allocation40_spill] sm:$0xff] %v12998_v61  ;;  %16997 = vst [vmem:[#allocation33_spill] sm:$0xff] %v13000_v3 }
 0x459   : > { %3097 = vbcast.lane.c.b16.xlu1 %v3067_v42, 368  ;;  %3093 = vbcast.lane.c.b16.xlu0 %v3067_v42, 352 }
 0x45b   : > { %v13004_v63 = vpop.permute.xlu1 %2852  ;;  %v13006_v18 = vpop.permute.xlu0 %2848 }
 0x45c   : > { %16999 = vst [vmem:[#allocation43_spill] sm:$0xff] %v13004_v63  ;;  %17000 = vst [vmem:[#allocation36_spill] sm:$0xff] %v13006_v18  ;;  %v3137_v18 = vrot.slane %v12472_v31, %v16998_v34 }
 0x45d   : > { %3108 = vbcast.lane.c.b16.xlu1 %v3102_v14, 272  ;;  %3104 = vbcast.lane.c.b16.xlu0 %v3102_v14, 256 }
 0x45f   : > { %v13008_v52 = vpop.permute.xlu1 %2863  ;;  %v13010_v22 = vpop.permute.xlu0 %2859 }
 0x460   : > { %17001 = vst [vmem:[#allocation85_spill] sm:$0xff] %v13008_v52  ;;  %17002 = vst [vmem:[#allocation48_spill] sm:$0xff] %v13010_v22  ;;  %v13030_v52 = vld [vmem:[#allocation3] sm:$0xff]  }
 0x461   : > { %3116 = vbcast.lane.c.b16.xlu1 %v3102_v14, 304  ;;  %3112 = vbcast.lane.c.b16.xlu0 %v3102_v14, 288 }
 0x463   : > { %v13012_v61 = vpop.permute.xlu1 %2871  ;;  %v13014_v30 = vpop.permute.xlu0 %2867 }
 0x464   : > { %17003 = vst [vmem:[#allocation52_spill] sm:$0xff] %v13012_v61  ;;  %17004 = vst [vmem:[#allocation66_spill] sm:$0xff] %v13014_v30  ;;  %v13026_v61 = vld [vmem:[#allocation3 + $0x8] sm:$0xff]  }
 0x465   : > { %3124 = vbcast.lane.c.b16.xlu1 %v3102_v14, 336  ;;  %3120 = vbcast.lane.c.b16.xlu0 %v3102_v14, 320  ;;  %v5866_v30 = vmul.bf16 %v13026_v61, %v12830_v56 }
 0x467   : > { %v13016_v37 = vpop.permute.xlu1 %2879  ;;  %v13018_v42 = vpop.permute.xlu0 %2875 }
 0x468   : > { %17005 = vst [vmem:[#allocation75_spill] sm:$0xff] %v13016_v37  ;;  %17006 = vst [vmem:[#allocation91_spill] sm:$0xff] %v13018_v42  ;;  %v5865_v37 = vmul.bf16 %v13030_v52, %v12832_v54 }
 0x469   : > { %3132 = vbcast.lane.c.b16.xlu1 %v3102_v14, 368  ;;  %3128 = vbcast.lane.c.b16.xlu0 %v3102_v14, 352  ;;  %v13038_v14 = vld [vmem:[#allocation3 + $0x10] sm:$0xff]  }
 0x46a   : > { %v5867_v34 = vmul.bf16 %v13038_v14, %v12841_v11 }
 0x46b   : > { %v13022_v63 = vpop.permute.xlu1 %2887  ;;  %v13024_v22 = vpop.permute.xlu0 %2883 }
 0x46c   : > { %17007 = vst [vmem:[#allocation58_spill] sm:$0xff] %v13022_v63  ;;  %17008 = vst [vmem:[#allocation88_spill] sm:$0xff] %v13024_v22  ;;  %v10234_v63 = vld [vmem:[#allocation6 + $0x20] sm:$0xff]   ;;  %v7321_v22 = vmax.bf16 %v5866_v30, %v5865_v37  ;;  %v5869_v30 = vmul.bf16 %v13056_v36, %v12849_v15  ;;  %v5875_v15 = vmul.bf16 %v13038_v14, %v12889_v58 }
 0x46d   : > { %3143 = vbcast.lane.c.b16.xlu1 %v3137_v18, 272  ;;  %3139 = vbcast.lane.c.b16.xlu0 %v3137_v18, 256  ;;  %v13046_v54 = vpack.i.b16 %v10234_v63, %v10234_v63 }
 0x46e   : > { %v7322_v17 = vmax.bf16 %v7321_v22, %v5867_v34  ;;  %v17016_v22 = vld [vmem:[#allocation27_spill] sm:$0xff] }
 0x46f   : > { %v13034_v42 = vpop.permute.xlu1 %2898  ;;  %v13036_v31 = vpop.permute.xlu0 %2894  ;;  %17013 = vst [vmem:[#allocation34_spill] sm:$0xff] %v13046_v54  ;;  %v3175_v34 = vrot.slane %v13046_v54, %v17016_v22 }
 0x470   : > { %17009 = vst [vmem:[#allocation47_spill] sm:$0xff] %v13034_v42  ;;  %17010 = vst [vmem:[#allocation81_spill] sm:$0xff] %v13036_v31  ;;  %v13048_v42 = vld [vmem:[#allocation3 + $0x18] sm:$0xff]  }
 0x471   : > { %3151 = vbcast.lane.c.b16.xlu1 %v3137_v18, 304  ;;  %3147 = vbcast.lane.c.b16.xlu0 %v3137_v18, 288  ;;  %v5868_v31 = vmul.bf16 %v13048_v42, %v12839_v51  ;;  %v5874_v51 = vmul.bf16 %v13026_v61, %v12872_v26 }
 0x473   : > { %v13042_v3 = vpop.permute.xlu1 %2906  ;;  %v13044_v56 = vpop.permute.xlu0 %2902  ;;  %v7323_v37 = vmax.bf16 %v7322_v17, %v5868_v31  ;;  %v13072_v17 = vld [vmem:[#allocation3 + $0x28] sm:$0xff]  }
 0x474   : > { %17011 = vst [vmem:[#allocation59_spill] sm:$0xff] %v13042_v3  ;;  %17012 = vst [vmem:[#allocation51_spill] sm:$0xff] %v13044_v56 }
 0x475   : > { %3159 = vbcast.lane.c.b16.xlu1 %v3137_v18, 336  ;;  %3155 = vbcast.lane.c.b16.xlu0 %v3137_v18, 320  ;;  %v7324_v56 = vmax.bf16 %v7323_v37, %v5869_v30  ;;  %v3207_v37 = vshrl.u32 %v10234_v63, 16  ;;  %v5877_v63 = vmul.bf16 %v13056_v36, %v12904_v27 }
 0x477   : > { %v13052_v16 = vpop.permute.xlu1 %2914  ;;  %v13054_v11 = vpop.permute.xlu0 %2910 }
 0x478   : > { %17014 = vst [vmem:[#allocation84_spill] sm:$0xff] %v13052_v16  ;;  %17015 = vst [vmem:[#allocation79_spill] sm:$0xff] %v13054_v11  ;;  %v5873_v16 = vmul.bf16 %v13030_v52, %v12876_v24  ;;  %v5871_v24 = vmul.bf16 %v13080_v2, %v12864_v49  ;;  %v13094_v49 = vpack.i.b16 %v3207_v37, %v3207_v37 }
 0x479   : > { %3167 = vbcast.lane.c.b16.xlu1 %v3137_v18, 368  ;;  %3163 = vbcast.lane.c.b16.xlu0 %v3137_v18, 352  ;;  %v5870_v18 = vmul.bf16 %v13072_v17, %v12847_v62  ;;  %v5876_v62 = vmul.bf16 %v13048_v42, %v12886_v38 }
 0x47a   : > { %v3213_v27 = vrot.slane %v13094_v49, %v17016_v22  ;;  %v17042_v22 = vld [vmem:[#allocation43_spill] sm:$0xff] }
 0x47b   : > { %v13062_v3 = vpop.permute.xlu1 %2922  ;;  %v13068_v11 = vpop.permute.xlu0 %2918  ;;  %v7325_v30 = vmax.bf16 %v7324_v56, %v5870_v18  ;;  %v13098_v56 = vld [vmem:[#allocation3 + $0x38] sm:$0xff]  }
 0x47c   : > { %17017 = vst [vmem:[#allocation70_spill] sm:$0xff] %v13062_v3  ;;  %17018 = vst [vmem:[#allocation73_spill] sm:$0xff] %v13068_v11  ;;  %v7338_v3 = vmax.bf16 %v5874_v51, %v5873_v16  ;;  %v5882_v51 = vmul.bf16 %v13026_v61, %v12918_v8  ;;  %v5872_v38 = vmul.bf16 %v13098_v56, %v12860_v59 }
 0x47d   : > { %3181 = vbcast.lane.c.b16.xlu1 %v3175_v34, 272  ;;  %3177 = vbcast.lane.c.b16.xlu0 %v3175_v34, 256  ;;  %v7326_v16 = vmax.bf16 %v7325_v30, %v5871_v24  ;;  %v5878_v59 = vmul.bf16 %v13072_v17, %v12900_v47 }
 0x47e   : > { %v7339_v58 = vmax.bf16 %v7338_v3, %v5875_v15  ;;  %v5883_v15 = vmul.bf16 %v13038_v14, %v12924_v35 }
 0x47f   : > { %v13076_v31 = vpop.permute.xlu1 %2933  ;;  %v13078_v26 = vpop.permute.xlu0 %2929 }
 0x480   : > { %17019 = vst [vmem:[#allocation42_spill] sm:$0xff] %v13078_v26  ;;  %v5881_v26 = vmul.bf16 %v13030_v52, %v12920_v0  ;;  %v7340_v3 = vmax.bf16 %v7339_v58, %v5876_v62  ;;  %v7327_v0 = vmax.bf16 %v7326_v16, %v5872_v38  ;;  %v5884_v16 = vmul.bf16 %v13048_v42, %v12922_v40 }
 0x481   : > { %3189 = vbcast.lane.c.b16.xlu1 %v3175_v34, 304  ;;  %3185 = vbcast.lane.c.b16.xlu0 %v3175_v34, 288  ;;  %v5889_v40 = vmul.bf16 %v13030_v52, %v12938_v7 }
 0x482   : > { %v7355_v24 = vmax.bf16 %v5882_v51, %v5881_v26  ;;  %v7341_v30 = vmax.bf16 %v7340_v3, %v5877_v63  ;;  %v7328_v35 = vunpack.i.l.bf16 %v7327_v0  ;;  %v5879_v26 = vmul.bf16 %v13080_v2, %v12916_v6 }
 0x483   : > { %v13084_v11 = vpop.permute.xlu1 %2941  ;;  %v13088_v10 = vpop.permute.xlu0 %2937 }
 0x484   : > { %v7356_v37 = vmax.bf16 %v7355_v24, %v5883_v15  ;;  %v7342_v51 = vmax.bf16 %v7341_v30, %v5878_v59  ;;  %v5890_v15 = vmul.bf16 %v13026_v61, %v12936_v29  ;;  %v5891_v24 = vmul.bf16 %v13038_v14, %v12942_v13 }
 0x485   : > { %3197 = vbcast.lane.c.b16.xlu1 %v3175_v34, 336  ;;  %3193 = vbcast.lane.c.b16.xlu0 %v3175_v34, 320  ;;  %v5880_v30 = vmul.bf16 %v13098_v56, %v12914_v23  ;;  %v5886_v29 = vmul.bf16 %v13072_v17, %v12926_v53  ;;  %v5897_v13 = vmul.bf16 %v13030_v52, %v12956_v60 }
 0x486   : > { %v7357_v63 = vmax.bf16 %v7356_v37, %v5884_v16  ;;  %v7372_v59 = vmax.bf16 %v5890_v15, %v5889_v40  ;;  %v5887_v16 = vmul.bf16 %v13080_v2, %v12934_v21  ;;  %v5899_v53 = vmul.bf16 %v13038_v14, %v12960_v1  ;;  %v17021_v15 = vld [vmem:[#allocation28_spill] sm:$0xff] }
 0x487   : > { %v13104_v8 = vpop.permute.xlu1 %2949  ;;  %v13106_v18 = vpop.permute.xlu0 %2945  ;;  %v3248_v60 = vrot.slane %v13046_v54, %v17021_v15 }
 0x488   : > { %17020 = vst [vmem:[#allocation64_spill] sm:$0xff] %v13104_v8  ;;  %v7329_v8 = vunpack.i.h.bf16 %v7327_v0  ;;  %v7343_v0 = vmax.bf16 %v7342_v51, %v5879_v26  ;;  %v7373_v26 = vmax.bf16 %v7372_v59, %v5891_v24  ;;  %v5893_v24 = vmul.bf16 %v13056_v36, %v12946_v9 }
 0x489   : > { %3205 = vbcast.lane.c.b16.xlu1 %v3175_v34, 368  ;;  %3201 = vbcast.lane.c.b16.xlu0 %v3175_v34, 352  ;;  %v5885_v34 = vmul.bf16 %v13056_v36, %v12928_v19  ;;  %v5905_v9 = vmul.bf16 %v13030_v52, %v12974_v28 }
 0x48a   : > { %v7330_v38 = vmax.f32 %v7328_v35, %v7329_v8  ;;  %v7344_v7 = vmax.bf16 %v7343_v0, %v5880_v30  ;;  %v5898_v35 = vmul.bf16 %v13026_v61, %v12954_v33  ;;  %v5892_v33 = vmul.bf16 %v13048_v42, %v12940_v45 }
 0x48b   : > { %v13110_v58 = vpop.permute.xlu1 %2957  ;;  %v13114_v62 = vpop.permute.xlu0 %2953  ;;  %v7358_v6 = vmax.bf16 %v7357_v63, %v5885_v34  ;;  %v5888_v45 = vmul.bf16 %v13098_v56, %v12932_v4 }
 0x48c   : > { %v7331_v8 = vrot.slane %v7330_v38, 4  ;;  %v7345_v40 = vunpack.i.l.bf16 %v7344_v7  ;;  %v7346_v0 = vunpack.i.h.bf16 %v7344_v7  ;;  %v7389_v21 = vmax.bf16 %v5898_v35, %v5897_v13 }
 0x48d   : > { %3219 = vbcast.lane.c.b16.xlu1 %v3213_v27, 272  ;;  %3215 = vbcast.lane.c.b16.xlu0 %v3213_v27, 256  ;;  %v7359_v23 = vmax.bf16 %v7358_v6, %v5886_v29  ;;  %v7374_v30 = vmax.bf16 %v7373_v26, %v5892_v33  ;;  %v5900_v7 = vmul.bf16 %v13048_v42, %v12958_v57 }
 0x48e   : > { %v7332_v63 = vmax.f32 %v7330_v38, %v7331_v8  ;;  %v7390_v29 = vmax.bf16 %v7389_v21, %v5899_v53  ;;  %v7347_v59 = vmax.f32 %v7345_v40, %v7346_v0  ;;  %v5907_v26 = vmul.bf16 %v13038_v14, %v12978_v46 }
 0x48f   : > { %v13122_v3 = vpop.permute.xlu1 %2968  ;;  %v13124_v47 = vpop.permute.xlu0 %2964  ;;  %v7360_v6 = vmax.bf16 %v7359_v23, %v5887_v16  ;;  %v7375_v13 = vmax.bf16 %v7374_v30, %v5893_v24  ;;  %v5901_v23 = vmul.bf16 %v13056_v36, %v12964_v48  ;;  %v5894_v57 = vmul.bf16 %v13072_v17, %v12944_v20 }
 0x490   : > { %v7333_v8 = vrot.slane %v7332_v63, 2  ;;  %v7391_v4 = vmax.bf16 %v7390_v29, %v5900_v7  ;;  %v7348_v28 = vrot.slane %v7347_v59, 4  ;;  %v5895_v21 = vmul.bf16 %v13080_v2, %v12952_v50 }
 0x491   : > { %3227 = vbcast.lane.c.b16.xlu1 %v3213_v27, 304  ;;  %3223 = vbcast.lane.c.b16.xlu0 %v3213_v27, 288  ;;  %v7361_v35 = vmax.bf16 %v7360_v6, %v5888_v45  ;;  %v7376_v48 = vmax.bf16 %v7375_v13, %v5894_v57  ;;  %v5914_v57 = vmul.bf16 %v13026_v61, %v12990_v55  ;;  %v17023_v55 = vld [vmem:[#allocation63_spill] sm:$0xff] }
 0x492   : > { %v7392_v24 = vmax.bf16 %v7391_v4, %v5901_v23  ;;  %v7349_v20 = vmax.f32 %v7347_v59, %v7348_v28 }
 0x493   : > { %v13132_v19 = vpop.permute.xlu1 %2976  ;;  %v13136_v37 = vpop.permute.xlu0 %2972  ;;  %v7362_v40 = vunpack.i.l.bf16 %v7361_v35  ;;  %v7363_v0 = vunpack.i.h.bf16 %v7361_v35  ;;  %v7377_v7 = vmax.bf16 %v7376_v48, %v5895_v21  ;;  %v5909_v35 = vmul.bf16 %v13056_v36, %v12982_v39  ;;  %v17022_v21 = vld [vmem:[#allocation55_spill] sm:$0xff] }
 0x494   : > { %v7350_v4 = vrot.slane %v7349_v20, 2  ;;  %v5913_v39 = vmul.bf16 %v13030_v52, %v12992_v32  ;;  %v5904_v48 = vmul.bf16 %v13098_v56, %v17022_v21  ;;  %v17029_v21 = vld [vmem:[#allocation33_spill] sm:$0xff] }
 0x495   : > { %3235 = vbcast.lane.c.b16.xlu1 %v3213_v27, 336  ;;  %3231 = vbcast.lane.c.b16.xlu0 %v3213_v27, 320  ;;  %v7364_v45 = vmax.f32 %v7362_v40, %v7363_v0  ;;  %v5915_v0 = vmul.bf16 %v13038_v14, %v12996_v25  ;;  %v17024_v25 = vld [vmem:[#allocation44_spill] sm:$0xff] }
 0x497   : > { %v13146_v51 = vpop.permute.xlu1 %2984  ;;  %v13150_v34 = vpop.permute.xlu0 %2980 }
 0x499   : > { %3243 = vbcast.lane.c.b16.xlu1 %v3213_v27, 368  ;;  %3239 = vbcast.lane.c.b16.xlu0 %v3213_v27, 352  ;;  %v5906_v27 = vmul.bf16 %v13026_v61, %v12972_v41  ;;  %v7334_v41 = vmax.f32 %v7332_v63, %v7333_v8  ;;  %v5902_v63 = vmul.bf16 %v13072_v17, %v12962_v5 }
 0x49a   : > { %v5908_v8 = vmul.bf16 %v13048_v42, %v12976_v44  ;;  %v5896_v5 = vmul.bf16 %v13098_v56, %v12950_v12  ;;  %v13202_v44 = vrot.slane %v13094_v49, %v17021_v15 }
 0x49b   : > { %v13158_v1 = vpop.permute.xlu1 %2992  ;;  %v13160_v38 = vpop.permute.xlu0 %2988  ;;  %v7406_v33 = vmax.bf16 %v5906_v27, %v5905_v9  ;;  %v7335_v29 = vrot.slane %v7334_v41, 1  ;;  %v5903_v27 = vmul.bf16 %v13080_v2, %v12970_v43  ;;  %v7393_v9 = vmax.bf16 %v7392_v24, %v5902_v63 }
 0x49c   : > { %v7378_v43 = vmax.bf16 %v7377_v7, %v5896_v5  ;;  %v5910_v24 = vmul.bf16 %v13072_v17, %v17023_v55  ;;  %v7423_v63 = vmax.bf16 %v5914_v57, %v5913_v39  ;;  %v17030_v55 = vld [vmem:[#allocation76_spill] sm:$0xff] }
 0x49d   : > { %3254 = vbcast.lane.c.b16.xlu1 %v3248_v60, 272  ;;  %3250 = vbcast.lane.c.b16.xlu0 %v3248_v60, 256  ;;  %v7407_v46 = vmax.bf16 %v7406_v33, %v5907_v26  ;;  %v7336_v23 = vmax.f32 %v7334_v41, %v7335_v29  ;;  %v7365_v26 = vrot.slane %v7364_v45, 4  ;;  %v7394_v33 = vmax.bf16 %v7393_v9, %v5903_v27 }
 0x49e   : > { %v7351_v41 = vmax.f32 %v7349_v20, %v7350_v4  ;;  %v7380_v29 = vunpack.i.h.bf16 %v7378_v43  ;;  %v5911_v27 = vmul.bf16 %v13080_v2, %v17024_v25 }
 0x49f   : > { %v13170_v16 = vpop.permute.xlu1 %3003  ;;  %v13176_v53 = vpop.permute.xlu0 %2999  ;;  %v7408_v13 = vmax.bf16 %v7407_v46, %v5908_v8  ;;  %v7366_v32 = vmax.f32 %v7364_v45, %v7365_v26  ;;  %v7379_v46 = vunpack.i.l.bf16 %v7378_v43  ;;  %v7395_v7 = vmax.bf16 %v7394_v33, %v5904_v48  ;;  %v17028_v26 = vld [vmem:[#allocation90_spill] sm:$0xff] }
 0x4a0   : > { %v7352_v45 = vrot.slane %v7351_v41, 1  ;;  %v5916_v43 = vmul.bf16 %v13048_v42, %v17028_v26  ;;  %v17034_v26 = vld [vmem:[#allocation42_spill] sm:$0xff] }
 0x4a1   : > { %3262 = vbcast.lane.c.b16.xlu1 %v3248_v60, 304  ;;  %3258 = vbcast.lane.c.b16.xlu0 %v3248_v60, 288  ;;  %v7409_v12 = vmax.bf16 %v7408_v13, %v5909_v35  ;;  %v7424_v35 = vmax.bf16 %v7423_v63, %v5915_v0  ;;  %v17025_v13 = vmov 0   ;;  %v13231_v4 = vmax.f32 %v7379_v46, %v7380_v29 }
 0x4a2   : > { %v7396_v39 = vunpack.i.l.bf16 %v7395_v7  ;;  %v7397_v33 = vunpack.i.h.bf16 %v7395_v7  ;;  %v13246_v29 = vmax.f32 %v7351_v41, %v7352_v45  ;;  %v17035_v45 = vld [vmem:[#allocation85_spill] sm:$0xff] }
 0x4a3   : > { %v13182_v6 = vpop.permute.xlu1 %3011  ;;  %v13184_v30 = vpop.permute.xlu0 %3007  ;;  %v7410_v9 = vmax.bf16 %v7409_v12, %v5910_v24  ;;  %17027 = vst [vmem:[#allocation56_spill] sm:$0xff] %v13231_v4  ;;  %v7425_v48 = vmax.bf16 %v7424_v35, %v5916_v43  ;;  %v5912_v24 = vmul.bf16 %v13098_v56, %v17030_v55  ;;  %v5938_v35 = vmul.bf16 %v13026_v61, %v13076_v31 }
 0x4a4   : > { %17031 = vst [vmem:[#allocation46_spill] sm:$0xff] %v13246_v29  ;;  %v5937_v43 = vmul.bf16 %v13030_v52, %v17034_v26  ;;  %v17039_v26 = vld [vmem:[#allocation48_spill] sm:$0xff] }
 0x4a5   : > { %3270 = vbcast.lane.c.b16.xlu1 %v3248_v60, 336  ;;  %3266 = vbcast.lane.c.b16.xlu0 %v3248_v60, 320  ;;  %v7411_v12 = vmax.bf16 %v7410_v9, %v5911_v27  ;;  %v13253_v27 = vmax.f32 %v7396_v39, %v7397_v33  ;;  %v17037_v39 = vld [vmem:[#allocation29_spill] sm:$0xff] }
 0x4a6   : > { %v13270_v33 = vrot.slane %v13046_v54, %v17037_v39 }
 0x4a7   : > { %v13190_v50 = vpop.permute.xlu1 %3019  ;;  %v13196_v59 = vpop.permute.xlu0 %3015  ;;  %17033 = vst [vmem:[#allocation53_spill] sm:$0xff] %v13253_v27  ;;  %v13255_v9 = vmax.bf16 %v7411_v12, %v5912_v24  ;;  %v17038_v12 = vld [vmem:[#allocation81_spill] sm:$0xff]  ;;  %v5939_v24 = vmul.bf16 %v13038_v14, %v13088_v10  ;;  %v5953_v10 = vmul.bf16 %v13030_v52, %v13176_v53  ;;  %v17044_v27 = vld [vmem:[#allocation66_spill] sm:$0xff] }
 0x4a8   : > { %v5929_v31 = vmul.bf16 %v13030_v52, %v17038_v12  ;;  %v5954_v12 = vmul.bf16 %v13026_v61, %v13170_v16  ;;  %v5923_v53 = vmul.bf16 %v13038_v14, %v17044_v27  ;;  %v5941_v27 = vmul.bf16 %v13056_v36, %v13106_v18 }
 0x4a9   : > { %3278 = vbcast.lane.c.b16.xlu1 %v3248_v60, 368  ;;  %3274 = vbcast.lane.c.b16.xlu0 %v3248_v60, 352  ;;  %v7337_v60 = vpack.i.bf16 %v7336_v23, %v7336_v23  ;;  %v7367_v23 = vrot.slane %v7366_v32, 2  ;;  %v5949_v18 = vmul.bf16 %v13056_v36, %v13150_v34 }
 0x4aa   : > { %v7508_v4 = vmax.bf16 %v5954_v12, %v5953_v10  ;;  %v17047_v12 = vld [vmem:[#allocation79_spill] sm:$0xff] }
 0x4ab   : > { %v13208_v28 = vpop.permute.xlu1 %3027  ;;  %v13210_v40 = vpop.permute.xlu0 %3023  ;;  %v13228_v5 = vmax.bf16 %v17025_v13, %v7337_v60  ;;  %v5917_v60 = vmul.bf16 %v13056_v36, %v17029_v21  ;;  %v13248_v63 = vmax.f32 %v7366_v32, %v7367_v23  ;;  %v5922_v32 = vmul.bf16 %v13026_v61, %v17035_v45  ;;  %v17036_v23 = vld [vmem:[#allocation47_spill] sm:$0xff] }
 0x4ac   : > { %v5930_v55 = vmul.bf16 %v13026_v61, %v17036_v23  ;;  %v5921_v45 = vmul.bf16 %v13030_v52, %v17039_v26  ;;  %v17040_v23 = vld [vmem:[#allocation51_spill] sm:$0xff]  ;;  %v5933_v10 = vmul.bf16 %v13056_v36, %v17047_v12 }
 0x4ad   : > { %3289 = vbcast.lane.c.b16.xlu1 %v13202_v44, 272  ;;  %3285 = vbcast.lane.c.b16.xlu0 %v13202_v44, 256  ;;  %17026 = vst [vmem:[#allocation35_spill] sm:$0xff] %v13228_v5  ;;  %17032 = vst [vmem:[#allocation32_spill] sm:$0xff] %v13248_v63  ;;  %v7426_v41 = vmax.bf16 %v7425_v48, %v5917_v60  ;;  %v5946_v60 = vmul.bf16 %v13026_v61, %v13122_v3  ;;  %v17043_v5 = vld [vmem:[#allocation36_spill] sm:$0xff] }
 0x4ae   : > { %v5945_v48 = vmul.bf16 %v13030_v52, %v13124_v47  ;;  %v5931_v46 = vmul.bf16 %v13038_v14, %v17040_v23  ;;  %v7474_v3 = vmax.bf16 %v5938_v35, %v5937_v43  ;;  %v5947_v47 = vmul.bf16 %v13038_v14, %v13136_v37  ;;  %v17041_v23 = vld [vmem:[#allocation40_spill] sm:$0xff] }
 0x4af   : > { %v13220_v8 = vpop.permute.xlu1 %3038  ;;  %v13224_v20 = vpop.permute.xlu0 %3034  ;;  %v5918_v16 = vmul.bf16 %v13072_v17, %v17041_v23  ;;  %v5919_v35 = vmul.bf16 %v13080_v2, %v17043_v5  ;;  %v5955_v37 = vmul.bf16 %v13038_v14, %v13184_v30  ;;  %v7440_v29 = vmax.bf16 %v5922_v32, %v5921_v45  ;;  %v17046_v32 = vld [vmem:[#allocation52_spill] sm:$0xff] }
 0x4b0   : > { %v5961_v26 = vmul.bf16 %v13030_v52, %v13224_v20  ;;  %v7475_v43 = vmax.bf16 %v7474_v3, %v5939_v24  ;;  %v7491_v13 = vmax.bf16 %v5946_v60, %v5945_v48  ;;  %v5940_v30 = vmul.bf16 %v13048_v42, %v13084_v11  ;;  %v17045_v24 = vld [vmem:[#allocation59_spill] sm:$0xff] }
 0x4b1   : > { %3297 = vbcast.lane.c.b16.xlu1 %v13202_v44, 304  ;;  %3293 = vbcast.lane.c.b16.xlu0 %v13202_v44, 288  ;;  %v7427_v23 = vmax.bf16 %v7426_v41, %v5918_v16  ;;  %v5932_v60 = vmul.bf16 %v13048_v42, %v17045_v24  ;;  %v5948_v11 = vmul.bf16 %v13048_v42, %v13132_v19 }
 0x4b2   : > { %v7492_v54 = vmax.bf16 %v7491_v13, %v5947_v47  ;;  %v5924_v45 = vmul.bf16 %v13048_v42, %v17046_v32  ;;  %v5956_v3 = vmul.bf16 %v13048_v42, %v13182_v6 }
 0x4b3   : > { %v13235_v57 = vpop.permute.xlu1 %3046  ;;  %v13237_v0 = vpop.permute.xlu0 %3042  ;;  %v7428_v6 = vmax.bf16 %v7427_v23, %v5919_v35 }
 0x4b4   : > { %v5963_v20 = vmul.bf16 %v13038_v14, %v13237_v0  ;;  %v7509_v0 = vmax.bf16 %v7508_v4, %v5955_v37  ;;  %v7441_v4 = vmax.bf16 %v7440_v29, %v5923_v53  ;;  %v5964_v19 = vmul.bf16 %v13048_v42, %v13235_v57 }
 0x4b5   : > { %3305 = vbcast.lane.c.b16.xlu1 %v13202_v44, 336  ;;  %3301 = vbcast.lane.c.b16.xlu0 %v13202_v44, 320  ;;  %v5957_v37 = vmul.bf16 %v13056_v36, %v13196_v59 }
 0x4b6   : > { %v7510_v29 = vmax.bf16 %v7509_v0, %v5956_v3 }
 0x4b7   : > { %v13251_v25 = vpop.permute.xlu1 %3054  ;;  %v13261_v21 = vpop.permute.xlu0 %3050 }
 0x4b9   : > { %3313 = vbcast.lane.c.b16.xlu1 %v13202_v44, 368  ;;  %3309 = vbcast.lane.c.b16.xlu0 %v13202_v44, 352  ;;  %v5962_v44 = vmul.bf16 %v13026_v61, %v13220_v8  ;;  %v7457_v8 = vmax.bf16 %v5930_v55, %v5929_v31 }
 0x4bb   : > { %v13289_v7 = vpop.permute.xlu1 %3062  ;;  %v13297_v15 = vpop.permute.xlu0 %3058  ;;  %v7458_v63 = vmax.bf16 %v7457_v8, %v5931_v46  ;;  %v7525_v55 = vmax.bf16 %v5962_v44, %v5961_v26  ;;  %v7476_v46 = vmax.bf16 %v7475_v43, %v5940_v30  ;;  %v7493_v26 = vmax.bf16 %v7492_v54, %v5948_v11  ;;  %v17048_v54 = vld [vmem:[#allocation91_spill] sm:$0xff] }
 0x4bc   : > { %v5925_v57 = vmul.bf16 %v13056_v36, %v17048_v54 }
 0x4bd   : > { %3324 = vbcast.lane.c.b16.xlu1 %v13270_v33, 272  ;;  %3320 = vbcast.lane.c.b16.xlu0 %v13270_v33, 256  ;;  %v7526_v13 = vmax.bf16 %v7525_v55, %v5963_v20  ;;  %v7459_v44 = vmax.bf16 %v7458_v63, %v5932_v60  ;;  %v7477_v43 = vmax.bf16 %v7476_v46, %v5941_v27  ;;  %v17050_v60 = vld [vmem:[#allocation84_spill] sm:$0xff] }
 0x4be   : > { %v5965_v63 = vmul.bf16 %v13056_v36, %v13261_v21  ;;  %v7442_v20 = vmax.bf16 %v7441_v4, %v5924_v45  ;;  %v7494_v35 = vmax.bf16 %v7493_v26, %v5949_v18  ;;  %v13349_v21 = vrot.slane %v13094_v49, %v17037_v39  ;;  %v17051_v4 = vld [vmem:[#allocation73_spill] sm:$0xff] }
 0x4bf   : > { %v3074_v5 = vpop.permute.xlu1 %3073  ;;  %v3070_v31 = vpop.permute.xlu0 %3069  ;;  %v7527_v34 = vmax.bf16 %v7526_v13, %v5964_v19  ;;  %v7460_v55 = vmax.bf16 %v7459_v44, %v5933_v10  ;;  %v5934_v0 = vmul.bf16 %v13072_v17, %v17050_v60  ;;  %v5943_v46 = vmul.bf16 %v13080_v2, %v13114_v62  ;;  %v17052_v19 = vld [vmem:[#allocation75_spill] sm:$0xff] }
 0x4c0   : > { %v5970_v48 = vmul.bf16 %v13026_v61, %v3074_v5  ;;  %v5969_v41 = vmul.bf16 %v13030_v52, %v3070_v31  ;;  %v17049_v31 = vld [vmem:[#allocation64_spill] sm:$0xff]  ;;  %v5950_v13 = vmul.bf16 %v13072_v17, %v13146_v51  ;;  %v7443_v45 = vmax.bf16 %v7442_v20, %v5925_v57 }
 0x4c1   : > { %3332 = vbcast.lane.c.b16.xlu1 %v13270_v33, 304  ;;  %3328 = vbcast.lane.c.b16.xlu0 %v13270_v33, 288  ;;  %v5942_v24 = vmul.bf16 %v13072_v17, %v17049_v31  ;;  %v7528_v32 = vmax.bf16 %v7527_v34, %v5965_v63  ;;  %v5935_v12 = vmul.bf16 %v13080_v2, %v17051_v4  ;;  %v7413_v20 = vunpack.i.l.bf16 %v13255_v9 }
 0x4c2   : > { %v7542_v53 = vmax.bf16 %v5970_v48, %v5969_v41  ;;  %v7511_v48 = vmax.bf16 %v7510_v29, %v5957_v37  ;;  %v5958_v10 = vmul.bf16 %v13072_v17, %v13190_v50  ;;  %v7461_v44 = vmax.bf16 %v7460_v55, %v5934_v0 }
 0x4c3   : > { %v3082_v47 = vpop.permute.xlu1 %3081  ;;  %v3078_v16 = vpop.permute.xlu0 %3077  ;;  %v7478_v11 = vmax.bf16 %v7477_v43, %v5942_v24  ;;  %v5951_v62 = vmul.bf16 %v13080_v2, %v13160_v38  ;;  %v7495_v18 = vmax.bf16 %v7494_v35, %v5950_v13  ;;  %v5966_v51 = vmul.bf16 %v13072_v17, %v13251_v25  ;;  %v17054_v43 = vld [vmem:[#allocation88_spill] sm:$0xff]  ;;  %v17055_v24 = vld [vmem:[#allocation70_spill] sm:$0xff] }
 0x4c4   : > { %v5971_v8 = vmul.bf16 %v13038_v14, %v3078_v16  ;;  %v5972_v59 = vmul.bf16 %v13048_v42, %v3082_v47  ;;  %v5959_v16 = vmul.bf16 %v13080_v2, %v13210_v40  ;;  %v7512_v37 = vmax.bf16 %v7511_v48, %v5958_v10 }
 0x4c5   : > { %3340 = vbcast.lane.c.b16.xlu1 %v13270_v33, 336  ;;  %3336 = vbcast.lane.c.b16.xlu0 %v13270_v33, 320  ;;  %v17053_v29 = vmul.bf16 %v13098_v56, %v17042_v22  ;;  %v5967_v25 = vmul.bf16 %v13080_v2, %v13297_v15  ;;  %v5927_v40 = vmul.bf16 %v13080_v2, %v17054_v43  ;;  %v7414_v15 = vunpack.i.h.bf16 %v13255_v9 }
 0x4c6   : > { %v7543_v5 = vmax.bf16 %v7542_v53, %v5971_v8  ;;  %v7479_v53 = vmax.bf16 %v7478_v11, %v5943_v46  ;;  %v7529_v8 = vmax.bf16 %v7528_v32, %v5966_v51  ;;  %v7462_v22 = vmax.bf16 %v7461_v44, %v5935_v12  ;;  %v17056_v11 = vld [vmem:[#allocation58_spill] sm:$0xff] }
 0x4c7   : > { %v3090_v30 = vpop.permute.xlu1 %3089  ;;  %v3086_v23 = vpop.permute.xlu0 %3085  ;;  %v13377_v38 = vmax.bf16 %v7428_v6, %v17053_v29  ;;  %v5944_v6 = vmul.bf16 %v13098_v56, %v13110_v58  ;;  %v5936_v35 = vmul.bf16 %v13098_v56, %v17055_v24  ;;  %v5952_v60 = vmul.bf16 %v13098_v56, %v13158_v1  ;;  %v17057_v51 = vld [vmem:[#allocation30_spill] sm:$0xff] }
 0x4c8   : > { %v5973_v41 = vmul.bf16 %v13056_v36, %v3086_v23  ;;  %v7544_v27 = vmax.bf16 %v7543_v5, %v5972_v59  ;;  %v5974_v50 = vmul.bf16 %v13072_v17, %v3090_v30  ;;  %v7496_v59 = vmax.bf16 %v7495_v18, %v5951_v62 }
 0x4c9   : > { %3348 = vbcast.lane.c.b16.xlu1 %v13270_v33, 368  ;;  %3344 = vbcast.lane.c.b16.xlu0 %v13270_v33, 352  ;;  %v5926_v33 = vmul.bf16 %v13072_v17, %v17052_v19  ;;  %v7513_v30 = vmax.bf16 %v7512_v37, %v5959_v16  ;;  %v7480_v23 = vmax.bf16 %v7479_v53, %v5944_v6  ;;  %v7430_v58 = vunpack.i.l.bf16 %v13377_v38 }
 0x4ca   : > { %v7545_v3 = vmax.bf16 %v7544_v27, %v5973_v41  ;;  %v7530_v0 = vmax.bf16 %v7529_v8, %v5967_v25  ;;  %v5960_v41 = vmul.bf16 %v13098_v56, %v13208_v28  ;;  %v5928_v13 = vmul.bf16 %v13098_v56, %v17056_v11 }
 0x4cb   : > { %v3098_v47 = vpop.permute.xlu1 %3097  ;;  %v3094_v26 = vpop.permute.xlu0 %3093  ;;  %v7444_v63 = vmax.bf16 %v7443_v45, %v5926_v33  ;;  %v7463_v32 = vmax.bf16 %v7462_v22, %v5936_v35  ;;  %v7497_v45 = vmax.bf16 %v7496_v59, %v5952_v60  ;;  %v5968_v4 = vmul.bf16 %v13098_v56, %v13289_v7 }
 0x4cc   : > { %v5975_v34 = vmul.bf16 %v13080_v2, %v3094_v26  ;;  %v7546_v54 = vmax.bf16 %v7545_v3, %v5974_v50  ;;  %v7514_v12 = vmax.bf16 %v7513_v30, %v5960_v41  ;;  %v5976_v10 = vmul.bf16 %v13098_v56, %v3098_v47  ;;  %v17058_v26 = vld [vmem:[#allocation34_spill] sm:$0xff] }
 0x4cd   : > { %3359 = vbcast.lane.c.b16.xlu1 %v13349_v21, 272  ;;  %3355 = vbcast.lane.c.b16.xlu0 %v13349_v21, 256  ;;  %v7445_v48 = vmax.bf16 %v7444_v63, %v5927_v40  ;;  %v7481_v28 = vunpack.i.l.bf16 %v7480_v23  ;;  %v7482_v62 = vunpack.i.h.bf16 %v7480_v23  ;;  %v7531_v18 = vmax.bf16 %v7530_v0, %v5968_v4 }
 0x4ce   : > { %v7547_v27 = vmax.bf16 %v7546_v54, %v5975_v34  ;;  %v13410_v19 = vrot.slane %v17058_v26, %v17057_v51  ;;  %v7464_v50 = vunpack.i.l.bf16 %v7463_v32  ;;  %v7465_v29 = vunpack.i.h.bf16 %v7463_v32 }
 0x4cf   : > { %v3109_v57 = vpop.permute.xlu1 %3108  ;;  %v3105_v5 = vpop.permute.xlu0 %3104  ;;  %v7446_v33 = vmax.bf16 %v7445_v48, %v5928_v13  ;;  %v7498_v53 = vunpack.i.l.bf16 %v7497_v45  ;;  %v7499_v25 = vunpack.i.h.bf16 %v7497_v45  ;;  %v7515_v43 = vunpack.i.l.bf16 %v7514_v12  ;;  %v17059_v48 = vld [vmem:[#allocation32_spill] sm:$0xff] }
 0x4d0   : > { %v5978_v55 = vmul.bf16 %v13026_v61, %v3109_v57  ;;  %v5977_v31 = vmul.bf16 %v13030_v52, %v3105_v5  ;;  %v7548_v7 = vmax.bf16 %v7547_v27, %v5976_v10  ;;  %v7516_v40 = vunpack.i.h.bf16 %v7514_v12  ;;  %v17060_v45 = vld [vmem:[#allocation56_spill] sm:$0xff] }
 0x4d1   : > { %3367 = vbcast.lane.c.b16.xlu1 %v13349_v21, 304  ;;  %3363 = vbcast.lane.c.b16.xlu0 %v13349_v21, 288  ;;  %v7431_v54 = vunpack.i.h.bf16 %v13377_v38  ;;  %v7483_v57 = vmax.f32 %v7481_v28, %v7482_v62  ;;  %v7532_v22 = vunpack.i.l.bf16 %v7531_v18  ;;  %v7533_v6 = vunpack.i.h.bf16 %v7531_v18  ;;  %v17062_v28 = vld [vmem:[#allocation53_spill] sm:$0xff] }
 0x4d2   : > { %v7559_v3 = vmax.bf16 %v5978_v55, %v5977_v31  ;;  %v7549_v59 = vunpack.i.l.bf16 %v7548_v7  ;;  %v7550_v5 = vunpack.i.h.bf16 %v7548_v7  ;;  %v7447_v24 = vunpack.i.l.bf16 %v7446_v33 }
 0x4d3   : > { %v3117_v46 = vpop.permute.xlu1 %3116  ;;  %v3113_v1 = vpop.permute.xlu0 %3112  ;;  %v7448_v35 = vunpack.i.h.bf16 %v7446_v33  ;;  %v7466_v23 = vmax.f32 %v7464_v50, %v7465_v29  ;;  %v7500_v60 = vmax.f32 %v7498_v53, %v7499_v25  ;;  %v7369_v41 = vrot.slane %v17059_v48, 1 }
 0x4d4   : > { %v5979_v44 = vmul.bf16 %v13038_v14, %v3113_v1  ;;  %v5980_v16 = vmul.bf16 %v13048_v42, %v3117_v46  ;;  %v7517_v27 = vmax.f32 %v7515_v43, %v7516_v40  ;;  %v7432_v11 = vmax.f32 %v7430_v58, %v7431_v54 }
 0x4d5   : > { %3375 = vbcast.lane.c.b16.xlu1 %v13349_v21, 336  ;;  %3371 = vbcast.lane.c.b16.xlu0 %v13349_v21, 320  ;;  %v7484_v13 = vrot.slane %v7483_v57, 4  ;;  %v7534_v32 = vmax.f32 %v7532_v22, %v7533_v6  ;;  %v17061_v4 = vrot.slane %v17060_v45, 4  ;;  %v7551_v12 = vmax.f32 %v7549_v59, %v7550_v5 }
 0x4d6   : > { %v7560_v37 = vmax.bf16 %v7559_v3, %v5979_v44  ;;  %v7399_v62 = vrot.slane %v17062_v28, 4  ;;  %v7449_v18 = vmax.f32 %v7447_v24, %v7448_v35  ;;  %v7467_v33 = vrot.slane %v7466_v23, 4 }
 0x4d7   : > { %v3125_v47 = vpop.permute.xlu1 %3124  ;;  %v3121_v8 = vpop.permute.xlu0 %3120  ;;  %v7383_v1 = vmax.f32 %v17060_v45, %v17061_v4  ;;  %v7501_v9 = vrot.slane %v7500_v60, 4  ;;  %v7485_v50 = vmax.f32 %v7483_v57, %v7484_v13  ;;  %v7535_v29 = vrot.slane %v7534_v32, 4 }
 0x4d8   : > { %v5981_v63 = vmul.bf16 %v13056_v36, %v3121_v8  ;;  %v7561_v34 = vmax.bf16 %v7560_v37, %v5980_v16  ;;  %v5982_v30 = vmul.bf16 %v13072_v17, %v3125_v47  ;;  %v7433_v47 = vrot.slane %v7432_v11, 4 }
 0x4d9   : > { %3383 = vbcast.lane.c.b16.xlu1 %v13349_v21, 368  ;;  %3379 = vbcast.lane.c.b16.xlu0 %v13349_v21, 352  ;;  %v7415_v21 = vmax.f32 %v7413_v20, %v7414_v15  ;;  %v7518_v15 = vrot.slane %v7517_v27, 4  ;;  %v7384_v53 = vrot.slane %v7383_v1, 2  ;;  %v7552_v25 = vrot.slane %v7551_v12, 4 }
 0x4da   : > { %v7562_v55 = vmax.bf16 %v7561_v34, %v5981_v63  ;;  %v7400_v63 = vmax.f32 %v17062_v28, %v7399_v62  ;;  %v7450_v34 = vrot.slane %v7449_v18, 4  ;;  %v7468_v54 = vmax.f32 %v7466_v23, %v7467_v33 }
 0x4db   : > { %v3133_v31 = vpop.permute.xlu1 %3132  ;;  %v3129_v0 = vpop.permute.xlu0 %3128  ;;  %v7416_v37 = vrot.slane %v7415_v21, 4  ;;  %v7553_v24 = vmax.f32 %v7551_v12, %v7552_v25  ;;  %v7385_v4 = vmax.f32 %v7383_v1, %v7384_v53 }
 0x4dc   : > { %v5983_v38 = vmul.bf16 %v13080_v2, %v3129_v0  ;;  %v7563_v46 = vmax.bf16 %v7562_v55, %v5982_v30  ;;  %v5984_v10 = vmul.bf16 %v13098_v56, %v3133_v31  ;;  %v7434_v30 = vmax.f32 %v7432_v11, %v7433_v47 }
 0x4dd   : > { %3394 = vbcast.lane.c.b16.xlu1 %v13410_v19, 272  ;;  %3390 = vbcast.lane.c.b16.xlu0 %v13410_v19, 256  ;;  %v7417_v57 = vmax.f32 %v7415_v21, %v7416_v37  ;;  %v7486_v55 = vrot.slane %v7485_v50, 2  ;;  %v7536_v31 = vmax.f32 %v7534_v32, %v7535_v29  ;;  %v7401_v12 = vrot.slane %v7400_v63, 2 }
 0x4de   : > { %v7564_v3 = vmax.bf16 %v7563_v46, %v5983_v38  ;;  %v7451_v38 = vmax.f32 %v7449_v18, %v7450_v34  ;;  %v7435_v33 = vrot.slane %v7434_v30, 2  ;;  %v7386_v37 = vrot.slane %v7385_v4, 1 }
 0x4df   : > { %v3144_v44 = vpop.permute.xlu1 %3143  ;;  %v3140_v20 = vpop.permute.xlu0 %3139 }
 0x4e0   : > { %v7565_v58 = vmax.bf16 %v7564_v3, %v5984_v10  ;;  %v5986_v7 = vmul.bf16 %v13026_v61, %v3144_v44  ;;  %v5985_v16 = vmul.bf16 %v13030_v52, %v3140_v20  ;;  %v7502_v61 = vmax.f32 %v7500_v60, %v7501_v9 }
 0x4e1   : > { %3402 = vbcast.lane.c.b16.xlu1 %v13410_v19, 304  ;;  %3398 = vbcast.lane.c.b16.xlu0 %v13410_v19, 288  ;;  %v7519_v52 = vmax.f32 %v7517_v27, %v7518_v15  ;;  %v7469_v27 = vrot.slane %v7468_v54, 2  ;;  %v7537_v10 = vrot.slane %v7536_v31, 2  ;;  %v7487_v3 = vmax.f32 %v7485_v50, %v7486_v55 }
 0x4e2   : > { %v7566_v8 = vunpack.i.l.bf16 %v7565_v58  ;;  %v7567_v43 = vunpack.i.h.bf16 %v7565_v58  ;;  %v7576_v59 = vmax.bf16 %v5986_v7, %v5985_v16  ;;  %v7503_v46 = vrot.slane %v7502_v61, 2 }
 0x4e3   : > { %v3152_v40 = vpop.permute.xlu1 %3151  ;;  %v3148_v22 = vpop.permute.xlu0 %3147  ;;  %v7520_v21 = vrot.slane %v7519_v52, 2  ;;  %v7554_v44 = vrot.slane %v7553_v24, 2  ;;  %v7452_v9 = vrot.slane %v7451_v38, 2  ;;  %v7470_v58 = vmax.f32 %v7468_v54, %v7469_v27 }
 0x4e4   : > { %v7568_v6 = vmax.f32 %v7566_v8, %v7567_v43  ;;  %v5987_v5 = vmul.bf16 %v13038_v14, %v3148_v22  ;;  %v5988_v0 = vmul.bf16 %v13048_v42, %v3152_v40  ;;  %v13442_v14 = vrot.slane %v13094_v49, %v17057_v51 }
 0x4e5   : > { %3410 = vbcast.lane.c.b16.xlu1 %v13410_v19, 336  ;;  %3406 = vbcast.lane.c.b16.xlu0 %v13410_v19, 320  ;;  %v7418_v42 = vrot.slane %v7417_v57, 2  ;;  %v7504_v20 = vmax.f32 %v7502_v61, %v7503_v46  ;;  %v7521_v7 = vmax.f32 %v7519_v52, %v7520_v21  ;;  %v7538_v50 = vmax.f32 %v7536_v31, %v7537_v10 }
 0x4e6   : > { %v7569_v35 = vrot.slane %v7568_v6, 4  ;;  %v7577_v23 = vmax.bf16 %v7576_v59, %v5987_v5  ;;  %v7555_v29 = vmax.f32 %v7553_v24, %v7554_v44  ;;  %v7436_v43 = vmax.f32 %v7434_v30, %v7435_v33 }
 0x4e7   : > { %v3160_v60 = vpop.permute.xlu1 %3159  ;;  %v3156_v13 = vpop.permute.xlu0 %3155  ;;  %v7419_v47 = vmax.f32 %v7417_v57, %v7418_v42  ;;  %v7453_v40 = vmax.f32 %v7451_v38, %v7452_v9  ;;  %v7505_v34 = vrot.slane %v7504_v20, 1  ;;  %v7471_v61 = vrot.slane %v7470_v58, 1 }
 0x4e8   : > { %v7570_v11 = vmax.f32 %v7568_v6, %v7569_v35  ;;  %v5989_v32 = vmul.bf16 %v13056_v36, %v3156_v13  ;;  %v7578_v45 = vmax.bf16 %v7577_v23, %v5988_v0  ;;  %v5990_v28 = vmul.bf16 %v13072_v17, %v3160_v60  ;;  %v17063_v60 = vld [vmem:[#allocation46_spill] sm:$0xff] }
 0x4e9   : > { %3418 = vbcast.lane.c.b16.xlu1 %v13410_v19, 368  ;;  %3414 = vbcast.lane.c.b16.xlu0 %v13410_v19, 352  ;;  %v7402_v19 = vmax.f32 %v7400_v63, %v7401_v12  ;;  %v7488_v17 = vrot.slane %v7487_v3, 1  ;;  %v7370_v63 = vmax.f32 %v17059_v48, %v7369_v41  ;;  %v7522_v22 = vrot.slane %v7521_v7, 1 }
 0x4ea   : > { %v7579_v62 = vmax.bf16 %v7578_v45, %v5989_v32  ;;  %v7571_v15 = vrot.slane %v7570_v11, 2  ;;  %v7387_v6 = vmax.f32 %v7385_v4, %v7386_v37  ;;  %v7420_v59 = vrot.slane %v7419_v47, 1 }
 0x4eb   : > { %v3168_v18 = vpop.permute.xlu1 %3167  ;;  %v3164_v36 = vpop.permute.xlu0 %3163  ;;  %v7539_v5 = vrot.slane %v7538_v50, 1  ;;  %v7489_v57 = vmax.f32 %v7487_v3, %v7488_v17  ;;  %v7556_v30 = vrot.slane %v7555_v29, 1  ;;  %v7437_v35 = vrot.slane %v7436_v43, 1 }
 0x4ec   : > { %v5991_v1 = vmul.bf16 %v13080_v2, %v3164_v36  ;;  %v7580_v16 = vmax.bf16 %v7579_v62, %v5990_v28  ;;  %v5992_v53 = vmul.bf16 %v13098_v56, %v3168_v18  ;;  %v7572_v2 = vmax.f32 %v7570_v11, %v7571_v15  ;;  %v17064_v36 = vld [vmem:[#allocation31_spill] sm:$0xff] }
 0x4ed   : > { %3429 = vbcast.lane.c.b16.xlu1 %v13442_v14, 272  ;;  %3425 = vbcast.lane.c.b16.xlu0 %v13442_v14, 256  ;;  %v7403_v56 = vrot.slane %v7402_v19, 1  ;;  %v7506_v0 = vmax.f32 %v7504_v20, %v7505_v34  ;;  %v7454_v23 = vrot.slane %v7453_v40, 1  ;;  %v7354_v38 = vpack.i.bf16 %v17063_v60, %v17063_v60 }
 0x4ee   : > { %v7581_v25 = vmax.bf16 %v7580_v16, %v5991_v1  ;;  %v7573_v48 = vrot.slane %v7572_v2, 1  ;;  %v7472_v27 = vmax.f32 %v7470_v58, %v7471_v61  ;;  %v7523_v46 = vmax.f32 %v7521_v7, %v7522_v22 }
 0x4ef   : > { %v13452_v8 = vpop.permute.xlu1 %3181  ;;  %v13454_v54 = vpop.permute.xlu0 %3177  ;;  %v7371_v21 = vpack.i.bf16 %v7370_v63, %v7370_v63  ;;  %v7388_v11 = vpack.i.bf16 %v7387_v6, %v7387_v6  ;;  %v7404_v32 = vmax.f32 %v7402_v19, %v7403_v56  ;;  %v7540_v45 = vmax.f32 %v7538_v50, %v7539_v5 }
 0x4f0   : > { %v7582_v52 = vmax.bf16 %v7581_v25, %v5992_v53  ;;  %v7421_v4 = vmax.f32 %v7419_v47, %v7420_v59  ;;  %v7490_v12 = vpack.i.bf16 %v7489_v57, %v7489_v57  ;;  %v7557_v42 = vmax.f32 %v7555_v29, %v7556_v30 }
 0x4f1   : > { %3437 = vbcast.lane.c.b16.xlu1 %v13442_v14, 304  ;;  %3433 = vbcast.lane.c.b16.xlu0 %v13442_v14, 288  ;;  %v7507_v44 = vpack.i.bf16 %v7506_v0, %v7506_v0  ;;  %v7438_v62 = vmax.f32 %v7436_v43, %v7437_v35  ;;  %v7455_v18 = vmax.f32 %v7453_v40, %v7454_v23  ;;  %v17065_v7 = vmov 0  }
 0x4f2   : > { %v7583_v55 = vunpack.i.l.bf16 %v7582_v52  ;;  %v7584_v31 = vunpack.i.h.bf16 %v7582_v52  ;;  %v7574_v33 = vmax.f32 %v7572_v2, %v7573_v48  ;;  %v7473_v9 = vpack.i.bf16 %v7472_v27, %v7472_v27 }
 0x4f3   : > { %v13461_v24 = vpop.permute.xlu1 %3189  ;;  %v13463_v41 = vpop.permute.xlu0 %3185  ;;  %v7524_v20 = vpack.i.bf16 %v7523_v46, %v7523_v46  ;;  %v13476_v58 = vrot.slane %v17058_v26, %v17064_v36  ;;  %v8730_v1 = vmax.bf16 %v17065_v7, %v7354_v38  ;;  %v8731_v16 = vmax.bf16 %v17065_v7, %v7371_v21 }
 0x4f4   : > { %v7585_v13 = vmax.f32 %v7583_v55, %v7584_v31  ;;  %v7405_v37 = vpack.i.bf16 %v7404_v32, %v7404_v32  ;;  %v7541_v19 = vpack.i.bf16 %v7540_v45, %v7540_v45  ;;  %v7422_v47 = vpack.i.bf16 %v7421_v4, %v7421_v4  ;;  %v17066_v32 = vld [vmem:[#allocation35_spill] sm:$0xff] }
 0x4f5   : > { %3445 = vbcast.lane.c.b16.xlu1 %v13442_v14, 336  ;;  %3441 = vbcast.lane.c.b16.xlu0 %v13442_v14, 320  ;;  %v8738_v50 = vmax.bf16 %v17065_v7, %v7490_v12  ;;  %v7558_v17 = vpack.i.bf16 %v7557_v42, %v7557_v42  ;;  %v8732_v25 = vmax.bf16 %v17065_v7, %v7388_v11  ;;  %v9020_v52 = vunpack.c.l.b16 %v8730_v1 }
 0x4f6   : > { %v7586_v10 = vrot.slane %v7585_v13, 4  ;;  %v8739_v43 = vmax.bf16 %v17065_v7, %v7507_v44  ;;  %v7439_v34 = vpack.i.bf16 %v7438_v62, %v7438_v62  ;;  %v7575_v2 = vpack.i.bf16 %v7574_v33, %v7574_v33 }
 0x4f7   : > { %v13469_v3 = vpop.permute.xlu1 %3197  ;;  %v13471_v28 = vpop.permute.xlu0 %3193  ;;  %v8737_v63 = vmax.bf16 %v17065_v7, %v7473_v9  ;;  %v8740_v61 = vmax.bf16 %v17065_v7, %v7524_v20  ;;  %v7456_v22 = vpack.i.bf16 %v7455_v18, %v7455_v18  ;;  %v9021_v6 = vunpack.c.l.b16 %v8731_v16 }
 0x4f8   : > { %v7587_v15 = vmax.f32 %v7585_v13, %v7586_v10  ;;  %v8733_v56 = vmax.bf16 %v17065_v7, %v7405_v37  ;;  %v8741_v59 = vmax.bf16 %v17065_v7, %v7541_v19  ;;  %v9028_v5 = vunpack.c.l.b16 %v8738_v50 }
 0x4f9   : > { %3453 = vbcast.lane.c.b16.xlu1 %v13442_v14, 368  ;;  %3449 = vbcast.lane.c.b16.xlu0 %v13442_v14, 352  ;;  %v8734_v55 = vmax.bf16 %v17065_v7, %v7422_v47  ;;  %v8742_v31 = vmax.bf16 %v17065_v7, %v7558_v17  ;;  %v9029_v35 = vunpack.c.l.b16 %v8739_v43  ;;  %v8735_v48 = vmax.bf16 %v17065_v7, %v7439_v34 }
 0x4fa   : > { %v7588_v29 = vrot.slane %v7587_v15, 2  ;;  %v8743_v23 = vmax.bf16 %v17065_v7, %v7575_v2  ;;  %v9022_v60 = vunpack.c.l.b16 %v8732_v25  ;;  %v9027_v38 = vunpack.c.l.b16 %v8737_v63 }
 0x4fb   : > { %v13482_v53 = vpop.permute.xlu1 %3205  ;;  %v13486_v40 = vpop.permute.xlu0 %3201  ;;  %v8736_v46 = vmax.bf16 %v17065_v7, %v7456_v22  ;;  %v9030_v13 = vunpack.c.l.b16 %v8740_v61  ;;  %v9023_v21 = vunpack.c.l.b16 %v8733_v56  ;;  %v9031_v11 = vunpack.c.l.b16 %v8741_v59 }
 0x4fc   : > { %v7589_v14 = vmax.f32 %v7587_v15, %v7588_v29  ;;  %v17067_v45 = vunpack.c.l.b16 %v17066_v32  ;;  %v9024_v10 = vunpack.c.l.b16 %v8734_v55  ;;  %v9032_v44 = vunpack.c.l.b16 %v8742_v31 }
 0x4fd   : > { %3464 = vbcast.lane.c.b16.xlu1 %v13476_v58, 272  ;;  %3460 = vbcast.lane.c.b16.xlu0 %v13476_v58, 256  ;;  %v9155_v62 = vsel %vm9099_vm0, %v9028_v5, %v9027_v38  ;;  %v9025_v33 = vunpack.c.l.b16 %v8735_v48  ;;  %v9033_v9 = vunpack.c.l.b16 %v8743_v23  ;;  %v9026_v16 = vunpack.c.l.b16 %v8736_v46 }
 0x4fe   : > { %v7590_v30 = vrot.slane %v7589_v14, 1  ;;  %v9148_v4 = vsel %vm9099_vm0, %v9020_v52, %v17067_v45  ;;  %v9156_v15 = vsel %vm9101_vm1, %v9029_v35, %v9155_v62  ;;  %v3493_v22 = vrot.slane %v13094_v49, %v17064_v36  ;;  %v17068_v35 = vld [vmem:[#allocation38_spill] sm:$0xff] }
 0x4ff   : > { %v13494_v57 = vpop.permute.xlu1 %3219  ;;  %v13498_v0 = vpop.permute.xlu0 %3215  ;;  %v9149_v20 = vsel %vm9101_vm1, %v9021_v6, %v9148_v4  ;;  %v9157_v19 = vsel %vm9103_vm2, %v9030_v13, %v9156_v15  ;;  %v3528_v48 = vrot.slane %v17058_v26, %v17068_v35  ;;  %v3563_v32 = vrot.slane %v13094_v49, %v17068_v35 }
 0x500   : > { %v7591_v27 = vmax.f32 %v7589_v14, %v7590_v30  ;;  %v9150_v37 = vsel %vm9103_vm2, %v9022_v60, %v9149_v20  ;;  %v9158_v50 = vsel %vm9105_vm3, %v9031_v11, %v9157_v19  ;;  %v17069_v20 = vld [vmem:[#allocation45_spill] sm:$0xff] }
 0x501   : > { %3472 = vbcast.lane.c.b16.xlu1 %v13476_v58, 304  ;;  %3468 = vbcast.lane.c.b16.xlu0 %v13476_v58, 288  ;;  %v9151_v47 = vsel %vm9105_vm3, %v9023_v21, %v9150_v37  ;;  %v9159_v43 = vsel %vm9107_vm4, %v9032_v44, %v9158_v50  ;;  %v3598_v15 = vrot.slane %v17058_v26, %v17069_v20 }
 0x502   : > { %v7592_v42 = vpack.i.bf16 %v7591_v27, %v7591_v27  ;;  %v9152_v25 = vsel %vm9107_vm4, %v9024_v10, %v9151_v47  ;;  %v9160_v63 = vsel %vm9109_vm5, %v9033_v9, %v9159_v43  ;;  %v3633_v43 = vrot.slane %v13094_v49, %v17069_v20 }
 0x503   : > { %v13508_v12 = vpop.permute.xlu1 %3227  ;;  %v13511_v18 = vpop.permute.xlu0 %3223  ;;  %v9153_v2 = vsel %vm9109_vm5, %v9025_v33, %v9152_v25 }
 0x504   : > { %v8744_v1 = vmax.bf16 %v17065_v7, %v7592_v42  ;;  %v9154_v61 = vsel %vm9111_vm6, %v9026_v16, %v9153_v2 }
 0x505   : > { %3480 = vbcast.lane.c.b16.xlu1 %v13476_v58, 336  ;;  %3476 = vbcast.lane.c.b16.xlu0 %v13476_v58, 320 }
 0x506   : > { %v9034_v29 = vunpack.c.l.b16 %v8744_v1 }
 0x507   : > { %v13522_v17 = vpop.permute.xlu1 %3235  ;;  %v13526_v34 = vpop.permute.xlu0 %3231 }
 0x508   : > { %v9161_v14 = vsel %vm9111_vm6, %v9034_v29, %v9160_v63 }
 0x509   : > { %3488 = vbcast.lane.c.b16.xlu1 %v13476_v58, 368  ;;  %3484 = vbcast.lane.c.b16.xlu0 %v13476_v58, 352  ;;  %v9221_v52 = vpack.c.b16 %v9161_v14, %v9154_v61 }
 0x50b   : > { %v13536_v6 = vpop.permute.xlu1 %3243  ;;  %v13538_v56 = vpop.permute.xlu0 %3239  ;;  %10086 = vmatmul.mubr.bf16.gmra.mxu1 %v9221_v52 }
 0x50d   : > { %3499 = vbcast.lane.c.b16.xlu1 %v3493_v22, 272  ;;  %3495 = vbcast.lane.c.b16.xlu0 %v3493_v22, 256 }
 0x50f   : > { %v13540_v59 = vpop.permute.xlu1 %3254  ;;  %v13542_v5 = vpop.permute.xlu0 %3250 }
 0x511   : > { %3507 = vbcast.lane.c.b16.xlu1 %v3493_v22, 304  ;;  %3503 = vbcast.lane.c.b16.xlu0 %v3493_v22, 288 }
 0x513   : > { %v13544_v30 = vpop.permute.xlu1 %3262  ;;  %v13546_v55 = vpop.permute.xlu0 %3258 }
 0x515   : > { %3515 = vbcast.lane.c.b16.xlu1 %v3493_v22, 336  ;;  %3511 = vbcast.lane.c.b16.xlu0 %v3493_v22, 320 }
 0x517   : > { %v13548_v58 = vpop.permute.xlu1 %3270  ;;  %v13550_v31 = vpop.permute.xlu0 %3266 }
 0x519   : > { %3523 = vbcast.lane.c.b16.xlu1 %v3493_v22, 368  ;;  %3519 = vbcast.lane.c.b16.xlu0 %v3493_v22, 352 }
 0x51b   : > { %v13554_v23 = vpop.permute.xlu1 %3278  ;;  %v13556_v60 = vpop.permute.xlu0 %3274 }
 0x51d   : > { %3534 = vbcast.lane.c.b16.xlu1 %v3528_v48, 272  ;;  %3530 = vbcast.lane.c.b16.xlu0 %v3528_v48, 256 }
 0x51f   : > { %v13558_v38 = vpop.permute.xlu1 %3289  ;;  %v13560_v27 = vpop.permute.xlu0 %3285 }
 0x521   : > { %3542 = vbcast.lane.c.b16.xlu1 %v3528_v48, 304  ;;  %3538 = vbcast.lane.c.b16.xlu0 %v3528_v48, 288 }
 0x523   : > { %v13562_v46 = vpop.permute.xlu1 %3297  ;;  %v13564_v13 = vpop.permute.xlu0 %3293 }
 0x525   : > { %3550 = vbcast.lane.c.b16.xlu1 %v3528_v48, 336  ;;  %3546 = vbcast.lane.c.b16.xlu0 %v3528_v48, 320 }
 0x527   : > { %v13566_v21 = vpop.permute.xlu1 %3305  ;;  %v13568_v11 = vpop.permute.xlu0 %3301 }
 0x529   : > { %3558 = vbcast.lane.c.b16.xlu1 %v3528_v48, 368  ;;  %3554 = vbcast.lane.c.b16.xlu0 %v3528_v48, 352 }
 0x52b   : > { %v13572_v45 = vpop.permute.xlu1 %3313  ;;  %v13574_v4 = vpop.permute.xlu0 %3309 }
 0x52d   : > { %3569 = vbcast.lane.c.b16.xlu1 %v3563_v32, 272  ;;  %3565 = vbcast.lane.c.b16.xlu0 %v3563_v32, 256 }
 0x52f   : > { %v13576_v42 = vpop.permute.xlu1 %3324  ;;  %v13578_v10 = vpop.permute.xlu0 %3320 }
 0x531   : > { %3577 = vbcast.lane.c.b16.xlu1 %v3563_v32, 304  ;;  %3573 = vbcast.lane.c.b16.xlu0 %v3563_v32, 288 }
 0x533   : > { %v13580_v44 = vpop.permute.xlu1 %3332  ;;  %v13582_v62 = vpop.permute.xlu0 %3328 }
 0x535   : > { %3585 = vbcast.lane.c.b16.xlu1 %v3563_v32, 336  ;;  %3581 = vbcast.lane.c.b16.xlu0 %v3563_v32, 320 }
 0x537   : > { %v13584_v33 = vpop.permute.xlu1 %3340  ;;  %v13586_v9 = vpop.permute.xlu0 %3336 }
 0x539   : > { %3593 = vbcast.lane.c.b16.xlu1 %v3563_v32, 368  ;;  %3589 = vbcast.lane.c.b16.xlu0 %v3563_v32, 352 }
 0x53b   : > { %v13590_v1 = vpop.permute.xlu1 %3348  ;;  %v13592_v16 = vpop.permute.xlu0 %3344 }
 0x53c   : > { %17070 = vst [vmem:[#allocation87_spill] sm:$0xff] %v13590_v1 }
 0x53d   : > { %3604 = vbcast.lane.c.b16.xlu1 %v3598_v15, 272  ;;  %3600 = vbcast.lane.c.b16.xlu0 %v3598_v15, 256 }
 0x53f   : > { %v13594_v37 = vpop.permute.xlu1 %3359  ;;  %v13596_v19 = vpop.permute.xlu0 %3355 }
 0x541   : > { %3612 = vbcast.lane.c.b16.xlu1 %v3598_v15, 304  ;;  %3608 = vbcast.lane.c.b16.xlu0 %v3598_v15, 288 }
 0x543   : > { %v13598_v47 = vpop.permute.xlu1 %3367  ;;  %v13600_v50 = vpop.permute.xlu0 %3363 }
 0x545   : > { %3620 = vbcast.lane.c.b16.xlu1 %v3598_v15, 336  ;;  %3616 = vbcast.lane.c.b16.xlu0 %v3598_v15, 320 }
 0x547   : > { %v13602_v29 = vpop.permute.xlu1 %3375  ;;  %v13604_v25 = vpop.permute.xlu0 %3371 }
 0x548   : > { %17071 = vst [vmem:[#allocation72_spill] sm:$0xff] %v13602_v29  ;;  %v13702_v29 = vld [vmem:[#allocation3 + $0x30] sm:$0xff]  }
 0x549   : > { %3628 = vbcast.lane.c.b16.xlu1 %v3598_v15, 368  ;;  %3624 = vbcast.lane.c.b16.xlu0 %v3598_v15, 352  ;;  %v17077_v15 = vld [vmem:[#allocation54_spill] sm:$0xff] }
 0x54a   : > { %v3668_v20 = vrot.slane %v17058_v26, %v17077_v15 }
 0x54b   : > { %v13608_v2 = vpop.permute.xlu1 %3383  ;;  %v13610_v63 = vpop.permute.xlu0 %3379 }
 0x54c   : > { %17072 = vst [vmem:[#allocation50_spill] sm:$0xff] %v13608_v2  ;;  %17073 = vst [vmem:[#allocation39_spill] sm:$0xff] %v13610_v63  ;;  %v13678_v63 = vld [vmem:[#allocation3 + $0x20] sm:$0xff]  }
 0x54d   : > { %3639 = vbcast.lane.c.b16.xlu1 %v3633_v43, 272  ;;  %3635 = vbcast.lane.c.b16.xlu0 %v3633_v43, 256 }
 0x54f   : > { %v13612_v61 = vpop.permute.xlu1 %3394  ;;  %v13614_v14 = vpop.permute.xlu0 %3390 }
 0x551   : > { %3647 = vbcast.lane.c.b16.xlu1 %v3633_v43, 304  ;;  %3643 = vbcast.lane.c.b16.xlu0 %v3633_v43, 288 }
 0x553   : > { %v13616_v22 = vpop.permute.xlu1 %3402  ;;  %v13618_v52 = vpop.permute.xlu0 %3398 }
 0x554   : > { %17074 = vst [vmem:[#allocation82_spill] sm:$0xff] %v13616_v22 }
 0x555   : > { %3655 = vbcast.lane.c.b16.xlu1 %v3633_v43, 336  ;;  %3651 = vbcast.lane.c.b16.xlu0 %v3633_v43, 320 }
 0x557   : > { %v13620_v48 = vpop.permute.xlu1 %3410  ;;  %v13622_v32 = vpop.permute.xlu0 %3406 }
 0x558   : > { %17075 = vst [vmem:[#allocation37_spill] sm:$0xff] %v13620_v48  ;;  %17076 = vst [vmem:[#allocation89_spill] sm:$0xff] %v13622_v32 }
 0x559   : > { %3663 = vbcast.lane.c.b16.xlu1 %v3633_v43, 368  ;;  %3659 = vbcast.lane.c.b16.xlu0 %v3633_v43, 352 }
 0x55b   : > { %v13626_v35 = vpop.permute.xlu1 %3418  ;;  %v13628_v36 = vpop.permute.xlu0 %3414 }
 0x55c   : > { %17078 = vst [vmem:[#allocation49_spill] sm:$0xff] %v13626_v35  ;;  %17079 = vst [vmem:[#allocation67_spill] sm:$0xff] %v13628_v36  ;;  %v3703_v36 = vrot.slane %v13094_v49, %v17077_v15 }
 0x55d   : > { %3674 = vbcast.lane.c.b16.xlu1 %v3668_v20, 272  ;;  %3670 = vbcast.lane.c.b16.xlu0 %v3668_v20, 256 }
 0x55f   : > { %v13630_v51 = vpop.permute.xlu1 %3429  ;;  %v13632_v39 = vpop.permute.xlu0 %3425 }
 0x560   : > { %17080 = vst [vmem:[#allocation41_spill] sm:$0xff] %v13630_v51  ;;  %17081 = vst [vmem:[#allocation55_spill] sm:$0xff] %v13632_v39  ;;  %v13652_v51 = vld [vmem:[#allocation3] sm:$0xff]  }
 0x561   : > { %3682 = vbcast.lane.c.b16.xlu1 %v3668_v20, 304  ;;  %3678 = vbcast.lane.c.b16.xlu0 %v3668_v20, 288 }
 0x563   : > { %v13634_v48 = vpop.permute.xlu1 %3437  ;;  %v13636_v2 = vpop.permute.xlu0 %3433 }
 0x564   : > { %17082 = vst [vmem:[#allocation63_spill] sm:$0xff] %v13634_v48  ;;  %17083 = vst [vmem:[#allocation44_spill] sm:$0xff] %v13636_v2  ;;  %v13648_v48 = vld [vmem:[#allocation3 + $0x8] sm:$0xff]  }
 0x565   : > { %3690 = vbcast.lane.c.b16.xlu1 %v3668_v20, 336  ;;  %3686 = vbcast.lane.c.b16.xlu0 %v3668_v20, 320  ;;  %v5994_v2 = vmul.bf16 %v13648_v48, %v13452_v8 }
 0x567   : > { %v13638_v26 = vpop.permute.xlu1 %3445  ;;  %v13640_v43 = vpop.permute.xlu0 %3441 }
 0x568   : > { %17084 = vst [vmem:[#allocation90_spill] sm:$0xff] %v13638_v26  ;;  %17085 = vst [vmem:[#allocation33_spill] sm:$0xff] %v13640_v43  ;;  %v5993_v26 = vmul.bf16 %v13652_v51, %v13454_v54 }
 0x569   : > { %3698 = vbcast.lane.c.b16.xlu1 %v3668_v20, 368  ;;  %3694 = vbcast.lane.c.b16.xlu0 %v3668_v20, 352  ;;  %v13660_v20 = vld [vmem:[#allocation3 + $0x10] sm:$0xff]  }
 0x56a   : > { %v5995_v15 = vmul.bf16 %v13660_v20, %v13463_v41 }
 0x56b   : > { %v13644_v35 = vpop.permute.xlu1 %3453  ;;  %v13646_v39 = vpop.permute.xlu0 %3449 }
 0x56c   : > { %17086 = vst [vmem:[#allocation76_spill] sm:$0xff] %v13644_v35  ;;  %17087 = vst [vmem:[#allocation42_spill] sm:$0xff] %v13646_v39  ;;  %v10235_v35 = vld [vmem:[#allocation6 + $0x28] sm:$0xff]   ;;  %v7593_v39 = vmax.bf16 %v5994_v2, %v5993_v26  ;;  %v5997_v2 = vmul.bf16 %v13678_v63, %v13471_v28  ;;  %v6003_v28 = vmul.bf16 %v13660_v20, %v13511_v18 }
 0x56d   : > { %3709 = vbcast.lane.c.b16.xlu1 %v3703_v36, 272  ;;  %3705 = vbcast.lane.c.b16.xlu0 %v3703_v36, 256  ;;  %v13668_v54 = vpack.i.b16 %v10235_v35, %v10235_v35 }
 0x56e   : > { %v7594_v22 = vmax.bf16 %v7593_v39, %v5995_v15  ;;  %v17095_v39 = vld [vmem:[#allocation27_spill] sm:$0xff] }
 0x56f   : > { %v13656_v43 = vpop.permute.xlu1 %3464  ;;  %v13658_v49 = vpop.permute.xlu0 %3460  ;;  %17092 = vst [vmem:[#allocation51_spill] sm:$0xff] %v13668_v54  ;;  %v3741_v15 = vrot.slane %v13668_v54, %v17095_v39 }
 0x570   : > { %17088 = vst [vmem:[#allocation85_spill] sm:$0xff] %v13656_v43  ;;  %17089 = vst [vmem:[#allocation47_spill] sm:$0xff] %v13658_v49  ;;  %v13670_v43 = vld [vmem:[#allocation3 + $0x18] sm:$0xff]  }
 0x571   : > { %3717 = vbcast.lane.c.b16.xlu1 %v3703_v36, 304  ;;  %3713 = vbcast.lane.c.b16.xlu0 %v3703_v36, 288  ;;  %v5996_v49 = vmul.bf16 %v13670_v43, %v13461_v24  ;;  %v6002_v24 = vmul.bf16 %v13648_v48, %v13494_v57 }
 0x573   : > { %v13664_v32 = vpop.permute.xlu1 %3472  ;;  %v13666_v8 = vpop.permute.xlu0 %3468  ;;  %v7595_v26 = vmax.bf16 %v7594_v22, %v5996_v49  ;;  %v13694_v22 = vld [vmem:[#allocation3 + $0x28] sm:$0xff]  }
 0x574   : > { %17090 = vst [vmem:[#allocation81_spill] sm:$0xff] %v13664_v32  ;;  %17091 = vst [vmem:[#allocation48_spill] sm:$0xff] %v13666_v8 }
 0x575   : > { %3725 = vbcast.lane.c.b16.xlu1 %v3703_v36, 336  ;;  %3721 = vbcast.lane.c.b16.xlu0 %v3703_v36, 320  ;;  %v7596_v8 = vmax.bf16 %v7595_v26, %v5997_v2  ;;  %v3773_v26 = vshrl.u32 %v10235_v35, 16  ;;  %v6005_v35 = vmul.bf16 %v13678_v63, %v13526_v34 }
 0x577   : > { %v13674_v7 = vpop.permute.xlu1 %3480  ;;  %v13676_v41 = vpop.permute.xlu0 %3476 }
 0x578   : > { %17093 = vst [vmem:[#allocation40_spill] sm:$0xff] %v13674_v7  ;;  %17094 = vst [vmem:[#allocation43_spill] sm:$0xff] %v13676_v41  ;;  %v6001_v7 = vmul.bf16 %v13652_v51, %v13498_v0  ;;  %v5999_v0 = vmul.bf16 %v13702_v29, %v13486_v40  ;;  %v13716_v40 = vpack.i.b16 %v3773_v26, %v3773_v26 }
 0x579   : > { %3733 = vbcast.lane.c.b16.xlu1 %v3703_v36, 368  ;;  %3729 = vbcast.lane.c.b16.xlu0 %v3703_v36, 352  ;;  %v5998_v36 = vmul.bf16 %v13694_v22, %v13469_v3  ;;  %v6004_v3 = vmul.bf16 %v13670_v43, %v13508_v12 }
 0x57a   : > { %v3779_v34 = vrot.slane %v13716_v40, %v17095_v39  ;;  %v17121_v39 = vld [vmem:[#allocation49_spill] sm:$0xff] }
 0x57b   : > { %v13684_v32 = vpop.permute.xlu1 %3488  ;;  %v13690_v41 = vpop.permute.xlu0 %3484  ;;  %v7597_v2 = vmax.bf16 %v7596_v8, %v5998_v36  ;;  %v13720_v8 = vld [vmem:[#allocation3 + $0x38] sm:$0xff]  }
 0x57c   : > { %17096 = vst [vmem:[#allocation36_spill] sm:$0xff] %v13684_v32  ;;  %17097 = vst [vmem:[#allocation66_spill] sm:$0xff] %v13690_v41  ;;  %v7610_v32 = vmax.bf16 %v6002_v24, %v6001_v7  ;;  %v6010_v24 = vmul.bf16 %v13648_v48, %v13540_v59  ;;  %v6000_v12 = vmul.bf16 %v13720_v8, %v13482_v53 }
 0x57d   : > { %3747 = vbcast.lane.c.b16.xlu1 %v3741_v15, 272  ;;  %3743 = vbcast.lane.c.b16.xlu0 %v3741_v15, 256  ;;  %v7598_v7 = vmax.bf16 %v7597_v2, %v5999_v0  ;;  %v6006_v53 = vmul.bf16 %v13694_v22, %v13522_v17 }
 0x57e   : > { %v7611_v18 = vmax.bf16 %v7610_v32, %v6003_v28  ;;  %v6011_v28 = vmul.bf16 %v13660_v20, %v13546_v55 }
 0x57f   : > { %v13698_v49 = vpop.permute.xlu1 %3499  ;;  %v13700_v57 = vpop.permute.xlu0 %3495 }
 0x580   : > { %17098 = vst [vmem:[#allocation59_spill] sm:$0xff] %v13700_v57  ;;  %v6009_v57 = vmul.bf16 %v13652_v51, %v13542_v5  ;;  %v7612_v32 = vmax.bf16 %v7611_v18, %v6004_v3  ;;  %v7599_v5 = vmax.bf16 %v7598_v7, %v6000_v12  ;;  %v6012_v7 = vmul.bf16 %v13670_v43, %v13544_v30 }
 0x581   : > { %3755 = vbcast.lane.c.b16.xlu1 %v3741_v15, 304  ;;  %3751 = vbcast.lane.c.b16.xlu0 %v3741_v15, 288  ;;  %v6017_v30 = vmul.bf16 %v13652_v51, %v13560_v27 }
 0x582   : > { %v7627_v0 = vmax.bf16 %v6010_v24, %v6009_v57  ;;  %v7613_v2 = vmax.bf16 %v7612_v32, %v6005_v35  ;;  %v7600_v55 = vunpack.i.l.bf16 %v7599_v5  ;;  %v6007_v57 = vmul.bf16 %v13702_v29, %v13538_v56 }
 0x583   : > { %v13706_v41 = vpop.permute.xlu1 %3507  ;;  %v13710_v1 = vpop.permute.xlu0 %3503 }
 0x584   : > { %v7628_v26 = vmax.bf16 %v7627_v0, %v6011_v28  ;;  %v7614_v24 = vmax.bf16 %v7613_v2, %v6006_v53  ;;  %v6018_v28 = vmul.bf16 %v13648_v48, %v13558_v38  ;;  %v6019_v0 = vmul.bf16 %v13660_v20, %v13564_v13 }
 0x585   : > { %3763 = vbcast.lane.c.b16.xlu1 %v3741_v15, 336  ;;  %3759 = vbcast.lane.c.b16.xlu0 %v3741_v15, 320  ;;  %v6008_v2 = vmul.bf16 %v13720_v8, %v13536_v6  ;;  %v6014_v38 = vmul.bf16 %v13694_v22, %v13548_v58  ;;  %v6025_v13 = vmul.bf16 %v13652_v51, %v13578_v10 }
 0x586   : > { %v7629_v35 = vmax.bf16 %v7628_v26, %v6012_v7  ;;  %v7644_v53 = vmax.bf16 %v6018_v28, %v6017_v30  ;;  %v6015_v7 = vmul.bf16 %v13702_v29, %v13556_v60  ;;  %v6027_v58 = vmul.bf16 %v13660_v20, %v13582_v62  ;;  %v17100_v28 = vld [vmem:[#allocation28_spill] sm:$0xff] }
 0x587   : > { %v13726_v59 = vpop.permute.xlu1 %3515  ;;  %v13728_v36 = vpop.permute.xlu0 %3511  ;;  %v3814_v10 = vrot.slane %v13668_v54, %v17100_v28 }
 0x588   : > { %17099 = vst [vmem:[#allocation52_spill] sm:$0xff] %v13726_v59  ;;  %v7601_v59 = vunpack.i.h.bf16 %v7599_v5  ;;  %v7615_v5 = vmax.bf16 %v7614_v24, %v6007_v57  ;;  %v7645_v57 = vmax.bf16 %v7644_v53, %v6019_v0  ;;  %v6021_v0 = vmul.bf16 %v13678_v63, %v13568_v11 }
 0x589   : > { %3771 = vbcast.lane.c.b16.xlu1 %v3741_v15, 368  ;;  %3767 = vbcast.lane.c.b16.xlu0 %v3741_v15, 352  ;;  %v6013_v15 = vmul.bf16 %v13678_v63, %v13550_v31  ;;  %v6033_v11 = vmul.bf16 %v13652_v51, %v13596_v19 }
 0x58a   : > { %v7602_v12 = vmax.f32 %v7600_v55, %v7601_v59  ;;  %v7616_v27 = vmax.bf16 %v7615_v5, %v6008_v2  ;;  %v6026_v55 = vmul.bf16 %v13648_v48, %v13576_v42  ;;  %v6020_v42 = vmul.bf16 %v13670_v43, %v13562_v46 }
 0x58b   : > { %v13732_v18 = vpop.permute.xlu1 %3523  ;;  %v13736_v3 = vpop.permute.xlu0 %3519  ;;  %v7630_v56 = vmax.bf16 %v7629_v35, %v6013_v15  ;;  %v6016_v46 = vmul.bf16 %v13720_v8, %v13554_v23 }
 0x58c   : > { %v7603_v59 = vrot.slane %v7602_v12, 4  ;;  %v7617_v30 = vunpack.i.l.bf16 %v7616_v27  ;;  %v7618_v5 = vunpack.i.h.bf16 %v7616_v27  ;;  %v7661_v60 = vmax.bf16 %v6026_v55, %v6025_v13 }
 0x58d   : > { %3785 = vbcast.lane.c.b16.xlu1 %v3779_v34, 272  ;;  %3781 = vbcast.lane.c.b16.xlu0 %v3779_v34, 256  ;;  %v7631_v6 = vmax.bf16 %v7630_v56, %v6014_v38  ;;  %v7646_v2 = vmax.bf16 %v7645_v57, %v6020_v42  ;;  %v6028_v27 = vmul.bf16 %v13670_v43, %v13580_v44 }
 0x58e   : > { %v7604_v35 = vmax.f32 %v7602_v12, %v7603_v59  ;;  %v7662_v38 = vmax.bf16 %v7661_v60, %v6027_v58  ;;  %v7619_v53 = vmax.f32 %v7617_v30, %v7618_v5  ;;  %v6035_v57 = vmul.bf16 %v13660_v20, %v13600_v50 }
 0x58f   : > { %v13744_v32 = vpop.permute.xlu1 %3534  ;;  %v13746_v17 = vpop.permute.xlu0 %3530  ;;  %v7632_v56 = vmax.bf16 %v7631_v6, %v6015_v7  ;;  %v7647_v13 = vmax.bf16 %v7646_v2, %v6021_v0  ;;  %v6029_v6 = vmul.bf16 %v13678_v63, %v13586_v9  ;;  %v6022_v44 = vmul.bf16 %v13694_v22, %v13566_v21 }
 0x590   : > { %v7605_v59 = vrot.slane %v7604_v35, 2  ;;  %v7663_v23 = vmax.bf16 %v7662_v38, %v6028_v27  ;;  %v7620_v19 = vrot.slane %v7619_v53, 4  ;;  %v6023_v60 = vmul.bf16 %v13702_v29, %v13574_v4 }
 0x591   : > { %3793 = vbcast.lane.c.b16.xlu1 %v3779_v34, 304  ;;  %3789 = vbcast.lane.c.b16.xlu0 %v3779_v34, 288  ;;  %v7633_v55 = vmax.bf16 %v7632_v56, %v6016_v46  ;;  %v7648_v9 = vmax.bf16 %v7647_v13, %v6022_v44  ;;  %v6042_v44 = vmul.bf16 %v13648_v48, %v13612_v61  ;;  %v17102_v61 = vld [vmem:[#allocation72_spill] sm:$0xff] }
 0x592   : > { %v7664_v0 = vmax.bf16 %v7663_v23, %v6029_v6  ;;  %v7621_v21 = vmax.f32 %v7619_v53, %v7620_v19 }
 0x593   : > { %v13754_v31 = vpop.permute.xlu1 %3542  ;;  %v13758_v26 = vpop.permute.xlu0 %3538  ;;  %v7634_v30 = vunpack.i.l.bf16 %v7633_v55  ;;  %v7635_v5 = vunpack.i.h.bf16 %v7633_v55  ;;  %v7649_v27 = vmax.bf16 %v7648_v9, %v6023_v60  ;;  %v6037_v55 = vmul.bf16 %v13678_v63, %v13604_v25  ;;  %v17101_v60 = vld [vmem:[#allocation87_spill] sm:$0xff] }
 0x594   : > { %v7622_v23 = vrot.slane %v7621_v21, 2  ;;  %v6041_v25 = vmul.bf16 %v13652_v51, %v13614_v14  ;;  %v6032_v9 = vmul.bf16 %v13720_v8, %v17101_v60  ;;  %v17108_v60 = vld [vmem:[#allocation89_spill] sm:$0xff] }
 0x595   : > { %3801 = vbcast.lane.c.b16.xlu1 %v3779_v34, 336  ;;  %3797 = vbcast.lane.c.b16.xlu0 %v3779_v34, 320  ;;  %v7636_v46 = vmax.f32 %v7634_v30, %v7635_v5  ;;  %v6043_v5 = vmul.bf16 %v13660_v20, %v13618_v52  ;;  %v17103_v52 = vld [vmem:[#allocation39_spill] sm:$0xff] }
 0x597   : > { %v13768_v24 = vpop.permute.xlu1 %3550  ;;  %v13772_v15 = vpop.permute.xlu0 %3546 }
 0x599   : > { %3809 = vbcast.lane.c.b16.xlu1 %v3779_v34, 368  ;;  %3805 = vbcast.lane.c.b16.xlu0 %v3779_v34, 352  ;;  %v6034_v34 = vmul.bf16 %v13648_v48, %v13594_v37  ;;  %v7606_v37 = vmax.f32 %v7604_v35, %v7605_v59  ;;  %v6030_v35 = vmul.bf16 %v13694_v22, %v13584_v33 }
 0x59a   : > { %v6036_v59 = vmul.bf16 %v13670_v43, %v13598_v47  ;;  %v6024_v33 = vmul.bf16 %v13720_v8, %v13572_v45  ;;  %v13824_v47 = vrot.slane %v13716_v40, %v17100_v28 }
 0x59b   : > { %v13780_v62 = vpop.permute.xlu1 %3558  ;;  %v13782_v12 = vpop.permute.xlu0 %3554  ;;  %v7678_v42 = vmax.bf16 %v6034_v34, %v6033_v11  ;;  %v7607_v38 = vrot.slane %v7606_v37, 1  ;;  %v6031_v34 = vmul.bf16 %v13702_v29, %v13592_v16  ;;  %v7665_v11 = vmax.bf16 %v7664_v0, %v6030_v35 }
 0x59c   : > { %v7650_v16 = vmax.bf16 %v7649_v27, %v6024_v33  ;;  %v6038_v0 = vmul.bf16 %v13694_v22, %v17102_v61  ;;  %v7695_v35 = vmax.bf16 %v6042_v44, %v6041_v25  ;;  %v17109_v61 = vld [vmem:[#allocation50_spill] sm:$0xff] }
 0x59d   : > { %3820 = vbcast.lane.c.b16.xlu1 %v3814_v10, 272  ;;  %3816 = vbcast.lane.c.b16.xlu0 %v3814_v10, 256  ;;  %v7679_v50 = vmax.bf16 %v7678_v42, %v6035_v57  ;;  %v7608_v6 = vmax.f32 %v7606_v37, %v7607_v38  ;;  %v7637_v57 = vrot.slane %v7636_v46, 4  ;;  %v7666_v42 = vmax.bf16 %v7665_v11, %v6031_v34 }
 0x59e   : > { %v7623_v37 = vmax.f32 %v7621_v21, %v7622_v23  ;;  %v7652_v38 = vunpack.i.h.bf16 %v7650_v16  ;;  %v6039_v34 = vmul.bf16 %v13702_v29, %v17103_v52 }
 0x59f   : > { %v13792_v7 = vpop.permute.xlu1 %3569  ;;  %v13798_v58 = vpop.permute.xlu0 %3565  ;;  %v7680_v13 = vmax.bf16 %v7679_v50, %v6036_v59  ;;  %v7638_v14 = vmax.f32 %v7636_v46, %v7637_v57  ;;  %v7651_v50 = vunpack.i.l.bf16 %v7650_v16  ;;  %v7667_v27 = vmax.bf16 %v7666_v42, %v6032_v9  ;;  %v17107_v57 = vld [vmem:[#allocation82_spill] sm:$0xff] }
 0x5a0   : > { %v7624_v46 = vrot.slane %v7623_v37, 1  ;;  %v6044_v16 = vmul.bf16 %v13670_v43, %v17107_v57  ;;  %v17113_v57 = vld [vmem:[#allocation59_spill] sm:$0xff] }
 0x5a1   : > { %3828 = vbcast.lane.c.b16.xlu1 %v3814_v10, 304  ;;  %3824 = vbcast.lane.c.b16.xlu0 %v3814_v10, 288  ;;  %v7681_v45 = vmax.bf16 %v7680_v13, %v6037_v55  ;;  %v7696_v55 = vmax.bf16 %v7695_v35, %v6043_v5  ;;  %v17104_v13 = vmov 0   ;;  %v13853_v23 = vmax.f32 %v7651_v50, %v7652_v38 }
 0x5a2   : > { %v7668_v25 = vunpack.i.l.bf16 %v7667_v27  ;;  %v7669_v42 = vunpack.i.h.bf16 %v7667_v27  ;;  %v13868_v38 = vmax.f32 %v7623_v37, %v7624_v46  ;;  %v17114_v46 = vld [vmem:[#allocation41_spill] sm:$0xff] }
 0x5a3   : > { %v13804_v56 = vpop.permute.xlu1 %3577  ;;  %v13806_v2 = vpop.permute.xlu0 %3573  ;;  %v7682_v11 = vmax.bf16 %v7681_v45, %v6038_v0  ;;  %17106 = vst [vmem:[#allocation91_spill] sm:$0xff] %v13853_v23  ;;  %v7697_v9 = vmax.bf16 %v7696_v55, %v6044_v16  ;;  %v6040_v0 = vmul.bf16 %v13720_v8, %v17109_v61  ;;  %v6066_v55 = vmul.bf16 %v13648_v48, %v13698_v49 }
 0x5a4   : > { %17110 = vst [vmem:[#allocation64_spill] sm:$0xff] %v13868_v38  ;;  %v6065_v16 = vmul.bf16 %v13652_v51, %v17113_v57  ;;  %v17118_v57 = vld [vmem:[#allocation55_spill] sm:$0xff] }
 0x5a5   : > { %3836 = vbcast.lane.c.b16.xlu1 %v3814_v10, 336  ;;  %3832 = vbcast.lane.c.b16.xlu0 %v3814_v10, 320  ;;  %v7683_v45 = vmax.bf16 %v7682_v11, %v6039_v34  ;;  %v13875_v34 = vmax.f32 %v7668_v25, %v7669_v42  ;;  %v17116_v25 = vld [vmem:[#allocation29_spill] sm:$0xff] }
 0x5a6   : > { %v13892_v42 = vrot.slane %v13668_v54, %v17116_v25 }
 0x5a7   : > { %v13812_v4 = vpop.permute.xlu1 %3585  ;;  %v13818_v53 = vpop.permute.xlu0 %3581  ;;  %17112 = vst [vmem:[#allocation73_spill] sm:$0xff] %v13875_v34  ;;  %v13877_v11 = vmax.bf16 %v7683_v45, %v6040_v0  ;;  %v17117_v45 = vld [vmem:[#allocation47_spill] sm:$0xff]  ;;  %v6067_v0 = vmul.bf16 %v13660_v20, %v13710_v1  ;;  %v6081_v1 = vmul.bf16 %v13652_v51, %v13798_v58  ;;  %v17123_v34 = vld [vmem:[#allocation44_spill] sm:$0xff] }
 0x5a8   : > { %v6057_v49 = vmul.bf16 %v13652_v51, %v17117_v45  ;;  %v6082_v45 = vmul.bf16 %v13648_v48, %v13792_v7  ;;  %v6051_v58 = vmul.bf16 %v13660_v20, %v17123_v34  ;;  %v6069_v34 = vmul.bf16 %v13678_v63, %v13728_v36 }
 0x5a9   : > { %3844 = vbcast.lane.c.b16.xlu1 %v3814_v10, 368  ;;  %3840 = vbcast.lane.c.b16.xlu0 %v3814_v10, 352  ;;  %v7609_v10 = vpack.i.bf16 %v7608_v6, %v7608_v6  ;;  %v7639_v6 = vrot.slane %v7638_v14, 2  ;;  %v6077_v36 = vmul.bf16 %v13678_v63, %v13772_v15 }
 0x5aa   : > { %v7780_v23 = vmax.bf16 %v6082_v45, %v6081_v1  ;;  %v17126_v45 = vld [vmem:[#allocation43_spill] sm:$0xff] }
 0x5ab   : > { %v13830_v19 = vpop.permute.xlu1 %3593  ;;  %v13832_v30 = vpop.permute.xlu0 %3589  ;;  %v13850_v33 = vmax.bf16 %v17104_v13, %v7609_v10  ;;  %v6045_v10 = vmul.bf16 %v13678_v63, %v17108_v60  ;;  %v13870_v35 = vmax.f32 %v7638_v14, %v7639_v6  ;;  %v6050_v14 = vmul.bf16 %v13648_v48, %v17114_v46  ;;  %v17115_v6 = vld [vmem:[#allocation85_spill] sm:$0xff] }
 0x5ac   : > { %v6058_v61 = vmul.bf16 %v13648_v48, %v17115_v6  ;;  %v6049_v46 = vmul.bf16 %v13652_v51, %v17118_v57  ;;  %v17119_v6 = vld [vmem:[#allocation48_spill] sm:$0xff]  ;;  %v6061_v1 = vmul.bf16 %v13678_v63, %v17126_v45 }
 0x5ad   : > { %3855 = vbcast.lane.c.b16.xlu1 %v13824_v47, 272  ;;  %3851 = vbcast.lane.c.b16.xlu0 %v13824_v47, 256  ;;  %17105 = vst [vmem:[#allocation79_spill] sm:$0xff] %v13850_v33  ;;  %17111 = vst [vmem:[#allocation84_spill] sm:$0xff] %v13870_v35  ;;  %v7698_v37 = vmax.bf16 %v7697_v9, %v6045_v10  ;;  %v6074_v10 = vmul.bf16 %v13648_v48, %v13744_v32  ;;  %v17122_v33 = vld [vmem:[#allocation67_spill] sm:$0xff] }
 0x5ae   : > { %v6073_v9 = vmul.bf16 %v13652_v51, %v13746_v17  ;;  %v6059_v50 = vmul.bf16 %v13660_v20, %v17119_v6  ;;  %v7746_v32 = vmax.bf16 %v6066_v55, %v6065_v16  ;;  %v6075_v17 = vmul.bf16 %v13660_v20, %v13758_v26  ;;  %v17120_v6 = vld [vmem:[#allocation37_spill] sm:$0xff] }
 0x5af   : > { %v13842_v59 = vpop.permute.xlu1 %3604  ;;  %v13846_v21 = vpop.permute.xlu0 %3600  ;;  %v6046_v7 = vmul.bf16 %v13694_v22, %v17120_v6  ;;  %v6047_v55 = vmul.bf16 %v13702_v29, %v17122_v33  ;;  %v6083_v26 = vmul.bf16 %v13660_v20, %v13806_v2  ;;  %v7712_v38 = vmax.bf16 %v6050_v14, %v6049_v46  ;;  %v17125_v14 = vld [vmem:[#allocation63_spill] sm:$0xff] }
 0x5b0   : > { %v6089_v57 = vmul.bf16 %v13652_v51, %v13846_v21  ;;  %v7747_v16 = vmax.bf16 %v7746_v32, %v6067_v0  ;;  %v7763_v13 = vmax.bf16 %v6074_v10, %v6073_v9  ;;  %v6068_v2 = vmul.bf16 %v13670_v43, %v13706_v41  ;;  %v17124_v0 = vld [vmem:[#allocation81_spill] sm:$0xff] }
 0x5b1   : > { %3863 = vbcast.lane.c.b16.xlu1 %v13824_v47, 304  ;;  %3859 = vbcast.lane.c.b16.xlu0 %v13824_v47, 288  ;;  %v7699_v6 = vmax.bf16 %v7698_v37, %v6046_v7  ;;  %v6060_v10 = vmul.bf16 %v13670_v43, %v17124_v0  ;;  %v6076_v41 = vmul.bf16 %v13670_v43, %v13754_v31 }
 0x5b2   : > { %v7764_v54 = vmax.bf16 %v7763_v13, %v6075_v17  ;;  %v6052_v46 = vmul.bf16 %v13670_v43, %v17125_v14  ;;  %v6084_v32 = vmul.bf16 %v13670_v43, %v13804_v56 }
 0x5b3   : > { %v13857_v44 = vpop.permute.xlu1 %3612  ;;  %v13859_v5 = vpop.permute.xlu0 %3608  ;;  %v7700_v56 = vmax.bf16 %v7699_v6, %v6047_v55 }
 0x5b4   : > { %v6091_v21 = vmul.bf16 %v13660_v20, %v13859_v5  ;;  %v7781_v5 = vmax.bf16 %v7780_v23, %v6083_v26  ;;  %v7713_v23 = vmax.bf16 %v7712_v38, %v6051_v58  ;;  %v6092_v31 = vmul.bf16 %v13670_v43, %v13857_v44 }
 0x5b5   : > { %3871 = vbcast.lane.c.b16.xlu1 %v13824_v47, 336  ;;  %3867 = vbcast.lane.c.b16.xlu0 %v13824_v47, 320  ;;  %v6085_v26 = vmul.bf16 %v13678_v63, %v13818_v53 }
 0x5b6   : > { %v7782_v38 = vmax.bf16 %v7781_v5, %v6084_v32 }
 0x5b7   : > { %v13873_v52 = vpop.permute.xlu1 %3620  ;;  %v13883_v60 = vpop.permute.xlu0 %3616 }
 0x5b9   : > { %3879 = vbcast.lane.c.b16.xlu1 %v13824_v47, 368  ;;  %3875 = vbcast.lane.c.b16.xlu0 %v13824_v47, 352  ;;  %v6090_v47 = vmul.bf16 %v13648_v48, %v13842_v59  ;;  %v7729_v59 = vmax.bf16 %v6058_v61, %v6057_v49 }
 0x5bb   : > { %v13911_v27 = vpop.permute.xlu1 %3628  ;;  %v13919_v28 = vpop.permute.xlu0 %3624  ;;  %v7730_v35 = vmax.bf16 %v7729_v59, %v6059_v50  ;;  %v7797_v61 = vmax.bf16 %v6090_v47, %v6089_v57  ;;  %v7748_v50 = vmax.bf16 %v7747_v16, %v6068_v2  ;;  %v7765_v57 = vmax.bf16 %v7764_v54, %v6076_v41  ;;  %v17127_v54 = vld [vmem:[#allocation33_spill] sm:$0xff] }
 0x5bc   : > { %v6053_v44 = vmul.bf16 %v13678_v63, %v17127_v54 }
 0x5bd   : > { %3890 = vbcast.lane.c.b16.xlu1 %v13892_v42, 272  ;;  %3886 = vbcast.lane.c.b16.xlu0 %v13892_v42, 256  ;;  %v7798_v13 = vmax.bf16 %v7797_v61, %v6091_v21  ;;  %v7731_v47 = vmax.bf16 %v7730_v35, %v6060_v10  ;;  %v7749_v16 = vmax.bf16 %v7748_v50, %v6069_v34  ;;  %v17129_v10 = vld [vmem:[#allocation40_spill] sm:$0xff] }
 0x5be   : > { %v6093_v35 = vmul.bf16 %v13678_v63, %v13883_v60  ;;  %v7714_v21 = vmax.bf16 %v7713_v23, %v6052_v46  ;;  %v7766_v55 = vmax.bf16 %v7765_v57, %v6077_v36  ;;  %v13971_v60 = vrot.slane %v13716_v40, %v17116_v25  ;;  %v17130_v23 = vld [vmem:[#allocation66_spill] sm:$0xff] }
 0x5bf   : > { %v3640_v33 = vpop.permute.xlu1 %3639  ;;  %v3636_v49 = vpop.permute.xlu0 %3635  ;;  %v7799_v15 = vmax.bf16 %v7798_v13, %v6092_v31  ;;  %v7732_v61 = vmax.bf16 %v7731_v47, %v6061_v1  ;;  %v6062_v5 = vmul.bf16 %v13694_v22, %v17129_v10  ;;  %v6071_v50 = vmul.bf16 %v13702_v29, %v13736_v3  ;;  %v17131_v31 = vld [vmem:[#allocation90_spill] sm:$0xff] }
 0x5c0   : > { %v6098_v9 = vmul.bf16 %v13648_v48, %v3640_v33  ;;  %v6097_v37 = vmul.bf16 %v13652_v51, %v3636_v49  ;;  %v17128_v49 = vld [vmem:[#allocation52_spill] sm:$0xff]  ;;  %v6078_v13 = vmul.bf16 %v13694_v22, %v13768_v24  ;;  %v7715_v46 = vmax.bf16 %v7714_v21, %v6053_v44 }
 0x5c1   : > { %3898 = vbcast.lane.c.b16.xlu1 %v13892_v42, 304  ;;  %3894 = vbcast.lane.c.b16.xlu0 %v13892_v42, 288  ;;  %v6070_v0 = vmul.bf16 %v13694_v22, %v17128_v49  ;;  %v7800_v14 = vmax.bf16 %v7799_v15, %v6093_v35  ;;  %v6063_v45 = vmul.bf16 %v13702_v29, %v17130_v23  ;;  %v7685_v21 = vunpack.i.l.bf16 %v13877_v11 }
 0x5c2   : > { %v7814_v58 = vmax.bf16 %v6098_v9, %v6097_v37  ;;  %v7783_v9 = vmax.bf16 %v7782_v38, %v6085_v26  ;;  %v6086_v1 = vmul.bf16 %v13694_v22, %v13812_v4  ;;  %v7733_v47 = vmax.bf16 %v7732_v61, %v6062_v5 }
 0x5c3   : > { %v3648_v17 = vpop.permute.xlu1 %3647  ;;  %v3644_v7 = vpop.permute.xlu0 %3643  ;;  %v7750_v41 = vmax.bf16 %v7749_v16, %v6070_v0  ;;  %v6079_v3 = vmul.bf16 %v13702_v29, %v13782_v12  ;;  %v7767_v36 = vmax.bf16 %v7766_v55, %v6078_v13  ;;  %v6094_v24 = vmul.bf16 %v13694_v22, %v13873_v52  ;;  %v17133_v16 = vld [vmem:[#allocation42_spill] sm:$0xff]  ;;  %v17134_v0 = vld [vmem:[#allocation36_spill] sm:$0xff] }
 0x5c4   : > { %v6099_v59 = vmul.bf16 %v13660_v20, %v3644_v7  ;;  %v6100_v53 = vmul.bf16 %v13670_v43, %v3648_v17  ;;  %v6087_v7 = vmul.bf16 %v13702_v29, %v13832_v30  ;;  %v7784_v26 = vmax.bf16 %v7783_v9, %v6086_v1 }
 0x5c5   : > { %3906 = vbcast.lane.c.b16.xlu1 %v13892_v42, 336  ;;  %3902 = vbcast.lane.c.b16.xlu0 %v13892_v42, 320  ;;  %v17132_v38 = vmul.bf16 %v13720_v8, %v17121_v39  ;;  %v6095_v52 = vmul.bf16 %v13702_v29, %v13919_v28  ;;  %v6055_v30 = vmul.bf16 %v13702_v29, %v17133_v16  ;;  %v7686_v28 = vunpack.i.h.bf16 %v13877_v11 }
 0x5c6   : > { %v7815_v33 = vmax.bf16 %v7814_v58, %v6099_v59  ;;  %v7751_v58 = vmax.bf16 %v7750_v41, %v6071_v50  ;;  %v7801_v59 = vmax.bf16 %v7800_v14, %v6094_v24  ;;  %v7734_v39 = vmax.bf16 %v7733_v47, %v6063_v45  ;;  %v17135_v41 = vld [vmem:[#allocation76_spill] sm:$0xff]  ;;  %v17136_v24 = vld [vmem:[#allocation30_spill] sm:$0xff] }
 0x5c7   : > { %v3656_v2 = vpop.permute.xlu1 %3655  ;;  %v3652_v6 = vpop.permute.xlu0 %3651  ;;  %v13999_v12 = vmax.bf16 %v7700_v56, %v17132_v38  ;;  %v6072_v56 = vmul.bf16 %v13720_v8, %v13732_v18  ;;  %v6064_v55 = vmul.bf16 %v13720_v8, %v17134_v0  ;;  %v6080_v10 = vmul.bf16 %v13720_v8, %v13780_v62 }
 0x5c8   : > { %v6101_v37 = vmul.bf16 %v13678_v63, %v3652_v6  ;;  %v7816_v34 = vmax.bf16 %v7815_v33, %v6100_v53  ;;  %v6102_v4 = vmul.bf16 %v13694_v22, %v3656_v2  ;;  %v7768_v53 = vmax.bf16 %v7767_v36, %v6079_v3 }
 0x5c9   : > { %3914 = vbcast.lane.c.b16.xlu1 %v13892_v42, 368  ;;  %3910 = vbcast.lane.c.b16.xlu0 %v13892_v42, 352  ;;  %v6054_v42 = vmul.bf16 %v13694_v22, %v17131_v31  ;;  %v7785_v2 = vmax.bf16 %v7784_v26, %v6087_v7  ;;  %v7752_v6 = vmax.bf16 %v7751_v58, %v6072_v56  ;;  %v7702_v18 = vunpack.i.l.bf16 %v13999_v12 }
 0x5ca   : > { %v7817_v32 = vmax.bf16 %v7816_v34, %v6101_v37  ;;  %v7802_v5 = vmax.bf16 %v7801_v59, %v6095_v52  ;;  %v6088_v37 = vmul.bf16 %v13720_v8, %v13830_v19  ;;  %v6056_v13 = vmul.bf16 %v13720_v8, %v17135_v41 }
 0x5cb   : > { %v3664_v17 = vpop.permute.xlu1 %3663  ;;  %v3660_v57 = vpop.permute.xlu0 %3659  ;;  %v7716_v35 = vmax.bf16 %v7715_v46, %v6054_v42  ;;  %v7735_v14 = vmax.bf16 %v7734_v39, %v6064_v55  ;;  %v7769_v46 = vmax.bf16 %v7768_v53, %v6080_v10  ;;  %v6096_v23 = vmul.bf16 %v13720_v8, %v13911_v27 }
 0x5cc   : > { %v6103_v15 = vmul.bf16 %v13702_v29, %v3660_v57  ;;  %v7818_v54 = vmax.bf16 %v7817_v32, %v6102_v4  ;;  %v7786_v45 = vmax.bf16 %v7785_v2, %v6088_v37  ;;  %v6104_v1 = vmul.bf16 %v13720_v8, %v3664_v17  ;;  %v17137_v57 = vld [vmem:[#allocation51_spill] sm:$0xff] }
 0x5cd   : > { %3925 = vbcast.lane.c.b16.xlu1 %v13971_v60, 272  ;;  %3921 = vbcast.lane.c.b16.xlu0 %v13971_v60, 256  ;;  %v7717_v9 = vmax.bf16 %v7716_v35, %v6055_v30  ;;  %v7753_v19 = vunpack.i.l.bf16 %v7752_v6  ;;  %v7754_v3 = vunpack.i.h.bf16 %v7752_v6  ;;  %v7803_v36 = vmax.bf16 %v7802_v5, %v6096_v23 }
 0x5ce   : > { %v7819_v34 = vmax.bf16 %v7818_v54, %v6103_v15  ;;  %v14032_v31 = vrot.slane %v17137_v57, %v17136_v24  ;;  %v7736_v4 = vunpack.i.l.bf16 %v7735_v14  ;;  %v7737_v38 = vunpack.i.h.bf16 %v7735_v14 }
 0x5cf   : > { %v3675_v44 = vpop.permute.xlu1 %3674  ;;  %v3671_v33 = vpop.permute.xlu0 %3670  ;;  %v7718_v42 = vmax.bf16 %v7717_v9, %v6056_v13  ;;  %v7770_v58 = vunpack.i.l.bf16 %v7769_v46  ;;  %v7771_v52 = vunpack.i.h.bf16 %v7769_v46  ;;  %v7787_v16 = vunpack.i.l.bf16 %v7786_v45  ;;  %v17138_v9 = vld [vmem:[#allocation84_spill] sm:$0xff]  ;;  %v17139_v46 = vld [vmem:[#allocation91_spill] sm:$0xff] }
 0x5d0   : > { %v6106_v61 = vmul.bf16 %v13648_v48, %v3675_v44  ;;  %v6105_v49 = vmul.bf16 %v13652_v51, %v3671_v33  ;;  %v7820_v27 = vmax.bf16 %v7819_v34, %v6104_v1  ;;  %v7788_v30 = vunpack.i.h.bf16 %v7786_v45 }
 0x5d1   : > { %3933 = vbcast.lane.c.b16.xlu1 %v13971_v60, 304  ;;  %3929 = vbcast.lane.c.b16.xlu0 %v13971_v60, 288  ;;  %v7703_v54 = vunpack.i.h.bf16 %v13999_v12  ;;  %v7755_v44 = vmax.f32 %v7753_v19, %v7754_v3  ;;  %v7804_v39 = vunpack.i.l.bf16 %v7803_v36  ;;  %v7805_v56 = vunpack.i.h.bf16 %v7803_v36  ;;  %v17141_v19 = vld [vmem:[#allocation73_spill] sm:$0xff] }
 0x5d2   : > { %v7831_v32 = vmax.bf16 %v6106_v61, %v6105_v49  ;;  %v7821_v53 = vunpack.i.l.bf16 %v7820_v27  ;;  %v7822_v33 = vunpack.i.h.bf16 %v7820_v27  ;;  %v7719_v0 = vunpack.i.l.bf16 %v7718_v42 }
 0x5d3   : > { %v3683_v50 = vpop.permute.xlu1 %3682  ;;  %v3679_v62 = vpop.permute.xlu0 %3678  ;;  %v7720_v55 = vunpack.i.h.bf16 %v7718_v42  ;;  %v7738_v6 = vmax.f32 %v7736_v4, %v7737_v38  ;;  %v7772_v10 = vmax.f32 %v7770_v58, %v7771_v52  ;;  %v7641_v37 = vrot.slane %v17138_v9, 1 }
 0x5d4   : > { %v6107_v47 = vmul.bf16 %v13660_v20, %v3679_v62  ;;  %v6108_v7 = vmul.bf16 %v13670_v43, %v3683_v50  ;;  %v7789_v34 = vmax.f32 %v7787_v16, %v7788_v30  ;;  %v7704_v41 = vmax.f32 %v7702_v18, %v7703_v54 }
 0x5d5   : > { %3941 = vbcast.lane.c.b16.xlu1 %v13971_v60, 336  ;;  %3937 = vbcast.lane.c.b16.xlu0 %v13971_v60, 320  ;;  %v7756_v13 = vrot.slane %v7755_v44, 4  ;;  %v7806_v14 = vmax.f32 %v7804_v39, %v7805_v56  ;;  %v17140_v23 = vrot.slane %v17139_v46, 4  ;;  %v7823_v45 = vmax.f32 %v7821_v53, %v7822_v33 }
 0x5d6   : > { %v7832_v26 = vmax.bf16 %v7831_v32, %v6107_v47  ;;  %v7671_v3 = vrot.slane %v17141_v19, 4  ;;  %v7721_v36 = vmax.f32 %v7719_v0, %v7720_v55  ;;  %v7739_v42 = vrot.slane %v7738_v6, 4 }
 0x5d7   : > { %v3691_v17 = vpop.permute.xlu1 %3690  ;;  %v3687_v59 = vpop.permute.xlu0 %3686  ;;  %v7655_v62 = vmax.f32 %v17139_v46, %v17140_v23  ;;  %v7773_v11 = vrot.slane %v7772_v10, 4  ;;  %v7757_v4 = vmax.f32 %v7755_v44, %v7756_v13  ;;  %v7807_v38 = vrot.slane %v7806_v14, 4 }
 0x5d8   : > { %v6109_v35 = vmul.bf16 %v13678_v63, %v3687_v59  ;;  %v7833_v15 = vmax.bf16 %v7832_v26, %v6108_v7  ;;  %v6110_v2 = vmul.bf16 %v13694_v22, %v3691_v17  ;;  %v7705_v17 = vrot.slane %v7704_v41, 4 }
 0x5d9   : > { %3949 = vbcast.lane.c.b16.xlu1 %v13971_v60, 368  ;;  %3945 = vbcast.lane.c.b16.xlu0 %v13971_v60, 352  ;;  %v7687_v60 = vmax.f32 %v7685_v21, %v7686_v28  ;;  %v7790_v28 = vrot.slane %v7789_v34, 4  ;;  %v7656_v58 = vrot.slane %v7655_v62, 2  ;;  %v7824_v52 = vrot.slane %v7823_v45, 4 }
 0x5da   : > { %v7834_v61 = vmax.bf16 %v7833_v15, %v6109_v35  ;;  %v7672_v35 = vmax.f32 %v17141_v19, %v7671_v3  ;;  %v7722_v15 = vrot.slane %v7721_v36, 4  ;;  %v7740_v54 = vmax.f32 %v7738_v6, %v7739_v42 }
 0x5db   : > { %v3699_v49 = vpop.permute.xlu1 %3698  ;;  %v3695_v5 = vpop.permute.xlu0 %3694  ;;  %v7688_v26 = vrot.slane %v7687_v60, 4  ;;  %v7825_v0 = vmax.f32 %v7823_v45, %v7824_v52  ;;  %v7657_v23 = vmax.f32 %v7655_v62, %v7656_v58 }
 0x5dc   : > { %v6111_v12 = vmul.bf16 %v13702_v29, %v3695_v5  ;;  %v7835_v50 = vmax.bf16 %v7834_v61, %v6110_v2  ;;  %v6112_v1 = vmul.bf16 %v13720_v8, %v3699_v49  ;;  %v7706_v2 = vmax.f32 %v7704_v41, %v7705_v17 }
 0x5dd   : > { %3960 = vbcast.lane.c.b16.xlu1 %v14032_v31, 272  ;;  %3956 = vbcast.lane.c.b16.xlu0 %v14032_v31, 256  ;;  %v7689_v44 = vmax.f32 %v7687_v60, %v7688_v26  ;;  %v7758_v61 = vrot.slane %v7757_v4, 2  ;;  %v7808_v49 = vmax.f32 %v7806_v14, %v7807_v38  ;;  %v7673_v45 = vrot.slane %v7672_v35, 2 }
 0x5de   : > { %v7836_v32 = vmax.bf16 %v7835_v50, %v6111_v12  ;;  %v7723_v12 = vmax.f32 %v7721_v36, %v7722_v15  ;;  %v7707_v42 = vrot.slane %v7706_v2, 2  ;;  %v7658_v26 = vrot.slane %v7657_v23, 1 }
 0x5df   : > { %v3710_v47 = vpop.permute.xlu1 %3709  ;;  %v3706_v21 = vpop.permute.xlu0 %3705 }
 0x5e0   : > { %v7837_v18 = vmax.bf16 %v7836_v32, %v6112_v1  ;;  %v6114_v27 = vmul.bf16 %v13648_v48, %v3710_v47  ;;  %v6113_v7 = vmul.bf16 %v13652_v51, %v3706_v21  ;;  %v7774_v48 = vmax.f32 %v7772_v10, %v7773_v11 }
 0x5e1   : > { %3968 = vbcast.lane.c.b16.xlu1 %v14032_v31, 304  ;;  %3964 = vbcast.lane.c.b16.xlu0 %v14032_v31, 288  ;;  %v7791_v51 = vmax.f32 %v7789_v34, %v7790_v28  ;;  %v7741_v34 = vrot.slane %v7740_v54, 2  ;;  %v7809_v1 = vrot.slane %v7808_v49, 2  ;;  %v7759_v32 = vmax.f32 %v7757_v4, %v7758_v61 }
 0x5e2   : > { %v7838_v59 = vunpack.i.l.bf16 %v7837_v18  ;;  %v7839_v16 = vunpack.i.h.bf16 %v7837_v18  ;;  %v7848_v53 = vmax.bf16 %v6114_v27, %v6113_v7  ;;  %v7775_v50 = vrot.slane %v7774_v48, 2 }
 0x5e3   : > { %v3718_v30 = vpop.permute.xlu1 %3717  ;;  %v3714_v39 = vpop.permute.xlu0 %3713  ;;  %v7792_v60 = vrot.slane %v7791_v51, 2  ;;  %v7826_v47 = vrot.slane %v7825_v0, 2  ;;  %v7724_v11 = vrot.slane %v7723_v12, 2  ;;  %v7742_v18 = vmax.f32 %v7740_v54, %v7741_v34 }
 0x5e4   : > { %v7840_v56 = vmax.f32 %v7838_v59, %v7839_v16  ;;  %v6115_v33 = vmul.bf16 %v13660_v20, %v3714_v39  ;;  %v6116_v5 = vmul.bf16 %v13670_v43, %v3718_v30  ;;  %v14064_v20 = vrot.slane %v13716_v40, %v17136_v24 }
 0x5e5   : > { %3976 = vbcast.lane.c.b16.xlu1 %v14032_v31, 336  ;;  %3972 = vbcast.lane.c.b16.xlu0 %v14032_v31, 320  ;;  %v7690_v43 = vrot.slane %v7689_v44, 2  ;;  %v7776_v21 = vmax.f32 %v7774_v48, %v7775_v50  ;;  %v7793_v27 = vmax.f32 %v7791_v51, %v7792_v60  ;;  %v7810_v4 = vmax.f32 %v7808_v49, %v7809_v1 }
 0x5e6   : > { %v7841_v55 = vrot.slane %v7840_v56, 4  ;;  %v7849_v6 = vmax.bf16 %v7848_v53, %v6115_v33  ;;  %v7827_v38 = vmax.f32 %v7825_v0, %v7826_v47  ;;  %v7708_v16 = vmax.f32 %v7706_v2, %v7707_v42 }
 0x5e7   : > { %v3726_v10 = vpop.permute.xlu1 %3725  ;;  %v3722_v13 = vpop.permute.xlu0 %3721  ;;  %v7691_v17 = vmax.f32 %v7689_v44, %v7690_v43  ;;  %v7725_v30 = vmax.f32 %v7723_v12, %v7724_v11  ;;  %v7777_v15 = vrot.slane %v7776_v21, 1  ;;  %v7743_v48 = vrot.slane %v7742_v18, 1 }
 0x5e8   : > { %v7842_v41 = vmax.f32 %v7840_v56, %v7841_v55  ;;  %v6117_v14 = vmul.bf16 %v13678_v63, %v3722_v13  ;;  %v7850_v46 = vmax.bf16 %v7849_v6, %v6116_v5  ;;  %v6118_v19 = vmul.bf16 %v13694_v22, %v3726_v10  ;;  %v17142_v10 = vld [vmem:[#allocation64_spill] sm:$0xff] }
 0x5e9   : > { %3984 = vbcast.lane.c.b16.xlu1 %v14032_v31, 368  ;;  %3980 = vbcast.lane.c.b16.xlu0 %v14032_v31, 352  ;;  %v7674_v31 = vmax.f32 %v7672_v35, %v7673_v45  ;;  %v7760_v22 = vrot.slane %v7759_v32, 1  ;;  %v7642_v35 = vmax.f32 %v17138_v9, %v7641_v37  ;;  %v7794_v39 = vrot.slane %v7793_v27, 1 }
 0x5ea   : > { %v7851_v3 = vmax.bf16 %v7850_v46, %v6117_v14  ;;  %v7843_v28 = vrot.slane %v7842_v41, 2  ;;  %v7659_v56 = vmax.f32 %v7657_v23, %v7658_v26  ;;  %v7692_v53 = vrot.slane %v7691_v17, 1 }
 0x5eb   : > { %v3734_v36 = vpop.permute.xlu1 %3733  ;;  %v3730_v63 = vpop.permute.xlu0 %3729  ;;  %v7811_v33 = vrot.slane %v7810_v4, 1  ;;  %v7761_v44 = vmax.f32 %v7759_v32, %v7760_v22  ;;  %v7828_v2 = vrot.slane %v7827_v38, 1  ;;  %v7709_v55 = vrot.slane %v7708_v16, 1 }
 0x5ec   : > { %v6119_v62 = vmul.bf16 %v13702_v29, %v3730_v63  ;;  %v7852_v7 = vmax.bf16 %v7851_v3, %v6118_v19  ;;  %v6120_v58 = vmul.bf16 %v13720_v8, %v3734_v36  ;;  %v7844_v29 = vmax.f32 %v7842_v41, %v7843_v28  ;;  %v17143_v63 = vld [vmem:[#allocation31_spill] sm:$0xff] }
 0x5ed   : > { %3995 = vbcast.lane.c.b16.xlu1 %v14064_v20, 272  ;;  %3991 = vbcast.lane.c.b16.xlu0 %v14064_v20, 256  ;;  %v7675_v8 = vrot.slane %v7674_v31, 1  ;;  %v7778_v5 = vmax.f32 %v7776_v21, %v7777_v15  ;;  %v7726_v6 = vrot.slane %v7725_v30, 1  ;;  %v7626_v12 = vpack.i.bf16 %v17142_v10, %v17142_v10 }
 0x5ee   : > { %v7853_v52 = vmax.bf16 %v7852_v7, %v6119_v62  ;;  %v7845_v9 = vrot.slane %v7844_v29, 1  ;;  %v7744_v34 = vmax.f32 %v7742_v18, %v7743_v48  ;;  %v7795_v50 = vmax.f32 %v7793_v27, %v7794_v39 }
 0x5ef   : > { %v14074_v59 = vpop.permute.xlu1 %3747  ;;  %v14076_v54 = vpop.permute.xlu0 %3743  ;;  %v7643_v60 = vpack.i.bf16 %v7642_v35, %v7642_v35  ;;  %v7660_v41 = vpack.i.bf16 %v7659_v56, %v7659_v56  ;;  %v7676_v14 = vmax.f32 %v7674_v31, %v7675_v8  ;;  %v7812_v46 = vmax.f32 %v7810_v4, %v7811_v33 }
 0x5f0   : > { %v7854_v51 = vmax.bf16 %v7853_v52, %v6120_v58  ;;  %v7693_v23 = vmax.f32 %v7691_v17, %v7692_v53  ;;  %v7762_v45 = vpack.i.bf16 %v7761_v44, %v7761_v44  ;;  %v7829_v43 = vmax.f32 %v7827_v38, %v7828_v2 }
 0x5f1   : > { %4003 = vbcast.lane.c.b16.xlu1 %v14064_v20, 304  ;;  %3999 = vbcast.lane.c.b16.xlu0 %v14064_v20, 288  ;;  %v7779_v47 = vpack.i.bf16 %v7778_v5, %v7778_v5  ;;  %v7710_v3 = vmax.f32 %v7708_v16, %v7709_v55  ;;  %v7727_v36 = vmax.f32 %v7725_v30, %v7726_v6  ;;  %v17144_v27 = vmov 0  }
 0x5f2   : > { %v7855_v61 = vunpack.i.l.bf16 %v7854_v51  ;;  %v7856_v49 = vunpack.i.h.bf16 %v7854_v51  ;;  %v7846_v42 = vmax.f32 %v7844_v29, %v7845_v9  ;;  %v7745_v11 = vpack.i.bf16 %v7744_v34, %v7744_v34 }
 0x5f3   : > { %v14083_v0 = vpop.permute.xlu1 %3755  ;;  %v14085_v37 = vpop.permute.xlu0 %3751  ;;  %v7796_v21 = vpack.i.bf16 %v7795_v50, %v7795_v50  ;;  %v14098_v18 = vrot.slane %v17137_v57, %v17143_v63  ;;  %v8746_v62 = vmax.bf16 %v17144_v27, %v7626_v12  ;;  %v8747_v7 = vmax.bf16 %v17144_v27, %v7643_v60 }
 0x5f4   : > { %v7857_v13 = vmax.f32 %v7855_v61, %v7856_v49  ;;  %v7677_v26 = vpack.i.bf16 %v7676_v14, %v7676_v14  ;;  %v7813_v31 = vpack.i.bf16 %v7812_v46, %v7812_v46  ;;  %v7694_v17 = vpack.i.bf16 %v7693_v23, %v7693_v23  ;;  %v17145_v14 = vld [vmem:[#allocation79_spill] sm:$0xff] }
 0x5f5   : > { %4011 = vbcast.lane.c.b16.xlu1 %v14064_v20, 336  ;;  %4007 = vbcast.lane.c.b16.xlu0 %v14064_v20, 320  ;;  %v8754_v4 = vmax.bf16 %v17144_v27, %v7762_v45  ;;  %v7830_v22 = vpack.i.bf16 %v7829_v43, %v7829_v43  ;;  %v8748_v52 = vmax.bf16 %v17144_v27, %v7660_v41  ;;  %v9036_v51 = vunpack.c.l.b16 %v8746_v62 }
 0x5f6   : > { %v7858_v1 = vrot.slane %v7857_v13, 4  ;;  %v8755_v16 = vmax.bf16 %v17144_v27, %v7779_v47  ;;  %v7711_v15 = vpack.i.bf16 %v7710_v3, %v7710_v3  ;;  %v7847_v29 = vpack.i.bf16 %v7846_v42, %v7846_v42 }
 0x5f7   : > { %v14091_v32 = vpop.permute.xlu1 %3763  ;;  %v14093_v19 = vpop.permute.xlu0 %3759  ;;  %v8753_v35 = vmax.bf16 %v17144_v27, %v7745_v11  ;;  %v8756_v48 = vmax.bf16 %v17144_v27, %v7796_v21  ;;  %v7728_v39 = vpack.i.bf16 %v7727_v36, %v7727_v36  ;;  %v9037_v56 = vunpack.c.l.b16 %v8747_v7 }
 0x5f8   : > { %v7859_v28 = vmax.f32 %v7857_v13, %v7858_v1  ;;  %v8749_v8 = vmax.bf16 %v17144_v27, %v7677_v26  ;;  %v8757_v53 = vmax.bf16 %v17144_v27, %v7813_v31  ;;  %v9044_v33 = vunpack.c.l.b16 %v8754_v4 }
 0x5f9   : > { %4019 = vbcast.lane.c.b16.xlu1 %v14064_v20, 368  ;;  %4015 = vbcast.lane.c.b16.xlu0 %v14064_v20, 352  ;;  %v8750_v61 = vmax.bf16 %v17144_v27, %v7694_v17  ;;  %v8758_v49 = vmax.bf16 %v17144_v27, %v7830_v22  ;;  %v9045_v55 = vunpack.c.l.b16 %v8755_v16  ;;  %v8751_v9 = vmax.bf16 %v17144_v27, %v7711_v15 }
 0x5fa   : > { %v7860_v38 = vrot.slane %v7859_v28, 2  ;;  %v8759_v6 = vmax.bf16 %v17144_v27, %v7847_v29  ;;  %v9038_v10 = vunpack.c.l.b16 %v8748_v52  ;;  %v9043_v12 = vunpack.c.l.b16 %v8753_v35 }
 0x5fb   : > { %v14104_v58 = vpop.permute.xlu1 %3771  ;;  %v14108_v30 = vpop.permute.xlu0 %3767  ;;  %v8752_v50 = vmax.bf16 %v17144_v27, %v7728_v39  ;;  %v9046_v13 = vunpack.c.l.b16 %v8756_v48  ;;  %v9039_v60 = vunpack.c.l.b16 %v8749_v8  ;;  %v9047_v41 = vunpack.c.l.b16 %v8757_v53 }
 0x5fc   : > { %v7861_v20 = vmax.f32 %v7859_v28, %v7860_v38  ;;  %v17146_v46 = vunpack.c.l.b16 %v17145_v14  ;;  %v9040_v1 = vunpack.c.l.b16 %v8750_v61  ;;  %v9048_v47 = vunpack.c.l.b16 %v8758_v49 }
 0x5fd   : > { %4030 = vbcast.lane.c.b16.xlu1 %v14098_v18, 272  ;;  %4026 = vbcast.lane.c.b16.xlu0 %v14098_v18, 256  ;;  %v9169_v3 = vsel %vm9099_vm0, %v9044_v33, %v9043_v12  ;;  %v9041_v42 = vunpack.c.l.b16 %v8751_v9  ;;  %v9049_v11 = vunpack.c.l.b16 %v8759_v6  ;;  %v9042_v7 = vunpack.c.l.b16 %v8752_v50 }
 0x5fe   : > { %v7862_v2 = vrot.slane %v7861_v20, 1  ;;  %v9162_v23 = vsel %vm9099_vm0, %v9036_v51, %v17146_v46  ;;  %v9170_v28 = vsel %vm9101_vm1, %v9045_v55, %v9169_v3  ;;  %v4059_v39 = vrot.slane %v13716_v40, %v17143_v63  ;;  %v17147_v55 = vld [vmem:[#allocation38_spill] sm:$0xff] }
 0x5ff   : > { %v14116_v44 = vpop.permute.xlu1 %3785  ;;  %v14120_v5 = vpop.permute.xlu0 %3781  ;;  %v9163_v21 = vsel %vm9101_vm1, %v9037_v56, %v9162_v23  ;;  %v9171_v31 = vsel %vm9103_vm2, %v9046_v13, %v9170_v28  ;;  %v4094_v9 = vrot.slane %v17137_v57, %v17147_v55  ;;  %v4129_v14 = vrot.slane %v13716_v40, %v17147_v55 }
 0x600   : > { %v7863_v34 = vmax.f32 %v7861_v20, %v7862_v2  ;;  %v9164_v26 = vsel %vm9103_vm2, %v9038_v10, %v9163_v21  ;;  %v9172_v4 = vsel %vm9105_vm3, %v9047_v41, %v9171_v31  ;;  %v17148_v21 = vld [vmem:[#allocation45_spill] sm:$0xff] }
 0x601   : > { %4038 = vbcast.lane.c.b16.xlu1 %v14098_v18, 304  ;;  %4034 = vbcast.lane.c.b16.xlu0 %v14098_v18, 288  ;;  %v9165_v17 = vsel %vm9105_vm3, %v9039_v60, %v9164_v26  ;;  %v9173_v16 = vsel %vm9107_vm4, %v9048_v47, %v9172_v4  ;;  %v4164_v28 = vrot.slane %v17137_v57, %v17148_v21 }
 0x602   : > { %v7864_v43 = vpack.i.bf16 %v7863_v34, %v7863_v34  ;;  %v9166_v52 = vsel %vm9107_vm4, %v9040_v1, %v9165_v17  ;;  %v9174_v35 = vsel %vm9109_vm5, %v9049_v11, %v9173_v16  ;;  %v4199_v16 = vrot.slane %v13716_v40, %v17148_v21 }
 0x603   : > { %v14130_v45 = vpop.permute.xlu1 %3793  ;;  %v14133_v36 = vpop.permute.xlu0 %3789  ;;  %v9167_v29 = vsel %vm9109_vm5, %v9041_v42, %v9166_v52 }
 0x604   : > { %v8760_v62 = vmax.bf16 %v17144_v27, %v7864_v43  ;;  %v9168_v48 = vsel %vm9111_vm6, %v9042_v7, %v9167_v29 }
 0x605   : > { %4046 = vbcast.lane.c.b16.xlu1 %v14098_v18, 336  ;;  %4042 = vbcast.lane.c.b16.xlu0 %v14098_v18, 320 }
 0x606   : > { %v9050_v38 = vunpack.c.l.b16 %v8760_v62 }
 0x607   : > { %v14144_v22 = vpop.permute.xlu1 %3801  ;;  %v14148_v15 = vpop.permute.xlu0 %3797 }
 0x608   : > { %v9175_v20 = vsel %vm9111_vm6, %v9050_v38, %v9174_v35 }
 0x609   : > { %4054 = vbcast.lane.c.b16.xlu1 %v14098_v18, 368  ;;  %4050 = vbcast.lane.c.b16.xlu0 %v14098_v18, 352  ;;  %v9222_v51 = vpack.c.b16 %v9175_v20, %v9168_v48 }
 0x60b   : > { %v14158_v56 = vpop.permute.xlu1 %3809  ;;  %v14160_v8 = vpop.permute.xlu0 %3805  ;;  %10089 = vmatprep.mubr.bf16.mxu1 %v9222_v51 }
 0x60d   : > { %4065 = vbcast.lane.c.b16.xlu1 %v4059_v39, 272  ;;  %4061 = vbcast.lane.c.b16.xlu0 %v4059_v39, 256 }
 0x60f   : > { %v14162_v53 = vpop.permute.xlu1 %3820  ;;  %v14164_v33 = vpop.permute.xlu0 %3816 }
 0x611   : > { %4073 = vbcast.lane.c.b16.xlu1 %v4059_v39, 304  ;;  %4069 = vbcast.lane.c.b16.xlu0 %v4059_v39, 288 }
 0x613   : > { %v14166_v2 = vpop.permute.xlu1 %3828  ;;  %v14168_v61 = vpop.permute.xlu0 %3824 }
 0x615   : > { %4081 = vbcast.lane.c.b16.xlu1 %v4059_v39, 336  ;;  %4077 = vbcast.lane.c.b16.xlu0 %v4059_v39, 320 }
 0x617   : > { %v14170_v18 = vpop.permute.xlu1 %3836  ;;  %v14172_v49 = vpop.permute.xlu0 %3832 }
 0x619   : > { %4089 = vbcast.lane.c.b16.xlu1 %v4059_v39, 368  ;;  %4085 = vbcast.lane.c.b16.xlu0 %v4059_v39, 352 }
 0x61b   : > { %v14176_v6 = vpop.permute.xlu1 %3844  ;;  %v14178_v10 = vpop.permute.xlu0 %3840 }
 0x61d   : > { %4100 = vbcast.lane.c.b16.xlu1 %v4094_v9, 272  ;;  %4096 = vbcast.lane.c.b16.xlu0 %v4094_v9, 256 }
 0x61f   : > { %v14180_v12 = vpop.permute.xlu1 %3855  ;;  %v14182_v34 = vpop.permute.xlu0 %3851 }
 0x621   : > { %4108 = vbcast.lane.c.b16.xlu1 %v4094_v9, 304  ;;  %4104 = vbcast.lane.c.b16.xlu0 %v4094_v9, 288 }
 0x623   : > { %v14184_v50 = vpop.permute.xlu1 %3863  ;;  %v14186_v13 = vpop.permute.xlu0 %3859 }
 0x625   : > { %4116 = vbcast.lane.c.b16.xlu1 %v4094_v9, 336  ;;  %4112 = vbcast.lane.c.b16.xlu0 %v4094_v9, 320 }
 0x627   : > { %v14188_v60 = vpop.permute.xlu1 %3871  ;;  %v14190_v41 = vpop.permute.xlu0 %3867 }
 0x629   : > { %4124 = vbcast.lane.c.b16.xlu1 %v4094_v9, 368  ;;  %4120 = vbcast.lane.c.b16.xlu0 %v4094_v9, 352 }
 0x62b   : > { %v14194_v46 = vpop.permute.xlu1 %3879  ;;  %v14196_v23 = vpop.permute.xlu0 %3875 }
 0x62d   : > { %4135 = vbcast.lane.c.b16.xlu1 %v4129_v14, 272  ;;  %4131 = vbcast.lane.c.b16.xlu0 %v4129_v14, 256 }
 0x62f   : > { %v14198_v43 = vpop.permute.xlu1 %3890  ;;  %v14200_v1 = vpop.permute.xlu0 %3886 }
 0x631   : > { %4143 = vbcast.lane.c.b16.xlu1 %v4129_v14, 304  ;;  %4139 = vbcast.lane.c.b16.xlu0 %v4129_v14, 288 }
 0x633   : > { %v14202_v47 = vpop.permute.xlu1 %3898  ;;  %v14204_v3 = vpop.permute.xlu0 %3894 }
 0x635   : > { %4151 = vbcast.lane.c.b16.xlu1 %v4129_v14, 336  ;;  %4147 = vbcast.lane.c.b16.xlu0 %v4129_v14, 320 }
 0x637   : > { %v14206_v42 = vpop.permute.xlu1 %3906  ;;  %v14208_v11 = vpop.permute.xlu0 %3902 }
 0x639   : > { %4159 = vbcast.lane.c.b16.xlu1 %v4129_v14, 368  ;;  %4155 = vbcast.lane.c.b16.xlu0 %v4129_v14, 352 }
 0x63b   : > { %v14212_v62 = vpop.permute.xlu1 %3914  ;;  %v14214_v7 = vpop.permute.xlu0 %3910 }
 0x63c   : > { %17149 = vst [vmem:[#allocation75_spill] sm:$0xff] %v14212_v62 }
 0x63d   : > { %4170 = vbcast.lane.c.b16.xlu1 %v4164_v28, 272  ;;  %4166 = vbcast.lane.c.b16.xlu0 %v4164_v28, 256 }
 0x63f   : > { %v14216_v26 = vpop.permute.xlu1 %3925  ;;  %v14218_v31 = vpop.permute.xlu0 %3921 }
 0x641   : > { %4178 = vbcast.lane.c.b16.xlu1 %v4164_v28, 304  ;;  %4174 = vbcast.lane.c.b16.xlu0 %v4164_v28, 288 }
 0x643   : > { %v14220_v17 = vpop.permute.xlu1 %3933  ;;  %v14222_v4 = vpop.permute.xlu0 %3929 }
 0x645   : > { %4186 = vbcast.lane.c.b16.xlu1 %v4164_v28, 336  ;;  %4182 = vbcast.lane.c.b16.xlu0 %v4164_v28, 320 }
 0x647   : > { %v14224_v38 = vpop.permute.xlu1 %3941  ;;  %v14226_v52 = vpop.permute.xlu0 %3937 }
 0x648   : > { %17150 = vst [vmem:[#allocation88_spill] sm:$0xff] %v14224_v38  ;;  %v14324_v38 = vld [vmem:[#allocation3 + $0x30] sm:$0xff]  }
 0x649   : > { %4194 = vbcast.lane.c.b16.xlu1 %v4164_v28, 368  ;;  %4190 = vbcast.lane.c.b16.xlu0 %v4164_v28, 352  ;;  %v17156_v28 = vld [vmem:[#allocation54_spill] sm:$0xff] }
 0x64a   : > { %v4234_v21 = vrot.slane %v17137_v57, %v17156_v28 }
 0x64b   : > { %v14230_v29 = vpop.permute.xlu1 %3949  ;;  %v14232_v35 = vpop.permute.xlu0 %3945 }
 0x64c   : > { %17151 = vst [vmem:[#allocation70_spill] sm:$0xff] %v14230_v29  ;;  %17152 = vst [vmem:[#allocation58_spill] sm:$0xff] %v14232_v35  ;;  %v14300_v35 = vld [vmem:[#allocation3 + $0x20] sm:$0xff]  }
 0x64d   : > { %4205 = vbcast.lane.c.b16.xlu1 %v4199_v16, 272  ;;  %4201 = vbcast.lane.c.b16.xlu0 %v4199_v16, 256 }
 0x64f   : > { %v14234_v48 = vpop.permute.xlu1 %3960  ;;  %v14236_v20 = vpop.permute.xlu0 %3956 }
 0x651   : > { %4213 = vbcast.lane.c.b16.xlu1 %v4199_v16, 304  ;;  %4209 = vbcast.lane.c.b16.xlu0 %v4199_v16, 288 }
 0x653   : > { %v14238_v39 = vpop.permute.xlu1 %3968  ;;  %v14240_v51 = vpop.permute.xlu0 %3964 }
 0x654   : > { %17153 = vst [vmem:[#allocation34_spill] sm:$0xff] %v14238_v39 }
 0x655   : > { %4221 = vbcast.lane.c.b16.xlu1 %v4199_v16, 336  ;;  %4217 = vbcast.lane.c.b16.xlu0 %v4199_v16, 320 }
 0x657   : > { %v14242_v9 = vpop.permute.xlu1 %3976  ;;  %v14244_v14 = vpop.permute.xlu0 %3972 }
 0x658   : > { %17154 = vst [vmem:[#allocation32_spill] sm:$0xff] %v14242_v9  ;;  %17155 = vst [vmem:[#allocation56_spill] sm:$0xff] %v14244_v14 }
 0x659   : > { %4229 = vbcast.lane.c.b16.xlu1 %v4199_v16, 368  ;;  %4225 = vbcast.lane.c.b16.xlu0 %v4199_v16, 352 }
 0x65b   : > { %v14248_v55 = vpop.permute.xlu1 %3984  ;;  %v14250_v63 = vpop.permute.xlu0 %3980 }
 0x65c   : > { %17157 = vst [vmem:[#allocation53_spill] sm:$0xff] %v14248_v55  ;;  %17158 = vst [vmem:[#allocation46_spill] sm:$0xff] %v14250_v63  ;;  %v4269_v63 = vrot.slane %v13716_v40, %v17156_v28 }
 0x65d   : > { %4240 = vbcast.lane.c.b16.xlu1 %v4234_v21, 272  ;;  %4236 = vbcast.lane.c.b16.xlu0 %v4234_v21, 256 }
 0x65f   : > { %v14252_v24 = vpop.permute.xlu1 %3995  ;;  %v14254_v25 = vpop.permute.xlu0 %3991 }
 0x660   : > { %17159 = vst [vmem:[#allocation35_spill] sm:$0xff] %v14252_v24  ;;  %17160 = vst [vmem:[#allocation87_spill] sm:$0xff] %v14254_v25  ;;  %v14274_v24 = vld [vmem:[#allocation3] sm:$0xff]  }
 0x661   : > { %4248 = vbcast.lane.c.b16.xlu1 %v4234_v21, 304  ;;  %4244 = vbcast.lane.c.b16.xlu0 %v4234_v21, 288 }
 0x663   : > { %v14256_v9 = vpop.permute.xlu1 %4003  ;;  %v14258_v29 = vpop.permute.xlu0 %3999 }
 0x664   : > { %17161 = vst [vmem:[#allocation72_spill] sm:$0xff] %v14256_v9  ;;  %17162 = vst [vmem:[#allocation39_spill] sm:$0xff] %v14258_v29  ;;  %v14270_v9 = vld [vmem:[#allocation3 + $0x8] sm:$0xff]  }
 0x665   : > { %4256 = vbcast.lane.c.b16.xlu1 %v4234_v21, 336  ;;  %4252 = vbcast.lane.c.b16.xlu0 %v4234_v21, 320  ;;  %v6122_v29 = vmul.bf16 %v14270_v9, %v14074_v59 }
 0x667   : > { %v14260_v57 = vpop.permute.xlu1 %4011  ;;  %v14262_v16 = vpop.permute.xlu0 %4007 }
 0x668   : > { %17163 = vst [vmem:[#allocation82_spill] sm:$0xff] %v14260_v57  ;;  %17164 = vst [vmem:[#allocation89_spill] sm:$0xff] %v14262_v16  ;;  %v6121_v57 = vmul.bf16 %v14274_v24, %v14076_v54 }
 0x669   : > { %4264 = vbcast.lane.c.b16.xlu1 %v4234_v21, 368  ;;  %4260 = vbcast.lane.c.b16.xlu0 %v4234_v21, 352  ;;  %v14282_v21 = vld [vmem:[#allocation3 + $0x10] sm:$0xff]  }
 0x66a   : > { %v6123_v28 = vmul.bf16 %v14282_v21, %v14085_v37 }
 0x66b   : > { %v14266_v55 = vpop.permute.xlu1 %4019  ;;  %v14268_v25 = vpop.permute.xlu0 %4015 }
 0x66c   : > { %17165 = vst [vmem:[#allocation50_spill] sm:$0xff] %v14266_v55  ;;  %17166 = vst [vmem:[#allocation59_spill] sm:$0xff] %v14268_v25  ;;  %v10236_v55 = vld [vmem:[#allocation6 + $0x30] sm:$0xff]   ;;  %v7865_v25 = vmax.bf16 %v6122_v29, %v6121_v57  ;;  %v6125_v29 = vmul.bf16 %v14300_v35, %v14093_v19  ;;  %v6131_v19 = vmul.bf16 %v14282_v21, %v14133_v36 }
 0x66d   : > { %4275 = vbcast.lane.c.b16.xlu1 %v4269_v63, 272  ;;  %4271 = vbcast.lane.c.b16.xlu0 %v4269_v63, 256  ;;  %v14290_v54 = vpack.i.b16 %v10236_v55, %v10236_v55 }
 0x66e   : > { %v7866_v39 = vmax.bf16 %v7865_v25, %v6123_v28  ;;  %v17174_v25 = vld [vmem:[#allocation27_spill] sm:$0xff] }
 0x66f   : > { %v14278_v16 = vpop.permute.xlu1 %4030  ;;  %v14280_v40 = vpop.permute.xlu0 %4026  ;;  %17171 = vst [vmem:[#allocation48_spill] sm:$0xff] %v14290_v54  ;;  %v4307_v28 = vrot.slane %v14290_v54, %v17174_v25 }
 0x670   : > { %17167 = vst [vmem:[#allocation41_spill] sm:$0xff] %v14278_v16  ;;  %17168 = vst [vmem:[#allocation85_spill] sm:$0xff] %v14280_v40  ;;  %v14292_v16 = vld [vmem:[#allocation3 + $0x18] sm:$0xff]  }
 0x671   : > { %4283 = vbcast.lane.c.b16.xlu1 %v4269_v63, 304  ;;  %4279 = vbcast.lane.c.b16.xlu0 %v4269_v63, 288  ;;  %v6124_v40 = vmul.bf16 %v14292_v16, %v14083_v0  ;;  %v6130_v0 = vmul.bf16 %v14270_v9, %v14116_v44 }
 0x673   : > { %v14286_v14 = vpop.permute.xlu1 %4038  ;;  %v14288_v59 = vpop.permute.xlu0 %4034  ;;  %v7867_v57 = vmax.bf16 %v7866_v39, %v6124_v40  ;;  %v14316_v39 = vld [vmem:[#allocation3 + $0x28] sm:$0xff]  }
 0x674   : > { %17169 = vst [vmem:[#allocation47_spill] sm:$0xff] %v14286_v14  ;;  %17170 = vst [vmem:[#allocation55_spill] sm:$0xff] %v14288_v59 }
 0x675   : > { %4291 = vbcast.lane.c.b16.xlu1 %v4269_v63, 336  ;;  %4287 = vbcast.lane.c.b16.xlu0 %v4269_v63, 320  ;;  %v7868_v59 = vmax.bf16 %v7867_v57, %v6125_v29  ;;  %v4339_v57 = vshrl.u32 %v10236_v55, 16  ;;  %v6133_v55 = vmul.bf16 %v14300_v35, %v14148_v15 }
 0x677   : > { %v14296_v27 = vpop.permute.xlu1 %4046  ;;  %v14298_v37 = vpop.permute.xlu0 %4042 }
 0x678   : > { %17172 = vst [vmem:[#allocation37_spill] sm:$0xff] %v14296_v27  ;;  %17173 = vst [vmem:[#allocation49_spill] sm:$0xff] %v14298_v37  ;;  %v6129_v27 = vmul.bf16 %v14274_v24, %v14120_v5  ;;  %v6127_v5 = vmul.bf16 %v14324_v38, %v14108_v30  ;;  %v14338_v30 = vpack.i.b16 %v4339_v57, %v4339_v57 }
 0x679   : > { %4299 = vbcast.lane.c.b16.xlu1 %v4269_v63, 368  ;;  %4295 = vbcast.lane.c.b16.xlu0 %v4269_v63, 352  ;;  %v6126_v63 = vmul.bf16 %v14316_v39, %v14091_v32  ;;  %v6132_v32 = vmul.bf16 %v14292_v16, %v14130_v45 }
 0x67a   : > { %v4345_v15 = vrot.slane %v14338_v30, %v17174_v25  ;;  %v17200_v25 = vld [vmem:[#allocation53_spill] sm:$0xff] }
 0x67b   : > { %v14306_v14 = vpop.permute.xlu1 %4054  ;;  %v14312_v37 = vpop.permute.xlu0 %4050  ;;  %v7869_v29 = vmax.bf16 %v7868_v59, %v6126_v63  ;;  %v14342_v59 = vld [vmem:[#allocation3 + $0x38] sm:$0xff]  }
 0x67c   : > { %17175 = vst [vmem:[#allocation67_spill] sm:$0xff] %v14306_v14  ;;  %17176 = vst [vmem:[#allocation44_spill] sm:$0xff] %v14312_v37  ;;  %v7882_v14 = vmax.bf16 %v6130_v0, %v6129_v27  ;;  %v6138_v0 = vmul.bf16 %v14270_v9, %v14162_v53  ;;  %v6128_v45 = vmul.bf16 %v14342_v59, %v14104_v58 }
 0x67d   : > { %4313 = vbcast.lane.c.b16.xlu1 %v4307_v28, 272  ;;  %4309 = vbcast.lane.c.b16.xlu0 %v4307_v28, 256  ;;  %v7870_v27 = vmax.bf16 %v7869_v29, %v6127_v5  ;;  %v6134_v58 = vmul.bf16 %v14316_v39, %v14144_v22 }
 0x67e   : > { %v7883_v36 = vmax.bf16 %v7882_v14, %v6131_v19  ;;  %v6139_v19 = vmul.bf16 %v14282_v21, %v14168_v61 }
 0x67f   : > { %v14320_v40 = vpop.permute.xlu1 %4065  ;;  %v14322_v44 = vpop.permute.xlu0 %4061 }
 0x680   : > { %17177 = vst [vmem:[#allocation81_spill] sm:$0xff] %v14322_v44  ;;  %v6137_v44 = vmul.bf16 %v14274_v24, %v14164_v33  ;;  %v7884_v14 = vmax.bf16 %v7883_v36, %v6132_v32  ;;  %v7871_v33 = vmax.bf16 %v7870_v27, %v6128_v45  ;;  %v6140_v27 = vmul.bf16 %v14292_v16, %v14166_v2 }
 0x681   : > { %4321 = vbcast.lane.c.b16.xlu1 %v4307_v28, 304  ;;  %4317 = vbcast.lane.c.b16.xlu0 %v4307_v28, 288  ;;  %v6145_v2 = vmul.bf16 %v14274_v24, %v14182_v34 }
 0x682   : > { %v7899_v5 = vmax.bf16 %v6138_v0, %v6137_v44  ;;  %v7885_v29 = vmax.bf16 %v7884_v14, %v6133_v55  ;;  %v7872_v61 = vunpack.i.l.bf16 %v7871_v33  ;;  %v6135_v44 = vmul.bf16 %v14324_v38, %v14160_v8 }
 0x683   : > { %v14328_v37 = vpop.permute.xlu1 %4073  ;;  %v14332_v62 = vpop.permute.xlu0 %4069 }
 0x684   : > { %v7900_v57 = vmax.bf16 %v7899_v5, %v6139_v19  ;;  %v7886_v0 = vmax.bf16 %v7885_v29, %v6134_v58  ;;  %v6146_v19 = vmul.bf16 %v14270_v9, %v14180_v12  ;;  %v6147_v5 = vmul.bf16 %v14282_v21, %v14186_v13 }
 0x685   : > { %4329 = vbcast.lane.c.b16.xlu1 %v4307_v28, 336  ;;  %4325 = vbcast.lane.c.b16.xlu0 %v4307_v28, 320  ;;  %v6136_v29 = vmul.bf16 %v14342_v59, %v14158_v56  ;;  %v6142_v12 = vmul.bf16 %v14316_v39, %v14170_v18  ;;  %v6153_v13 = vmul.bf16 %v14274_v24, %v14200_v1 }
 0x686   : > { %v7901_v55 = vmax.bf16 %v7900_v57, %v6140_v27  ;;  %v7916_v58 = vmax.bf16 %v6146_v19, %v6145_v2  ;;  %v6143_v27 = vmul.bf16 %v14324_v38, %v14178_v10  ;;  %v6155_v18 = vmul.bf16 %v14282_v21, %v14204_v3  ;;  %v17179_v19 = vld [vmem:[#allocation28_spill] sm:$0xff] }
 0x687   : > { %v14348_v53 = vpop.permute.xlu1 %4081  ;;  %v14350_v63 = vpop.permute.xlu0 %4077  ;;  %v4380_v1 = vrot.slane %v14290_v54, %v17179_v19 }
 0x688   : > { %17178 = vst [vmem:[#allocation63_spill] sm:$0xff] %v14348_v53  ;;  %v7873_v53 = vunpack.i.h.bf16 %v7871_v33  ;;  %v7887_v33 = vmax.bf16 %v7886_v0, %v6135_v44  ;;  %v7917_v44 = vmax.bf16 %v7916_v58, %v6147_v5  ;;  %v6149_v5 = vmul.bf16 %v14300_v35, %v14190_v41 }
 0x689   : > { %4337 = vbcast.lane.c.b16.xlu1 %v4307_v28, 368  ;;  %4333 = vbcast.lane.c.b16.xlu0 %v4307_v28, 352  ;;  %v6141_v28 = vmul.bf16 %v14300_v35, %v14172_v49  ;;  %v6161_v41 = vmul.bf16 %v14274_v24, %v14218_v31 }
 0x68a   : > { %v7874_v45 = vmax.f32 %v7872_v61, %v7873_v53  ;;  %v7888_v34 = vmax.bf16 %v7887_v33, %v6136_v29  ;;  %v6154_v61 = vmul.bf16 %v14270_v9, %v14198_v43  ;;  %v6148_v43 = vmul.bf16 %v14292_v16, %v14184_v50 }
 0x68b   : > { %v14354_v36 = vpop.permute.xlu1 %4089  ;;  %v14358_v32 = vpop.permute.xlu0 %4085  ;;  %v7902_v8 = vmax.bf16 %v7901_v55, %v6141_v28  ;;  %v6144_v50 = vmul.bf16 %v14342_v59, %v14176_v6 }
 0x68c   : > { %v7875_v53 = vrot.slane %v7874_v45, 4  ;;  %v7889_v2 = vunpack.i.l.bf16 %v7888_v34  ;;  %v7890_v33 = vunpack.i.h.bf16 %v7888_v34  ;;  %v7933_v10 = vmax.bf16 %v6154_v61, %v6153_v13 }
 0x68d   : > { %4351 = vbcast.lane.c.b16.xlu1 %v4345_v15, 272  ;;  %4347 = vbcast.lane.c.b16.xlu0 %v4345_v15, 256  ;;  %v7903_v56 = vmax.bf16 %v7902_v8, %v6142_v12  ;;  %v7918_v29 = vmax.bf16 %v7917_v44, %v6148_v43  ;;  %v6156_v34 = vmul.bf16 %v14292_v16, %v14202_v47 }
 0x68e   : > { %v7876_v55 = vmax.f32 %v7874_v45, %v7875_v53  ;;  %v7934_v12 = vmax.bf16 %v7933_v10, %v6155_v18  ;;  %v7891_v58 = vmax.f32 %v7889_v2, %v7890_v33  ;;  %v6163_v44 = vmul.bf16 %v14282_v21, %v14222_v4 }
 0x68f   : > { %v14366_v14 = vpop.permute.xlu1 %4100  ;;  %v14368_v22 = vpop.permute.xlu0 %4096  ;;  %v7904_v8 = vmax.bf16 %v7903_v56, %v6143_v27  ;;  %v7919_v13 = vmax.bf16 %v7918_v29, %v6149_v5  ;;  %v6157_v56 = vmul.bf16 %v14300_v35, %v14208_v11  ;;  %v6150_v47 = vmul.bf16 %v14316_v39, %v14188_v60 }
 0x690   : > { %v7877_v53 = vrot.slane %v7876_v55, 2  ;;  %v7935_v6 = vmax.bf16 %v7934_v12, %v6156_v34  ;;  %v7892_v31 = vrot.slane %v7891_v58, 4  ;;  %v6151_v10 = vmul.bf16 %v14324_v38, %v14196_v23 }
 0x691   : > { %4359 = vbcast.lane.c.b16.xlu1 %v4345_v15, 304  ;;  %4355 = vbcast.lane.c.b16.xlu0 %v4345_v15, 288  ;;  %v7905_v61 = vmax.bf16 %v7904_v8, %v6144_v50  ;;  %v7920_v11 = vmax.bf16 %v7919_v13, %v6150_v47  ;;  %v6170_v47 = vmul.bf16 %v14270_v9, %v14234_v48  ;;  %v17181_v48 = vld [vmem:[#allocation88_spill] sm:$0xff] }
 0x692   : > { %v7936_v5 = vmax.bf16 %v7935_v6, %v6157_v56  ;;  %v7893_v60 = vmax.f32 %v7891_v58, %v7892_v31 }
 0x693   : > { %v14376_v49 = vpop.permute.xlu1 %4108  ;;  %v14380_v57 = vpop.permute.xlu0 %4104  ;;  %v7906_v2 = vunpack.i.l.bf16 %v7905_v61  ;;  %v7907_v33 = vunpack.i.h.bf16 %v7905_v61  ;;  %v7921_v34 = vmax.bf16 %v7920_v11, %v6151_v10  ;;  %v6165_v61 = vmul.bf16 %v14300_v35, %v14226_v52  ;;  %v17180_v10 = vld [vmem:[#allocation75_spill] sm:$0xff] }
 0x694   : > { %v7894_v6 = vrot.slane %v7893_v60, 2  ;;  %v6169_v52 = vmul.bf16 %v14274_v24, %v14236_v20  ;;  %v6160_v11 = vmul.bf16 %v14342_v59, %v17180_v10  ;;  %v17187_v10 = vld [vmem:[#allocation56_spill] sm:$0xff] }
 0x695   : > { %4367 = vbcast.lane.c.b16.xlu1 %v4345_v15, 336  ;;  %4363 = vbcast.lane.c.b16.xlu0 %v4345_v15, 320  ;;  %v7908_v50 = vmax.f32 %v7906_v2, %v7907_v33  ;;  %v6171_v33 = vmul.bf16 %v14282_v21, %v14240_v51  ;;  %v17182_v51 = vld [vmem:[#allocation58_spill] sm:$0xff] }
 0x697   : > { %v14390_v0 = vpop.permute.xlu1 %4116  ;;  %v14394_v28 = vpop.permute.xlu0 %4112 }
 0x699   : > { %4375 = vbcast.lane.c.b16.xlu1 %v4345_v15, 368  ;;  %4371 = vbcast.lane.c.b16.xlu0 %v4345_v15, 352  ;;  %v6162_v15 = vmul.bf16 %v14270_v9, %v14216_v26  ;;  %v7878_v26 = vmax.f32 %v7876_v55, %v7877_v53  ;;  %v6158_v55 = vmul.bf16 %v14316_v39, %v14206_v42 }
 0x69a   : > { %v6164_v53 = vmul.bf16 %v14292_v16, %v14220_v17  ;;  %v6152_v42 = vmul.bf16 %v14342_v59, %v14194_v46  ;;  %v14446_v17 = vrot.slane %v14338_v30, %v17179_v19 }
 0x69b   : > { %v14402_v3 = vpop.permute.xlu1 %4124  ;;  %v14404_v45 = vpop.permute.xlu0 %4120  ;;  %v7950_v43 = vmax.bf16 %v6162_v15, %v6161_v41  ;;  %v7879_v12 = vrot.slane %v7878_v26, 1  ;;  %v6159_v15 = vmul.bf16 %v14324_v38, %v14214_v7  ;;  %v7937_v41 = vmax.bf16 %v7936_v5, %v6158_v55 }
 0x69c   : > { %v7922_v7 = vmax.bf16 %v7921_v34, %v6152_v42  ;;  %v6166_v5 = vmul.bf16 %v14316_v39, %v17181_v48  ;;  %v7967_v55 = vmax.bf16 %v6170_v47, %v6169_v52  ;;  %v17188_v48 = vld [vmem:[#allocation70_spill] sm:$0xff] }
 0x69d   : > { %4386 = vbcast.lane.c.b16.xlu1 %v4380_v1, 272  ;;  %4382 = vbcast.lane.c.b16.xlu0 %v4380_v1, 256  ;;  %v7951_v4 = vmax.bf16 %v7950_v43, %v6163_v44  ;;  %v7880_v56 = vmax.f32 %v7878_v26, %v7879_v12  ;;  %v7909_v44 = vrot.slane %v7908_v50, 4  ;;  %v7938_v43 = vmax.bf16 %v7937_v41, %v6159_v15 }
 0x69e   : > { %v7895_v26 = vmax.f32 %v7893_v60, %v7894_v6  ;;  %v7924_v12 = vunpack.i.h.bf16 %v7922_v7  ;;  %v6167_v15 = vmul.bf16 %v14324_v38, %v17182_v51 }
 0x69f   : > { %v14414_v27 = vpop.permute.xlu1 %4135  ;;  %v14420_v18 = vpop.permute.xlu0 %4131  ;;  %v7952_v13 = vmax.bf16 %v7951_v4, %v6164_v53  ;;  %v7910_v20 = vmax.f32 %v7908_v50, %v7909_v44  ;;  %v7923_v4 = vunpack.i.l.bf16 %v7922_v7  ;;  %v7939_v34 = vmax.bf16 %v7938_v43, %v6160_v11  ;;  %v17186_v44 = vld [vmem:[#allocation34_spill] sm:$0xff] }
 0x6a0   : > { %v7896_v50 = vrot.slane %v7895_v26, 1  ;;  %v6172_v7 = vmul.bf16 %v14292_v16, %v17186_v44  ;;  %v17192_v44 = vld [vmem:[#allocation81_spill] sm:$0xff] }
 0x6a1   : > { %4394 = vbcast.lane.c.b16.xlu1 %v4380_v1, 304  ;;  %4390 = vbcast.lane.c.b16.xlu0 %v4380_v1, 288  ;;  %v7953_v46 = vmax.bf16 %v7952_v13, %v6165_v61  ;;  %v7968_v61 = vmax.bf16 %v7967_v55, %v6171_v33  ;;  %v17183_v13 = vmov 0   ;;  %v14475_v6 = vmax.f32 %v7923_v4, %v7924_v12 }
 0x6a2   : > { %v7940_v52 = vunpack.i.l.bf16 %v7939_v34  ;;  %v7941_v43 = vunpack.i.h.bf16 %v7939_v34  ;;  %v14490_v12 = vmax.f32 %v7895_v26, %v7896_v50  ;;  %v17193_v50 = vld [vmem:[#allocation35_spill] sm:$0xff] }
 0x6a3   : > { %v14426_v8 = vpop.permute.xlu1 %4143  ;;  %v14428_v29 = vpop.permute.xlu0 %4139  ;;  %v7954_v41 = vmax.bf16 %v7953_v46, %v6166_v5  ;;  %17185 = vst [vmem:[#allocation33_spill] sm:$0xff] %v14475_v6  ;;  %v7969_v11 = vmax.bf16 %v7968_v61, %v6172_v7  ;;  %v6168_v5 = vmul.bf16 %v14342_v59, %v17188_v48  ;;  %v6194_v61 = vmul.bf16 %v14270_v9, %v14320_v40 }
 0x6a4   : > { %17189 = vst [vmem:[#allocation52_spill] sm:$0xff] %v14490_v12  ;;  %v6193_v7 = vmul.bf16 %v14274_v24, %v17192_v44  ;;  %v17197_v44 = vld [vmem:[#allocation87_spill] sm:$0xff] }
 0x6a5   : > { %4402 = vbcast.lane.c.b16.xlu1 %v4380_v1, 336  ;;  %4398 = vbcast.lane.c.b16.xlu0 %v4380_v1, 320  ;;  %v7955_v46 = vmax.bf16 %v7954_v41, %v6167_v15  ;;  %v14497_v15 = vmax.f32 %v7940_v52, %v7941_v43  ;;  %v17195_v52 = vld [vmem:[#allocation29_spill] sm:$0xff] }
 0x6a6   : > { %v14514_v43 = vrot.slane %v14290_v54, %v17195_v52 }
 0x6a7   : > { %v14434_v23 = vpop.permute.xlu1 %4151  ;;  %v14440_v58 = vpop.permute.xlu0 %4147  ;;  %17191 = vst [vmem:[#allocation66_spill] sm:$0xff] %v14497_v15  ;;  %v14499_v41 = vmax.bf16 %v7955_v46, %v6168_v5  ;;  %v17196_v46 = vld [vmem:[#allocation85_spill] sm:$0xff]  ;;  %v6195_v5 = vmul.bf16 %v14282_v21, %v14332_v62  ;;  %v6209_v62 = vmul.bf16 %v14274_v24, %v14420_v18  ;;  %v17202_v15 = vld [vmem:[#allocation39_spill] sm:$0xff] }
 0x6a8   : > { %v6185_v40 = vmul.bf16 %v14274_v24, %v17196_v46  ;;  %v6210_v46 = vmul.bf16 %v14270_v9, %v14414_v27  ;;  %v6179_v18 = vmul.bf16 %v14282_v21, %v17202_v15  ;;  %v6197_v15 = vmul.bf16 %v14300_v35, %v14350_v63 }
 0x6a9   : > { %4410 = vbcast.lane.c.b16.xlu1 %v4380_v1, 368  ;;  %4406 = vbcast.lane.c.b16.xlu0 %v4380_v1, 352  ;;  %v7881_v1 = vpack.i.bf16 %v7880_v56, %v7880_v56  ;;  %v7911_v56 = vrot.slane %v7910_v20, 2  ;;  %v6205_v63 = vmul.bf16 %v14300_v35, %v14394_v28 }
 0x6aa   : > { %v8052_v6 = vmax.bf16 %v6210_v46, %v6209_v62  ;;  %v17205_v46 = vld [vmem:[#allocation49_spill] sm:$0xff] }
 0x6ab   : > { %v14452_v31 = vpop.permute.xlu1 %4159  ;;  %v14454_v2 = vpop.permute.xlu0 %4155  ;;  %v14472_v42 = vmax.bf16 %v17183_v13, %v7881_v1  ;;  %v6173_v1 = vmul.bf16 %v14300_v35, %v17187_v10  ;;  %v14492_v55 = vmax.f32 %v7910_v20, %v7911_v56  ;;  %v6178_v20 = vmul.bf16 %v14270_v9, %v17193_v50  ;;  %v17194_v56 = vld [vmem:[#allocation41_spill] sm:$0xff] }
 0x6ac   : > { %v6186_v48 = vmul.bf16 %v14270_v9, %v17194_v56  ;;  %v6177_v50 = vmul.bf16 %v14274_v24, %v17197_v44  ;;  %v17198_v56 = vld [vmem:[#allocation55_spill] sm:$0xff]  ;;  %v6189_v62 = vmul.bf16 %v14300_v35, %v17205_v46 }
 0x6ad   : > { %4421 = vbcast.lane.c.b16.xlu1 %v14446_v17, 272  ;;  %4417 = vbcast.lane.c.b16.xlu0 %v14446_v17, 256  ;;  %17184 = vst [vmem:[#allocation43_spill] sm:$0xff] %v14472_v42  ;;  %17190 = vst [vmem:[#allocation40_spill] sm:$0xff] %v14492_v55  ;;  %v7970_v26 = vmax.bf16 %v7969_v11, %v6173_v1  ;;  %v6202_v1 = vmul.bf16 %v14270_v9, %v14366_v14  ;;  %v17201_v42 = vld [vmem:[#allocation46_spill] sm:$0xff] }
 0x6ae   : > { %v6201_v11 = vmul.bf16 %v14274_v24, %v14368_v22  ;;  %v6187_v4 = vmul.bf16 %v14282_v21, %v17198_v56  ;;  %v8018_v14 = vmax.bf16 %v6194_v61, %v6193_v7  ;;  %v6203_v22 = vmul.bf16 %v14282_v21, %v14380_v57  ;;  %v17199_v56 = vld [vmem:[#allocation32_spill] sm:$0xff] }
 0x6af   : > { %v14464_v53 = vpop.permute.xlu1 %4170  ;;  %v14468_v60 = vpop.permute.xlu0 %4166  ;;  %v6174_v27 = vmul.bf16 %v14316_v39, %v17199_v56  ;;  %v6175_v61 = vmul.bf16 %v14324_v38, %v17201_v42  ;;  %v6211_v57 = vmul.bf16 %v14282_v21, %v14428_v29  ;;  %v7984_v12 = vmax.bf16 %v6178_v20, %v6177_v50  ;;  %v17204_v20 = vld [vmem:[#allocation72_spill] sm:$0xff] }
 0x6b0   : > { %v6217_v44 = vmul.bf16 %v14274_v24, %v14468_v60  ;;  %v8019_v7 = vmax.bf16 %v8018_v14, %v6195_v5  ;;  %v8035_v13 = vmax.bf16 %v6202_v1, %v6201_v11  ;;  %v6196_v29 = vmul.bf16 %v14292_v16, %v14328_v37  ;;  %v17203_v5 = vld [vmem:[#allocation47_spill] sm:$0xff] }
 0x6b1   : > { %4429 = vbcast.lane.c.b16.xlu1 %v14446_v17, 304  ;;  %4425 = vbcast.lane.c.b16.xlu0 %v14446_v17, 288  ;;  %v7971_v56 = vmax.bf16 %v7970_v26, %v6174_v27  ;;  %v6188_v1 = vmul.bf16 %v14292_v16, %v17203_v5  ;;  %v6204_v37 = vmul.bf16 %v14292_v16, %v14376_v49 }
 0x6b2   : > { %v8036_v54 = vmax.bf16 %v8035_v13, %v6203_v22  ;;  %v6180_v50 = vmul.bf16 %v14292_v16, %v17204_v20  ;;  %v6212_v14 = vmul.bf16 %v14292_v16, %v14426_v8 }
 0x6b3   : > { %v14479_v47 = vpop.permute.xlu1 %4178  ;;  %v14481_v33 = vpop.permute.xlu0 %4174  ;;  %v7972_v8 = vmax.bf16 %v7971_v56, %v6175_v61 }
 0x6b4   : > { %v6219_v60 = vmul.bf16 %v14282_v21, %v14481_v33  ;;  %v8053_v33 = vmax.bf16 %v8052_v6, %v6211_v57  ;;  %v7985_v6 = vmax.bf16 %v7984_v12, %v6179_v18  ;;  %v6220_v49 = vmul.bf16 %v14292_v16, %v14479_v47 }
 0x6b5   : > { %4437 = vbcast.lane.c.b16.xlu1 %v14446_v17, 336  ;;  %4433 = vbcast.lane.c.b16.xlu0 %v14446_v17, 320  ;;  %v6213_v57 = vmul.bf16 %v14300_v35, %v14440_v58 }
 0x6b6   : > { %v8054_v12 = vmax.bf16 %v8053_v33, %v6212_v14 }
 0x6b7   : > { %v14495_v51 = vpop.permute.xlu1 %4186  ;;  %v14505_v10 = vpop.permute.xlu0 %4182 }
 0x6b9   : > { %4445 = vbcast.lane.c.b16.xlu1 %v14446_v17, 368  ;;  %4441 = vbcast.lane.c.b16.xlu0 %v14446_v17, 352  ;;  %v6218_v17 = vmul.bf16 %v14270_v9, %v14464_v53  ;;  %v8001_v53 = vmax.bf16 %v6186_v48, %v6185_v40 }
 0x6bb   : > { %v14533_v34 = vpop.permute.xlu1 %4194  ;;  %v14541_v19 = vpop.permute.xlu0 %4190  ;;  %v8002_v55 = vmax.bf16 %v8001_v53, %v6187_v4  ;;  %v8069_v48 = vmax.bf16 %v6218_v17, %v6217_v44  ;;  %v8020_v4 = vmax.bf16 %v8019_v7, %v6196_v29  ;;  %v8037_v44 = vmax.bf16 %v8036_v54, %v6204_v37  ;;  %v17206_v54 = vld [vmem:[#allocation89_spill] sm:$0xff] }
 0x6bc   : > { %v6181_v47 = vmul.bf16 %v14300_v35, %v17206_v54 }
 0x6bd   : > { %4456 = vbcast.lane.c.b16.xlu1 %v14514_v43, 272  ;;  %4452 = vbcast.lane.c.b16.xlu0 %v14514_v43, 256  ;;  %v8070_v13 = vmax.bf16 %v8069_v48, %v6219_v60  ;;  %v8003_v17 = vmax.bf16 %v8002_v55, %v6188_v1  ;;  %v8021_v7 = vmax.bf16 %v8020_v4, %v6197_v15  ;;  %v17208_v1 = vld [vmem:[#allocation37_spill] sm:$0xff] }
 0x6be   : > { %v6221_v55 = vmul.bf16 %v14300_v35, %v14505_v10  ;;  %v7986_v60 = vmax.bf16 %v7985_v6, %v6180_v50  ;;  %v8038_v61 = vmax.bf16 %v8037_v44, %v6205_v63  ;;  %v14593_v10 = vrot.slane %v14338_v30, %v17195_v52  ;;  %v17209_v6 = vld [vmem:[#allocation44_spill] sm:$0xff] }
 0x6bf   : > { %v4206_v42 = vpop.permute.xlu1 %4205  ;;  %v4202_v40 = vpop.permute.xlu0 %4201  ;;  %v8071_v28 = vmax.bf16 %v8070_v13, %v6220_v49  ;;  %v8004_v48 = vmax.bf16 %v8003_v17, %v6189_v62  ;;  %v6190_v33 = vmul.bf16 %v14316_v39, %v17208_v1  ;;  %v6199_v4 = vmul.bf16 %v14324_v38, %v14358_v32  ;;  %v17210_v49 = vld [vmem:[#allocation82_spill] sm:$0xff] }
 0x6c0   : > { %v6226_v11 = vmul.bf16 %v14270_v9, %v4206_v42  ;;  %v6225_v26 = vmul.bf16 %v14274_v24, %v4202_v40  ;;  %v17207_v40 = vld [vmem:[#allocation63_spill] sm:$0xff]  ;;  %v6206_v13 = vmul.bf16 %v14316_v39, %v14390_v0  ;;  %v7987_v50 = vmax.bf16 %v7986_v60, %v6181_v47 }
 0x6c1   : > { %4464 = vbcast.lane.c.b16.xlu1 %v14514_v43, 304  ;;  %4460 = vbcast.lane.c.b16.xlu0 %v14514_v43, 288  ;;  %v6198_v5 = vmul.bf16 %v14316_v39, %v17207_v40  ;;  %v8072_v20 = vmax.bf16 %v8071_v28, %v6221_v55  ;;  %v6191_v46 = vmul.bf16 %v14324_v38, %v17209_v6  ;;  %v7957_v60 = vunpack.i.l.bf16 %v14499_v41 }
 0x6c2   : > { %v8086_v18 = vmax.bf16 %v6226_v11, %v6225_v26  ;;  %v8055_v11 = vmax.bf16 %v8054_v12, %v6213_v57  ;;  %v6214_v62 = vmul.bf16 %v14316_v39, %v14434_v23  ;;  %v8005_v17 = vmax.bf16 %v8004_v48, %v6190_v33 }
 0x6c3   : > { %v4214_v22 = vpop.permute.xlu1 %4213  ;;  %v4210_v27 = vpop.permute.xlu0 %4209  ;;  %v8022_v37 = vmax.bf16 %v8021_v7, %v6198_v5  ;;  %v6207_v32 = vmul.bf16 %v14324_v38, %v14404_v45  ;;  %v8039_v63 = vmax.bf16 %v8038_v61, %v6206_v13  ;;  %v6222_v0 = vmul.bf16 %v14316_v39, %v14495_v51  ;;  %v17212_v7 = vld [vmem:[#allocation59_spill] sm:$0xff] }
 0x6c4   : > { %v6227_v53 = vmul.bf16 %v14282_v21, %v4210_v27  ;;  %v6228_v58 = vmul.bf16 %v14292_v16, %v4214_v22  ;;  %v6215_v27 = vmul.bf16 %v14324_v38, %v14454_v2  ;;  %v8056_v57 = vmax.bf16 %v8055_v11, %v6214_v62  ;;  %v17213_v5 = vld [vmem:[#allocation67_spill] sm:$0xff] }
 0x6c5   : > { %4472 = vbcast.lane.c.b16.xlu1 %v14514_v43, 336  ;;  %4468 = vbcast.lane.c.b16.xlu0 %v14514_v43, 320  ;;  %v17211_v12 = vmul.bf16 %v14342_v59, %v17200_v25  ;;  %v6223_v51 = vmul.bf16 %v14324_v38, %v14541_v19  ;;  %v6183_v2 = vmul.bf16 %v14324_v38, %v17212_v7  ;;  %v7958_v19 = vunpack.i.h.bf16 %v14499_v41 }
 0x6c6   : > { %v8087_v42 = vmax.bf16 %v8086_v18, %v6227_v53  ;;  %v8023_v18 = vmax.bf16 %v8022_v37, %v6199_v4  ;;  %v8073_v53 = vmax.bf16 %v8072_v20, %v6222_v0  ;;  %v8006_v25 = vmax.bf16 %v8005_v17, %v6191_v46  ;;  %v17214_v37 = vld [vmem:[#allocation50_spill] sm:$0xff] }
 0x6c7   : > { %v4222_v29 = vpop.permute.xlu1 %4221  ;;  %v4218_v56 = vpop.permute.xlu0 %4217  ;;  %v14621_v45 = vmax.bf16 %v7972_v8, %v17211_v12  ;;  %v6200_v8 = vmul.bf16 %v14342_v59, %v14354_v36  ;;  %v6192_v61 = vmul.bf16 %v14342_v59, %v17213_v5  ;;  %v6208_v1 = vmul.bf16 %v14342_v59, %v14402_v3  ;;  %v17215_v0 = vld [vmem:[#allocation30_spill] sm:$0xff] }
 0x6c8   : > { %v6229_v26 = vmul.bf16 %v14300_v35, %v4218_v56  ;;  %v8088_v15 = vmax.bf16 %v8087_v42, %v6228_v58  ;;  %v6230_v23 = vmul.bf16 %v14316_v39, %v4222_v29  ;;  %v8040_v58 = vmax.bf16 %v8039_v63, %v6207_v32 }
 0x6c9   : > { %4480 = vbcast.lane.c.b16.xlu1 %v14514_v43, 368  ;;  %4476 = vbcast.lane.c.b16.xlu0 %v14514_v43, 352  ;;  %v6182_v43 = vmul.bf16 %v14316_v39, %v17210_v49  ;;  %v8057_v29 = vmax.bf16 %v8056_v57, %v6215_v27  ;;  %v8024_v56 = vmax.bf16 %v8023_v18, %v6200_v8  ;;  %v7974_v36 = vunpack.i.l.bf16 %v14621_v45 }
 0x6ca   : > { %v8089_v14 = vmax.bf16 %v8088_v15, %v6229_v26  ;;  %v8074_v33 = vmax.bf16 %v8073_v53, %v6223_v51  ;;  %v6216_v26 = vmul.bf16 %v14342_v59, %v14452_v31  ;;  %v6184_v13 = vmul.bf16 %v14342_v59, %v17214_v37 }
 0x6cb   : > { %v4230_v22 = vpop.permute.xlu1 %4229  ;;  %v4226_v44 = vpop.permute.xlu0 %4225  ;;  %v7988_v55 = vmax.bf16 %v7987_v50, %v6182_v43  ;;  %v8007_v20 = vmax.bf16 %v8006_v25, %v6192_v61  ;;  %v8041_v50 = vmax.bf16 %v8040_v58, %v6208_v1  ;;  %v6224_v6 = vmul.bf16 %v14342_v59, %v14533_v34 }
 0x6cc   : > { %v6231_v28 = vmul.bf16 %v14324_v38, %v4226_v44  ;;  %v8090_v54 = vmax.bf16 %v8089_v14, %v6230_v23  ;;  %v8058_v46 = vmax.bf16 %v8057_v29, %v6216_v26  ;;  %v6232_v62 = vmul.bf16 %v14342_v59, %v4230_v22  ;;  %v17216_v44 = vld [vmem:[#allocation48_spill] sm:$0xff] }
 0x6cd   : > { %4491 = vbcast.lane.c.b16.xlu1 %v14593_v10, 272  ;;  %4487 = vbcast.lane.c.b16.xlu0 %v14593_v10, 256  ;;  %v7989_v11 = vmax.bf16 %v7988_v55, %v6183_v2  ;;  %v8025_v31 = vunpack.i.l.bf16 %v8024_v56  ;;  %v8026_v32 = vunpack.i.h.bf16 %v8024_v56  ;;  %v8075_v63 = vmax.bf16 %v8074_v33, %v6224_v6 }
 0x6ce   : > { %v8091_v15 = vmax.bf16 %v8090_v54, %v6231_v28  ;;  %v14654_v49 = vrot.slane %v17216_v44, %v17215_v0  ;;  %v8008_v23 = vunpack.i.l.bf16 %v8007_v20  ;;  %v8009_v12 = vunpack.i.h.bf16 %v8007_v20 }
 0x6cf   : > { %v4241_v47 = vpop.permute.xlu1 %4240  ;;  %v4237_v42 = vpop.permute.xlu0 %4236  ;;  %v7990_v43 = vmax.bf16 %v7989_v11, %v6184_v13  ;;  %v8042_v18 = vunpack.i.l.bf16 %v8041_v50  ;;  %v8043_v51 = vunpack.i.h.bf16 %v8041_v50  ;;  %v8059_v7 = vunpack.i.l.bf16 %v8058_v46  ;;  %v17217_v11 = vld [vmem:[#allocation40_spill] sm:$0xff]  ;;  %v17218_v50 = vld [vmem:[#allocation33_spill] sm:$0xff] }
 0x6d0   : > { %v6234_v48 = vmul.bf16 %v14270_v9, %v4241_v47  ;;  %v6233_v40 = vmul.bf16 %v14274_v24, %v4237_v42  ;;  %v8092_v34 = vmax.bf16 %v8091_v15, %v6232_v62  ;;  %v8060_v2 = vunpack.i.h.bf16 %v8058_v46 }
 0x6d1   : > { %4499 = vbcast.lane.c.b16.xlu1 %v14593_v10, 304  ;;  %4495 = vbcast.lane.c.b16.xlu0 %v14593_v10, 288  ;;  %v7975_v54 = vunpack.i.h.bf16 %v14621_v45  ;;  %v8027_v47 = vmax.f32 %v8025_v31, %v8026_v32  ;;  %v8076_v25 = vunpack.i.l.bf16 %v8075_v63  ;;  %v8077_v8 = vunpack.i.h.bf16 %v8075_v63  ;;  %v17220_v31 = vld [vmem:[#allocation66_spill] sm:$0xff] }
 0x6d2   : > { %v8103_v14 = vmax.bf16 %v6234_v48, %v6233_v40  ;;  %v8093_v58 = vunpack.i.l.bf16 %v8092_v34  ;;  %v8094_v42 = vunpack.i.h.bf16 %v8092_v34  ;;  %v7991_v5 = vunpack.i.l.bf16 %v7990_v43 }
 0x6d3   : > { %v4249_v4 = vpop.permute.xlu1 %4248  ;;  %v4245_v3 = vpop.permute.xlu0 %4244  ;;  %v7992_v61 = vunpack.i.h.bf16 %v7990_v43  ;;  %v8010_v56 = vmax.f32 %v8008_v23, %v8009_v12  ;;  %v8044_v1 = vmax.f32 %v8042_v18, %v8043_v51  ;;  %v7913_v26 = vrot.slane %v17217_v11, 1 }
 0x6d4   : > { %v6235_v17 = vmul.bf16 %v14282_v21, %v4245_v3  ;;  %v6236_v27 = vmul.bf16 %v14292_v16, %v4249_v4  ;;  %v8061_v15 = vmax.f32 %v8059_v7, %v8060_v2  ;;  %v7976_v37 = vmax.f32 %v7974_v36, %v7975_v54 }
 0x6d5   : > { %4507 = vbcast.lane.c.b16.xlu1 %v14593_v10, 336  ;;  %4503 = vbcast.lane.c.b16.xlu0 %v14593_v10, 320  ;;  %v8028_v13 = vrot.slane %v8027_v47, 4  ;;  %v8078_v20 = vmax.f32 %v8076_v25, %v8077_v8  ;;  %v17219_v6 = vrot.slane %v17218_v50, 4  ;;  %v8095_v46 = vmax.f32 %v8093_v58, %v8094_v42 }
 0x6d6   : > { %v8104_v57 = vmax.bf16 %v8103_v14, %v6235_v17  ;;  %v7943_v32 = vrot.slane %v17220_v31, 4  ;;  %v7993_v63 = vmax.f32 %v7991_v5, %v7992_v61  ;;  %v8011_v43 = vrot.slane %v8010_v56, 4 }
 0x6d7   : > { %v4257_v22 = vpop.permute.xlu1 %4256  ;;  %v4253_v53 = vpop.permute.xlu0 %4252  ;;  %v7927_v3 = vmax.f32 %v17218_v50, %v17219_v6  ;;  %v8045_v41 = vrot.slane %v8044_v1, 4  ;;  %v8029_v23 = vmax.f32 %v8027_v47, %v8028_v13  ;;  %v8079_v12 = vrot.slane %v8078_v20, 4 }
 0x6d8   : > { %v6237_v55 = vmul.bf16 %v14300_v35, %v4253_v53  ;;  %v8105_v28 = vmax.bf16 %v8104_v57, %v6236_v27  ;;  %v6238_v29 = vmul.bf16 %v14316_v39, %v4257_v22  ;;  %v7977_v22 = vrot.slane %v7976_v37, 4 }
 0x6d9   : > { %4515 = vbcast.lane.c.b16.xlu1 %v14593_v10, 368  ;;  %4511 = vbcast.lane.c.b16.xlu0 %v14593_v10, 352  ;;  %v7959_v10 = vmax.f32 %v7957_v60, %v7958_v19  ;;  %v8062_v19 = vrot.slane %v8061_v15, 4  ;;  %v7928_v18 = vrot.slane %v7927_v3, 2  ;;  %v8096_v51 = vrot.slane %v8095_v46, 4 }
 0x6da   : > { %v8106_v48 = vmax.bf16 %v8105_v28, %v6237_v55  ;;  %v7944_v55 = vmax.f32 %v17220_v31, %v7943_v32  ;;  %v7994_v28 = vrot.slane %v7993_v63, 4  ;;  %v8012_v54 = vmax.f32 %v8010_v56, %v8011_v43 }
 0x6db   : > { %v4265_v40 = vpop.permute.xlu1 %4264  ;;  %v4261_v33 = vpop.permute.xlu0 %4260  ;;  %v7960_v57 = vrot.slane %v7959_v10, 4  ;;  %v8097_v5 = vmax.f32 %v8095_v46, %v8096_v51  ;;  %v7929_v6 = vmax.f32 %v7927_v3, %v7928_v18 }
 0x6dc   : > { %v6239_v45 = vmul.bf16 %v14324_v38, %v4261_v33  ;;  %v8107_v4 = vmax.bf16 %v8106_v48, %v6238_v29  ;;  %v6240_v62 = vmul.bf16 %v14342_v59, %v4265_v40  ;;  %v7978_v29 = vmax.f32 %v7976_v37, %v7977_v22 }
 0x6dd   : > { %4526 = vbcast.lane.c.b16.xlu1 %v14654_v49, 272  ;;  %4522 = vbcast.lane.c.b16.xlu0 %v14654_v49, 256  ;;  %v7961_v47 = vmax.f32 %v7959_v10, %v7960_v57  ;;  %v8030_v48 = vrot.slane %v8029_v23, 2  ;;  %v8080_v40 = vmax.f32 %v8078_v20, %v8079_v12  ;;  %v7945_v46 = vrot.slane %v7944_v55, 2 }
 0x6de   : > { %v8108_v14 = vmax.bf16 %v8107_v4, %v6239_v45  ;;  %v7995_v45 = vmax.f32 %v7993_v63, %v7994_v28  ;;  %v7979_v43 = vrot.slane %v7978_v29, 2  ;;  %v7930_v57 = vrot.slane %v7929_v6, 1 }
 0x6df   : > { %v4276_v17 = vpop.permute.xlu1 %4275  ;;  %v4272_v60 = vpop.permute.xlu0 %4271 }
 0x6e0   : > { %v8109_v36 = vmax.bf16 %v8108_v14, %v6240_v62  ;;  %v6242_v34 = vmul.bf16 %v14270_v9, %v4276_v17  ;;  %v6241_v27 = vmul.bf16 %v14274_v24, %v4272_v60  ;;  %v8046_v9 = vmax.f32 %v8044_v1, %v8045_v41 }
 0x6e1   : > { %4534 = vbcast.lane.c.b16.xlu1 %v14654_v49, 304  ;;  %4530 = vbcast.lane.c.b16.xlu0 %v14654_v49, 288  ;;  %v8063_v24 = vmax.f32 %v8061_v15, %v8062_v19  ;;  %v8013_v15 = vrot.slane %v8012_v54, 2  ;;  %v8081_v62 = vrot.slane %v8080_v40, 2  ;;  %v8031_v14 = vmax.f32 %v8029_v23, %v8030_v48 }
 0x6e2   : > { %v8110_v53 = vunpack.i.l.bf16 %v8109_v36  ;;  %v8111_v7 = vunpack.i.h.bf16 %v8109_v36  ;;  %v8120_v58 = vmax.bf16 %v6242_v34, %v6241_v27  ;;  %v8047_v4 = vrot.slane %v8046_v9, 2 }
 0x6e3   : > { %v4284_v2 = vpop.permute.xlu1 %4283  ;;  %v4280_v25 = vpop.permute.xlu0 %4279  ;;  %v8064_v10 = vrot.slane %v8063_v24, 2  ;;  %v8098_v17 = vrot.slane %v8097_v5, 2  ;;  %v7996_v41 = vrot.slane %v7995_v45, 2  ;;  %v8014_v36 = vmax.f32 %v8012_v54, %v8013_v15 }
 0x6e4   : > { %v8112_v8 = vmax.f32 %v8110_v53, %v8111_v7  ;;  %v6243_v42 = vmul.bf16 %v14282_v21, %v4280_v25  ;;  %v6244_v33 = vmul.bf16 %v14292_v16, %v4284_v2  ;;  %v14686_v21 = vrot.slane %v14338_v30, %v17215_v0 }
 0x6e5   : > { %4542 = vbcast.lane.c.b16.xlu1 %v14654_v49, 336  ;;  %4538 = vbcast.lane.c.b16.xlu0 %v14654_v49, 320  ;;  %v7962_v16 = vrot.slane %v7961_v47, 2  ;;  %v8048_v60 = vmax.f32 %v8046_v9, %v8047_v4  ;;  %v8065_v34 = vmax.f32 %v8063_v24, %v8064_v10  ;;  %v8082_v23 = vmax.f32 %v8080_v40, %v8081_v62 }
 0x6e6   : > { %v8113_v61 = vrot.slane %v8112_v8, 4  ;;  %v8121_v56 = vmax.bf16 %v8120_v58, %v6243_v42  ;;  %v8099_v12 = vmax.f32 %v8097_v5, %v8098_v17  ;;  %v7980_v7 = vmax.f32 %v7978_v29, %v7979_v43 }
 0x6e7   : > { %v4292_v1 = vpop.permute.xlu1 %4291  ;;  %v4288_v13 = vpop.permute.xlu0 %4287  ;;  %v7963_v22 = vmax.f32 %v7961_v47, %v7962_v16  ;;  %v7997_v2 = vmax.f32 %v7995_v45, %v7996_v41  ;;  %v8049_v28 = vrot.slane %v8048_v60, 1  ;;  %v8015_v9 = vrot.slane %v8014_v36, 1 }
 0x6e8   : > { %v8114_v37 = vmax.f32 %v8112_v8, %v8113_v61  ;;  %v6245_v20 = vmul.bf16 %v14300_v35, %v4288_v13  ;;  %v8122_v50 = vmax.bf16 %v8121_v56, %v6244_v33  ;;  %v6246_v31 = vmul.bf16 %v14316_v39, %v4292_v1  ;;  %v17221_v1 = vld [vmem:[#allocation52_spill] sm:$0xff] }
 0x6e9   : > { %4550 = vbcast.lane.c.b16.xlu1 %v14654_v49, 368  ;;  %4546 = vbcast.lane.c.b16.xlu0 %v14654_v49, 352  ;;  %v7946_v49 = vmax.f32 %v7944_v55, %v7945_v46  ;;  %v8032_v39 = vrot.slane %v8031_v14, 1  ;;  %v7914_v55 = vmax.f32 %v17217_v11, %v7913_v26  ;;  %v8066_v25 = vrot.slane %v8065_v34, 1 }
 0x6ea   : > { %v8123_v32 = vmax.bf16 %v8122_v50, %v6245_v20  ;;  %v8115_v19 = vrot.slane %v8114_v37, 2  ;;  %v7931_v8 = vmax.f32 %v7929_v6, %v7930_v57  ;;  %v7964_v58 = vrot.slane %v7963_v22, 1 }
 0x6eb   : > { %v4300_v63 = vpop.permute.xlu1 %4299  ;;  %v4296_v35 = vpop.permute.xlu0 %4295  ;;  %v8083_v42 = vrot.slane %v8082_v23, 1  ;;  %v8033_v47 = vmax.f32 %v8031_v14, %v8032_v39  ;;  %v8100_v29 = vrot.slane %v8099_v12, 1  ;;  %v7981_v61 = vrot.slane %v7980_v7, 1 }
 0x6ec   : > { %v6247_v3 = vmul.bf16 %v14324_v38, %v4296_v35  ;;  %v8124_v27 = vmax.bf16 %v8123_v32, %v6246_v31  ;;  %v6248_v18 = vmul.bf16 %v14342_v59, %v4300_v63  ;;  %v8116_v38 = vmax.f32 %v8114_v37, %v8115_v19  ;;  %v17222_v35 = vld [vmem:[#allocation31_spill] sm:$0xff] }
 0x6ed   : > { %4561 = vbcast.lane.c.b16.xlu1 %v14686_v21, 272  ;;  %4557 = vbcast.lane.c.b16.xlu0 %v14686_v21, 256  ;;  %v7947_v59 = vrot.slane %v7946_v49, 1  ;;  %v8050_v33 = vmax.f32 %v8048_v60, %v8049_v28  ;;  %v7998_v56 = vrot.slane %v7997_v2, 1  ;;  %v7898_v45 = vpack.i.bf16 %v17221_v1, %v17221_v1 }
 0x6ee   : > { %v8125_v51 = vmax.bf16 %v8124_v27, %v6247_v3  ;;  %v8117_v11 = vrot.slane %v8116_v38, 1  ;;  %v8016_v15 = vmax.f32 %v8014_v36, %v8015_v9  ;;  %v8067_v4 = vmax.f32 %v8065_v34, %v8066_v25 }
 0x6ef   : > { %v14696_v53 = vpop.permute.xlu1 %4313  ;;  %v14698_v54 = vpop.permute.xlu0 %4309  ;;  %v7915_v10 = vpack.i.bf16 %v7914_v55, %v7914_v55  ;;  %v7932_v37 = vpack.i.bf16 %v7931_v8, %v7931_v8  ;;  %v7948_v20 = vmax.f32 %v7946_v49, %v7947_v59  ;;  %v8084_v50 = vmax.f32 %v8082_v23, %v8083_v42 }
 0x6f0   : > { %v8126_v24 = vmax.bf16 %v8125_v51, %v6248_v18  ;;  %v7965_v6 = vmax.f32 %v7963_v22, %v7964_v58  ;;  %v8034_v46 = vpack.i.bf16 %v8033_v47, %v8033_v47  ;;  %v8101_v16 = vmax.f32 %v8099_v12, %v8100_v29 }
 0x6f1   : > { %4569 = vbcast.lane.c.b16.xlu1 %v14686_v21, 304  ;;  %4565 = vbcast.lane.c.b16.xlu0 %v14686_v21, 288  ;;  %v8051_v17 = vpack.i.bf16 %v8050_v33, %v8050_v33  ;;  %v7982_v32 = vmax.f32 %v7980_v7, %v7981_v61  ;;  %v7999_v63 = vmax.f32 %v7997_v2, %v7998_v56  ;;  %v17223_v34 = vmov 0  }
 0x6f2   : > { %v8127_v48 = vunpack.i.l.bf16 %v8126_v24  ;;  %v8128_v40 = vunpack.i.h.bf16 %v8126_v24  ;;  %v8118_v43 = vmax.f32 %v8116_v38, %v8117_v11  ;;  %v8017_v41 = vpack.i.bf16 %v8016_v15, %v8016_v15 }
 0x6f3   : > { %v14705_v5 = vpop.permute.xlu1 %4321  ;;  %v14707_v26 = vpop.permute.xlu0 %4317  ;;  %v8068_v60 = vpack.i.bf16 %v8067_v4, %v8067_v4  ;;  %v14720_v36 = vrot.slane %v17216_v44, %v17222_v35  ;;  %v8762_v3 = vmax.bf16 %v17223_v34, %v7898_v45  ;;  %v8763_v27 = vmax.bf16 %v17223_v34, %v7915_v10 }
 0x6f4   : > { %v8129_v13 = vmax.f32 %v8127_v48, %v8128_v40  ;;  %v7949_v57 = vpack.i.bf16 %v7948_v20, %v7948_v20  ;;  %v8085_v49 = vpack.i.bf16 %v8084_v50, %v8084_v50  ;;  %v7966_v22 = vpack.i.bf16 %v7965_v6, %v7965_v6  ;;  %v17224_v20 = vld [vmem:[#allocation43_spill] sm:$0xff] }
 0x6f5   : > { %4577 = vbcast.lane.c.b16.xlu1 %v14686_v21, 336  ;;  %4573 = vbcast.lane.c.b16.xlu0 %v14686_v21, 320  ;;  %v8770_v23 = vmax.bf16 %v17223_v34, %v8034_v46  ;;  %v8102_v39 = vpack.i.bf16 %v8101_v16, %v8101_v16  ;;  %v8764_v51 = vmax.bf16 %v17223_v34, %v7932_v37  ;;  %v9052_v24 = vunpack.c.l.b16 %v8762_v3 }
 0x6f6   : > { %v8130_v62 = vrot.slane %v8129_v13, 4  ;;  %v8771_v7 = vmax.bf16 %v17223_v34, %v8051_v17  ;;  %v7983_v28 = vpack.i.bf16 %v7982_v32, %v7982_v32  ;;  %v8119_v38 = vpack.i.bf16 %v8118_v43, %v8118_v43 }
 0x6f7   : > { %v14713_v14 = vpop.permute.xlu1 %4329  ;;  %v14715_v31 = vpop.permute.xlu0 %4325  ;;  %v8769_v55 = vmax.bf16 %v17223_v34, %v8017_v41  ;;  %v8772_v9 = vmax.bf16 %v17223_v34, %v8068_v60  ;;  %v8000_v25 = vpack.i.bf16 %v7999_v63, %v7999_v63  ;;  %v9053_v8 = vunpack.c.l.b16 %v8763_v27 }
 0x6f8   : > { %v8131_v19 = vmax.f32 %v8129_v13, %v8130_v62  ;;  %v8765_v59 = vmax.bf16 %v17223_v34, %v7949_v57  ;;  %v8773_v58 = vmax.bf16 %v17223_v34, %v8085_v49  ;;  %v9060_v42 = vunpack.c.l.b16 %v8770_v23 }
 0x6f9   : > { %4585 = vbcast.lane.c.b16.xlu1 %v14686_v21, 368  ;;  %4581 = vbcast.lane.c.b16.xlu0 %v14686_v21, 352  ;;  %v8766_v48 = vmax.bf16 %v17223_v34, %v7966_v22  ;;  %v8774_v40 = vmax.bf16 %v17223_v34, %v8102_v39  ;;  %v9061_v61 = vunpack.c.l.b16 %v8771_v7  ;;  %v8767_v11 = vmax.bf16 %v17223_v34, %v7983_v28 }
 0x6fa   : > { %v8132_v12 = vrot.slane %v8131_v19, 2  ;;  %v8775_v56 = vmax.bf16 %v17223_v34, %v8119_v38  ;;  %v9054_v1 = vunpack.c.l.b16 %v8764_v51  ;;  %v9059_v45 = vunpack.c.l.b16 %v8769_v55 }
 0x6fb   : > { %v14726_v18 = vpop.permute.xlu1 %4337  ;;  %v14730_v2 = vpop.permute.xlu0 %4333  ;;  %v8768_v4 = vmax.bf16 %v17223_v34, %v8000_v25  ;;  %v9062_v13 = vunpack.c.l.b16 %v8772_v9  ;;  %v9055_v10 = vunpack.c.l.b16 %v8765_v59  ;;  %v9063_v37 = vunpack.c.l.b16 %v8773_v58 }
 0x6fc   : > { %v8133_v21 = vmax.f32 %v8131_v19, %v8132_v12  ;;  %v17225_v50 = vunpack.c.l.b16 %v17224_v20  ;;  %v9056_v62 = vunpack.c.l.b16 %v8766_v48  ;;  %v9064_v17 = vunpack.c.l.b16 %v8774_v40 }
 0x6fd   : > { %4596 = vbcast.lane.c.b16.xlu1 %v14720_v36, 272  ;;  %4592 = vbcast.lane.c.b16.xlu0 %v14720_v36, 256  ;;  %v9183_v32 = vsel %vm9099_vm0, %v9060_v42, %v9059_v45  ;;  %v9057_v43 = vunpack.c.l.b16 %v8767_v11  ;;  %v9065_v41 = vunpack.c.l.b16 %v8775_v56  ;;  %v9058_v27 = vunpack.c.l.b16 %v8768_v4 }
 0x6fe   : > { %v8134_v29 = vrot.slane %v8133_v21, 1  ;;  %v9176_v6 = vsel %vm9099_vm0, %v9052_v24, %v17225_v50  ;;  %v9184_v19 = vsel %vm9101_vm1, %v9061_v61, %v9183_v32  ;;  %v4625_v25 = vrot.slane %v14338_v30, %v17222_v35  ;;  %v17226_v61 = vld [vmem:[#allocation38_spill] sm:$0xff]  ;;  %v17231_v32 = vld [vmem:[#allocation27_spill] sm:$0xff] }
 0x6ff   : > { %v14738_v47 = vpop.permute.xlu1 %4351  ;;  %v14742_v33 = vpop.permute.xlu0 %4347  ;;  %v9177_v60 = vsel %vm9101_vm1, %v9053_v8, %v9176_v6  ;;  %v9185_v49 = vsel %vm9103_vm2, %v9062_v13, %v9184_v19  ;;  %v4660_v11 = vrot.slane %v17216_v44, %v17226_v61  ;;  %v14816_v50 = vrot.slane %v14338_v30, %v17226_v61 }
 0x700   : > { %v8135_v15 = vmax.f32 %v8133_v21, %v8134_v29  ;;  %v9178_v57 = vsel %vm9103_vm2, %v9054_v1, %v9177_v60  ;;  %v9186_v23 = vsel %vm9105_vm3, %v9063_v37, %v9185_v49 }
 0x701   : > { %4604 = vbcast.lane.c.b16.xlu1 %v14720_v36, 304  ;;  %4600 = vbcast.lane.c.b16.xlu0 %v14720_v36, 288  ;;  %v9179_v22 = vsel %vm9105_vm3, %v9055_v10, %v9178_v57  ;;  %v9187_v7 = vsel %vm9107_vm4, %v9064_v17, %v9186_v23  ;;  %v10237_v10 = vld [vmem:[#allocation6 + $0x38] sm:$0xff]  }
 0x702   : > { %v8136_v16 = vpack.i.bf16 %v8135_v15, %v8135_v15  ;;  %v9180_v51 = vsel %vm9107_vm4, %v9056_v62, %v9179_v22  ;;  %v9188_v55 = vsel %vm9109_vm5, %v9065_v41, %v9187_v7  ;;  %v14818_v6 = vpack.i.b16 %v10237_v10, %v10237_v10 }
 0x703   : > { %v14752_v46 = vpop.permute.xlu1 %4359  ;;  %v14755_v63 = vpop.permute.xlu0 %4355  ;;  %v9181_v38 = vsel %vm9109_vm5, %v9057_v43, %v9180_v51 }
 0x704   : > { %v8776_v3 = vmax.bf16 %v17223_v34, %v8136_v16  ;;  %v9182_v9 = vsel %vm9111_vm6, %v9058_v27, %v9181_v38  ;;  %v4905_v16 = vshrl.u32 %v10237_v10, 16  ;;  %v14827_v43 = vrot.slane %v14818_v6, %v17231_v32  ;;  %v17239_v38 = vld [vmem:[#allocation28_spill] sm:$0xff] }
 0x705   : > { %4612 = vbcast.lane.c.b16.xlu1 %v14720_v36, 336  ;;  %4608 = vbcast.lane.c.b16.xlu0 %v14720_v36, 320  ;;  %v14849_v49 = vrot.slane %v14818_v6, %v17222_v35 }
 0x706   : > { %v9066_v12 = vunpack.c.l.b16 %v8776_v3  ;;  %v14829_v41 = vpack.i.b16 %v4905_v16, %v4905_v16 }
 0x707   : > { %v14766_v39 = vpop.permute.xlu1 %4367  ;;  %v14770_v28 = vpop.permute.xlu0 %4363  ;;  %17234 = vst [vmem:[#allocation91_spill] sm:$0xff] %v14849_v49 }
 0x708   : > { %v9189_v21 = vsel %vm9111_vm6, %v9066_v12, %v9188_v55  ;;  %v14839_v3 = vrot.slane %v14829_v41, %v17231_v32  ;;  %v14859_v12 = vrot.slane %v14829_v41, %v17222_v35  ;;  %v14869_v55 = vrot.slane %v14818_v6, %v17239_v38 }
 0x709   : > { %4620 = vbcast.lane.c.b16.xlu1 %v14720_v36, 368  ;;  %4616 = vbcast.lane.c.b16.xlu0 %v14720_v36, 352  ;;  %v9223_v24 = vpack.c.b16 %v9189_v21, %v9182_v9  ;;  %v14879_v35 = vrot.slane %v14818_v6, %v17226_v61 }
 0x70a   : > { %17232 = vst [vmem:[#allocation51_spill] sm:$0xff] %v14839_v3 }
 0x70b   : > { %v14780_v8 = vpop.permute.xlu1 %4375  ;;  %v14782_v59 = vpop.permute.xlu0 %4371  ;;  %10090 = vmatmul.mubr.bf16.gmra.mxu1 %v9223_v24 }
 0x70d   : > { %4631 = vbcast.lane.c.b16.xlu1 %v4625_v25, 272  ;;  %4627 = vbcast.lane.c.b16.xlu0 %v4625_v25, 256 }
 0x70f   : > { %v14784_v58 = vpop.permute.xlu1 %4386  ;;  %v14786_v42 = vpop.permute.xlu0 %4382 }
 0x711   : > { %4639 = vbcast.lane.c.b16.xlu1 %v4625_v25, 304  ;;  %4635 = vbcast.lane.c.b16.xlu0 %v4625_v25, 288 }
 0x713   : > { %v14788_v29 = vpop.permute.xlu1 %4394  ;;  %v14790_v48 = vpop.permute.xlu0 %4390 }
 0x715   : > { %4647 = vbcast.lane.c.b16.xlu1 %v4625_v25, 336  ;;  %4643 = vbcast.lane.c.b16.xlu0 %v4625_v25, 320 }
 0x717   : > { %v14792_v36 = vpop.permute.xlu1 %4402  ;;  %v14794_v40 = vpop.permute.xlu0 %4398 }
 0x719   : > { %4655 = vbcast.lane.c.b16.xlu1 %v4625_v25, 368  ;;  %4651 = vbcast.lane.c.b16.xlu0 %v4625_v25, 352 }
 0x71b   : > { %v14798_v56 = vpop.permute.xlu1 %4410  ;;  %v14800_v1 = vpop.permute.xlu0 %4406 }
 0x71c   : > { %17227 = vst [vmem:[#allocation90_spill] sm:$0xff] %v14798_v56 }
 0x71d   : > { %4666 = vbcast.lane.c.b16.xlu1 %v4660_v11, 272  ;;  %4662 = vbcast.lane.c.b16.xlu0 %v4660_v11, 256 }
 0x71f   : > { %v14802_v45 = vpop.permute.xlu1 %4421  ;;  %v14804_v15 = vpop.permute.xlu0 %4417 }
 0x721   : > { %4674 = vbcast.lane.c.b16.xlu1 %v4660_v11, 304  ;;  %4670 = vbcast.lane.c.b16.xlu0 %v4660_v11, 288 }
 0x723   : > { %v14806_v4 = vpop.permute.xlu1 %4429  ;;  %v14808_v13 = vpop.permute.xlu0 %4425 }
 0x725   : > { %4682 = vbcast.lane.c.b16.xlu1 %v4660_v11, 336  ;;  %4678 = vbcast.lane.c.b16.xlu0 %v4660_v11, 320 }
 0x727   : > { %v14810_v37 = vpop.permute.xlu1 %4437  ;;  %v14812_v20 = vpop.permute.xlu0 %4433 }
 0x728   : > { %17228 = vst [vmem:[#allocation42_spill] sm:$0xff] %v14810_v37 }
 0x729   : > { %4690 = vbcast.lane.c.b16.xlu1 %v4660_v11, 368  ;;  %4686 = vbcast.lane.c.b16.xlu0 %v4660_v11, 352  ;;  %v17241_v11 = vld [vmem:[#allocation45_spill] sm:$0xff] }
 0x72a   : > { %v14889_v10 = vrot.slane %v17216_v44, %v17241_v11 }
 0x72b   : > { %v14820_v62 = vpop.permute.xlu1 %4445  ;;  %v14822_v17 = vpop.permute.xlu0 %4441 }
 0x72c   : > { %17229 = vst [vmem:[#allocation36_spill] sm:$0xff] %v14820_v62  ;;  %17230 = vst [vmem:[#allocation76_spill] sm:$0xff] %v14822_v17 }
 0x72d   : > { %4701 = vbcast.lane.c.b16.xlu1 %v14816_v50, 272  ;;  %4697 = vbcast.lane.c.b16.xlu0 %v14816_v50, 256 }
 0x72f   : > { %v14832_v60 = vpop.permute.xlu1 %4456  ;;  %v14834_v19 = vpop.permute.xlu0 %4452 }
 0x731   : > { %4879 = vbcast.lane.c.b16.xlu1 %v14827_v43, 272  ;;  %4875 = vbcast.lane.c.b16.xlu0 %v14827_v43, 256 }
 0x733   : > { %v14842_v27 = vpop.permute.xlu1 %4464  ;;  %v14844_v57 = vpop.permute.xlu0 %4460 }
 0x734   : > { %17233 = vst [vmem:[#allocation84_spill] sm:$0xff] %v14842_v27 }
 0x735   : > { %4917 = vbcast.lane.c.b16.xlu1 %v14839_v3, 272  ;;  %4913 = vbcast.lane.c.b16.xlu0 %v14839_v3, 256 }
 0x737   : > { %v14852_v22 = vpop.permute.xlu1 %4472  ;;  %v14854_v23 = vpop.permute.xlu0 %4468 }
 0x738   : > { %17235 = vst [vmem:[#allocation73_spill] sm:$0xff] %v14852_v22  ;;  %17236 = vst [vmem:[#allocation64_spill] sm:$0xff] %v14854_v23  ;;  %v14931_v23 = vrot.slane %v14338_v30, %v17241_v11 }
 0x739   : > { %5162 = vbcast.lane.c.b16.xlu1 %v14849_v49, 272  ;;  %5158 = vbcast.lane.c.b16.xlu0 %v14849_v49, 256 }
 0x73b   : > { %v14862_v51 = vpop.permute.xlu1 %4480  ;;  %v14864_v7 = vpop.permute.xlu0 %4476 }
 0x73c   : > { %17237 = vst [vmem:[#allocation79_spill] sm:$0xff] %v14862_v51  ;;  %17238 = vst [vmem:[#allocation75_spill] sm:$0xff] %v14864_v7  ;;  %v14905_v7 = vrot.slane %v14829_v41, %v17239_v38  ;;  %v14921_v38 = vrot.slane %v14829_v41, %v17226_v61 }
 0x73d   : > { %5197 = vbcast.lane.c.b16.xlu1 %v14859_v12, 272  ;;  %5193 = vbcast.lane.c.b16.xlu0 %v14859_v12, 256 }
 0x73f   : > { %v14872_v9 = vpop.permute.xlu1 %4491  ;;  %v14874_v21 = vpop.permute.xlu0 %4487 }
 0x741   : > { %4952 = vbcast.lane.c.b16.xlu1 %v14869_v55, 272  ;;  %4948 = vbcast.lane.c.b16.xlu0 %v14869_v55, 256 }
 0x743   : > { %v14882_v25 = vpop.permute.xlu1 %4499  ;;  %v14884_v24 = vpop.permute.xlu0 %4495 }
 0x744   : > { %17240 = vst [vmem:[#allocation88_spill] sm:$0xff] %v14882_v25 }
 0x745   : > { %5232 = vbcast.lane.c.b16.xlu1 %v14879_v35, 272  ;;  %5228 = vbcast.lane.c.b16.xlu0 %v14879_v35, 256 }
 0x747   : > { %v14892_v16 = vpop.permute.xlu1 %4507  ;;  %v14894_v32 = vpop.permute.xlu0 %4503 }
 0x748   : > { %17242 = vst [vmem:[#allocation58_spill] sm:$0xff] %v14892_v16  ;;  %17243 = vst [vmem:[#allocation34_spill] sm:$0xff] %v14894_v32 }
 0x749   : > { %4736 = vbcast.lane.c.b16.xlu1 %v14889_v10, 272  ;;  %4732 = vbcast.lane.c.b16.xlu0 %v14889_v10, 256 }
 0x74b   : > { %v14898_v34 = vpop.permute.xlu1 %4515  ;;  %v14900_v51 = vpop.permute.xlu0 %4511 }
 0x74c   : > { %17244 = vst [vmem:[#allocation56_spill] sm:$0xff] %v14898_v34  ;;  %17245 = vst [vmem:[#allocation70_spill] sm:$0xff] %v14900_v51 }
 0x74d   : > { %4921 = vbcast.lane.c.b16.xlu1 %v14839_v3, 288  ;;  %4883 = vbcast.lane.c.b16.xlu0 %v14827_v43, 288 }
 0x74f   : > { %v14908_v22 = vpop.permute.xlu1 %4526  ;;  %v14910_v16 = vpop.permute.xlu0 %4522 }
 0x751   : > { %4987 = vbcast.lane.c.b16.xlu1 %v14905_v7, 272  ;;  %4983 = vbcast.lane.c.b16.xlu0 %v14905_v7, 256 }
 0x753   : > { %v14914_v62 = vpop.permute.xlu1 %4534  ;;  %v14916_v34 = vpop.permute.xlu0 %4530 }
 0x754   : > { %17246 = vst [vmem:[#allocation81_spill] sm:$0xff] %v14914_v62  ;;  %17247 = vst [vmem:[#allocation35_spill] sm:$0xff] %v14916_v34 }
 0x755   : > { %5201 = vbcast.lane.c.b16.xlu1 %v14859_v12, 288  ;;  %5166 = vbcast.lane.c.b16.xlu0 %v14849_v49, 288 }
 0x757   : > { %v14924_v51 = vpop.permute.xlu1 %4542  ;;  %v14926_v32 = vpop.permute.xlu0 %4538 }
 0x758   : > { %17248 = vst [vmem:[#allocation41_spill] sm:$0xff] %v14924_v51  ;;  %17249 = vst [vmem:[#allocation29_spill] sm:$0xff] %v14926_v32  ;;  %v14947_v32 = vrot.slane %v14818_v6, %v17195_v52 }
 0x759   : > { %5267 = vbcast.lane.c.b16.xlu1 %v14921_v38, 272  ;;  %5263 = vbcast.lane.c.b16.xlu0 %v14921_v38, 256 }
 0x75b   : > { %v14934_v62 = vpop.permute.xlu1 %4550  ;;  %v14936_v25 = vpop.permute.xlu0 %4546 }
 0x75c   : > { %17250 = vst [vmem:[#allocation85_spill] sm:$0xff] %v14934_v62  ;;  %17251 = vst [vmem:[#allocation87_spill] sm:$0xff] %v14936_v25  ;;  %v14957_v25 = vrot.slane %v14818_v6, %v17241_v11 }
 0x75d   : > { %4767 = vbcast.lane.c.b16.xlu1 %v14931_v23, 256  ;;  %4705 = vbcast.lane.c.b16.xlu0 %v14816_v50, 288 }
 0x75f   : > { %v14940_v61 = vpop.permute.xlu1 %4561  ;;  %v14942_v51 = vpop.permute.xlu0 %4557 }
 0x760   : > { %17252 = vst [vmem:[#allocation55_spill] sm:$0xff] %v14940_v61  ;;  %17253 = vst [vmem:[#allocation32_spill] sm:$0xff] %v14942_v51 }
 0x761   : > { %4956 = vbcast.lane.c.b16.xlu1 %v14869_v55, 288  ;;  %4771 = vbcast.lane.c.b16.xlu0 %v14931_v23, 272 }
 0x763   : > { %v14950_v27 = vpop.permute.xlu1 %4569  ;;  %v14952_v62 = vpop.permute.xlu0 %4565 }
 0x764   : > { %17254 = vst [vmem:[#allocation53_spill] sm:$0xff] %v14950_v27  ;;  %17255 = vst [vmem:[#allocation46_spill] sm:$0xff] %v14952_v62  ;;  %v17260_v62 = vld [vmem:[#allocation54_spill] sm:$0xff] }
 0x765   : > { %5022 = vbcast.lane.c.b16.xlu1 %v14947_v32, 272  ;;  %5018 = vbcast.lane.c.b16.xlu0 %v14947_v32, 256  ;;  %v14973_v37 = vrot.slane %v17216_v44, %v17260_v62  ;;  %v14989_v44 = vrot.slane %v14829_v41, %v17195_v52 }
 0x767   : > { %v14960_v51 = vpop.permute.xlu1 %4577  ;;  %v14962_v61 = vpop.permute.xlu0 %4573  ;;  %17265 = vst [vmem:[#allocation82_spill] sm:$0xff] %v14989_v44 }
 0x768   : > { %17256 = vst [vmem:[#allocation39_spill] sm:$0xff] %v14960_v51  ;;  %17257 = vst [vmem:[#allocation47_spill] sm:$0xff] %v14962_v61 }
 0x769   : > { %5298 = vbcast.lane.c.b16.xlu1 %v14957_v25, 256  ;;  %5236 = vbcast.lane.c.b16.xlu0 %v14879_v35, 288 }
 0x76b   : > { %v14966_v17 = vpop.permute.xlu1 %4585  ;;  %v14968_v27 = vpop.permute.xlu0 %4581 }
 0x76c   : > { %17258 = vst [vmem:[#allocation72_spill] sm:$0xff] %v14966_v17  ;;  %17259 = vst [vmem:[#allocation49_spill] sm:$0xff] %v14968_v27 }
 0x76d   : > { %4740 = vbcast.lane.c.b16.xlu1 %v14889_v10, 288  ;;  %5302 = vbcast.lane.c.b16.xlu0 %v14957_v25, 272 }
 0x76f   : > { %v14976_v56 = vpop.permute.xlu1 %4596  ;;  %v14978_v51 = vpop.permute.xlu0 %4592 }
 0x770   : > { %17261 = vst [vmem:[#allocation89_spill] sm:$0xff] %v14976_v56  ;;  %17262 = vst [vmem:[#allocation63_spill] sm:$0xff] %v14978_v51 }
 0x771   : > { %4806 = vbcast.lane.c.b16.xlu1 %v14973_v37, 272  ;;  %4802 = vbcast.lane.c.b16.xlu0 %v14973_v37, 256 }
 0x773   : > { %v14982_v61 = vpop.permute.xlu1 %4604  ;;  %v14984_v17 = vpop.permute.xlu0 %4600 }
 0x774   : > { %17263 = vst [vmem:[#allocation37_spill] sm:$0xff] %v14982_v61  ;;  %17264 = vst [vmem:[#allocation44_spill] sm:$0xff] %v14984_v17 }
 0x775   : > { %4925 = vbcast.lane.c.b16.xlu1 %v14839_v3, 304  ;;  %4887 = vbcast.lane.c.b16.xlu0 %v14827_v43, 304 }
 0x777   : > { %v14992_v27 = vpop.permute.xlu1 %4612  ;;  %v14994_v56 = vpop.permute.xlu0 %4608 }
 0x778   : > { %17266 = vst [vmem:[#allocation59_spill] sm:$0xff] %v14992_v27  ;;  %17267 = vst [vmem:[#allocation67_spill] sm:$0xff] %v14994_v56  ;;  %v15011_v27 = vrot.slane %v14829_v41, %v17241_v11  ;;  %v15027_v11 = vrot.slane %v14338_v30, %v17260_v62  ;;  %v15043_v30 = vrot.slane %v14818_v6, %v17215_v0 }
 0x779   : > { %5053 = vbcast.lane.c.b16.xlu1 %v14989_v44, 256  ;;  %4991 = vbcast.lane.c.b16.xlu0 %v14905_v7, 288 }
 0x77b   : > { %v14998_v51 = vpop.permute.xlu1 %4620  ;;  %v15000_v61 = vpop.permute.xlu0 %4616 }
 0x77c   : > { %17268 = vst [vmem:[#allocation50_spill] sm:$0xff] %v14998_v51  ;;  %17269 = vst [vmem:[#allocation30_spill] sm:$0xff] %v15000_v61 }
 0x77d   : > { %5170 = vbcast.lane.c.b16.xlu1 %v14849_v49, 304  ;;  %5057 = vbcast.lane.c.b16.xlu0 %v14989_v44, 272 }
 0x77f   : > { %v15004_v52 = vpop.permute.xlu1 %4631  ;;  %v15006_v17 = vpop.permute.xlu0 %4627 }
 0x780   : > { %17270 = vst [vmem:[#allocation48_spill] sm:$0xff] %v15004_v52  ;;  %17271 = vst [vmem:[#allocation40_spill] sm:$0xff] %v15006_v17 }
 0x781   : > { %5271 = vbcast.lane.c.b16.xlu1 %v14921_v38, 288  ;;  %5205 = vbcast.lane.c.b16.xlu0 %v14859_v12, 304 }
 0x783   : > { %v15014_v56 = vpop.permute.xlu1 %4639  ;;  %v15016_v51 = vpop.permute.xlu0 %4635 }
 0x784   : > { %17272 = vst [vmem:[#allocation33_spill] sm:$0xff] %v15014_v56  ;;  %17273 = vst [vmem:[#allocation66_spill] sm:$0xff] %v15016_v51 }
 0x785   : > { %5337 = vbcast.lane.c.b16.xlu1 %v15011_v27, 272  ;;  %5333 = vbcast.lane.c.b16.xlu0 %v15011_v27, 256 }
 0x787   : > { %v15020_v61 = vpop.permute.xlu1 %4647  ;;  %v15022_v52 = vpop.permute.xlu0 %4643 }
 0x788   : > { %17274 = vst [vmem:[#allocation52_spill] sm:$0xff] %v15020_v61  ;;  %17275 = vst [vmem:[#allocation31_spill] sm:$0xff] %v15022_v52 }
 0x789   : > { %4775 = vbcast.lane.c.b16.xlu1 %v14931_v23, 288  ;;  %4709 = vbcast.lane.c.b16.xlu0 %v14816_v50, 304 }
 0x78b   : > { %v15030_v17 = vpop.permute.xlu1 %4655  ;;  %v15032_v56 = vpop.permute.xlu0 %4651 }
 0x78c   : > { %17276 = vst [vmem:[#allocation43_spill] sm:$0xff] %v15030_v17  ;;  %17277 = vst [vmem:[#allocation38_spill] sm:$0xff] %v15032_v56 }
 0x78d   : > { %4841 = vbcast.lane.c.b16.xlu1 %v15027_v11, 272  ;;  %4837 = vbcast.lane.c.b16.xlu0 %v15027_v11, 256 }
 0x78f   : > { %v15036_v51 = vpop.permute.xlu1 %4666  ;;  %v15038_v61 = vpop.permute.xlu0 %4662 }
 0x790   : > { %17278 = vst [vmem:[#allocation27_spill] sm:$0xff] %v15036_v51  ;;  %17279 = vst [vmem:[#allocation28_spill] sm:$0xff] %v15038_v61  ;;  %v15059_v61 = vrot.slane %v14818_v6, %v17260_v62 }
 0x791   : > { %5026 = vbcast.lane.c.b16.xlu1 %v14947_v32, 288  ;;  %4960 = vbcast.lane.c.b16.xlu0 %v14869_v55, 304 }
 0x793   : > { %v15046_v52 = vpop.permute.xlu1 %4674  ;;  %v15048_v17 = vpop.permute.xlu0 %4670 }
 0x794   : > { %17280 = vst [vmem:[#allocation45_spill] sm:$0xff] %v15046_v52  ;;  %17281 = vst [vmem:[#allocation54_spill] sm:$0xff] %v15048_v17 }
 0x795   : > { %5092 = vbcast.lane.c.b16.xlu1 %v15043_v30, 272  ;;  %5088 = vbcast.lane.c.b16.xlu0 %v15043_v30, 256 }
 0x797   : > { %v15052_v56 = vpop.permute.xlu1 %4682  ;;  %v15054_v51 = vpop.permute.xlu0 %4678 }
 0x798   : > { %17282 = vst [vmem:[#allocation93_spill] sm:$0xff] %v15052_v56  ;;  %17283 = vst [vmem:[#allocation94_spill] sm:$0xff] %v15054_v51 }
 0x799   : > { %5306 = vbcast.lane.c.b16.xlu1 %v14957_v25, 288  ;;  %5240 = vbcast.lane.c.b16.xlu0 %v14879_v35, 304 }
 0x79b   : > { %v15062_v34 = vpop.permute.xlu1 %4690  ;;  %v15064_v52 = vpop.permute.xlu0 %4686 }
 0x79c   : > { %17284 = vst [vmem:[#allocation95_spill] sm:$0xff] %v15062_v34  ;;  %17285 = vst [vmem:[#allocation96_spill] sm:$0xff] %v15064_v52 }
 0x79d   : > { %5372 = vbcast.lane.c.b16.xlu1 %v15059_v61, 272  ;;  %5368 = vbcast.lane.c.b16.xlu0 %v15059_v61, 256 }
 0x79f   : > { %v15068_v17 = vpop.permute.xlu1 %4701  ;;  %v15070_v56 = vpop.permute.xlu0 %4697 }
 0x7a0   : > { %17286 = vst [vmem:[#allocation97_spill] sm:$0xff] %v15068_v17  ;;  %17287 = vst [vmem:[#allocation98_spill] sm:$0xff] %v15070_v56  ;;  %v15087_v56 = vrot.slane %v14829_v41, %v17215_v0 }
 0x7a1   : > { %4810 = vbcast.lane.c.b16.xlu1 %v14973_v37, 288  ;;  %4744 = vbcast.lane.c.b16.xlu0 %v14889_v10, 304 }
 0x7a2   : > { %17292 = vst [vmem:[#allocation103_spill] sm:$0xff] %v15087_v56 }
 0x7a3   : > { %v15074_v6 = vpop.permute.xlu1 %4879  ;;  %v15076_v51 = vpop.permute.xlu0 %4875 }
 0x7a4   : > { %17288 = vst [vmem:[#allocation99_spill] sm:$0xff] %v15074_v6  ;;  %17289 = vst [vmem:[#allocation100_spill] sm:$0xff] %v15076_v51 }
 0x7a5   : > { %4929 = vbcast.lane.c.b16.xlu1 %v14839_v3, 320  ;;  %4891 = vbcast.lane.c.b16.xlu0 %v14827_v43, 320 }
 0x7a7   : > { %v15080_v34 = vpop.permute.xlu1 %4917  ;;  %v15082_v52 = vpop.permute.xlu0 %4913 }
 0x7a8   : > { %17290 = vst [vmem:[#allocation101_spill] sm:$0xff] %v15080_v34  ;;  %17291 = vst [vmem:[#allocation102_spill] sm:$0xff] %v15082_v52 }
 0x7a9   : > { %5061 = vbcast.lane.c.b16.xlu1 %v14989_v44, 288  ;;  %4995 = vbcast.lane.c.b16.xlu0 %v14905_v7, 304 }
 0x7ab   : > { %v15090_v17 = vpop.permute.xlu1 %5162  ;;  %v15092_v6 = vpop.permute.xlu0 %5158 }
 0x7ac   : > { %17293 = vst [vmem:[#allocation104_spill] sm:$0xff] %v15090_v17  ;;  %17294 = vst [vmem:[#allocation105_spill] sm:$0xff] %v15092_v6  ;;  %v15109_v6 = vrot.slane %v14829_v41, %v17260_v62 }
 0x7ad   : > { %5127 = vbcast.lane.c.b16.xlu1 %v15087_v56, 272  ;;  %5123 = vbcast.lane.c.b16.xlu0 %v15087_v56, 256 }
 0x7af   : > { %v15096_v51 = vpop.permute.xlu1 %5197  ;;  %v15098_v34 = vpop.permute.xlu0 %5193 }
 0x7b0   : > { %17295 = vst [vmem:[#allocation106_spill] sm:$0xff] %v15096_v51  ;;  %17296 = vst [vmem:[#allocation107_spill] sm:$0xff] %v15098_v34 }
 0x7b1   : > { %5209 = vbcast.lane.c.b16.xlu1 %v14859_v12, 320  ;;  %5174 = vbcast.lane.c.b16.xlu0 %v14849_v49, 320 }
 0x7b3   : > { %v15102_v0 = vpop.permute.xlu1 %4952  ;;  %v15104_v52 = vpop.permute.xlu0 %4948 }
 0x7b4   : > { %17297 = vst [vmem:[#allocation108_spill] sm:$0xff] %v15102_v0  ;;  %17298 = vst [vmem:[#allocation109_spill] sm:$0xff] %v15104_v52  ;;  %v15235_v52 = vld [vmem:[#allocation3] sm:$0xff]  }
 0x7b5   : > { %5341 = vbcast.lane.c.b16.xlu1 %v15011_v27, 288  ;;  %5275 = vbcast.lane.c.b16.xlu0 %v14921_v38, 304 }
 0x7b7   : > { %v15112_v17 = vpop.permute.xlu1 %5232  ;;  %v15114_v51 = vpop.permute.xlu0 %5228 }
 0x7b8   : > { %17299 = vst [vmem:[#allocation110_spill] sm:$0xff] %v15112_v17  ;;  %17300 = vst [vmem:[#allocation111_spill] sm:$0xff] %v15114_v51 }
 0x7b9   : > { %5407 = vbcast.lane.c.b16.xlu1 %v15109_v6, 272  ;;  %5403 = vbcast.lane.c.b16.xlu0 %v15109_v6, 256 }
 0x7bb   : > { %v15118_v34 = vpop.permute.xlu1 %4736  ;;  %v15120_v0 = vpop.permute.xlu0 %4732 }
 0x7bc   : > { %17301 = vst [vmem:[#allocation112_spill] sm:$0xff] %v15118_v34  ;;  %17302 = vst [vmem:[#allocation113_spill] sm:$0xff] %v15120_v0 }
 0x7bd   : > { %4779 = vbcast.lane.c.b16.xlu1 %v14931_v23, 304  ;;  %4713 = vbcast.lane.c.b16.xlu0 %v14816_v50, 320 }
 0x7bf   : > { %v15124_v62 = vpop.permute.xlu1 %4921  ;;  %v15126_v41 = vpop.permute.xlu0 %4883 }
 0x7c0   : > { %17303 = vst [vmem:[#allocation114_spill] sm:$0xff] %v15124_v62  ;;  %17304 = vst [vmem:[#allocation115_spill] sm:$0xff] %v15126_v41 }
 0x7c1   : > { %4964 = vbcast.lane.c.b16.xlu1 %v14869_v55, 320  ;;  %4845 = vbcast.lane.c.b16.xlu0 %v15027_v11, 288 }
 0x7c3   : > { %v15130_v51 = vpop.permute.xlu1 %4987  ;;  %v15132_v17 = vpop.permute.xlu0 %4983 }
 0x7c4   : > { %17305 = vst [vmem:[#allocation116_spill] sm:$0xff] %v15130_v51  ;;  %17306 = vst [vmem:[#allocation117_spill] sm:$0xff] %v15132_v17 }
 0x7c5   : > { %5096 = vbcast.lane.c.b16.xlu1 %v15043_v30, 288  ;;  %5030 = vbcast.lane.c.b16.xlu0 %v14947_v32, 304 }
 0x7c7   : > { %v15136_v0 = vpop.permute.xlu1 %5201  ;;  %v15138_v34 = vpop.permute.xlu0 %5166 }
 0x7c8   : > { %17307 = vst [vmem:[#allocation118_spill] sm:$0xff] %v15136_v0  ;;  %17308 = vst [vmem:[#allocation119_spill] sm:$0xff] %v15138_v34 }
 0x7c9   : > { %5310 = vbcast.lane.c.b16.xlu1 %v14957_v25, 304  ;;  %5244 = vbcast.lane.c.b16.xlu0 %v14879_v35, 320 }
 0x7cb   : > { %v15142_v41 = vpop.permute.xlu1 %5267  ;;  %v15144_v62 = vpop.permute.xlu0 %5263 }
 0x7cc   : > { %17309 = vst [vmem:[#allocation120_spill] sm:$0xff] %v15142_v41  ;;  %17310 = vst [vmem:[#allocation121_spill] sm:$0xff] %v15144_v62 }
 0x7cd   : > { %4748 = vbcast.lane.c.b16.xlu1 %v14889_v10, 320  ;;  %5376 = vbcast.lane.c.b16.xlu0 %v15059_v61, 288 }
 0x7cf   : > { %v15148_v17 = vpop.permute.xlu1 %4767  ;;  %v15150_v51 = vpop.permute.xlu0 %4705 }
 0x7d0   : > { %17311 = vst [vmem:[#allocation122_spill] sm:$0xff] %v15148_v17  ;;  %17312 = vst [vmem:[#allocation123_spill] sm:$0xff] %v15150_v51 }
 0x7d1   : > { %4895 = vbcast.lane.c.b16.xlu1 %v14827_v43, 336  ;;  %4814 = vbcast.lane.c.b16.xlu0 %v14973_v37, 304 }
 0x7d3   : > { %v15154_v34 = vpop.permute.xlu1 %4956  ;;  %v15156_v0 = vpop.permute.xlu0 %4771 }
 0x7d4   : > { %17313 = vst [vmem:[#allocation124_spill] sm:$0xff] %v15154_v34  ;;  %17314 = vst [vmem:[#allocation125_spill] sm:$0xff] %v15156_v0 }
 0x7d5   : > { %4999 = vbcast.lane.c.b16.xlu1 %v14905_v7, 320  ;;  %4933 = vbcast.lane.c.b16.xlu0 %v14839_v3, 336 }
 0x7d7   : > { %v15160_v62 = vpop.permute.xlu1 %5022  ;;  %v15162_v41 = vpop.permute.xlu0 %5018 }
 0x7d8   : > { %17315 = vst [vmem:[#allocation126_spill] sm:$0xff] %v15160_v62  ;;  %17316 = vst [vmem:[#allocation127_spill] sm:$0xff] %v15162_v41 }
 0x7d9   : > { %5131 = vbcast.lane.c.b16.xlu1 %v15087_v56, 288  ;;  %5065 = vbcast.lane.c.b16.xlu0 %v14989_v44, 304 }
 0x7db   : > { %v15166_v17 = vpop.permute.xlu1 %5298  ;;  %v15168_v51 = vpop.permute.xlu0 %5236 }
 0x7dc   : > { %17317 = vst [vmem:[#allocation128_spill] sm:$0xff] %v15166_v17  ;;  %17318 = vst [vmem:[#allocation129_spill] sm:$0xff] %v15168_v51 }
 0x7dd   : > { %5213 = vbcast.lane.c.b16.xlu1 %v14859_v12, 336  ;;  %5178 = vbcast.lane.c.b16.xlu0 %v14849_v49, 336 }
 0x7df   : > { %v15172_v0 = vpop.permute.xlu1 %4740  ;;  %v15174_v34 = vpop.permute.xlu0 %5302 }
 0x7e0   : > { %17319 = vst [vmem:[#allocation130_spill] sm:$0xff] %v15172_v0  ;;  %17320 = vst [vmem:[#allocation131_spill] sm:$0xff] %v15174_v34 }
 0x7e1   : > { %5345 = vbcast.lane.c.b16.xlu1 %v15011_v27, 304  ;;  %5279 = vbcast.lane.c.b16.xlu0 %v14921_v38, 320 }
 0x7e3   : > { %v15178_v41 = vpop.permute.xlu1 %4806  ;;  %v15180_v62 = vpop.permute.xlu0 %4802 }
 0x7e4   : > { %17321 = vst [vmem:[#allocation132_spill] sm:$0xff] %v15178_v41  ;;  %17322 = vst [vmem:[#allocation133_spill] sm:$0xff] %v15180_v62 }
 0x7e5   : > { %4717 = vbcast.lane.c.b16.xlu1 %v14816_v50, 336  ;;  %5411 = vbcast.lane.c.b16.xlu0 %v15109_v6, 288 }
 0x7e7   : > { %v15184_v17 = vpop.permute.xlu1 %4925  ;;  %v15186_v51 = vpop.permute.xlu0 %4887 }
 0x7e8   : > { %17323 = vst [vmem:[#allocation134_spill] sm:$0xff] %v15184_v17  ;;  %17324 = vst [vmem:[#allocation135_spill] sm:$0xff] %v15186_v51 }
 0x7e9   : > { %4849 = vbcast.lane.c.b16.xlu1 %v15027_v11, 304  ;;  %4783 = vbcast.lane.c.b16.xlu0 %v14931_v23, 320 }
 0x7eb   : > { %v15190_v34 = vpop.permute.xlu1 %5053  ;;  %v15192_v0 = vpop.permute.xlu0 %4991 }
 0x7ec   : > { %17325 = vst [vmem:[#allocation136_spill] sm:$0xff] %v15190_v34  ;;  %17326 = vst [vmem:[#allocation137_spill] sm:$0xff] %v15192_v0 }
 0x7ed   : > { %5034 = vbcast.lane.c.b16.xlu1 %v14947_v32, 320  ;;  %4968 = vbcast.lane.c.b16.xlu0 %v14869_v55, 336 }
 0x7ef   : > { %v15196_v62 = vpop.permute.xlu1 %5170  ;;  %v15198_v41 = vpop.permute.xlu0 %5057 }
 0x7f0   : > { %17327 = vst [vmem:[#allocation138_spill] sm:$0xff] %v15196_v62  ;;  %17328 = vst [vmem:[#allocation139_spill] sm:$0xff] %v15198_v41 }
 0x7f1   : > { %5248 = vbcast.lane.c.b16.xlu1 %v14879_v35, 336  ;;  %5100 = vbcast.lane.c.b16.xlu0 %v15043_v30, 304 }
 0x7f3   : > { %v15202_v51 = vpop.permute.xlu1 %5271  ;;  %v15204_v17 = vpop.permute.xlu0 %5205 }
 0x7f4   : > { %17329 = vst [vmem:[#allocation140_spill] sm:$0xff] %v15202_v51  ;;  %17330 = vst [vmem:[#allocation141_spill] sm:$0xff] %v15204_v17 }
 0x7f5   : > { %5380 = vbcast.lane.c.b16.xlu1 %v15059_v61, 304  ;;  %5314 = vbcast.lane.c.b16.xlu0 %v14957_v25, 320 }
 0x7f7   : > { %v15208_v34 = vpop.permute.xlu1 %5337  ;;  %v15210_v0 = vpop.permute.xlu0 %5333 }
 0x7f8   : > { %17331 = vst [vmem:[#allocation142_spill] sm:$0xff] %v15208_v34  ;;  %17332 = vst [vmem:[#allocation143_spill] sm:$0xff] %v15210_v0 }
 0x7f9   : > { %4818 = vbcast.lane.c.b16.xlu1 %v14973_v37, 320  ;;  %4752 = vbcast.lane.c.b16.xlu0 %v14889_v10, 336 }
 0x7fb   : > { %v15214_v41 = vpop.permute.xlu1 %4775  ;;  %v15216_v62 = vpop.permute.xlu0 %4709 }
 0x7fc   : > { %17333 = vst [vmem:[#allocation144_spill] sm:$0xff] %v15214_v41  ;;  %17334 = vst [vmem:[#allocation145_spill] sm:$0xff] %v15216_v62  ;;  %v15231_v41 = vld [vmem:[#allocation3 + $0x8] sm:$0xff]  }
 0x7fd   : > { %4937 = vbcast.lane.c.b16.xlu1 %v14839_v3, 352  ;;  %4899 = vbcast.lane.c.b16.xlu0 %v14827_v43, 352  ;;  %v6250_v62 = vmul.bf16 %v15231_v41, %v14696_v53 }
 0x7ff   : > { %v15220_v17 = vpop.permute.xlu1 %4841  ;;  %v15222_v51 = vpop.permute.xlu0 %4837 }
 0x800   : > { %17335 = vst [vmem:[#allocation146_spill] sm:$0xff] %v15220_v17  ;;  %17336 = vst [vmem:[#allocation147_spill] sm:$0xff] %v15222_v51  ;;  %v6249_v51 = vmul.bf16 %v15235_v52, %v14698_v54 }
 0x801   : > { %5069 = vbcast.lane.c.b16.xlu1 %v14989_v44, 320  ;;  %5003 = vbcast.lane.c.b16.xlu0 %v14905_v7, 336  ;;  %v15242_v44 = vld [vmem:[#allocation3 + $0x10] sm:$0xff]  }
 0x803   : > { %v15226_v0 = vpop.permute.xlu1 %5026  ;;  %v15228_v34 = vpop.permute.xlu0 %4960 }
 0x804   : > { %17337 = vst [vmem:[#allocation148_spill] sm:$0xff] %v15226_v0  ;;  %17338 = vst [vmem:[#allocation149_spill] sm:$0xff] %v15228_v34  ;;  %v6251_v34 = vmul.bf16 %v15242_v44, %v14707_v26  ;;  %v6258_v26 = vmul.bf16 %v15231_v41, %v14738_v47  ;;  %v6265_v47 = vmul.bf16 %v15235_v52, %v14786_v42 }
 0x805   : > { %5182 = vbcast.lane.c.b16.xlu1 %v14849_v49, 352  ;;  %5135 = vbcast.lane.c.b16.xlu0 %v15087_v56, 304  ;;  %v8137_v49 = vmax.bf16 %v6250_v62, %v6249_v51  ;;  %v6257_v51 = vmul.bf16 %v15235_v52, %v14742_v33 }
 0x807   : > { %v15240_v17 = vpop.permute.xlu1 %5092  ;;  %v15246_v0 = vpop.permute.xlu0 %5088  ;;  %v8138_v3 = vmax.bf16 %v8137_v49, %v6251_v34  ;;  %v15266_v34 = vld [vmem:[#allocation3 + $0x20] sm:$0xff]   ;;  %v8154_v33 = vmax.bf16 %v6258_v26, %v6257_v51 }
 0x808   : > { %17339 = vst [vmem:[#allocation150_spill] sm:$0xff] %v15240_v17  ;;  %17340 = vst [vmem:[#allocation151_spill] sm:$0xff] %v15246_v0  ;;  %v15255_v17 = vld [vmem:[#allocation3 + $0x18] sm:$0xff]   ;;  %v6253_v49 = vmul.bf16 %v15266_v34, %v14715_v31  ;;  %v6266_v0 = vmul.bf16 %v15231_v41, %v14784_v58  ;;  %v6267_v31 = vmul.bf16 %v15242_v44, %v14790_v48  ;;  %v15287_v58 = vld [vmem:[#allocation3 + $0x28] sm:$0xff]  }
 0x809   : > { %5283 = vbcast.lane.c.b16.xlu1 %v14921_v38, 336  ;;  %5217 = vbcast.lane.c.b16.xlu0 %v14859_v12, 352  ;;  %v6252_v56 = vmul.bf16 %v15255_v17, %v14705_v5  ;;  %v6259_v5 = vmul.bf16 %v15242_v44, %v14755_v63  ;;  %v6254_v42 = vmul.bf16 %v15287_v58, %v14713_v14 }
 0x80a   : > { %v6260_v26 = vmul.bf16 %v15255_v17, %v14752_v46  ;;  %v6274_v46 = vmul.bf16 %v15231_v41, %v14802_v45 }
 0x80b   : > { %v15250_v53 = vpop.permute.xlu1 %5306  ;;  %v15252_v54 = vpop.permute.xlu0 %5240  ;;  %v8155_v63 = vmax.bf16 %v8154_v33, %v6259_v5  ;;  %v6261_v5 = vmul.bf16 %v15266_v34, %v14770_v28  ;;  %v6268_v33 = vmul.bf16 %v15255_v17, %v14788_v29 }
 0x80c   : > { %17341 = vst [vmem:[#allocation152_spill] sm:$0xff] %v15250_v53  ;;  %17342 = vst [vmem:[#allocation153_spill] sm:$0xff] %v15252_v54  ;;  %v8139_v54 = vmax.bf16 %v8138_v3, %v6252_v56 }
 0x80d   : > { %5415 = vbcast.lane.c.b16.xlu1 %v15109_v6, 304  ;;  %5349 = vbcast.lane.c.b16.xlu0 %v15011_v27, 320  ;;  %v8156_v14 = vmax.bf16 %v8155_v63, %v6260_v26 }
 0x80e   : > { %v8140_v3 = vmax.bf16 %v8139_v54, %v6253_v49  ;;  %v15296_v54 = vld [vmem:[#allocation3 + $0x30] sm:$0xff]  }
 0x80f   : > { %v15264_v62 = vpop.permute.xlu1 %5372  ;;  %v15270_v53 = vpop.permute.xlu0 %5368  ;;  %v8157_v45 = vmax.bf16 %v8156_v14, %v6261_v5  ;;  %v6263_v5 = vmul.bf16 %v15296_v54, %v14782_v59  ;;  %v6289_v59 = vmul.bf16 %v15235_v52, %v14874_v21  ;;  %v6298_v21 = vmul.bf16 %v15231_v41, %v14908_v22 }
 0x810   : > { %17343 = vst [vmem:[#allocation154_spill] sm:$0xff] %v15264_v62  ;;  %17344 = vst [vmem:[#allocation155_spill] sm:$0xff] %v15270_v53  ;;  %v8171_v62 = vmax.bf16 %v6266_v0, %v6265_v47  ;;  %v6255_v0 = vmul.bf16 %v15296_v54, %v14730_v2  ;;  %v8141_v49 = vmax.bf16 %v8140_v3, %v6254_v42 }
 0x811   : > { %4787 = vbcast.lane.c.b16.xlu1 %v14931_v23, 336  ;;  %4721 = vbcast.lane.c.b16.xlu0 %v14816_v50, 352  ;;  %v6269_v2 = vmul.bf16 %v15266_v34, %v14794_v40  ;;  %v6262_v40 = vmul.bf16 %v15287_v58, %v14766_v39  ;;  %v6282_v39 = vmul.bf16 %v15231_v41, %v14832_v60 }
 0x812   : > { %v8172_v48 = vmax.bf16 %v8171_v62, %v6267_v31  ;;  %v6273_v62 = vmul.bf16 %v15235_v52, %v14804_v15  ;;  %v6275_v31 = vmul.bf16 %v15242_v44, %v14808_v13  ;;  %v8142_v29 = vmax.bf16 %v8141_v49, %v6255_v0  ;;  %v15321_v15 = vld [vmem:[#allocation3 + $0x38] sm:$0xff]  }
 0x813   : > { %v15282_v56 = vpop.permute.xlu1 %4810  ;;  %v15284_v53 = vpop.permute.xlu0 %4744  ;;  %v6256_v26 = vmul.bf16 %v15321_v15, %v14726_v18  ;;  %v8158_v14 = vmax.bf16 %v8157_v45, %v6262_v40  ;;  %v6270_v18 = vmul.bf16 %v15287_v58, %v14792_v36  ;;  %v6271_v36 = vmul.bf16 %v15296_v54, %v14800_v1  ;;  %v17354_v40 = vld [vmem:[#allocation35_spill] sm:$0xff]  ;;  %v17357_v45 = vld [vmem:[#allocation40_spill] sm:$0xff] }
 0x814   : > { %17345 = vst [vmem:[#allocation156_spill] sm:$0xff] %v15284_v53  ;;  %v8173_v28 = vmax.bf16 %v8172_v48, %v6268_v33  ;;  %v8188_v42 = vmax.bf16 %v6274_v46, %v6273_v62  ;;  %v6276_v46 = vmul.bf16 %v15255_v17, %v14806_v4  ;;  %v6281_v62 = vmul.bf16 %v15235_v52, %v14834_v19 }
 0x815   : > { %4972 = vbcast.lane.c.b16.xlu1 %v14869_v55, 352  ;;  %4853 = vbcast.lane.c.b16.xlu0 %v15027_v11, 320  ;;  %v15330_v0 = vmax.bf16 %v8142_v29, %v6256_v26  ;;  %v6283_v19 = vmul.bf16 %v15242_v44, %v14844_v57  ;;  %v6297_v29 = vmul.bf16 %v15235_v52, %v14910_v16  ;;  %v17355_v16 = vld [vmem:[#allocation90_spill] sm:$0xff] }
 0x816   : > { %v8174_v13 = vmax.bf16 %v8173_v28, %v6269_v2  ;;  %v8189_v48 = vmax.bf16 %v8188_v42, %v6275_v31  ;;  %v6290_v2 = vmul.bf16 %v15231_v41, %v14872_v9  ;;  %v6277_v28 = vmul.bf16 %v15266_v34, %v14812_v20 }
 0x817   : > { %v15294_v51 = vpop.permute.xlu1 %4929  ;;  %v15302_v47 = vpop.permute.xlu0 %4891  ;;  %v6291_v9 = vmul.bf16 %v15242_v44, %v14884_v24  ;;  %v6264_v42 = vmul.bf16 %v15321_v15, %v14780_v8  ;;  %v8159_v57 = vmax.bf16 %v8158_v14, %v6263_v5  ;;  %v8205_v26 = vmax.bf16 %v6282_v39, %v6281_v62 }
 0x818   : > { %17346 = vst [vmem:[#allocation157_spill] sm:$0xff] %v15294_v51  ;;  %17347 = vst [vmem:[#allocation158_spill] sm:$0xff] %v15302_v47  ;;  %v8175_v4 = vmax.bf16 %v8174_v13, %v6270_v18  ;;  %v8190_v31 = vmax.bf16 %v8189_v48, %v6276_v46  ;;  %v8222_v24 = vmax.bf16 %v6290_v2, %v6289_v59  ;;  %v17356_v18 = vld [vmem:[#allocation48_spill] sm:$0xff]  ;;  %v17360_v2 = vld [vmem:[#allocation42_spill] sm:$0xff] }
 0x819   : > { %5104 = vbcast.lane.c.b16.xlu1 %v15043_v30, 320  ;;  %5038 = vbcast.lane.c.b16.xlu0 %v14947_v32, 336  ;;  %v6299_v22 = vmul.bf16 %v15242_v44, %v17354_v40  ;;  %v6272_v13 = vmul.bf16 %v15321_v15, %v17355_v16  ;;  %v6322_v46 = vmul.bf16 %v15231_v41, %v17356_v18  ;;  %v17361_v40 = vld [vmem:[#allocation89_spill] sm:$0xff]  ;;  %v17363_v18 = vld [vmem:[#allocation66_spill] sm:$0xff] }
 0x81a   : > { %v8191_v48 = vmax.bf16 %v8190_v31, %v6277_v28  ;;  %v6321_v8 = vmul.bf16 %v15235_v52, %v17357_v45  ;;  %v8206_v5 = vmax.bf16 %v8205_v26, %v6283_v19  ;;  %v8223_v14 = vmax.bf16 %v8222_v24, %v6291_v9  ;;  %v17362_v31 = vld [vmem:[#allocation63_spill] sm:$0xff]  ;;  %v17365_v19 = vld [vmem:[#allocation84_spill] sm:$0xff] }
 0x81b   : > { %v15316_v3 = vpop.permute.xlu1 %5061  ;;  %v15318_v63 = vpop.permute.xlu0 %4995  ;;  %v8239_v39 = vmax.bf16 %v6298_v21, %v6297_v29  ;;  %v6278_v59 = vmul.bf16 %v15287_v58, %v17360_v2  ;;  %v6314_v28 = vmul.bf16 %v15231_v41, %v17361_v40  ;;  %v6313_v16 = vmul.bf16 %v15235_v52, %v17362_v31  ;;  %v17366_v21 = vld [vmem:[#allocation88_spill] sm:$0xff]  ;;  %v17367_v24 = vld [vmem:[#allocation51_spill] sm:$0xff] }
 0x81c   : > { %17348 = vst [vmem:[#allocation159_spill] sm:$0xff] %v15316_v3  ;;  %17349 = vst [vmem:[#allocation160_spill] sm:$0xff] %v15318_v63  ;;  %v6323_v45 = vmul.bf16 %v15242_v44, %v17363_v18  ;;  %v6284_v9 = vmul.bf16 %v15255_v17, %v17365_v19  ;;  %v6292_v29 = vmul.bf16 %v15255_v17, %v17366_v21  ;;  %v17368_v40 = vld [vmem:[#allocation64_spill] sm:$0xff]  ;;  %v17374_v21 = vld [vmem:[#allocation27_spill] sm:$0xff] }
 0x81d   : > { %5318 = vbcast.lane.c.b16.xlu1 %v14957_v25, 336  ;;  %5252 = vbcast.lane.c.b16.xlu0 %v14879_v35, 352  ;;  %v8240_v26 = vmax.bf16 %v8239_v39, %v6299_v22  ;;  %v8192_v2 = vmax.bf16 %v8191_v48, %v6278_v59  ;;  %v6285_v31 = vmul.bf16 %v15266_v34, %v17368_v40  ;;  %v17375_v40 = vld [vmem:[#allocation28_spill] sm:$0xff] }
 0x81e   : > { %v8273_v48 = vmax.bf16 %v6314_v28, %v6313_v16  ;;  %v17380_v28 = vld [vmem:[#allocation82_spill] sm:$0xff] }
 0x81f   : > { %v15328_v33 = vpop.permute.xlu1 %5127  ;;  %v15332_v49 = vpop.permute.xlu0 %5123 }
 0x820   : > { %17350 = vst [vmem:[#allocation161_spill] sm:$0xff] %v15328_v33  ;;  %17351 = vst [vmem:[#allocation162_spill] sm:$0xff] %v15332_v49  ;;  %v8224_v49 = vmax.bf16 %v8223_v14, %v6292_v29  ;;  %v17372_v33 = vld [vmem:[#allocation81_spill] sm:$0xff]  ;;  %v17378_v14 = vld [vmem:[#allocation55_spill] sm:$0xff] }
 0x821   : > { %4756 = vbcast.lane.c.b16.xlu1 %v14889_v10, 352  ;;  %5384 = vbcast.lane.c.b16.xlu0 %v15059_v61, 320  ;;  %v6300_v22 = vmul.bf16 %v15255_v17, %v17372_v33  ;;  %v17379_v33 = vld [vmem:[#allocation32_spill] sm:$0xff] }
 0x822   : > { %v6305_v29 = vmul.bf16 %v15235_v52, %v17379_v33  ;;  %v17385_v33 = vld [vmem:[#allocation46_spill] sm:$0xff] }
 0x823   : > { %v15354_v60 = vpop.permute.xlu1 %5209  ;;  %v15364_v1 = vpop.permute.xlu0 %5174  ;;  %v6307_v63 = vmul.bf16 %v15242_v44, %v17385_v33 }
 0x824   : > { %17352 = vst [vmem:[#allocation163_spill] sm:$0xff] %v15354_v60  ;;  %17353 = vst [vmem:[#allocation164_spill] sm:$0xff] %v15364_v1  ;;  %v17371_v60 = vld [vmem:[#allocation34_spill] sm:$0xff] }
 0x825   : > { %4903 = vbcast.lane.c.b16.xlu1 %v14827_v43, 368  ;;  %4822 = vbcast.lane.c.b16.xlu0 %v14973_v37, 336  ;;  %v8176_v43 = vmax.bf16 %v8175_v4, %v6271_v36  ;;  %v17364_v36 = vld [vmem:[#allocation76_spill] sm:$0xff]  ;;  %v6293_v19 = vmul.bf16 %v15266_v34, %v17371_v60  ;;  %v8241_v60 = vmax.bf16 %v8240_v26, %v6300_v22 }
 0x826   : > { %v6279_v4 = vmul.bf16 %v15296_v54, %v17364_v36  ;;  %v8207_v36 = vmax.bf16 %v8206_v5, %v6284_v9  ;;  %v17377_v5 = vld [vmem:[#allocation29_spill] sm:$0xff]  ;;  %v6306_v9 = vmul.bf16 %v15231_v41, %v17378_v14  ;;  %v17384_v22 = vld [vmem:[#allocation36_spill] sm:$0xff] }
 0x827   : > { %v15380_v20 = vpop.permute.xlu1 %5341  ;;  %v15382_v62 = vpop.permute.xlu0 %5275  ;;  %v15432_v26 = vmax.bf16 %v8176_v43, %v6272_v13  ;;  %v8225_v43 = vmax.bf16 %v8224_v49, %v6293_v19 }
 0x828   : > { %17358 = vst [vmem:[#allocation35_spill] sm:$0xff] %v15380_v20  ;;  %17359 = vst [vmem:[#allocation90_spill] sm:$0xff] %v15382_v62  ;;  %v17369_v62 = vld [vmem:[#allocation44_spill] sm:$0xff]  ;;  %v8290_v20 = vmax.bf16 %v6322_v46, %v6321_v8  ;;  %v6329_v46 = vmul.bf16 %v15235_v52, %v17375_v40  ;;  %v17376_v8 = vld [vmem:[#allocation103_spill] sm:$0xff]  ;;  %v8208_v14 = vmax.bf16 %v8207_v36, %v6285_v31 }
 0x829   : > { %5007 = vbcast.lane.c.b16.xlu1 %v14905_v7, 352  ;;  %4941 = vbcast.lane.c.b16.xlu0 %v17367_v24, 368  ;;  %v6315_v18 = vmul.bf16 %v15242_v44, %v17369_v62  ;;  %v6330_v24 = vmul.bf16 %v15231_v41, %v17374_v21  ;;  %v6301_v62 = vmul.bf16 %v15266_v34, %v17377_v5  ;;  %v17382_v40 = vld [vmem:[#allocation54_spill] sm:$0xff]  ;;  %v17389_v31 = vld [vmem:[#allocation91_spill] sm:$0xff]  ;;  %v17390_v36 = vld [vmem:[#allocation73_spill] sm:$0xff] }
 0x82a   : > { %v8291_v59 = vmax.bf16 %v8290_v20, %v6323_v45  ;;  %v15424_v20 = vmax.bf16 %v8159_v57, %v6264_v42  ;;  %v17381_v45 = vld [vmem:[#allocation33_spill] sm:$0xff]  ;;  %v6280_v5 = vmul.bf16 %v15321_v15, %v17384_v22  ;;  %v8193_v13 = vmax.bf16 %v8192_v2, %v6279_v4 }
 0x82b   : > { %v15404_v1 = vpop.permute.xlu1 %5407  ;;  %v15410_v39 = vpop.permute.xlu0 %5403  ;;  %v8274_v16 = vmax.bf16 %v8273_v48, %v6315_v18  ;;  %v6324_v21 = vmul.bf16 %v15255_v17, %v17381_v45  ;;  %v17387_v57 = vld [vmem:[#allocation37_spill] sm:$0xff]  ;;  %v17388_v48 = vld [vmem:[#allocation31_spill] sm:$0xff]  ;;  %v8307_v3 = vmax.bf16 %v6330_v24, %v6329_v46  ;;  %v8256_v22 = vmax.bf16 %v6306_v9, %v6305_v29 }
 0x82c   : > { %17370 = vst [vmem:[#allocation48_spill] sm:$0xff] %v15404_v1  ;;  %17373 = vst [vmem:[#allocation40_spill] sm:$0xff] %v15410_v39  ;;  %v6331_v39 = vmul.bf16 %v15242_v44, %v17382_v40  ;;  %v6316_v18 = vmul.bf16 %v15255_v17, %v17387_v57  ;;  %v6325_v45 = vmul.bf16 %v15266_v34, %v17388_v48  ;;  %v17394_v4 = vld [vmem:[#allocation41_spill] sm:$0xff] }
 0x82d   : > { %5139 = vbcast.lane.c.b16.xlu1 %v17376_v8, 320  ;;  %5073 = vbcast.lane.c.b16.xlu0 %v17380_v28, 336  ;;  %v8292_v40 = vmax.bf16 %v8291_v59, %v6324_v21  ;;  %v6286_v33 = vmul.bf16 %v15287_v58, %v17390_v36  ;;  %v17392_v59 = vld [vmem:[#allocation75_spill] sm:$0xff]  ;;  %v6302_v2 = vmul.bf16 %v15287_v58, %v17394_v4  ;;  %v17398_v48 = vld [vmem:[#allocation53_spill] sm:$0xff] }
 0x82e   : > { %v8275_v57 = vmax.bf16 %v8274_v16, %v6316_v18  ;;  %v8308_v51 = vmax.bf16 %v8307_v3, %v6331_v39  ;;  %v6287_v24 = vmul.bf16 %v15296_v54, %v17392_v59  ;;  %v8257_v19 = vmax.bf16 %v8256_v22, %v6307_v63  ;;  %v17396_v3 = vld [vmem:[#allocation45_spill] sm:$0xff]  ;;  %v17397_v21 = vld [vmem:[#allocation87_spill] sm:$0xff]  ;;  %v17399_v22 = vld [vmem:[#allocation52_spill] sm:$0xff] }
 0x82f   : > { %v15430_v1 = vpop.permute.xlu1 %4779  ;;  %v15438_v42 = vpop.permute.xlu0 %4713  ;;  %v8293_v29 = vmax.bf16 %v8292_v40, %v6325_v45  ;;  %v6332_v39 = vmul.bf16 %v15255_v17, %v17396_v3  ;;  %v6308_v63 = vmul.bf16 %v15255_v17, %v17398_v48  ;;  %v17400_v45 = vld [vmem:[#allocation94_spill] sm:$0xff]  ;;  %v8162_v59 = vunpack.i.h.bf16 %v15424_v20 }
 0x830   : > { %17383 = vst [vmem:[#allocation42_spill] sm:$0xff] %v15430_v1  ;;  %17386 = vst [vmem:[#allocation89_spill] sm:$0xff] %v15438_v42  ;;  %v8242_v1 = vmax.bf16 %v8241_v60, %v6301_v62  ;;  %v17391_v42 = vld [vmem:[#allocation67_spill] sm:$0xff]  ;;  %v8209_v62 = vmax.bf16 %v8208_v14, %v6286_v33  ;;  %v17395_v60 = vld [vmem:[#allocation70_spill] sm:$0xff]  ;;  %v6333_v40 = vmul.bf16 %v15266_v34, %v17400_v45 }
 0x831   : > { %5221 = vbcast.lane.c.b16.xlu1 %v14859_v12, 368  ;;  %5186 = vbcast.lane.c.b16.xlu0 %v17389_v31, 368  ;;  %v6317_v47 = vmul.bf16 %v15266_v34, %v17391_v42  ;;  %v17393_v12 = vld [vmem:[#allocation58_spill] sm:$0xff]  ;;  %v6295_v9 = vmul.bf16 %v15296_v54, %v17395_v60  ;;  %v6303_v42 = vmul.bf16 %v15296_v54, %v17397_v21  ;;  %v17405_v45 = vld [vmem:[#allocation79_spill] sm:$0xff] }
 0x832   : > { %v6294_v49 = vmul.bf16 %v15287_v58, %v17393_v12  ;;  %v8243_v18 = vmax.bf16 %v8242_v1, %v6302_v2  ;;  %v6326_v31 = vmul.bf16 %v15287_v58, %v17399_v22  ;;  %v8309_v36 = vmax.bf16 %v8308_v51, %v6332_v39  ;;  %v17401_v1 = vld [vmem:[#allocation47_spill] sm:$0xff]  ;;  %v17403_v60 = vld [vmem:[#allocation38_spill] sm:$0xff] }
 0x833   : > { %v15450_v53 = vpop.permute.xlu1 %4964  ;;  %v15458_v46 = vpop.permute.xlu0 %4845  ;;  %v8276_v14 = vmax.bf16 %v8275_v57, %v6317_v47  ;;  %v6309_v12 = vmul.bf16 %v15266_v34, %v17401_v1  ;;  %v8194_v47 = vmax.bf16 %v8193_v13, %v6280_v5  ;;  %v17402_v57 = vld [vmem:[#allocation59_spill] sm:$0xff]  ;;  %v6327_v3 = vmul.bf16 %v15296_v54, %v17403_v60  ;;  %v17408_v1 = vld [vmem:[#allocation93_spill] sm:$0xff] }
 0x834   : > { %v8226_v16 = vmax.bf16 %v8225_v43, %v6294_v49  ;;  %v8161_v43 = vunpack.i.l.bf16 %v15424_v20  ;;  %v8258_v49 = vmax.bf16 %v8257_v19, %v6308_v63  ;;  %v6318_v2 = vmul.bf16 %v15287_v58, %v17402_v57  ;;  %v17404_v19 = vld [vmem:[#allocation30_spill] sm:$0xff] }
 0x835   : > { %5353 = vbcast.lane.c.b16.xlu1 %v15011_v27, 336  ;;  %5287 = vbcast.lane.c.b16.xlu0 %v14921_v38, 352  ;;  %v8294_v51 = vmax.bf16 %v8293_v29, %v6326_v31  ;;  %v8178_v39 = vunpack.i.l.bf16 %v15432_v26  ;;  %v8210_v21 = vmax.bf16 %v8209_v62, %v6287_v24  ;;  %v8244_v48 = vmax.bf16 %v8243_v18, %v6303_v42  ;;  %v17407_v24 = vld [vmem:[#allocation85_spill] sm:$0xff] }
 0x836   : > { %v8227_v20 = vmax.bf16 %v8226_v16, %v6295_v9  ;;  %v8179_v34 = vunpack.i.h.bf16 %v15432_v26  ;;  %v6319_v5 = vmul.bf16 %v15296_v54, %v17404_v19  ;;  %v8277_v13 = vmax.bf16 %v8276_v14, %v6318_v2  ;;  %v17409_v2 = vld [vmem:[#allocation39_spill] sm:$0xff] }
 0x837   : > { %v15474_v33 = vpop.permute.xlu1 %5096  ;;  %v15480_v4 = vpop.permute.xlu0 %5030  ;;  %v8310_v63 = vmax.bf16 %v8309_v36, %v6333_v40  ;;  %v6288_v29 = vmul.bf16 %v15321_v15, %v17405_v45  ;;  %v6304_v62 = vmul.bf16 %v15321_v15, %v17407_v24  ;;  %v8259_v9 = vmax.bf16 %v8258_v49, %v6309_v12  ;;  %v17410_v12 = vld [vmem:[#allocation43_spill] sm:$0xff]  ;;  %v17411_v45 = vld [vmem:[#allocation96_spill] sm:$0xff] }
 0x838   : > { %v8195_v26 = vunpack.i.l.bf16 %v8194_v47  ;;  %v8196_v42 = vunpack.i.h.bf16 %v8194_v47  ;;  %v8295_v18 = vmax.bf16 %v8294_v51, %v6327_v3  ;;  %v6334_v14 = vmul.bf16 %v15287_v58, %v17408_v1 }
 0x839   : > { %4725 = vbcast.lane.c.b16.xlu1 %v14816_v50, 368  ;;  %5419 = vbcast.lane.c.b16.xlu0 %v15109_v6, 320  ;;  %v17406_v50 = vld [vmem:[#allocation56_spill] sm:$0xff]  ;;  %v8211_v40 = vmax.bf16 %v8210_v21, %v6288_v29  ;;  %v8245_v57 = vmax.bf16 %v8244_v48, %v6304_v62  ;;  %v6310_v60 = vmul.bf16 %v15287_v58, %v17409_v2  ;;  %v17414_v21 = vunpack.i.l.bf16 %v15330_v0  ;;  %v17415_v29 = vld [vmem:[#allocation49_spill] sm:$0xff]  ;;  %v17416_v62 = vld [vmem:[#allocation50_spill] sm:$0xff] }
 0x83a   : > { %v6296_v31 = vmul.bf16 %v15321_v15, %v17406_v50  ;;  %v8278_v19 = vmax.bf16 %v8277_v13, %v6319_v5  ;;  %v6328_v49 = vmul.bf16 %v15321_v15, %v17410_v12  ;;  %v6335_v47 = vmul.bf16 %v15296_v54, %v17411_v45 }
 0x83b   : > { %v15492_v22 = vpop.permute.xlu1 %5310  ;;  %v15500_v16 = vpop.permute.xlu0 %5244  ;;  %v8311_v3 = vmax.bf16 %v8310_v63, %v6334_v14  ;;  %v17413_v50 = vunpack.i.h.bf16 %v15330_v0  ;;  %v8163_v48 = vmax.f32 %v8161_v43, %v8162_v59  ;;  %v6311_v58 = vmul.bf16 %v15296_v54, %v17415_v29 }
 0x83c   : > { %v8228_v36 = vmax.bf16 %v8227_v20, %v6296_v31  ;;  %v8260_v31 = vmax.bf16 %v8259_v9, %v6310_v60  ;;  %v8180_v13 = vmax.f32 %v8178_v39, %v8179_v34  ;;  %v8197_v24 = vmax.f32 %v8195_v26, %v8196_v42 }
 0x83d   : > { %4857 = vbcast.lane.c.b16.xlu1 %v15027_v11, 336  ;;  %4791 = vbcast.lane.c.b16.xlu0 %v14931_v23, 352  ;;  %v8146_v20 = vmax.f32 %v17414_v21, %v17413_v50  ;;  %v6320_v1 = vmul.bf16 %v15321_v15, %v17416_v62  ;;  %v8296_v63 = vmax.bf16 %v8295_v18, %v6328_v49  ;;  %v8212_v14 = vunpack.i.l.bf16 %v8211_v40  ;;  %v17417_v50 = vld [vmem:[#allocation95_spill] sm:$0xff] }
 0x83e   : > { %v8213_v2 = vunpack.i.h.bf16 %v8211_v40  ;;  %v8229_v12 = vunpack.i.l.bf16 %v8228_v36  ;;  %v8230_v0 = vunpack.i.h.bf16 %v8228_v36  ;;  %v8246_v43 = vunpack.i.l.bf16 %v8245_v57 }
 0x83f   : > { %v15512_v51 = vpop.permute.xlu1 %4748  ;;  %v15520_v5 = vpop.permute.xlu0 %5376  ;;  %v8247_v59 = vunpack.i.h.bf16 %v8245_v57  ;;  %v8279_v54 = vmax.bf16 %v8278_v19, %v6320_v1  ;;  %v8312_v9 = vmax.bf16 %v8311_v3, %v6335_v47  ;;  %v8147_v39 = vrot.slane %v8146_v20, 4  ;;  %v17418_v19 = vld [vmem:[#allocation72_spill] sm:$0xff] }
 0x840   : > { %17412 = vst [vmem:[#allocation63_spill] sm:$0xff] %v15512_v51  ;;  %v8164_v34 = vrot.slane %v8163_v48, 4  ;;  %v8261_v26 = vmax.bf16 %v8260_v31, %v6311_v58  ;;  %v8181_v18 = vrot.slane %v8180_v13, 4  ;;  %v8297_v49 = vunpack.i.l.bf16 %v8296_v63 }
 0x841   : > { %5042 = vbcast.lane.c.b16.xlu1 %v14947_v32, 352  ;;  %4976 = vbcast.lane.c.b16.xlu0 %v14869_v55, 368  ;;  %v8298_v45 = vunpack.i.h.bf16 %v8296_v63  ;;  %v6336_v40 = vmul.bf16 %v15321_v15, %v17417_v50  ;;  %v8198_v55 = vrot.slane %v8197_v24, 4  ;;  %v8214_v36 = vmax.f32 %v8212_v14, %v8213_v2 }
 0x842   : > { %v8231_v57 = vmax.f32 %v8229_v12, %v8230_v0  ;;  %v6312_v47 = vmul.bf16 %v15321_v15, %v17418_v19  ;;  %v8248_v3 = vmax.f32 %v8246_v43, %v8247_v59  ;;  %v8280_v21 = vunpack.i.l.bf16 %v8279_v54 }
 0x843   : > { %v15526_v60 = vpop.permute.xlu1 %4895  ;;  %v15528_v42 = vpop.permute.xlu0 %4814  ;;  %v8281_v29 = vunpack.i.h.bf16 %v8279_v54  ;;  %v8313_v58 = vmax.bf16 %v8312_v9, %v6336_v40  ;;  %v8165_v62 = vmax.f32 %v8163_v48, %v8164_v34  ;;  %v8182_v50 = vmax.f32 %v8180_v13, %v8181_v18 }
 0x844   : > { %v8262_v1 = vmax.bf16 %v8261_v26, %v6312_v47  ;;  %v8148_v14 = vmax.f32 %v8146_v20, %v8147_v39  ;;  %v8199_v2 = vmax.f32 %v8197_v24, %v8198_v55  ;;  %v8215_v12 = vrot.slane %v8214_v36, 4  ;;  %v15546_v13 = vpop.f32.mrf.mxu1 }
 0x845   : > { %5256 = vbcast.lane.c.b16.xlu1 %v14879_v35, 368  ;;  %5108 = vbcast.lane.c.b16.xlu0 %v15043_v30, 336  ;;  %v8299_v35 = vmax.f32 %v8297_v49, %v8298_v45  ;;  %v8232_v15 = vrot.slane %v8231_v57, 4  ;;  %v8249_v0 = vrot.slane %v8248_v3, 4  ;;  %v8282_v43 = vmax.f32 %v8280_v21, %v8281_v29 }
 0x846   : > { %v8314_v59 = vunpack.i.l.bf16 %v8313_v58  ;;  %v8315_v54 = vunpack.i.h.bf16 %v8313_v58  ;;  %v8166_v48 = vrot.slane %v8165_v62, 2  ;;  %v8263_v34 = vunpack.i.l.bf16 %v8262_v1  ;;  %v15554_v51 = vpop.f32.mrf.mxu1 }
 0x847   : > { %v15536_v31 = vpop.permute.xlu1 %4999  ;;  %v15538_v63 = vpop.permute.xlu0 %4933  ;;  %v8264_v26 = vunpack.i.h.bf16 %v8262_v1  ;;  %v8183_v18 = vrot.slane %v8182_v50, 2  ;;  %v8300_v20 = vrot.slane %v8299_v35, 4  ;;  %v8149_v24 = vrot.slane %v8148_v14, 2 }
 0x848   : > { %17419 = vst [vmem:[#allocation66_spill] sm:$0xff] %v15538_v63  ;;  %v8200_v39 = vrot.slane %v8199_v2, 2  ;;  %v8216_v49 = vmax.f32 %v8214_v36, %v8215_v12  ;;  %v8233_v45 = vmax.f32 %v8231_v57, %v8232_v15  ;;  %v8250_v55 = vmax.f32 %v8248_v3, %v8249_v0 }
 0x849   : > { %5388 = vbcast.lane.c.b16.xlu1 %v15059_v61, 336  ;;  %5322 = vbcast.lane.c.b16.xlu0 %v14957_v25, 352  ;;  %v8283_v19 = vrot.slane %v8282_v43, 4  ;;  %v8316_v47 = vmax.f32 %v8314_v59, %v8315_v54  ;;  %v8167_v29 = vmax.f32 %v8165_v62, %v8166_v48  ;;  %v8265_v58 = vmax.f32 %v8263_v34, %v8264_v26  ;;  %v15562_v48 = vpop.f32.mrf.mxu1 }
 0x84a   : > { %v8150_v63 = vmax.f32 %v8148_v14, %v8149_v24  ;;  %v8201_v36 = vmax.f32 %v8199_v2, %v8200_v39  ;;  %v8217_v12 = vrot.slane %v8216_v49, 2  ;;  %v8251_v57 = vrot.slane %v8250_v55, 2 }
 0x84b   : > { %v15542_v9 = vpop.permute.xlu1 %5131  ;;  %v15544_v40 = vpop.permute.xlu0 %5065  ;;  %v8284_v3 = vmax.f32 %v8282_v43, %v8283_v19  ;;  %v8317_v15 = vrot.slane %v8316_v47, 4  ;;  %v8168_v62 = vrot.slane %v8167_v29, 1  ;;  %v8266_v59 = vrot.slane %v8265_v58, 4 }
 0x84c   : > { %17420 = vst [vmem:[#allocation76_spill] sm:$0xff] %v15542_v9  ;;  %17421 = vst [vmem:[#allocation84_spill] sm:$0xff] %v15544_v40  ;;  %v8184_v9 = vmax.f32 %v8182_v50, %v8183_v18  ;;  %v8301_v40 = vmax.f32 %v8299_v35, %v8300_v20  ;;  %v8151_v14 = vrot.slane %v8150_v63, 1  ;;  %v8202_v2 = vrot.slane %v8201_v36, 1 }
 0x84d   : > { %4826 = vbcast.lane.c.b16.xlu1 %v14973_v37, 352  ;;  %4760 = vbcast.lane.c.b16.xlu0 %v14889_v10, 368  ;;  %v8234_v10 = vrot.slane %v8233_v45, 2  ;;  %v8218_v34 = vmax.f32 %v8216_v49, %v8217_v12  ;;  %v8252_v43 = vmax.f32 %v8250_v55, %v8251_v57  ;;  %v8285_v26 = vrot.slane %v8284_v3, 2 }
 0x84e   : > { %v8185_v50 = vrot.slane %v8184_v9, 1  ;;  %v8302_v35 = vrot.slane %v8301_v40, 2  ;;  %v8318_v18 = vmax.f32 %v8316_v47, %v8317_v15  ;;  %v8169_v24 = vmax.f32 %v8167_v29, %v8168_v62 }
 0x84f   : > { %v15550_v21 = vpop.permute.xlu1 %5213  ;;  %v15552_v1 = vpop.permute.xlu0 %5178  ;;  %v8267_v39 = vmax.f32 %v8265_v58, %v8266_v59  ;;  %v8203_v49 = vmax.f32 %v8201_v36, %v8202_v2  ;;  %v8219_v12 = vrot.slane %v8218_v34, 1  ;;  %v8253_v47 = vrot.slane %v8252_v43, 1 }
 0x850   : > { %17422 = vst [vmem:[#allocation88_spill] sm:$0xff] %v15550_v21  ;;  %17423 = vst [vmem:[#allocation51_spill] sm:$0xff] %v15552_v1  ;;  %v8303_v1 = vmax.f32 %v8301_v40, %v8302_v35  ;;  %v8319_v29 = vrot.slane %v8318_v18, 2  ;;  %v8170_v57 = vpack.i.bf16 %v8169_v24, %v8169_v24  ;;  %v17431_v24 = vmov 0  }
 0x851   : > { %5077 = vbcast.lane.c.b16.xlu1 %v17380_v28, 352  ;;  %5011 = vbcast.lane.c.b16.xlu0 %v14905_v7, 368  ;;  %v8235_v7 = vmax.f32 %v8233_v45, %v8234_v10  ;;  %v8286_v10 = vmax.f32 %v8284_v3, %v8285_v26  ;;  %v8268_v15 = vrot.slane %v8267_v39, 2  ;;  %v8204_v36 = vpack.i.bf16 %v8203_v49, %v8203_v49 }
 0x852   : > { %v8304_v40 = vrot.slane %v8303_v1, 1  ;;  %v8220_v59 = vmax.f32 %v8218_v34, %v8219_v12  ;;  %v8254_v26 = vmax.f32 %v8252_v43, %v8253_v47 }
 0x853   : > { %v15558_v0 = vpop.permute.xlu1 %5345  ;;  %v15560_v54 = vpop.permute.xlu0 %5279  ;;  %v8236_v55 = vrot.slane %v8235_v7, 1  ;;  %v8287_v3 = vrot.slane %v8286_v10, 1 }
 0x854   : > { %17424 = vst [vmem:[#allocation64_spill] sm:$0xff] %v15558_v0  ;;  %17425 = vst [vmem:[#allocation44_spill] sm:$0xff] %v15560_v54  ;;  %v15570_v54 = vpop.f32.mrf.mxu1  ;;  %v8186_v0 = vmax.f32 %v8184_v9, %v8185_v50  ;;  %v8305_v34 = vmax.f32 %v8303_v1, %v8304_v40  ;;  %v8221_v12 = vpack.i.bf16 %v8220_v59, %v8220_v59 }
 0x855   : > { %5291 = vbcast.lane.c.b16.xlu1 %v14921_v38, 368  ;;  %5143 = vbcast.lane.c.b16.xlu0 %v17376_v8, 336  ;;  %v8152_v38 = vmax.f32 %v8150_v63, %v8151_v14  ;;  %v8237_v35 = vmax.f32 %v8235_v7, %v8236_v55  ;;  %v8320_v14 = vmax.f32 %v8318_v18, %v8319_v29  ;;  %v17434_v7 = vld [vmem:[#allocation57_spill] sm:$0xff] }
 0x856   : > { %v15574_v45 = vpop.f32.mrf.mxu1  ;;  %v8187_v9 = vpack.i.bf16 %v8186_v0, %v8186_v0  ;;  %v9379_v18 = vadd.f32 %v15554_v51, %v17434_v7  ;;  %v8255_v29 = vpack.i.bf16 %v8254_v26, %v8254_v26 }
 0x857   : > { %v15566_v20 = vpop.permute.xlu1 %4717  ;;  %v15568_v19 = vpop.permute.xlu0 %5411  ;;  %v8153_v63 = vpack.i.bf16 %v8152_v38, %v8152_v38  ;;  %v8321_v47 = vrot.slane %v8320_v14, 1 }
 0x858   : > { %17426 = vst [vmem:[#allocation34_spill] sm:$0xff] %v15566_v20  ;;  %17427 = vst [vmem:[#allocation81_spill] sm:$0xff] %v15568_v19  ;;  %v9332_v50 = vpop.f32.mrf.mxu1  ;;  %v17433_v19 = vld [vmem:[#allocation61_spill] sm:$0xff]  ;;  %v8779_v49 = vmax.bf16 %v17431_v24, %v8187_v9 }
 0x859   : > { %5423 = vbcast.lane.c.b16.xlu1 %v15109_v6, 336  ;;  %5357 = vbcast.lane.c.b16.xlu0 %v15011_v27, 352  ;;  %v9381_v38 = vadd.f32 %v15546_v13, %v17433_v19  ;;  %v8777_v43 = vmax.bf16 %v17431_v24, %v8153_v63  ;;  %v8238_v13 = vpack.i.bf16 %v8237_v35, %v8237_v35 }
 0x85a   : > { %v10088_v55 = vpop.f32.mrf.mxu1  ;;  %v8288_v19 = vmax.f32 %v8286_v10, %v8287_v3  ;;  %v9069_v40 = vunpack.c.l.b16 %v8779_v49  ;;  %v8306_v63 = vpack.i.bf16 %v8305_v34, %v8305_v34  ;;  %v8781_v10 = vmax.bf16 %v17431_v24, %v8221_v12  ;;  %v17439_v34 = vld [vmem:[#allocation62_spill] sm:$0xff]  ;;  %v17442_v12 = vld [vmem:[#allocation69_spill] sm:$0xff] }
 0x85b   : > { %v15576_v58 = vpop.permute.xlu1 %4849  ;;  %v15578_v62 = vpop.permute.xlu0 %4783  ;;  %v8322_v3 = vmax.f32 %v8320_v14, %v8321_v47  ;;  %v8783_v49 = vmax.bf16 %v17431_v24, %v8255_v29  ;;  %v9382_v7 = vadd.f32 %v15562_v48, %v17439_v34  ;;  %v9385_v14 = vadd.f32 %v15574_v45, %v17442_v12  ;;  %v17444_v48 = vld [vmem:[#allocation71_spill] sm:$0xff]  ;;  %v17451_v12 = vld [vmem:[#allocation101_spill] sm:$0xff] }
 0x85c   : > { %17428 = vst [vmem:[#allocation27_spill] sm:$0xff] %v15576_v58  ;;  %17429 = vst [vmem:[#allocation28_spill] sm:$0xff] %v15578_v62  ;;  %v8778_v58 = vmax.bf16 %v17431_v24, %v8170_v57  ;;  %v8269_v62 = vmax.f32 %v8267_v39, %v8268_v15  ;;  %v8780_v39 = vmax.bf16 %v17431_v24, %v8204_v36  ;;  %v9067_v36 = vunpack.c.l.b16 %v8777_v43 }
 0x85d   : > { %4861 = vbcast.lane.c.b16.xlu1 %v15027_v11, 352  ;;  %4795 = vbcast.lane.c.b16.xlu0 %v14931_v23, 368  ;;  %v15593_v23 = vld [vmem:[%s386_s23] ss:$0 sm:$0xff]  ;;  %v8289_v35 = vpack.i.bf16 %v8288_v19, %v8288_v19  ;;  %v17443_v19 = vld [vmem:[#allocation65_spill] sm:$0xff]  ;;  %v9386_v34 = vadd.f32 %v10088_v55, %v17444_v48  ;;  %v8323_v45 = vpack.i.bf16 %v8322_v3, %v8322_v3 }
 0x85e   : > { %v9068_v57 = vunpack.c.l.b16 %v8778_v58  ;;  %v8270_v9 = vrot.slane %v8269_v62, 1  ;;  %v15605_v51 = vadd.f32 %v15593_v23, %v9381_v38  ;;  %v9070_v59 = vunpack.c.l.b16 %v8780_v39  ;;  %v9335_v58 = vpop.f32.mrf.mxu1 }
 0x85f   : > { %v15582_v2 = vpop.permute.xlu1 %5034  ;;  %v15585_v0 = vpop.permute.xlu0 %4968  ;;  %v8782_v38 = vmax.bf16 %v17431_v24, %v8238_v13  ;;  %v9383_v47 = vadd.f32 %v9332_v50, %v17443_v19  ;;  %v8786_v13 = vmax.bf16 %v17431_v24, %v8306_v63  ;;  %v9073_v63 = vunpack.c.l.b16 %v8783_v49  ;;  %v17452_v49 = vld [vmem:[#allocation102_spill] sm:$0xff] }
 0x860   : > { %17430 = vst [vmem:[#allocation103_spill] sm:$0xff] %v15582_v2  ;;  %17432 = vst [vmem:[#allocation29_spill] sm:$0xff] %v15585_v0  ;;  %v9190_v39 = vsel %vm9099_vm0, %v9068_v57, %v9067_v36  ;;  %v6385_v19 = vmul.bf16 %v15235_v52, %v17452_v49  ;;  %v17463_v49 = vld [vmem:[#allocation105_spill] sm:$0xff]  ;;  %v17475_v2 = vld [vmem:[#allocation116_spill] sm:$0xff] }
 0x861   : > { %5112 = vbcast.lane.c.b16.xlu1 %v15043_v30, 352  ;;  %5046 = vbcast.lane.c.b16.xlu0 %v14947_v32, 368  ;;  %17437 = vst [vmem:[#allocation82_spill] sm:$0xff] %v15605_v51  ;;  %v15609_v32 = vadd.f32 %v15593_v23, %v9379_v18  ;;  %v17440_v18 = vld [vmem:[#allocation60_spill] sm:$0xff]  ;;  %v9191_v29 = vsel %vm9101_vm1, %v9069_v40, %v9190_v39  ;;  %v9072_v50 = vunpack.c.l.b16 %v8782_v38  ;;  %v17447_v40 = vld [vmem:[#allocation98_spill] sm:$0xff]  ;;  %v17448_v39 = vld [vmem:[#allocation99_spill] sm:$0xff] }
 0x862   : > { %v9380_v43 = vadd.f32 %v15570_v54, %v17440_v18  ;;  %v9192_v57 = vsel %vm9103_vm2, %v9070_v59, %v9191_v29  ;;  %v17446_v18 = vld [vmem:[#allocation97_spill] sm:$0xff]  ;;  %v6337_v55 = vmul.bf16 %v15235_v52, %v17447_v40  ;;  %v6386_v38 = vmul.bf16 %v15231_v41, %v17451_v12 }
 0x863   : > { %v15600_v1 = vpop.permute.xlu1 %5248  ;;  %v15602_v15 = vpop.permute.xlu0 %5100  ;;  %17438 = vst [vmem:[#allocation33_spill] sm:$0xff] %v15609_v32  ;;  %v15653_v29 = vadd.f32 %v15593_v23, %v9382_v7  ;;  %v6402_v0 = vmul.bf16 %v15231_v41, %v17475_v2 }
 0x864   : > { %17435 = vst [vmem:[#allocation55_spill] sm:$0xff] %v15600_v1  ;;  %17436 = vst [vmem:[#allocation32_spill] sm:$0xff] %v15602_v15  ;;  %v17445_v1 = vld [vmem:[#allocation68_spill] sm:$0xff]  ;;  %v15656_v48 = vadd.f32 %v15593_v23, %v9380_v43  ;;  %v15671_v43 = vadd.f32 %v15593_v23, %v9386_v34 }
 0x865   : > { %5392 = vbcast.lane.c.b16.xlu1 %v15059_v61, 352  ;;  %5326 = vbcast.lane.c.b16.xlu0 %v14957_v25, 368  ;;  %v8271_v25 = vmax.f32 %v8269_v62, %v8270_v9  ;;  %v9384_v54 = vadd.f32 %v9335_v58, %v17445_v1  ;;  %v9071_v62 = vunpack.c.l.b16 %v8781_v10  ;;  %v8785_v9 = vmax.bf16 %v17431_v24, %v8289_v35  ;;  %v17450_v35 = vld [vmem:[#allocation100_spill] sm:$0xff] }
 0x866   : > { %v6378_v1 = vmul.bf16 %v15231_v41, %v17448_v39  ;;  %v9076_v58 = vunpack.c.l.b16 %v8786_v13  ;;  %v6377_v3 = vmul.bf16 %v15235_v52, %v17450_v35  ;;  %17453 = vst [vmem:[#allocation46_spill] sm:$0xff] %v15653_v29  ;;  %17454 = vst [vmem:[#allocation37_spill] sm:$0xff] %v15656_v48  ;;  %v8787_v39 = vmax.bf16 %v17431_v24, %v8323_v45  ;;  %v17481_v29 = vld [vmem:[#allocation78_spill] sm:$0xff] }
 0x867   : > { %v15613_v26 = vpop.permute.xlu1 %5380  ;;  %v15621_v15 = vpop.permute.xlu0 %5314  ;;  %v8272_v59 = vpack.i.bf16 %v8271_v25, %v8271_v25  ;;  %v15659_v25 = vadd.f32 %v15593_v23, %v9385_v14  ;;  %v9193_v13 = vsel %vm9105_vm3, %v9071_v62, %v9192_v57  ;;  %v9075_v40 = vunpack.c.l.b16 %v8785_v9  ;;  %17458 = vst [vmem:[#allocation67_spill] sm:$0xff] %v15671_v43  ;;  %v17476_v43 = vld [vmem:[#allocation117_spill] sm:$0xff] }
 0x868   : > { %17441 = vst [vmem:[#allocation54_spill] sm:$0xff] %v15621_v15  ;;  %v9194_v7 = vsel %vm9107_vm4, %v9072_v50, %v9193_v13  ;;  %v15674_v14 = vadd.f32 %v15593_v23, %v9384_v54  ;;  %v8409_v9 = vmax.bf16 %v6378_v1, %v6377_v3  ;;  %v8426_v45 = vmax.bf16 %v6386_v38, %v6385_v19  ;;  %v17462_v50 = vld [vmem:[#allocation104_spill] sm:$0xff]  ;;  %v17465_v15 = vld [vmem:[#allocation107_spill] sm:$0xff]  ;;  %v17467_v1 = vld [vmem:[#allocation109_spill] sm:$0xff] }
 0x869   : > { %5081 = vbcast.lane.c.b16.xlu1 %v17380_v28, 368  ;;  %4830 = vbcast.lane.c.b16.xlu0 %v14973_v37, 368  ;;  %v6338_v28 = vmul.bf16 %v15231_v41, %v17446_v18  ;;  %v10091_v37 = vpop.f32.mrf.mxu1  ;;  %17455 = vst [vmem:[#allocation31_spill] sm:$0xff] %v15659_v25  ;;  %v15664_v18 = vadd.f32 %v15593_v23, %v9383_v47  ;;  %v17468_v3 = vld [vmem:[#allocation110_spill] sm:$0xff] }
 0x86a   : > { %17459 = vst [vmem:[#allocation75_spill] sm:$0xff] %v15674_v14  ;;  %v15679_v62 = vmax.bf16 %v17431_v24, %v8272_v59  ;;  %v15682_v47 = vsel %vm9109_vm5, %v9073_v63, %v9194_v7  ;;  %v9197_v34 = vsel %vm9099_vm0, %v9076_v58, %v9075_v40  ;;  %v6442_v54 = vmul.bf16 %v15231_v41, %v17462_v50  ;;  %v17470_v40 = vld [vmem:[#allocation111_spill] sm:$0xff]  ;;  %v17471_v7 = vld [vmem:[#allocation112_spill] sm:$0xff]  ;;  %v17472_v50 = vld [vmem:[#allocation113_spill] sm:$0xff] }
 0x86b   : > { %v15635_v36 = vpop.permute.xlu1 %4818  ;;  %v15643_v10 = vpop.permute.xlu0 %4752  ;;  %17456 = vst [vmem:[#allocation91_spill] sm:$0xff] %v15664_v18  ;;  %17461 = vst [vmem:[#allocation41_spill] sm:$0xff] %v15682_v47  ;;  %v8324_v57 = vmax.bf16 %v6338_v28, %v6337_v55  ;;  %v6441_v13 = vmul.bf16 %v15235_v52, %v17463_v49  ;;  %v6449_v63 = vmul.bf16 %v15235_v52, %v17465_v15  ;;  %v9077_v28 = vunpack.c.l.b16 %v8787_v39  ;;  %v17466_v55 = vld [vmem:[#allocation108_spill] sm:$0xff]  ;;  %v17473_v49 = vld [vmem:[#allocation114_spill] sm:$0xff] }
 0x86c   : > { %17449 = vst [vmem:[#allocation36_spill] sm:$0xff] %v15643_v10  ;;  %v9348_v35 = vpop.f32.mrf.mxu1  ;;  %17460 = vst [vmem:[#allocation58_spill] sm:$0xff] %v15679_v62  ;;  %v17464_v10 = vld [vmem:[#allocation106_spill] sm:$0xff]  ;;  %v6393_v58 = vmul.bf16 %v15235_v52, %v17467_v1  ;;  %v6458_v38 = vmul.bf16 %v15231_v41, %v17468_v3  ;;  %v6346_v15 = vmul.bf16 %v15231_v41, %v17471_v7  ;;  %v17474_v1 = vld [vmem:[#allocation115_spill] sm:$0xff] }
 0x86d   : > { %5361 = vbcast.lane.c.b16.xlu1 %v15011_v27, 368  ;;  %5147 = vbcast.lane.c.b16.xlu0 %v17376_v8, 352  ;;  %v6450_v59 = vmul.bf16 %v15231_v41, %v17464_v10  ;;  %v6457_v10 = vmul.bf16 %v15235_v52, %v17470_v40  ;;  %v6345_v39 = vmul.bf16 %v15235_v52, %v17472_v50  ;;  %v17477_v25 = vld [vmem:[#allocation118_spill] sm:$0xff]  ;;  %v17478_v50 = vld [vmem:[#allocation119_spill] sm:$0xff]  ;;  %v17479_v14 = vld [vmem:[#allocation120_spill] sm:$0xff] }
 0x86e   : > { %v10092_v47 = vpop.f32.mrf.mxu1  ;;  %v6379_v3 = vmul.bf16 %v15242_v44, %v17474_v1  ;;  %v6401_v40 = vmul.bf16 %v15235_v52, %v17476_v43  ;;  %v6451_v7 = vmul.bf16 %v15242_v44, %v17477_v25  ;;  %v6466_v20 = vmul.bf16 %v15231_v41, %v17479_v14  ;;  %v17480_v18 = vld [vmem:[#allocation121_spill] sm:$0xff]  ;;  %v17482_v62 = vld [vmem:[#allocation74_spill] sm:$0xff]  ;;  %v17483_v25 = vld [vmem:[#allocation123_spill] sm:$0xff] }
 0x86f   : > { %v15667_v27 = vpop.permute.xlu1 %4937  ;;  %v15676_v12 = vpop.permute.xlu0 %4899  ;;  %v6465_v1 = vmul.bf16 %v15235_v52, %v17480_v18  ;;  %v9389_v21 = vadd.f32 %v10091_v37, %v17481_v29  ;;  %v8545_v2 = vmax.bf16 %v6442_v54, %v6441_v13  ;;  %v8562_v43 = vmax.bf16 %v6450_v59, %v6449_v63  ;;  %v17486_v54 = vld [vmem:[#allocation80_spill] sm:$0xff] }
 0x870   : > { %17457 = vst [vmem:[#allocation73_spill] sm:$0xff] %v15667_v27  ;;  %v9387_v48 = vadd.f32 %v9348_v35, %v17482_v62  ;;  %v8341_v32 = vmax.bf16 %v6346_v15, %v6345_v39  ;;  %v9351_v14 = vpop.f32.mrf.mxu1  ;;  %v15738_v18 = vsel %vm9101_vm1, %v9077_v28, %v9197_v34  ;;  %v8460_v29 = vmax.bf16 %v6402_v0, %v6401_v40  ;;  %v17489_v34 = vld [vmem:[#allocation122_spill] sm:$0xff]  ;;  %v17492_v28 = vld [vmem:[#allocation124_spill] sm:$0xff]  ;;  %v17498_v39 = vld [vmem:[#allocation129_spill] sm:$0xff] }
 0x871   : > { %4865 = vbcast.lane.c.b16.xlu1 %v15027_v11, 368  ;;  %5427 = vbcast.lane.c.b16.xlu0 %v15109_v6, 352  ;;  %v6394_v11 = vmul.bf16 %v15231_v41, %v17466_v55  ;;  %v6387_v55 = vmul.bf16 %v15242_v44, %v17473_v49  ;;  %v6443_v49 = vmul.bf16 %v15242_v44, %v17478_v50 }
 0x872   : > { %17485 = vst [vmem:[#allocation87_spill] sm:$0xff] %v15738_v18  ;;  %v9390_v13 = vadd.f32 %v10092_v47, %v17486_v54  ;;  %v15742_v35 = vmax.bf16 %v8562_v43, %v6451_v7  ;;  %v8596_v59 = vmax.bf16 %v6466_v20, %v6465_v1  ;;  %v15745_v63 = vadd.f32 %v15593_v23, %v9389_v21  ;;  %v17490_v47 = vld [vmem:[#allocation77_spill] sm:$0xff]  ;;  %v17500_v7 = vld [vmem:[#allocation131_spill] sm:$0xff]  ;;  %v17501_v1 = vld [vmem:[#allocation132_spill] sm:$0xff] }
 0x873   : > { %v15701_v19 = vpop.permute.xlu1 %5069  ;;  %v15711_v24 = vpop.permute.xlu0 %5003  ;;  %v8443_v50 = vmax.bf16 %v6394_v11, %v6393_v58  ;;  %v8427_v37 = vmax.bf16 %v8426_v45, %v6387_v55  ;;  %v8546_v62 = vmax.bf16 %v8545_v2, %v6443_v49  ;;  %v15749_v11 = vadd.f32 %v15593_v23, %v9387_v48  ;;  %v17493_v58 = vld [vmem:[#allocation125_spill] sm:$0xff]  ;;  %v17495_v48 = vld [vmem:[#allocation127_spill] sm:$0xff] }
 0x874   : > { %17469 = vst [vmem:[#allocation70_spill] sm:$0xff] %v15701_v19  ;;  %v8579_v19 = vmax.bf16 %v6458_v38, %v6457_v10  ;;  %17487 = vst [vmem:[#allocation53_spill] sm:$0xff] %v15745_v63  ;;  %v9388_v45 = vadd.f32 %v9351_v14, %v17490_v47  ;;  %v6395_v20 = vmul.bf16 %v15242_v44, %v17492_v28  ;;  %v17494_v38 = vld [vmem:[#allocation126_spill] sm:$0xff]  ;;  %v17502_v43 = vld [vmem:[#allocation133_spill] sm:$0xff] }
 0x875   : > { %5396 = vbcast.lane.c.b16.xlu1 %v15059_v61, 368  ;;  %5116 = vbcast.lane.c.b16.xlu0 %v15043_v30, 368  ;;  %v6339_v61 = vmul.bf16 %v15242_v44, %v17483_v25  ;;  %v8410_v30 = vmax.bf16 %v8409_v9, %v6379_v3  ;;  %17488 = vst [vmem:[#allocation52_spill] sm:$0xff] %v15749_v11  ;;  %v17499_v3 = vld [vmem:[#allocation130_spill] sm:$0xff]  ;;  %v17504_v54 = vld [vmem:[#allocation135_spill] sm:$0xff]  ;;  %v17506_v47 = vld [vmem:[#allocation137_spill] sm:$0xff] }
 0x876   : > { %v6353_v9 = vmul.bf16 %v15235_v52, %v17489_v34  ;;  %v6354_v21 = vmul.bf16 %v15231_v41, %v17493_v58  ;;  %v6409_v10 = vmul.bf16 %v15235_v52, %v17495_v48  ;;  %v6459_v55 = vmul.bf16 %v15242_v44, %v17498_v39  ;;  %v17507_v58 = vld [vmem:[#allocation138_spill] sm:$0xff]  ;;  %v15792_v48 = vld [vmem:[#allocation3 + $0x8] sm:$0xff]  }
 0x877   : > { %v15733_v51 = vpop.permute.xlu1 %5182  ;;  %v15735_v27 = vpop.permute.xlu0 %5135  ;;  %v15753_v0 = vmax.bf16 %v8324_v57, %v6339_v61  ;;  %v15769_v57 = vadd.f32 %v15593_v23, %v9390_v13  ;;  %v6347_v40 = vmul.bf16 %v15242_v44, %v17499_v3  ;;  %v6474_v49 = vmul.bf16 %v15231_v41, %v17500_v7  ;;  %v17503_v61 = vld [vmem:[#allocation134_spill] sm:$0xff] }
 0x878   : > { %17484 = vst [vmem:[#allocation45_spill] sm:$0xff] %v15733_v51  ;;  %v6362_v2 = vmul.bf16 %v15231_v41, %v17501_v1  ;;  %v6361_v25 = vmul.bf16 %v15235_v52, %v17502_v43  ;;  %v6388_v14 = vmul.bf16 %v15255_v17, %v17503_v61  ;;  %v6380_v13 = vmul.bf16 %v15255_v17, %v17504_v54  ;;  %v15798_v43 = vld [vmem:[#allocation3] sm:$0xff]   ;;  %v17533_v51 = vld [vmem:[#allocation157_spill] sm:$0xff] }
 0x879   : > { %5431 = vbcast.lane.c.b16.xlu1 %v15109_v6, 368  ;;  %5151 = vbcast.lane.c.b16.xlu0 %v17376_v8, 368  ;;  %v6410_v8 = vmul.bf16 %v15231_v41, %v17494_v38  ;;  %17497 = vst [vmem:[#allocation59_spill] sm:$0xff] %v15769_v57  ;;  %v15786_v34 = vadd.f32 %v15593_v23, %v9388_v45  ;;  %v17508_v41 = vld [vmem:[#allocation139_spill] sm:$0xff]  ;;  %v17510_v23 = vld [vmem:[#allocation128_spill] sm:$0xff] }
 0x87a   : > { %v6403_v28 = vmul.bf16 %v15242_v44, %v17506_v47  ;;  %v6444_v38 = vmul.bf16 %v15255_v17, %v17507_v58  ;;  %v6418_v52 = vmul.bf16 %v15792_v48, %v17508_v41  ;;  %v8444_v3 = vmax.bf16 %v8443_v50, %v6395_v20  ;;  %v17512_v17 = vld [vmem:[#allocation136_spill] sm:$0xff]  ;;  %v17530_v57 = vld [vmem:[#allocation155_spill] sm:$0xff] }
 0x87b   : > { %v15756_v6 = vpop.permute.xlu1 %5283  ;;  %v15766_v15 = vpop.permute.xlu0 %5217  ;;  %17505 = vst [vmem:[#allocation38_spill] sm:$0xff] %v15786_v34  ;;  %v8358_v7 = vmax.bf16 %v6354_v21, %v6353_v9  ;;  %v8477_v1 = vmax.bf16 %v6410_v8, %v6409_v10  ;;  %v6473_v45 = vmul.bf16 %v15798_v43, %v17510_v23  ;;  %v8580_v44 = vmax.bf16 %v8579_v19, %v6459_v55  ;;  %v15806_v58 = vld [vmem:[#allocation3 + $0x10] sm:$0xff]  }
 0x87c   : > { %17491 = vst [vmem:[#allocation94_spill] sm:$0xff] %v15756_v6  ;;  %17496 = vst [vmem:[#allocation47_spill] sm:$0xff] %v15766_v15  ;;  %v8342_v54 = vmax.bf16 %v8341_v32, %v6347_v40  ;;  %v6417_v47 = vmul.bf16 %v15798_v43, %v17512_v17  ;;  %v17513_v41 = vld [vmem:[#allocation140_spill] sm:$0xff]  ;;  %v8375_v9 = vmax.bf16 %v6362_v2, %v6361_v25  ;;  %v17514_v19 = vld [vmem:[#allocation141_spill] sm:$0xff] }
 0x87d   : > { %v6467_v18 = vmul.bf16 %v15806_v58, %v17513_v41  ;;  %v8613_v50 = vmax.bf16 %v6474_v49, %v6473_v45  ;;  %v8428_v20 = vmax.bf16 %v8427_v37, %v6388_v14  ;;  %v8411_v21 = vmax.bf16 %v8410_v30, %v6380_v13  ;;  %v17516_v40 = vld [vmem:[#allocation142_spill] sm:$0xff]  ;;  %v17517_v6 = vld [vmem:[#allocation143_spill] sm:$0xff]  ;;  %v17518_v2 = vld [vmem:[#allocation144_spill] sm:$0xff] }
 0x87e   : > { %v8461_v8 = vmax.bf16 %v8460_v29, %v6403_v28  ;;  %v15810_v10 = vmax.bf16 %v8546_v62, %v6444_v38  ;;  %v8494_v23 = vmax.bf16 %v6418_v52, %v6417_v47  ;;  %v6482_v17 = vmul.bf16 %v15792_v48, %v17516_v40  ;;  %v17519_v30 = vld [vmem:[#allocation145_spill] sm:$0xff]  ;;  %v17521_v14 = vld [vmem:[#allocation146_spill] sm:$0xff]  ;;  %v17522_v28 = vld [vmem:[#allocation147_spill] sm:$0xff] }
 0x87f   : > { %v15796_v39 = vpop.permute.xlu1 %5415  ;;  %v15802_v61 = vpop.permute.xlu0 %5349  ;;  %v6481_v49 = vmul.bf16 %v15798_v43, %v17517_v6  ;;  %v6355_v37 = vmul.bf16 %v15806_v58, %v17518_v2  ;;  %v8597_v25 = vmax.bf16 %v8596_v59, %v6467_v18  ;;  %v6370_v13 = vmul.bf16 %v15792_v48, %v17521_v14  ;;  %v17523_v52 = vld [vmem:[#allocation148_spill] sm:$0xff]  ;;  %v17524_v47 = vld [vmem:[#allocation149_spill] sm:$0xff]  ;;  %v17525_v41 = vld [vmem:[#allocation150_spill] sm:$0xff] }
 0x880   : > { %17509 = vst [vmem:[#allocation30_spill] sm:$0xff] %v15796_v39  ;;  %17511 = vst [vmem:[#allocation79_spill] sm:$0xff] %v15802_v61  ;;  %v15812_v39 = vld [vmem:[#allocation3 + $0x18] sm:$0xff]   ;;  %v6369_v38 = vmul.bf16 %v15798_v43, %v17522_v28  ;;  %v6411_v45 = vmul.bf16 %v15806_v58, %v17523_v52  ;;  %v17526_v40 = vld [vmem:[#allocation151_spill] sm:$0xff]  ;;  %v6489_v52 = vmul.bf16 %v15798_v43, %v17530_v57 }
 0x881   : > { %v6452_v32 = vmul.bf16 %v15812_v39, %v17514_v19  ;;  %v6340_v29 = vmul.bf16 %v15812_v39, %v17519_v30  ;;  %v6396_v6 = vmul.bf16 %v15812_v39, %v17524_v47  ;;  %v6426_v19 = vmul.bf16 %v15792_v48, %v17525_v41  ;;  %v17527_v30 = vld [vmem:[#allocation152_spill] sm:$0xff]  ;;  %v17528_v59 = vld [vmem:[#allocation153_spill] sm:$0xff]  ;;  %v15860_v57 = vld [vmem:[#allocation3 + $0x20] sm:$0xff]  }
 0x882   : > { %v6425_v2 = vmul.bf16 %v15798_v43, %v17526_v40  ;;  %v6475_v18 = vmul.bf16 %v15806_v58, %v17527_v30  ;;  %v6460_v14 = vmul.bf16 %v15812_v39, %v17528_v59  ;;  %v6363_v47 = vmul.bf16 %v15806_v58, %v15282_v56 }
 0x883   : > { %v15816_v55 = vpop.permute.xlu1 %4787  ;;  %v15826_v62 = vpop.permute.xlu0 %4721  ;;  %v8564_v41 = vmax.bf16 %v15742_v35, %v6452_v32  ;;  %v8630_v40 = vmax.bf16 %v6482_v17, %v6481_v49  ;;  %v8359_v34 = vmax.bf16 %v8358_v7, %v6355_v37  ;;  %v8326_v30 = vmax.bf16 %v15753_v0, %v6340_v29  ;;  %v17534_v7 = vld [vmem:[#allocation158_spill] sm:$0xff]  ;;  %v17535_v49 = vld [vmem:[#allocation159_spill] sm:$0xff] }
 0x884   : > { %17515 = vst [vmem:[#allocation56_spill] sm:$0xff] %v15816_v55  ;;  %17520 = vst [vmem:[#allocation85_spill] sm:$0xff] %v15826_v62  ;;  %v17529_v55 = vld [vmem:[#allocation154_spill] sm:$0xff]  ;;  %v8392_v59 = vmax.bf16 %v6370_v13, %v6369_v38  ;;  %v15856_v62 = vmax.bf16 %v8477_v1, %v6411_v45  ;;  %v6389_v56 = vmul.bf16 %v15860_v57, %v17533_v51  ;;  %v17536_v13 = vld [vmem:[#allocation160_spill] sm:$0xff] }
 0x885   : > { %v6490_v28 = vmul.bf16 %v15792_v48, %v17529_v55  ;;  %v17532_v55 = vld [vmem:[#allocation156_spill] sm:$0xff]  ;;  %v8511_v15 = vmax.bf16 %v6426_v19, %v6425_v2  ;;  %v15864_v35 = vmax.bf16 %v8613_v50, %v6475_v18  ;;  %v6381_v0 = vmul.bf16 %v15860_v57, %v17534_v7  ;;  %v17537_v51 = vld [vmem:[#allocation161_spill] sm:$0xff]  ;;  %v17538_v50 = vld [vmem:[#allocation162_spill] sm:$0xff] }
 0x886   : > { %v6348_v61 = vmul.bf16 %v15812_v39, %v17532_v55  ;;  %v15868_v32 = vmax.bf16 %v8580_v44, %v6460_v14  ;;  %v8376_v1 = vmax.bf16 %v8375_v9, %v6363_v47  ;;  %v6419_v37 = vmul.bf16 %v15806_v58, %v17535_v49  ;;  %v17540_v18 = vld [vmem:[#allocation164_spill] sm:$0xff]  ;;  %v17542_v55 = vld [vmem:[#allocation90_spill] sm:$0xff] }
 0x887   : > { %v15850_v63 = vpop.permute.xlu1 %4972  ;;  %v15854_v11 = vpop.permute.xlu0 %4853  ;;  %v8647_v17 = vmax.bf16 %v6490_v28, %v6489_v52  ;;  %v6404_v38 = vmul.bf16 %v15812_v39, %v17536_v13  ;;  %v6433_v45 = vmul.bf16 %v15798_v43, %v17538_v50  ;;  %v15886_v2 = vmax.bf16 %v8428_v20, %v6389_v56  ;;  %v17541_v28 = vld [vmem:[#allocation35_spill] sm:$0xff]  ;;  %v17543_v49 = vld [vmem:[#allocation48_spill] sm:$0xff]  ;;  %v17546_v56 = vld [vmem:[#allocation89_spill] sm:$0xff] }
 0x888   : > { %17531 = vst [vmem:[#allocation93_spill] sm:$0xff] %v15850_v63  ;;  %v8445_v63 = vmax.bf16 %v8444_v3, %v6396_v6  ;;  %v6434_v3 = vmul.bf16 %v15792_v48, %v17537_v51  ;;  %v17539_v6 = vld [vmem:[#allocation163_spill] sm:$0xff]  ;;  %v15884_v9 = vmax.bf16 %v8342_v54, %v6348_v61  ;;  %v6445_v14 = vmul.bf16 %v15860_v57, %v17540_v18  ;;  %v17544_v51 = vld [vmem:[#allocation40_spill] sm:$0xff]  ;;  %v17545_v54 = vld [vmem:[#allocation42_spill] sm:$0xff] }
 0x889   : > { %v6453_v44 = vmul.bf16 %v15860_v57, %v17539_v6  ;;  %v6483_v52 = vmul.bf16 %v15806_v58, %v17541_v28  ;;  %v8412_v47 = vmax.bf16 %v8411_v21, %v6381_v0  ;;  %v6468_v7 = vmul.bf16 %v15812_v39, %v17542_v55 }
 0x88a   : > { %v6498_v13 = vmul.bf16 %v15792_v48, %v17543_v49  ;;  %v6497_v50 = vmul.bf16 %v15798_v43, %v17544_v51  ;;  %v15898_v61 = vmax.bf16 %v8494_v23, %v6419_v37  ;;  %v6356_v20 = vmul.bf16 %v15812_v39, %v17545_v54 }
 0x88b   : > { %v15872_v29 = vpop.permute.xlu1 %5104  ;;  %v15882_v19 = vpop.permute.xlu0 %5038  ;;  %v6341_v6 = vmul.bf16 %v15860_v57, %v17546_v56  ;;  %v6491_v21 = vmul.bf16 %v15806_v58, %v15520_v5  ;;  %v8462_v18 = vmax.bf16 %v8461_v8, %v6404_v38  ;;  %v15908_v28 = vmax.bf16 %v6434_v3, %v6433_v45  ;;  %v15931_v3 = vld [vmem:[#allocation3 + $0x28] sm:$0xff]  }
 0x88c   : > { %v15910_v48 = vmax.bf16 %v8564_v41, %v6453_v44  ;;  %v6397_v43 = vmul.bf16 %v15860_v57, %v15450_v53  ;;  %v15917_v37 = vmax.bf16 %v15810_v10, %v6445_v14  ;;  %v15919_v55 = vmax.bf16 %v8630_v40, %v6483_v52  ;;  %v15949_v52 = vld [vmem:[#allocation3 + $0x30] sm:$0xff]  }
 0x88d   : > { %v6371_v5 = vmul.bf16 %v15806_v58, %v15458_v46  ;;  %v6492_v8 = vmul.bf16 %v15812_v39, %v15613_v26  ;;  %v15925_v38 = vmax.bf16 %v8597_v25, %v6468_v7  ;;  %v15927_v41 = vmax.bf16 %v6498_v13, %v6497_v50 }
 0x88e   : > { %v6427_v53 = vmul.bf16 %v15806_v58, %v15474_v33  ;;  %v6382_v10 = vmul.bf16 %v15931_v3, %v15526_v60  ;;  %v15935_v40 = vmax.bf16 %v8359_v34, %v6356_v20  ;;  %v15937_v45 = vmax.bf16 %v8326_v30, %v6341_v6 }
 0x88f   : > { %v15906_v0 = vpop.permute.xlu1 %5318  ;;  %v15914_v23 = vpop.permute.xlu0 %5252  ;;  %v8648_v46 = vmax.bf16 %v8647_v17, %v6491_v21  ;;  %v6364_v26 = vmul.bf16 %v15812_v39, %v15528_v42  ;;  %v15943_v44 = vmax.bf16 %v8445_v63, %v6397_v43  ;;  %v6412_v33 = vmul.bf16 %v15812_v39, %v15480_v4  ;;  %v17549_v21 = vld [vmem:[#allocation73_spill] sm:$0xff] }
 0x890   : > { %v6405_v14 = vmul.bf16 %v15860_v57, %v15536_v31  ;;  %v6383_v60 = vmul.bf16 %v15949_v52, %v15676_v12  ;;  %v15953_v30 = vmax.bf16 %v8392_v59, %v6371_v5  ;;  %v6365_v42 = vmul.bf16 %v15860_v57, %v15635_v36  ;;  %v17547_v12 = vld [vmem:[#allocation66_spill] sm:$0xff]  ;;  %v17550_v5 = vld [vmem:[#allocation33_spill] sm:$0xff] }
 0x891   : > { %v8649_v17 = vmax.bf16 %v8648_v46, %v6492_v8  ;;  %v15958_v7 = vmax.bf16 %v8511_v15, %v6427_v53  ;;  %v6476_v4 = vmul.bf16 %v15812_v39, %v15492_v22  ;;  %v6461_v31 = vmul.bf16 %v15860_v57, %v15500_v16  ;;  %v15973_v22 = vld [vmem:[#allocation3 + $0x38] sm:$0xff]   ;;  %v17551_v8 = vld [vmem:[#allocation76_spill] sm:$0xff] }
 0x892   : > { %v8413_v49 = vmax.bf16 %v8412_v47, %v6382_v10  ;;  %v8377_v13 = vmax.bf16 %v8376_v1, %v6364_v26  ;;  %v6390_v59 = vmul.bf16 %v15931_v3, %v17547_v12  ;;  %v6406_v51 = vmul.bf16 %v15931_v3, %v15711_v24  ;;  %v17548_v1 = vld [vmem:[#allocation84_spill] sm:$0xff]  ;;  %v17552_v26 = vld [vmem:[#allocation70_spill] sm:$0xff] }
 0x893   : > { %v15941_v25 = vpop.permute.xlu1 %4756  ;;  %v5385_v34 = vpop.permute.xlu0 %5384  ;;  %v15971_v15 = vmax.bf16 %v15856_v62, %v6412_v33  ;;  %v8463_v54 = vmax.bf16 %v8462_v18, %v6405_v14  ;;  %v6420_v56 = vmul.bf16 %v15812_v39, %v17548_v1  ;;  %v6391_v24 = vmul.bf16 %v15949_v52, %v17549_v21  ;;  %v17555_v12 = vld [vmem:[#allocation58_spill] sm:$0xff] }
 0x894   : > { %v6493_v63 = vmul.bf16 %v15860_v57, %v5385_v34  ;;  %v8414_v20 = vmax.bf16 %v8413_v49, %v6383_v60  ;;  %v8378_v6 = vmax.bf16 %v8377_v13, %v6365_v42  ;;  %v15983_v62 = vmax.bf16 %v15864_v35, %v6476_v4  ;;  %v17553_v49 = vld [vmem:[#allocation82_spill] sm:$0xff]  ;;  %v17554_v13 = vld [vmem:[#allocation37_spill] sm:$0xff] }
 0x895   : > { %v15986_v18 = vmax.bf16 %v15868_v32, %v6461_v31  ;;  %v6435_v53 = vmul.bf16 %v15806_v58, %v17551_v8  ;;  %v8430_v46 = vmax.bf16 %v15886_v2, %v6390_v59  ;;  %v6421_v33 = vmul.bf16 %v15860_v57, %v17552_v26 }
 0x896   : > { %v15968_v50 = vmax.bf16 %v8649_v17, %v6493_v63  ;;  %v8464_v14 = vmax.bf16 %v8463_v54, %v6406_v51  ;;  %v6436_v35 = vmul.bf16 %v15812_v39, %v15735_v27  ;;  %v8496_v4 = vmax.bf16 %v15898_v61, %v6420_v56 }
 0x897   : > { %v4904_v36 = vpop.permute.xlu1 %4903  ;;  %v4823_v47 = vpop.permute.xlu0 %4822  ;;  %v8431_v31 = vmax.bf16 %v8430_v46, %v6391_v24  ;;  %v8529_v51 = vmax.bf16 %v15908_v28, %v6435_v53  ;;  %v17560_v46 = vld [vmem:[#allocation45_spill] sm:$0xff] }
 0x898   : > { %v6384_v16 = vmul.bf16 %v15973_v22, %v4904_v36  ;;  %v6366_v43 = vmul.bf16 %v15931_v3, %v4823_v47  ;;  %9418 = vadd.xlane.f32.xlu0 %v17550_v5  ;;  %v17556_v36 = vld [vmem:[#allocation88_spill] sm:$0xff]  ;;  %v8497_v56 = vmax.bf16 %v8496_v4, %v6421_v33  ;;  %v6447_v26 = vmul.bf16 %v15949_v52, %v17560_v46  ;;  %v17562_v33 = vld [vmem:[#allocation91_spill] sm:$0xff] }
 0x899   : > { %v6454_v27 = vmul.bf16 %v15931_v3, %v17556_v36  ;;  %v17558_v47 = vld [vmem:[#allocation64_spill] sm:$0xff]  ;;  %v8530_v24 = vmax.bf16 %v8529_v51, %v6436_v35  ;;  %v17564_v51 = vld [vmem:[#allocation79_spill] sm:$0xff] }
 0x89a   : > { %v8415_v10 = vmax.bf16 %v8414_v20, %v6384_v16  ;;  %v15993_v60 = vmax.bf16 %v8378_v6, %v6366_v43  ;;  %v17557_v16 = vld [vmem:[#allocation51_spill] sm:$0xff]  ;;  %v6484_v1 = vmul.bf16 %v15812_v39, %v17558_v47  ;;  %v6485_v36 = vmul.bf16 %v15860_v57, %v17564_v51 }
 0x89b   : > { %v5008_v34 = vpop.permute.xlu1 %5007  ;;  %v4942_v63 = vpop.permute.xlu0 %4941  ;;  %v6446_v61 = vmul.bf16 %v15931_v3, %v17557_v16  ;;  %v17559_v43 = vld [vmem:[#allocation47_spill] sm:$0xff] }
 0x89c   : > { %v8416_v17 = vunpack.i.l.bf16 %v8415_v10  ;;  %v8417_v42 = vunpack.i.h.bf16 %v8415_v10  ;;  %v6407_v32 = vmul.bf16 %v15949_v52, %v5008_v34  ;;  %v6392_v2 = vmul.bf16 %v15973_v22, %v4942_v63  ;;  %9422 = vadd.xlane.f32.xlu0 %v17553_v49 }
 0x89d   : > { %9420 = vadd.xlane.f32.xlu1 %v17554_v13  ;;  %v6455_v8 = vmul.bf16 %v15949_v52, %v17559_v43  ;;  %v8566_v63 = vmax.bf16 %v15910_v48, %v6454_v27  ;;  %v17565_v48 = vld [vmem:[#allocation34_spill] sm:$0xff] }
 0x89e   : > { %v8418_v54 = vmax.f32 %v8416_v17, %v8417_v42  ;;  %v16006_v20 = vmax.bf16 %v8464_v14, %v6407_v32  ;;  %v8432_v6 = vmax.bf16 %v8431_v31, %v6392_v2  ;;  %v17561_v42 = vld [vmem:[#allocation46_spill] sm:$0xff]  ;;  %v17563_v32 = vld [vmem:[#allocation63_spill] sm:$0xff]  ;;  %v8549_v2 = vmax.bf16 %v15917_v37, %v6446_v61 }
 0x89f   : > { %v5140_v21 = vpop.permute.xlu1 %5139  ;;  %v5074_v10 = vpop.permute.xlu0 %5073  ;;  %v6349_v35 = vmul.bf16 %v15860_v57, %v17563_v32  ;;  %v8567_v43 = vmax.bf16 %v8566_v63, %v6455_v8  ;;  %v6342_v27 = vmul.bf16 %v15931_v3, %v17565_v48  ;;  %v17566_v61 = vld [vmem:[#allocation75_spill] sm:$0xff] }
 0x8a0   : > { %v8419_v28 = vrot.slane %v8418_v54, 4  ;;  %v6437_v53 = vmul.bf16 %v15860_v57, %v5140_v21  ;;  %v8433_v14 = vunpack.i.l.bf16 %v8432_v6  ;;  %v8434_v34 = vunpack.i.h.bf16 %v8432_v6  ;;  %9424 = vadd.xlane.f32.xlu0 %v17561_v42 }
 0x8a1   : > { %v6422_v17 = vmul.bf16 %v15931_v3, %v5074_v10  ;;  %9426 = vadd.xlane.f32.xlu1 %v17562_v33  ;;  %v8632_v21 = vmax.bf16 %v15919_v55, %v6484_v1  ;;  %v17569_v55 = vld [vmem:[#allocation81_spill] sm:$0xff] }
 0x8a2   : > { %v8420_v4 = vmax.f32 %v8418_v54, %v8419_v28  ;;  %v16023_v31 = vmax.bf16 %v8530_v24, %v6437_v53  ;;  %v8435_v16 = vmax.f32 %v8433_v14, %v8434_v34  ;;  %v8550_v54 = vmax.bf16 %v8549_v2, %v6447_v26  ;;  %v17567_v28 = vld [vmem:[#allocation31_spill] sm:$0xff] }
 0x8a3   : > { %v16028_v47 = vmax.bf16 %v8497_v56, %v6422_v17  ;;  %v5222_v6 = vpop.permute.xlu1 %5221  ;;  %v5187_v32 = vpop.permute.xlu0 %5186  ;;  %v17568_v56 = vld [vmem:[#allocation44_spill] sm:$0xff]  ;;  %v6499_v1 = vmul.bf16 %v15806_v58, %v17569_v55  ;;  %v8633_v34 = vmax.bf16 %v8632_v21, %v6485_v36  ;;  %v17570_v17 = vld [vmem:[#allocation85_spill] sm:$0xff]  ;;  %v17573_v21 = vld [vmem:[#allocation27_spill] sm:$0xff] }
 0x8a4   : > { %v8421_v10 = vrot.slane %v8420_v4, 2  ;;  %v6456_v46 = vmul.bf16 %v15973_v22, %v5222_v6  ;;  %v8436_v24 = vrot.slane %v8435_v16, 4  ;;  %v6448_v37 = vmul.bf16 %v15973_v22, %v5187_v32  ;;  %9428 = vadd.xlane.f32.xlu0 %v17566_v61  ;;  %v17572_v36 = vld [vmem:[#allocation52_spill] sm:$0xff] }
 0x8a5   : > { %9430 = vadd.xlane.f32.xlu1 %v17567_v28  ;;  %v6469_v53 = vmul.bf16 %v15860_v57, %v17568_v56  ;;  %v6343_v63 = vmul.bf16 %v15949_v52, %v17570_v17  ;;  %v8328_v56 = vmax.bf16 %v15937_v45, %v6342_v27 }
 0x8a6   : > { %v8422_v8 = vmax.f32 %v8420_v4, %v8421_v10  ;;  %v8568_v14 = vmax.bf16 %v8567_v43, %v6456_v46  ;;  %v8437_v26 = vmax.f32 %v8435_v16, %v8436_v24  ;;  %v8551_v2 = vmax.bf16 %v8550_v54, %v6448_v37  ;;  %v17571_v43 = vld [vmem:[#allocation67_spill] sm:$0xff]  ;;  %v17574_v37 = vld [vmem:[#allocation28_spill] sm:$0xff] }
 0x8a7   : > { %v5354_v51 = vpop.permute.xlu1 %5353  ;;  %v16044_v61 = vpop.permute.xlu0 %5287  ;;  %v6372_v16 = vmul.bf16 %v15812_v39, %v17573_v21  ;;  %v16054_v24 = vmax.bf16 %v15884_v9, %v6349_v35  ;;  %v6357_v45 = vmul.bf16 %v15860_v57, %v17574_v37  ;;  %v16059_v17 = vmax.bf16 %v15925_v38, %v6469_v53 }
 0x8a8   : > { %v8423_v6 = vrot.slane %v8422_v8, 1  ;;  %v8569_v32 = vunpack.i.l.bf16 %v8568_v14  ;;  %v8570_v48 = vunpack.i.h.bf16 %v8568_v14  ;;  %v6486_v59 = vmul.bf16 %v15931_v3, %v5354_v51  ;;  %9432 = vadd.xlane.f32.xlu0 %v17571_v43 }
 0x8a9   : > { %v8438_v28 = vrot.slane %v8437_v26, 2  ;;  %v8552_v58 = vunpack.i.l.bf16 %v8551_v2  ;;  %v8553_v4 = vunpack.i.h.bf16 %v8551_v2  ;;  %9434 = vadd.xlane.f32.xlu1 %v17572_v36  ;;  %v8329_v2 = vmax.bf16 %v8328_v56, %v6343_v63  ;;  %v17578_v56 = vld [vmem:[#allocation103_spill] sm:$0xff] }
 0x8aa   : > { %v8424_v10 = vmax.f32 %v8422_v8, %v8423_v6  ;;  %v8571_v46 = vmax.f32 %v8569_v32, %v8570_v48  ;;  %v16051_v54 = vmax.bf16 %v8633_v34, %v6486_v59  ;;  %v17575_v59 = vld [vmem:[#allocation29_spill] sm:$0xff]  ;;  %v17576_v32 = vld [vmem:[#allocation38_spill] sm:$0xff]  ;;  %v16072_v38 = vmax.bf16 %v15953_v30, %v6372_v16 }
 0x8ab   : > { %v8439_v27 = vmax.f32 %v8437_v26, %v8438_v28  ;;  %v8554_v55 = vmax.f32 %v8552_v58, %v8553_v4  ;;  %v4726_v14 = vpop.permute.xlu1 %4725  ;;  %v16062_v8 = vpop.permute.xlu0 %5419  ;;  %v6398_v34 = vmul.bf16 %v15931_v3, %v17575_v59  ;;  %v17577_v28 = vld [vmem:[#allocation53_spill] sm:$0xff]  ;;  %v16069_v26 = vmax.bf16 %v15927_v41, %v6499_v1 }
 0x8ac   : > { %v8572_v51 = vrot.slane %v8571_v46, 4  ;;  %v6344_v21 = vmul.bf16 %v15973_v22, %v4726_v14  ;;  %v8425_v9 = vpack.i.bf16 %v8424_v10, %v8424_v10  ;;  %9436 = vadd.xlane.f32.xlu0 %v17576_v32  ;;  %v16075_v48 = vmax.bf16 %v15935_v40, %v6357_v45  ;;  %v17579_v14 = vld [vmem:[#allocation93_spill] sm:$0xff] }
 0x8ad   : > { %v8440_v35 = vrot.slane %v8439_v27, 1  ;;  %v8555_v6 = vrot.slane %v8554_v55, 4  ;;  %9438 = vadd.xlane.f32.xlu1 %v17577_v28  ;;  %v6413_v58 = vmul.bf16 %v15860_v57, %v17578_v56  ;;  %v6399_v59 = vmul.bf16 %v15949_v52, %v17579_v14  ;;  %v17584_v14 = vld [vmem:[#allocation54_spill] sm:$0xff] }
 0x8ae   : > { %v8573_v53 = vmax.f32 %v8571_v46, %v8572_v51  ;;  %v8330_v63 = vmax.bf16 %v8329_v2, %v6344_v21  ;;  %v8447_v16 = vmax.bf16 %v15943_v44, %v6398_v34  ;;  %v17580_v46 = vmov 0   ;;  %v17581_v51 = vld [vmem:[#allocation59_spill] sm:$0xff]  ;;  %v17583_v21 = vld [vmem:[#allocation32_spill] sm:$0xff] }
 0x8af   : > { %v8441_v4 = vmax.f32 %v8439_v27, %v8440_v35  ;;  %v8556_v10 = vmax.f32 %v8554_v55, %v8555_v6  ;;  %v16079_v37 = vpop.permute.xlu1 %4857  ;;  %v16083_v30 = vpop.permute.xlu0 %4791  ;;  %v8793_v40 = vmax.bf16 %v17580_v46, %v8425_v9  ;;  %v17582_v27 = vld [vmem:[#allocation55_spill] sm:$0xff]  ;;  %v6428_v35 = vmul.bf16 %v15812_v39, %v17583_v21 }
 0x8b0   : > { %v8574_v41 = vrot.slane %v8573_v53, 2  ;;  %v8331_v1 = vunpack.i.l.bf16 %v8330_v63  ;;  %v8332_v32 = vunpack.i.h.bf16 %v8330_v63  ;;  %9440 = vadd.xlane.f32.xlu0 %v17581_v51  ;;  %v6462_v55 = vmul.bf16 %v15931_v3, %v17582_v27 }
 0x8b1   : > { %v8442_v45 = vpack.i.bf16 %v8441_v4, %v8441_v4  ;;  %v8557_v2 = vrot.slane %v8556_v10, 2  ;;  %v16093_v63 = vmax.bf16 %v15971_v15, %v6413_v58  ;;  %v6477_v44 = vmul.bf16 %v15860_v57, %v17584_v14 }
 0x8b2   : > { %v8575_v6 = vmax.f32 %v8573_v53, %v8574_v41  ;;  %v8333_v56 = vmax.f32 %v8331_v1, %v8332_v32  ;;  %v8448_v51 = vmax.bf16 %v8447_v16, %v6399_v59  ;;  %v6463_v27 = vmul.bf16 %v15949_v52, %v15914_v23 }
 0x8b3   : > { %v8794_v34 = vmax.bf16 %v17580_v46, %v8442_v45  ;;  %v8558_v9 = vmax.f32 %v8556_v10, %v8557_v2  ;;  %v16098_v4 = vpop.permute.xlu1 %5042  ;;  %v4977_v21 = vpop.permute.xlu0 %4976  ;;  %v9083_v53 = vunpack.c.l.b16 %v8793_v40  ;;  %v8583_v58 = vmax.bf16 %v15986_v18, %v6462_v55  ;;  %v17585_v18 = vld [vmem:[#allocation36_spill] sm:$0xff] }
 0x8b4   : > { %v8576_v28 = vrot.slane %v8575_v6, 1  ;;  %v8334_v43 = vrot.slane %v8333_v56, 4  ;;  %v6400_v15 = vmul.bf16 %v15973_v22, %v4977_v21  ;;  %v8513_v1 = vmax.bf16 %v15958_v7, %v6428_v35  ;;  %v17587_v35 = vld [vmem:[#allocation30_spill] sm:$0xff] }
 0x8b5   : > { %v9084_v32 = vunpack.c.l.b16 %v8794_v34  ;;  %v8559_v41 = vrot.slane %v8558_v9, 1  ;;  %v8616_v2 = vmax.bf16 %v15983_v62, %v6477_v44  ;;  %v8584_v36 = vmax.bf16 %v8583_v58, %v6463_v27  ;;  %v17586_v62 = vld [vmem:[#allocation94_spill] sm:$0xff] }
 0x8b6   : > { %v8577_v45 = vmax.f32 %v8575_v6, %v8576_v28  ;;  %v8335_v10 = vmax.f32 %v8333_v56, %v8334_v43  ;;  %v8449_v16 = vmax.bf16 %v8448_v51, %v6400_v15  ;;  %v6350_v7 = vmul.bf16 %v15931_v3, %v17585_v18 }
 0x8b7   : > { %v8560_v59 = vmax.f32 %v8558_v9, %v8559_v41  ;;  %v5257_v14 = vpop.permute.xlu1 %5256  ;;  %v16107_v23 = vsel %vm9099_vm0, %v9084_v32, %v9083_v53  ;;  %v16110_v21 = vpop.permute.xlu0 %5108  ;;  %v6470_v51 = vmul.bf16 %v15931_v3, %v17586_v62  ;;  %v6500_v6 = vmul.bf16 %v15812_v39, %v17587_v35  ;;  %v17588_v9 = vld [vmem:[#allocation56_spill] sm:$0xff] }
 0x8b8   : > { %v8578_v40 = vpack.i.bf16 %v8577_v45, %v8577_v45  ;;  %v8336_v34 = vrot.slane %v8335_v10, 2  ;;  %v6464_v42 = vmul.bf16 %v15973_v22, %v5257_v14  ;;  %v8450_v43 = vunpack.i.l.bf16 %v8449_v16 }
 0x8b9   : > { %v8561_v28 = vpack.i.bf16 %v8560_v59, %v8560_v59  ;;  %v8451_v55 = vunpack.i.h.bf16 %v8449_v16  ;;  %v6358_v27 = vmul.bf16 %v15931_v3, %v17588_v9  ;;  %v6373_v53 = vmul.bf16 %v15860_v57, %v15854_v11 }
 0x8ba   : > { %v8802_v56 = vmax.bf16 %v17580_v46, %v8578_v40  ;;  %v8585_v44 = vmax.bf16 %v8584_v36, %v6464_v42  ;;  %v8337_v45 = vmax.f32 %v8335_v10, %v8336_v34  ;;  %v6429_v39 = vmul.bf16 %v15860_v57, %v15872_v29 }
 0x8bb   : > { %v8801_v32 = vmax.bf16 %v17580_v46, %v8561_v28  ;;  %v8452_v41 = vmax.f32 %v8450_v43, %v8451_v55  ;;  %v16124_v15 = vpop.permute.xlu1 %5388  ;;  %v16126_v14 = vpop.permute.xlu0 %5322  ;;  %v6351_v42 = vmul.bf16 %v15949_v52, %v15941_v25  ;;  %v8345_v11 = vmax.bf16 %v16054_v24, %v6350_v7 }
 0x8bc   : > { %v9092_v58 = vunpack.c.l.b16 %v8802_v56  ;;  %v8586_v59 = vunpack.i.l.bf16 %v8585_v44  ;;  %v8587_v16 = vunpack.i.h.bf16 %v8585_v44  ;;  %v8600_v18 = vmax.bf16 %v16059_v17, %v6470_v51 }
 0x8bd   : > { %v9091_v36 = vunpack.c.l.b16 %v8801_v32  ;;  %v8453_v40 = vrot.slane %v8452_v41, 4  ;;  %v8666_v28 = vmax.bf16 %v16069_v26, %v6500_v6  ;;  %v8362_v10 = vmax.bf16 %v16075_v48, %v6358_v27 }
 0x8be   : > { %v8588_v43 = vmax.f32 %v8586_v59, %v8587_v16  ;;  %v6414_v34 = vmul.bf16 %v15931_v3, %v15882_v19  ;;  %v8395_v25 = vmax.bf16 %v16072_v38, %v6373_v53  ;;  %v6478_v24 = vmul.bf16 %v15931_v3, %v15906_v0 }
 0x8bf   : > { %v8454_v55 = vmax.f32 %v8452_v41, %v8453_v40  ;;  %v16138_v62 = vpop.permute.xlu1 %4826  ;;  %v16141_v29 = vsel %vm9099_vm0, %v9092_v58, %v9091_v36  ;;  %v8338_v17 = vrot.slane %v8337_v45, 1  ;;  %v4761_v26 = vpop.permute.xlu0 %4760  ;;  %v8514_v51 = vmax.bf16 %v8513_v1, %v6429_v39 }
 0x8c0   : > { %v8589_v7 = vrot.slane %v8588_v43, 4  ;;  %v8346_v35 = vmax.bf16 %v8345_v11, %v6351_v42  ;;  %v6352_v6 = vmul.bf16 %v15973_v22, %v4761_v26  ;;  %v6471_v19 = vmul.bf16 %v15949_v52, %v16044_v61 }
 0x8c1   : > { %v8455_v48 = vrot.slane %v8454_v55, 2  ;;  %v6501_v56 = vmul.bf16 %v15860_v57, %v16062_v8  ;;  %v6374_v38 = vmul.bf16 %v15931_v3, %v16079_v37  ;;  %v8481_v0 = vmax.bf16 %v16093_v63, %v6414_v34 }
 0x8c2   : > { %v8590_v44 = vmax.f32 %v8588_v43, %v8589_v7  ;;  %v6359_v9 = vmul.bf16 %v15949_v52, %v16083_v30  ;;  %v8347_v27 = vmax.bf16 %v8346_v35, %v6352_v6  ;;  %v8617_v32 = vmax.bf16 %v8616_v2, %v6478_v24 }
 0x8c3   : > { %v8456_v1 = vmax.f32 %v8454_v55, %v8455_v48  ;;  %v16156_v53 = vpop.permute.xlu1 %5077  ;;  %v8339_v41 = vmax.f32 %v8337_v45, %v8338_v17  ;;  %v6415_v61 = vmul.bf16 %v15949_v52, %v16098_v4  ;;  %v5012_v57 = vpop.permute.xlu0 %5011  ;;  %v8601_v63 = vmax.bf16 %v8600_v18, %v6471_v19 }
 0x8c4   : > { %v8591_v58 = vrot.slane %v8590_v44, 2  ;;  %v8348_v59 = vunpack.i.l.bf16 %v8347_v27  ;;  %v8349_v37 = vunpack.i.h.bf16 %v8347_v27  ;;  %v6408_v16 = vmul.bf16 %v15973_v22, %v5012_v57 }
 0x8c5   : > { %v8457_v8 = vrot.slane %v8456_v1, 1  ;;  %v16161_v39 = vmax.bf16 %v8666_v28, %v6501_v56  ;;  %v16163_v30 = vmax.bf16 %v8395_v25, %v6374_v38  ;;  %v8363_v36 = vmax.bf16 %v8362_v10, %v6359_v9 }
 0x8c6   : > { %v8592_v42 = vmax.f32 %v8590_v44, %v8591_v58  ;;  %v8350_v2 = vmax.f32 %v8348_v59, %v8349_v37  ;;  %v8466_v45 = vmax.bf16 %v16006_v20, %v6408_v16  ;;  %v8340_v4 = vpack.i.bf16 %v8339_v41, %v8339_v41 }
 0x8c7   : > { %v8458_v40 = vmax.f32 %v8456_v1, %v8457_v8  ;;  %v5292_v11 = vpop.permute.xlu1 %5291  ;;  %v16166_v43 = vmax.bf16 %v8481_v0, %v6415_v61  ;;  %v5144_v24 = vpop.permute.xlu0 %5143  ;;  %v6430_v10 = vmul.bf16 %v15931_v3, %v16110_v21  ;;  %v6494_v26 = vmul.bf16 %v15931_v3, %v16124_v15 }
 0x8c8   : > { %v8593_v34 = vrot.slane %v8592_v42, 1  ;;  %v6472_v55 = vmul.bf16 %v15973_v22, %v5292_v11  ;;  %v8351_v18 = vrot.slane %v8350_v2, 4  ;;  %v8467_v28 = vunpack.i.l.bf16 %v8466_v45 }
 0x8c9   : > { %v8459_v17 = vpack.i.bf16 %v8458_v40, %v8458_v40  ;;  %v8468_v7 = vunpack.i.h.bf16 %v8466_v45  ;;  %v6479_v48 = vmul.bf16 %v15949_v52, %v16126_v14  ;;  %v8788_v38 = vmax.bf16 %v17580_v46, %v8340_v4 }
 0x8ca   : > { %v8594_v25 = vmax.f32 %v8592_v42, %v8593_v34  ;;  %v8602_v20 = vmax.bf16 %v8601_v63, %v6472_v55  ;;  %v8352_v6 = vmax.f32 %v8350_v2, %v8351_v18  ;;  %v6367_v21 = vmul.bf16 %v15949_v52, %v16138_v62 }
 0x8cb   : > { %v8795_v35 = vmax.bf16 %v17580_v46, %v8459_v17  ;;  %v8469_v19 = vmax.f32 %v8467_v28, %v8468_v7  ;;  %v5424_v56 = vpop.permute.xlu1 %5423  ;;  %v5358_v1 = vpop.permute.xlu0 %5357  ;;  %v16180_v58 = vmax.bf16 %v8514_v51, %v6430_v10  ;;  %v16183_v14 = vmax.bf16 %v15968_v50, %v6494_v26 }
 0x8cc   : > { %v8595_v44 = vpack.i.bf16 %v8594_v25, %v8594_v25  ;;  %v8603_v0 = vunpack.i.l.bf16 %v8602_v20  ;;  %v8604_v9 = vunpack.i.h.bf16 %v8602_v20  ;;  %v8353_v15 = vrot.slane %v8352_v6, 2  ;;  %v17589_v20 = vld [vmem:[#allocation87_spill] sm:$0xff] }
 0x8cd   : > { %v9085_v27 = vunpack.c.l.b16 %v8795_v35  ;;  %v8470_v41 = vrot.slane %v8469_v19, 4  ;;  %v8618_v8 = vmax.bf16 %v8617_v32, %v6479_v48  ;;  %v9078_v42 = vunpack.c.l.b16 %v8788_v38 }
 0x8ce   : > { %v8803_v61 = vmax.bf16 %v17580_v46, %v8595_v44  ;;  %v8605_v57 = vmax.f32 %v8603_v0, %v8604_v9  ;;  %v8354_v59 = vmax.f32 %v8352_v6, %v8353_v15  ;;  %v6423_v40 = vmul.bf16 %v15949_v52, %v16156_v53 }
 0x8cf   : > { %v8471_v37 = vmax.f32 %v8469_v19, %v8470_v41  ;;  %v4862_v16 = vpop.permute.xlu1 %4861  ;;  %v16187_v63 = vsel %vm9101_vm1, %v9085_v27, %v16107_v23  ;;  %v4796_v51 = vpop.permute.xlu0 %4795  ;;  %v16192_v45 = vmax.bf16 %v15993_v60, %v6367_v21  ;;  %v6438_v34 = vmul.bf16 %v15931_v3, %v5144_v24 }
 0x8d0   : > { %v9093_v62 = vunpack.c.l.b16 %v8803_v61  ;;  %v8606_v2 = vrot.slane %v8605_v57, 4  ;;  %v8355_v50 = vrot.slane %v8354_v59, 1  ;;  %v6360_v32 = vmul.bf16 %v15973_v22, %v4796_v51 }
 0x8d1   : > { %v8472_v11 = vrot.slane %v8471_v37, 2  ;;  %v6502_v23 = vmul.bf16 %v15931_v3, %v5424_v56  ;;  %v6487_v18 = vmul.bf16 %v15949_v52, %v5358_v1  ;;  %v8499_v7 = vmax.bf16 %v16028_v47, %v6423_v40 }
 0x8d2   : > { %v8607_v4 = vmax.f32 %v8605_v57, %v8606_v2  ;;  %v16199_v55 = vsel %vm9101_vm1, %v9093_v62, %v16141_v29  ;;  %v8356_v17 = vmax.f32 %v8354_v59, %v8355_v50  ;;  %v8364_v28 = vmax.bf16 %v8363_v36, %v6360_v32 }
 0x8d3   : > { %v8473_v53 = vmax.f32 %v8471_v37, %v8472_v11  ;;  %v5113_v60 = vpop.permute.xlu1 %5112  ;;  %v6375_v10 = vmul.bf16 %v15949_v52, %v4862_v16  ;;  %v5047_v26 = vpop.permute.xlu0 %5046  ;;  %v9199_v24 = vsel %vm9103_vm2, %v9078_v42, %v17589_v20  ;;  %v16207_v19 = vmax.bf16 %v16023_v31, %v6438_v34 }
 0x8d4   : > { %v8608_v25 = vrot.slane %v8607_v4, 2  ;;  %v8357_v3 = vpack.i.bf16 %v8356_v17, %v8356_v17  ;;  %v8365_v48 = vunpack.i.l.bf16 %v8364_v28  ;;  %v8366_v29 = vunpack.i.h.bf16 %v8364_v28 }
 0x8d5   : > { %v8474_v35 = vrot.slane %v8473_v53, 1  ;;  %v16210_v36 = vmax.bf16 %v16161_v39, %v6502_v23  ;;  %v6416_v47 = vmul.bf16 %v15973_v22, %v5047_v26  ;;  %v8635_v44 = vmax.bf16 %v16051_v54, %v6487_v18 }
 0x8d6   : > { %v8609_v6 = vmax.f32 %v8607_v4, %v8608_v25  ;;  %v8789_v56 = vmax.bf16 %v17580_v46, %v8357_v3  ;;  %v8367_v0 = vmax.f32 %v8365_v48, %v8366_v29  ;;  %v16216_v27 = vmax.bf16 %v16163_v30, %v6375_v10 }
 0x8d7   : > { %v8475_v38 = vmax.f32 %v8473_v53, %v8474_v35  ;;  %v5393_v9 = vpop.permute.xlu1 %5392  ;;  %v6431_v21 = vmul.bf16 %v15949_v52, %v5113_v60  ;;  %v8483_v31 = vmax.bf16 %v16166_v43, %v6416_v47  ;;  %v5327_v15 = vpop.permute.xlu0 %5326 }
 0x8d8   : > { %v8610_v1 = vrot.slane %v8609_v6, 1  ;;  %v9079_v39 = vunpack.c.l.b16 %v8789_v56  ;;  %v8368_v61 = vrot.slane %v8367_v0, 4  ;;  %v6480_v57 = vmul.bf16 %v15973_v22, %v5327_v15 }
 0x8d9   : > { %v8476_v41 = vpack.i.bf16 %v8475_v38, %v8475_v38  ;;  %v8484_v37 = vunpack.i.l.bf16 %v8483_v31  ;;  %v8485_v16 = vunpack.i.h.bf16 %v8483_v31  ;;  %v6495_v54 = vmul.bf16 %v15949_v52, %v5393_v9 }
 0x8da   : > { %v8611_v59 = vmax.f32 %v8609_v6, %v8610_v1  ;;  %v8369_v62 = vmax.f32 %v8367_v0, %v8368_v61  ;;  %v8619_v30 = vmax.bf16 %v8618_v8, %v6480_v57  ;;  %v16224_v2 = vsel %vm9105_vm3, %v9079_v39, %v9199_v24 }
 0x8db   : > { %v8796_v42 = vmax.bf16 %v17580_v46, %v8476_v41  ;;  %v5082_v40 = vpop.permute.xlu1 %5081  ;;  %v16227_v51 = vmax.bf16 %v16180_v58, %v6431_v21  ;;  %v8486_v50 = vmax.f32 %v8484_v37, %v8485_v16  ;;  %v4831_v32 = vpop.permute.xlu0 %4830  ;;  %v8652_v25 = vmax.bf16 %v16183_v14, %v6495_v54 }
 0x8dc   : > { %v8612_v43 = vpack.i.bf16 %v8611_v59, %v8611_v59  ;;  %v6424_v11 = vmul.bf16 %v15973_v22, %v5082_v40  ;;  %v8370_v34 = vrot.slane %v8369_v62, 2  ;;  %v8620_v23 = vunpack.i.l.bf16 %v8619_v30 }
 0x8dd   : > { %v9086_v4 = vunpack.c.l.b16 %v8796_v42  ;;  %v8621_v17 = vunpack.i.h.bf16 %v8619_v30  ;;  %v8487_v18 = vrot.slane %v8486_v50, 4  ;;  %v6368_v28 = vmul.bf16 %v15973_v22, %v4831_v32 }
 0x8de   : > { %v8804_v53 = vmax.bf16 %v17580_v46, %v8612_v43  ;;  %v8500_v8 = vmax.bf16 %v8499_v7, %v6424_v11  ;;  %v8371_v60 = vmax.f32 %v8369_v62, %v8370_v34 }
 0x8df   : > { %v8622_v10 = vmax.f32 %v8620_v23, %v8621_v17  ;;  %v5362_v58 = vpop.permute.xlu1 %5361  ;;  %v16235_v26 = vsel %vm9103_vm2, %v9086_v4, %v16187_v63  ;;  %v8488_v24 = vmax.f32 %v8486_v50, %v8487_v18  ;;  %v5148_v48 = vpop.permute.xlu0 %5147  ;;  %v8381_v7 = vmax.bf16 %v16192_v45, %v6368_v28 }
 0x8e0   : > { %v9094_v20 = vunpack.c.l.b16 %v8804_v53  ;;  %v8501_v3 = vunpack.i.l.bf16 %v8500_v8  ;;  %v8502_v35 = vunpack.i.h.bf16 %v8500_v8  ;;  %v8372_v29 = vrot.slane %v8371_v60, 1 }
 0x8e1   : > { %v8623_v6 = vrot.slane %v8622_v10, 4  ;;  %v6488_v47 = vmul.bf16 %v15973_v22, %v5362_v58  ;;  %v8489_v56 = vrot.slane %v8488_v24, 2  ;;  %v6439_v14 = vmul.bf16 %v15949_v52, %v5148_v48 }
 0x8e2   : > { %v8503_v38 = vmax.f32 %v8501_v3, %v8502_v35  ;;  %v16242_v0 = vsel %vm9103_vm2, %v9094_v20, %v16199_v55  ;;  %v16244_v63 = vmax.f32 %v8371_v60, %v8372_v29  ;;  %v8382_v1 = vunpack.i.l.bf16 %v8381_v7 }
 0x8e3   : > { %v8624_v9 = vmax.f32 %v8622_v10, %v8623_v6  ;;  %v8383_v21 = vunpack.i.h.bf16 %v8381_v7  ;;  %v4866_v31 = vpop.permute.xlu1 %4865  ;;  %v8490_v15 = vmax.f32 %v8488_v24, %v8489_v56  ;;  %v8636_v41 = vmax.bf16 %v8635_v44, %v6488_v47  ;;  %v5428_v61 = vpop.permute.xlu0 %5427 }
 0x8e4   : > { %v8504_v39 = vrot.slane %v8503_v38, 4  ;;  %v16247_v45 = vmax.bf16 %v16207_v19, %v6439_v14  ;;  %v8374_v57 = vpack.i.bf16 %v16244_v63, %v16244_v63  ;;  %v6376_v55 = vmul.bf16 %v15973_v22, %v4866_v31 }
 0x8e5   : > { %v8625_v59 = vrot.slane %v8624_v9, 2  ;;  %v8384_v37 = vmax.f32 %v8382_v1, %v8383_v21  ;;  %v8491_v16 = vrot.slane %v8490_v15, 1  ;;  %v8637_v42 = vunpack.i.l.bf16 %v8636_v41 }
 0x8e6   : > { %v8505_v54 = vmax.f32 %v8503_v38, %v8504_v39  ;;  %v8638_v62 = vunpack.i.h.bf16 %v8636_v41  ;;  %v8398_v43 = vmax.bf16 %v16216_v27, %v6376_v55  ;;  %v6503_v44 = vmul.bf16 %v15949_v52, %v5428_v61 }
 0x8e7   : > { %v8626_v30 = vmax.f32 %v8624_v9, %v8625_v59  ;;  %v8385_v40 = vrot.slane %v8384_v37, 4  ;;  %v5397_v19 = vpop.permute.xlu1 %5396  ;;  %v8492_v50 = vmax.f32 %v8490_v15, %v8491_v16  ;;  %v5117_v18 = vpop.permute.xlu0 %5116 }
 0x8e8   : > { %v8506_v11 = vrot.slane %v8505_v54, 2  ;;  %v8639_v32 = vmax.f32 %v8637_v42, %v8638_v62  ;;  %v6496_v4 = vmul.bf16 %v15973_v22, %v5397_v19  ;;  %v8399_v17 = vunpack.i.l.bf16 %v8398_v43 }
 0x8e9   : > { %v8627_v34 = vrot.slane %v8626_v30, 1  ;;  %v8386_v23 = vmax.f32 %v8384_v37, %v8385_v40  ;;  %v8400_v53 = vunpack.i.h.bf16 %v8398_v43  ;;  %v8493_v8 = vpack.i.bf16 %v8492_v50, %v8492_v50 }
 0x8ea   : > { %v8507_v28 = vmax.f32 %v8505_v54, %v8506_v11  ;;  %v8640_v60 = vrot.slane %v8639_v32, 4  ;;  %v8669_v10 = vmax.bf16 %v16210_v36, %v6503_v44  ;;  %v8653_v52 = vmax.bf16 %v8652_v25, %v6496_v4 }
 0x8eb   : > { %v8628_v58 = vmax.f32 %v8626_v30, %v8627_v34  ;;  %v8387_v27 = vrot.slane %v8386_v23, 2  ;;  %v8401_v20 = vmax.f32 %v8399_v17, %v8400_v53  ;;  %v16257_v24 = vmax.bf16 %v17580_v46, %v8493_v8  ;;  %v5432_v56 = vpop.permute.xlu1 %5431  ;;  %v5152_v59 = vpop.permute.xlu0 %5151 }
 0x8ec   : > { %v8508_v3 = vrot.slane %v8507_v28, 1  ;;  %v8641_v35 = vmax.f32 %v8639_v32, %v8640_v60  ;;  %v6432_v48 = vmul.bf16 %v15973_v22, %v5117_v18  ;;  %v8654_v47 = vunpack.i.l.bf16 %v8653_v52 }
 0x8ed   : > { %v8629_v29 = vpack.i.bf16 %v8628_v58, %v8628_v58  ;;  %v8388_v6 = vmax.f32 %v8386_v23, %v8387_v27  ;;  %v8402_v7 = vrot.slane %v8401_v20, 4  ;;  %v9087_v38 = vunpack.c.l.b16 %v16257_v24 }
 0x8ee   : > { %v8509_v14 = vmax.f32 %v8507_v28, %v8508_v3  ;;  %v8642_v36 = vrot.slane %v8641_v35, 2  ;;  %v8655_v9 = vunpack.i.h.bf16 %v8653_v52  ;;  %v8517_v31 = vmax.bf16 %v16227_v51, %v6432_v48 }
 0x8ef   : > { %v16262_v1 = vmax.bf16 %v17580_v46, %v8629_v29  ;;  %v8389_v25 = vrot.slane %v8388_v6, 1  ;;  %v8403_v21 = vmax.f32 %v8401_v20, %v8402_v7  ;;  %v6504_v61 = vmul.bf16 %v15973_v22, %v5432_v56 }
 0x8f0   : > { %v8510_v15 = vpack.i.bf16 %v8509_v14, %v8509_v14  ;;  %v8643_v39 = vmax.f32 %v8641_v35, %v8642_v36  ;;  %v8656_v41 = vmax.f32 %v8654_v47, %v8655_v9  ;;  %v8518_v54 = vunpack.i.l.bf16 %v8517_v31 }
 0x8f1   : > { %v9095_v37 = vunpack.c.l.b16 %v16262_v1  ;;  %v8390_v55 = vmax.f32 %v8388_v6, %v8389_v25  ;;  %v8404_v16 = vrot.slane %v8403_v21, 2  ;;  %v8519_v30 = vunpack.i.h.bf16 %v8517_v31 }
 0x8f2   : > { %v8644_v42 = vrot.slane %v8643_v39, 1  ;;  %v8657_v62 = vrot.slane %v8656_v41, 4  ;;  %v8670_v40 = vmax.bf16 %v8669_v10, %v6504_v61  ;;  %v6440_v19 = vmul.bf16 %v15973_v22, %v5152_v59  ;;  %v17590_v59 = vld [vmem:[#allocation41_spill] sm:$0xff] }
 0x8f3   : > { %v8391_v43 = vpack.i.bf16 %v8390_v55, %v8390_v55  ;;  %v8405_v44 = vmax.f32 %v8403_v21, %v8404_v16  ;;  %v8790_v51 = vmax.bf16 %v17580_v46, %v8374_v57  ;;  %v8520_v32 = vmax.f32 %v8518_v54, %v8519_v30 }
 0x8f4   : > { %v8645_v50 = vmax.f32 %v8643_v39, %v8644_v42  ;;  %v8658_v11 = vmax.f32 %v8656_v41, %v8657_v62  ;;  %v8671_v4 = vunpack.i.l.bf16 %v8670_v40  ;;  %v8672_v23 = vunpack.i.h.bf16 %v8670_v40 }
 0x8f5   : > { %v8406_v34 = vrot.slane %v8405_v44, 1  ;;  %v8534_v17 = vmax.bf16 %v16247_v45, %v6440_v19  ;;  %v8791_v53 = vmax.bf16 %v17580_v46, %v8391_v43  ;;  %v8521_v28 = vrot.slane %v8520_v32, 4 }
 0x8f6   : > { %v8646_v18 = vpack.i.bf16 %v8645_v50, %v8645_v50  ;;  %v8659_v8 = vrot.slane %v8658_v11, 2  ;;  %v9080_v60 = vunpack.c.l.b16 %v8790_v51  ;;  %v8673_v22 = vmax.f32 %v8671_v4, %v8672_v23 }
 0x8f7   : > { %v8535_v10 = vunpack.i.l.bf16 %v8534_v17  ;;  %v8536_v58 = vunpack.i.h.bf16 %v8534_v17  ;;  %v8407_v63 = vmax.f32 %v8405_v44, %v8406_v34  ;;  %v8522_v57 = vmax.f32 %v8520_v32, %v8521_v28 }
 0x8f8   : > { %v8660_v27 = vmax.f32 %v8658_v11, %v8659_v8  ;;  %v9081_v20 = vunpack.c.l.b16 %v8791_v53  ;;  %v9201_v52 = vsel %vm9107_vm4, %v9080_v60, %v16224_v2  ;;  %v8674_v24 = vrot.slane %v8673_v22, 4 }
 0x8f9   : > { %v8537_v3 = vmax.f32 %v8535_v10, %v8536_v58  ;;  %v8408_v35 = vpack.i.bf16 %v8407_v63, %v8407_v63  ;;  %v8798_v45 = vmax.bf16 %v17580_v46, %v8510_v15  ;;  %v8523_v29 = vrot.slane %v8522_v57, 2 }
 0x8fa   : > { %v8661_v48 = vrot.slane %v8660_v27, 1  ;;  %v9202_v6 = vsel %vm9109_vm5, %v9081_v20, %v9201_v52  ;;  %v8806_v7 = vmax.bf16 %v17580_v46, %v8646_v18  ;;  %v8675_v47 = vmax.f32 %v8673_v22, %v8674_v24  ;;  %v17593_v52 = vld [vmem:[#allocation92_spill] sm:$0xff] }
 0x8fb   : > { %v8538_v56 = vrot.slane %v8537_v3, 4  ;;  %v8792_v14 = vmax.bf16 %v17580_v46, %v8408_v35  ;;  %v9088_v36 = vunpack.c.l.b16 %v8798_v45  ;;  %v8524_v1 = vmax.f32 %v8522_v57, %v8523_v29  ;;  %v17594_v45 = vld [vmem:[#allocation86_spill] sm:$0xff]  ;;  %v695_v29 = vpop.f32.mrf.mxu0 }
 0x8fc   : > { %v8662_v9 = vmax.f32 %v8660_v27, %v8661_v48  ;;  %v9096_v25 = vunpack.c.l.b16 %v8806_v7  ;;  %v9207_v2 = vsel %vm9105_vm3, %v9087_v38, %v16235_v26  ;;  %v8676_v21 = vrot.slane %v8675_v47, 2  ;;  %v17592_v27 = vld [vmem:[#allocation83_spill] sm:$0xff] }
 0x8fd   : > { %v8539_v31 = vmax.f32 %v8537_v3, %v8538_v56  ;;  %v9082_v15 = vunpack.c.l.b16 %v8792_v14  ;;  %v9208_v39 = vsel %vm9107_vm4, %v9088_v36, %v9207_v2  ;;  %v8525_v61 = vrot.slane %v8524_v1, 1  ;;  %v10326_v3 = vld [vmem:[%s386_s23] ss:$0 sm:$0xff] }
 0x8fe   : > { %v8663_v41 = vpack.i.bf16 %v8662_v9, %v8662_v9  ;;  %v17591_v55 = vunpack.c.l.b16 %v17555_v12  ;;  %v9214_v54 = vsel %vm9105_vm3, %v9095_v37, %v16242_v0  ;;  %v8677_v42 = vmax.f32 %v8675_v47, %v8676_v21  ;;  %v17596_v21 = vld [vmem:[#allocation31_spill] sm:$0xff] }
 0x8ff   : > { %v8540_v62 = vrot.slane %v8539_v31, 2  ;;  %v9203_v30 = vsel %vm9111_vm6, %v9082_v15, %v9202_v6  ;;  %v9215_v26 = vsel %vm9107_vm4, %v9096_v25, %v9214_v54  ;;  %v8526_v38 = vmax.f32 %v8524_v1, %v8525_v61  ;;  %v17595_v25 = vld [vmem:[#allocation46_spill] sm:$0xff]  ;;  %v17597_v15 = vld [vmem:[#allocation75_spill] sm:$0xff] }
 0x900   : > { %v9196_v16 = vsel %vm9111_vm6, %v17591_v55, %v17590_v59  ;;  %v8807_v43 = vmax.bf16 %v17580_v46, %v8663_v41  ;;  %v8678_v44 = vrot.slane %v8677_v42, 1  ;;  %v9467_v14 = vmul.f32 %v17550_v5, %v17550_v5  ;;  %v17598_v41 = vld [vmem:[#allocation52_spill] sm:$0xff]  ;;  %v17599_v59 = vld [vmem:[#allocation67_spill] sm:$0xff] }
 0x901   : > { %v9224_v40 = vpack.c.b16 %v9203_v30, %v9196_v16  ;;  %v8541_v19 = vmax.f32 %v8539_v31, %v8540_v62  ;;  %v8527_v51 = vpack.i.bf16 %v8526_v38, %v8526_v38  ;;  %v9469_v36 = vmul.f32 %v17553_v49, %v17553_v49  ;;  %v17600_v16 = vld [vmem:[#allocation53_spill] sm:$0xff] }
 0x902   : > { %v9097_v12 = vunpack.c.l.b16 %v8807_v43  ;;  %v8679_v11 = vmax.f32 %v8677_v42, %v8678_v44  ;;  %v9468_v9 = vmul.f32 %v17554_v13, %v17554_v13  ;;  %v9471_v1 = vmul.f32 %v17562_v33, %v17562_v33  ;;  %v17601_v42 = vld [vmem:[#allocation38_spill] sm:$0xff] }
 0x903   : > { %10093 = vmatprep.mubr.bf16.mxu1 %v9224_v40  ;;  %v8542_v50 = vrot.slane %v8541_v19, 1  ;;  %v8799_v32 = vmax.bf16 %v17580_v46, %v8527_v51  ;;  %v9470_v2 = vmul.f32 %v17595_v25, %v17595_v25  ;;  %v9473_v31 = vmul.f32 %v17596_v21, %v17596_v21 }
 0x904   : > { %v9216_v0 = vsel %vm9109_vm5, %v9097_v12, %v9215_v26  ;;  %v8680_v4 = vpack.i.bf16 %v8679_v11, %v8679_v11  ;;  %v9475_v61 = vmul.f32 %v17598_v41, %v17598_v41  ;;  %v9474_v55 = vmul.f32 %v17599_v59, %v17599_v59  ;;  %v17602_v26 = vld [vmem:[#allocation59_spill] sm:$0xff] }
 0x905   : > { %v8543_v37 = vmax.f32 %v8541_v19, %v8542_v50  ;;  %v9089_v34 = vunpack.c.l.b16 %v8799_v32  ;;  %v9477_v54 = vmul.f32 %v17600_v16, %v17600_v16  ;;  %v9476_v62 = vmul.f32 %v17601_v42, %v17601_v42 }
 0x906   : > { %v8808_v17 = vmax.bf16 %v17580_v46, %v8680_v4  ;;  %v9478_v38 = vmul.f32 %v17602_v26, %v17602_v26 }
 0x907   : > { %v8544_v23 = vpack.i.bf16 %v8543_v37, %v8543_v37  ;;  %v9209_v53 = vsel %vm9109_vm5, %v9089_v34, %v9208_v39  ;;  %v9472_v39 = vmul.f32 %v17597_v15, %v17597_v15 }
 0x908   : > { %v9098_v8 = vunpack.c.l.b16 %v8808_v17 }
 0x909   : > { %v8800_v18 = vmax.bf16 %v17580_v46, %v8544_v23 }
 0x90a   : > { %v9217_v60 = vsel %vm9111_vm6, %v9098_v8, %v9216_v0 }
 0x90b   : > { %v9090_v28 = vunpack.c.l.b16 %v8800_v18 }
 0x90d   : > { %v9210_v22 = vsel %vm9111_vm6, %v9090_v28, %v9209_v53 }
 0x90e   : > { %v9225_v10 = vpack.c.b16 %v9217_v60, %v9210_v22 }
 0x910   : > { %10094 = vmatmul.mubr.bf16.gmra.mxu1 %v9225_v10 }
 0x921   : > { %v9419_v19 = vpop.xlane.xlu0 %9418 }
 0x922   : > { %v16358_v28 = vmul.f32 0.0078125, %v9419_v19 }
 0x925   : > { %v9423_v51 = vpop.xlane.xlu0 %9422 }
 0x926   : > { %v9421_v12 = vpop.xlane.xlu1 %9420  ;;  %v16360_v60 = vmul.f32 0.0078125, %v9423_v51 }
 0x929   : > { %v9425_v50 = vpop.xlane.xlu0 %9424 }
 0x92a   : > { %v9427_v11 = vpop.xlane.xlu1 %9426 }
 0x92d   : > { %v9429_v32 = vpop.xlane.xlu0 %9428 }
 0x92e   : > { %v9431_v0 = vpop.xlane.xlu1 %9430 }
 0x931   : > { %v9433_v37 = vpop.xlane.xlu0 %9432 }
 0x932   : > { %v9435_v4 = vpop.xlane.xlu1 %9434 }
 0x935   : > { %v9437_v34 = vpop.xlane.xlu0 %9436 }
 0x936   : > { %v16348_v23 = vpop.xlane.xlu1 %9438 }
 0x939   : > { %v16350_v17 = vpop.xlane.xlu0 %9440 }
 0x9d0   : > { %v10095_v58 = vpop.f32.mrf.mxu1 }
 0x9d1   : > { %v9393_v24 = vadd.f32 %v10095_v58, %v17593_v52  ;;  %v9531_v58 = vmul.f32 %v16358_v28, %v16358_v28  ;;  %v16370_v52 = vmul.f32 0.0078125, %v9427_v11 }
 0x9d2   : > { %v9364_v63 = vpop.f32.mrf.mxu1 }
 0x9d3   : > { %v9391_v57 = vadd.f32 %v9364_v63, %v17592_v27  ;;  %v16307_v6 = vadd.f32 %v10326_v3, %v9393_v24  ;;  %v16366_v63 = vmul.f32 0.0078125, %v9421_v12  ;;  %v9583_v19 = vsub.f32 %v17562_v33, %v16370_v52 }
 0x9d4   : > { %v10096_v20 = vpop.f32.mrf.mxu1 }
 0x9d5   : > { %v16303_v35 = vadd.f32 %v10326_v3, %v9391_v57  ;;  %v9394_v7 = vadd.f32 %v10096_v20, %v695_v29  ;;  %v9481_v40 = vmul.f32 %v16307_v6, %v16307_v6  ;;  %v9533_v20 = vmul.f32 %v16360_v60, %v16360_v60 }
 0x9d6   : > { %v9367_v46 = vpop.f32.mrf.mxu1 }
 0x9d7   : > { %v9392_v48 = vadd.f32 %v9367_v46, %v17594_v45  ;;  %9442 = vadd.xlane.f32.xlu1 %v16303_v35  ;;  %v16313_v56 = vadd.f32 %v10326_v3, %v9394_v7  ;;  %v9479_v30 = vmul.f32 %v16303_v35, %v16303_v35  ;;  %v9532_v46 = vmul.f32 %v16366_v63, %v16366_v63 }
 0x9d8   : > { %v9579_v7 = vsub.f32 %v17550_v5, %v16358_v28 }
 0x9d9   : > { %v16309_v47 = vadd.f32 %v10326_v3, %v9392_v48  ;;  %v9482_v44 = vmul.f32 %v16313_v56, %v16313_v56 }
 0x9db   : > { %9446 = vadd.xlane.f32.xlu1 %v16307_v6  ;;  %9444 = vadd.xlane.f32.xlu0 %v16309_v47  ;;  %v9480_v43 = vmul.f32 %v16309_v47, %v16309_v47 }
 0x9df   : > { %9483 = vadd.xlane.f32.xlu1 %v9467_v14  ;;  %9448 = vadd.xlane.f32.xlu0 %v16313_v56  ;;  %v16376_v14 = vmul.f32 0.0078125, %v9425_v50 }
 0x9e3   : > { %9487 = vadd.xlane.f32.xlu1 %v9469_v36  ;;  %9485 = vadd.xlane.f32.xlu0 %v9468_v9  ;;  %v16378_v36 = vmul.f32 0.0078125, %v9429_v32 }
 0x9e5   : > { %v9536_v12 = vmul.f32 %v16378_v36, %v16378_v36 }
 0x9e7   : > { %9491 = vadd.xlane.f32.xlu1 %v9471_v1  ;;  %9489 = vadd.xlane.f32.xlu0 %v9470_v2 }
 0x9eb   : > { %9495 = vadd.xlane.f32.xlu1 %v9473_v31  ;;  %9493 = vadd.xlane.f32.xlu0 %v9472_v39  ;;  %v9581_v31 = vsub.f32 %v17553_v49, %v16360_v60  ;;  %v9580_v39 = vsub.f32 %v17554_v13, %v16366_v63 }
 0x9ef   : > { %9499 = vadd.xlane.f32.xlu1 %v9475_v61  ;;  %9497 = vadd.xlane.f32.xlu0 %v9474_v55  ;;  %v9535_v61 = vmul.f32 %v16370_v52, %v16370_v52  ;;  %v16386_v55 = vmul.f32 0.0078125, %v9431_v0 }
 0x9f1   : > { %v9537_v0 = vmul.f32 %v16386_v55, %v16386_v55 }
 0x9f3   : > { %9503 = vadd.xlane.f32.xlu1 %v9477_v54  ;;  %9501 = vadd.xlane.f32.xlu0 %v9476_v62 }
 0x9f7   : > { %9507 = vadd.xlane.f32.xlu1 %v9479_v30  ;;  %9505 = vadd.xlane.f32.xlu0 %v9478_v38 }
 0x9fb   : > { %9511 = vadd.xlane.f32.xlu1 %v9481_v40  ;;  %9509 = vadd.xlane.f32.xlu0 %v9480_v43  ;;  %v9534_v43 = vmul.f32 %v16376_v14, %v16376_v14 }
 0x9ff   : > { %9513 = vadd.xlane.f32.xlu0 %v9482_v44  ;;  %v9582_v44 = vsub.f32 %v17595_v25, %v16376_v14 }
 0xa60   : > { %v16352_v53 = vpop.xlane.xlu1 %9442 }
 0xa64   : > { %v16354_v18 = vpop.xlane.xlu1 %9446  ;;  %v16356_v8 = vpop.xlane.xlu0 %9444 }
 0xa68   : > { %v9484_v22 = vpop.xlane.xlu1 %9483  ;;  %v16362_v10 = vpop.xlane.xlu0 %9448 }
 0xa69   : > { %v9515_v27 = vmul.f32 0.0078125, %v9484_v22  ;;  %v16398_v22 = vmul.f32 0.0078125, %v9433_v37 }
 0xa6b   : > { %v9547_v57 = vsub.f32 %v9515_v27, %v9531_v58  ;;  %v16400_v58 = vmul.f32 0.0078125, %v9435_v4 }
 0xa6c   : > { %v9488_v24 = vpop.xlane.xlu1 %9487  ;;  %v9486_v3 = vpop.xlane.xlu0 %9485 }
 0xa6d   : > { %v9563_v45 = vmax.f32 %v9547_v57, 0.0  ;;  %v9517_v48 = vmul.f32 0.0078125, %v9488_v24  ;;  %v9516_v29 = vmul.f32 0.0078125, %v9486_v3 }
 0xa6f   : > { %v9595_v9 = vadd.f32 1e-05, %v9563_v45  ;;  %v9549_v1 = vsub.f32 %v9517_v48, %v9533_v20  ;;  %v9548_v2 = vsub.f32 %v9516_v29, %v9532_v46  ;;  %v9584_v45 = vsub.f32 %v17597_v15, %v16378_v36 }
 0xa70   : > { %v9492_v54 = vpop.xlane.xlu1 %9491  ;;  %v9490_v62 = vpop.xlane.xlu0 %9489  ;;  %v9585_v48 = vsub.f32 %v17596_v21, %v16386_v55 }
 0xa71   : > { %10238 = vrsqrt.f32 %v9595_v9  ;;  %v9565_v30 = vmax.f32 %v9549_v1, 0.0  ;;  %v9564_v38 = vmax.f32 %v9548_v2, 0.0  ;;  %v9519_v40 = vmul.f32 0.0078125, %v9492_v54 }
 0xa72   : > { %v9518_v51 = vmul.f32 0.0078125, %v9490_v62  ;;  %v16406_v9 = vmul.f32 0.0078125, %v9437_v34  ;;  %v9538_v2 = vmul.f32 %v16398_v22, %v16398_v22  ;;  %v16413_v54 = vmul.f32 0.0078125, %v16348_v23 }
 0xa73   : > { %v9597_v50 = vadd.f32 1e-05, %v9565_v30  ;;  %v9596_v11 = vadd.f32 1e-05, %v9564_v38  ;;  %v9551_v32 = vsub.f32 %v9519_v40, %v9535_v61  ;;  %v9539_v61 = vmul.f32 %v16400_v58, %v16400_v58 }
 0xa74   : > { %v9550_v27 = vsub.f32 %v9518_v51, %v9534_v43  ;;  %v9496_v57 = vpop.xlane.xlu1 %9495  ;;  %v9494_v20 = vpop.xlane.xlu0 %9493  ;;  %v9586_v51 = vsub.f32 %v17599_v59, %v16398_v22 }
 0xa75   : > { %10240 = vrsqrt.f32 %v9597_v50  ;;  %v9567_v24 = vmax.f32 %v9551_v32, 0.0  ;;  %v9521_v3 = vmul.f32 0.0078125, %v9496_v57  ;;  %v9520_v46 = vmul.f32 0.0078125, %v9494_v20 }
 0xa76   : > { %10242 = vrsqrt.f32 %v9596_v11  ;;  %v9566_v29 = vmax.f32 %v9550_v27, 0.0  ;;  %v9540_v11 = vmul.f32 %v16406_v9, %v16406_v9  ;;  %v9541_v27 = vmul.f32 %v16413_v54, %v16413_v54 }
 0xa77   : > { %v9599_v37 = vadd.f32 1e-05, %v9567_v24  ;;  %v9553_v4 = vsub.f32 %v9521_v3, %v9537_v0  ;;  %v9552_v1 = vsub.f32 %v9520_v46, %v9536_v12  ;;  %v16418_v12 = vmul.f32 0.0078125, %v16350_v17 }
 0xa78   : > { %v9598_v62 = vadd.f32 1e-05, %v9566_v29  ;;  %v9500_v30 = vpop.xlane.xlu1 %9499  ;;  %v9498_v38 = vpop.xlane.xlu0 %9497  ;;  %v16425_v57 = vmul.f32 0.0078125, %v16352_v53  ;;  %v16428_v20 = vmul.f32 0.0078125, %v16354_v18  ;;  %v16440_v53 = vld [vmem:[%s436_s21] ss:$0 sm:$0xff] }
 0xa79   : > { %10244 = vrsqrt.f32 %v9599_v37  ;;  %v9569_v40 = vmax.f32 %v9553_v4, 0.0  ;;  %v9568_v43 = vmax.f32 %v9552_v1, 0.0  ;;  %v9523_v34 = vmul.f32 0.0078125, %v9500_v30 }
 0xa7a   : > { %10246 = vrsqrt.f32 %v9598_v62  ;;  %v9522_v50 = vmul.f32 0.0078125, %v9498_v38  ;;  %v9542_v1 = vmul.f32 %v16418_v12, %v16418_v12 }
 0xa7b   : > { %v9601_v23 = vadd.f32 1e-05, %v9569_v40  ;;  %v9600_v32 = vadd.f32 1e-05, %v9568_v43  ;;  %v9555_v0 = vsub.f32 %v9523_v34, %v9539_v61  ;;  %v16433_v61 = vmul.f32 0.0078125, %v16356_v8 }
 0xa7c   : > { %v9554_v17 = vsub.f32 %v9522_v50, %v9538_v2  ;;  %v9504_v24 = vpop.xlane.xlu1 %9503  ;;  %v9502_v3 = vpop.xlane.xlu0 %9501  ;;  %v9543_v40 = vmul.f32 %v16425_v57, %v16425_v57  ;;  %v9545_v8 = vmul.f32 %v16428_v20, %v16428_v20  ;;  %v16454_v43 = vld [vmem:[%s439_s0] ss:$0 sm:$0xff]  ;;  %v16457_v34 = vmul.f32 0.0078125, %v16362_v10 }
 0xa7d   : > { %10248 = vrsqrt.f32 %v9601_v23  ;;  %v9571_v46 = vmax.f32 %v9555_v0, 0.0  ;;  %v9525_v29 = vmul.f32 0.0078125, %v9504_v24  ;;  %v9524_v37 = vmul.f32 0.0078125, %v9502_v3 }
 0xa7e   : > { %v10239_v4 = vpop.eup %10238  ;;  %10250 = vrsqrt.f32 %v9600_v32  ;;  %v9570_v18 = vmax.f32 %v9554_v17, 0.0  ;;  %v9544_v0 = vmul.f32 %v16433_v61, %v16433_v61 }
 0xa7f   : > { %v9627_v2 = vmul.f32 %v10239_v4, %v9579_v7  ;;  %v9603_v62 = vadd.f32 1e-05, %v9571_v46  ;;  %v9557_v30 = vsub.f32 %v9525_v29, %v9541_v27  ;;  %v9556_v38 = vsub.f32 %v9524_v37, %v9540_v11 }
 0xa80   : > { %v9602_v5 = vadd.f32 1e-05, %v9570_v18  ;;  %v9508_v28 = vpop.xlane.xlu1 %9507  ;;  %v9506_v7 = vpop.xlane.xlu0 %9505  ;;  %v9546_v37 = vmul.f32 %v16457_v34, %v16457_v34 }
 0xa81   : > { %v9650_v50 = vmul.f32 %v16440_v53, %v9627_v2  ;;  %10252 = vrsqrt.f32 %v9603_v62  ;;  %v9573_v11 = vmax.f32 %v9557_v30, 0.0  ;;  %v9572_v23 = vmax.f32 %v9556_v38, 0.0 }
 0xa82   : > { %v10241_v32 = vpop.eup %10240  ;;  %10254 = vrsqrt.f32 %v9602_v5  ;;  %v9527_v27 = vmul.f32 0.0078125, %v9508_v28  ;;  %v9526_v17 = vmul.f32 0.0078125, %v9506_v7 }
 0xa83   : > { %v10243_v24 = vpop.eup %10242  ;;  %v9673_v3 = vadd.f32 %v16454_v43, %v9650_v50  ;;  %v9629_v10 = vmul.f32 %v10241_v32, %v9581_v31  ;;  %v9605_v46 = vadd.f32 1e-05, %v9573_v11  ;;  %v9604_v29 = vadd.f32 1e-05, %v9572_v23 }
 0xa84   : > { %v9628_v4 = vmul.f32 %v10243_v24, %v9580_v39  ;;  %v9559_v18 = vsub.f32 %v9527_v27, %v9543_v40  ;;  %v9558_v2 = vsub.f32 %v9526_v17, %v9542_v1  ;;  %v9512_v62 = vpop.xlane.xlu1 %9511  ;;  %v9510_v30 = vpop.xlane.xlu0 %9509 }
 0xa85   : > { %v9689_v38 = vmax.f32 %v9673_v3, 0.0  ;;  %v9652_v5 = vmul.f32 %v16440_v53, %v9629_v10  ;;  %10256 = vrsqrt.f32 %v9605_v46  ;;  %v9529_v28 = vmul.f32 0.0078125, %v9512_v62 }
 0xa86   : > { %v10245_v49 = vpop.eup %10244  ;;  %v9651_v60 = vmul.f32 %v16440_v53, %v9628_v4  ;;  %10258 = vrsqrt.f32 %v9604_v29  ;;  %v9575_v31 = vmax.f32 %v9559_v18, 0.0  ;;  %v9574_v7 = vmax.f32 %v9558_v2, 0.0 }
 0xa87   : > { %v10247_v50 = vpop.eup %10246  ;;  %9706 = vst [vmem:[#allocation2] sm:$0xff] %v9689_v38  ;;  %9722 = vst [vmem:[#allocation14] sm:$0xff] %v9689_v38  ;;  %v9675_v13 = vadd.f32 %v16454_v43, %v9652_v5  ;;  %v9631_v63 = vmul.f32 %v10245_v49, %v9583_v19  ;;  %v9561_v39 = vsub.f32 %v9529_v28, %v9545_v8  ;;  %v9528_v1 = vmul.f32 0.0078125, %v9510_v30 }
 0xa88   : > { %v9674_v40 = vadd.f32 %v16454_v43, %v9651_v60  ;;  %v9630_v11 = vmul.f32 %v10247_v50, %v9582_v44  ;;  %v9607_v23 = vadd.f32 1e-05, %v9575_v31  ;;  %v9606_v32 = vadd.f32 1e-05, %v9574_v7  ;;  %v9514_v27 = vpop.xlane.xlu0 %9513 }
 0xa89   : > { %v9691_v17 = vmax.f32 %v9675_v13, 0.0  ;;  %v9654_v24 = vmul.f32 %v16440_v53, %v9631_v63  ;;  %v9577_v3 = vmax.f32 %v9561_v39, 0.0  ;;  %v9560_v10 = vsub.f32 %v9528_v1, %v9544_v0 }
 0xa8a   : > { %v10249_v46 = vpop.eup %10248  ;;  %v9690_v29 = vmax.f32 %v9674_v40, 0.0  ;;  %v9653_v33 = vmul.f32 %v16440_v53, %v9630_v11  ;;  %10260 = vrsqrt.f32 %v9607_v23  ;;  %v9530_v52 = vmul.f32 0.0078125, %v9514_v27 }
 0xa8b   : > { %v10251_v19 = vpop.eup %10250  ;;  %9708 = vst [vmem:[#allocation2 + $0x10] sm:$0xff] %v9691_v17  ;;  %9724 = vst [vmem:[#allocation14 + $0x10] sm:$0xff] %v9691_v17  ;;  %v9677_v25 = vadd.f32 %v16454_v43, %v9654_v24  ;;  %v9633_v14 = vmul.f32 %v10249_v46, %v9585_v48  ;;  %10262 = vrsqrt.f32 %v9606_v32  ;;  %v9609_v44 = vadd.f32 1e-05, %v9577_v3 }
 0xa8c   : > { %9707 = vst [vmem:[#allocation2 + $0x8] sm:$0xff] %v9690_v29  ;;  %9723 = vst [vmem:[#allocation14 + $0x8] sm:$0xff] %v9690_v29  ;;  %v9676_v8 = vadd.f32 %v16454_v43, %v9653_v33  ;;  %v9632_v0 = vmul.f32 %v10251_v19, %v9584_v45  ;;  %v9576_v4 = vmax.f32 %v9560_v10, 0.0  ;;  %v9562_v18 = vsub.f32 %v9530_v52, %v9546_v37 }
 0xa8d   : > { %v9587_v2 = vsub.f32 %v17598_v41, %v16400_v58  ;;  %v9693_v62 = vmax.f32 %v9677_v25, 0.0  ;;  %v9656_v30 = vmul.f32 %v16440_v53, %v9633_v14  ;;  %10264 = vrsqrt.f32 %v9609_v44 }
 0xa8e   : > { %v10253_v21 = vpop.eup %10252  ;;  %v9692_v55 = vmax.f32 %v9676_v8, 0.0  ;;  %v9655_v48 = vmul.f32 %v16440_v53, %v9632_v0  ;;  %v9608_v38 = vadd.f32 1e-05, %v9576_v4  ;;  %v9578_v5 = vmax.f32 %v9562_v18, 0.0 }
 0xa8f   : > { %v10255_v28 = vpop.eup %10254  ;;  %9710 = vst [vmem:[#allocation2 + $0x20] sm:$0xff] %v9693_v62  ;;  %9726 = vst [vmem:[#allocation14 + $0x20] sm:$0xff] %v9693_v62  ;;  %v9679_v15 = vadd.f32 %v16454_v43, %v9656_v30  ;;  %v9635_v36 = vmul.f32 %v10253_v21, %v9587_v2  ;;  %v9589_v37 = vsub.f32 %v17600_v16, %v16413_v54 }
 0xa90   : > { %9709 = vst [vmem:[#allocation2 + $0x18] sm:$0xff] %v9692_v55  ;;  %9725 = vst [vmem:[#allocation14 + $0x18] sm:$0xff] %v9692_v55  ;;  %v9678_v41 = vadd.f32 %v16454_v43, %v9655_v48  ;;  %v9634_v58 = vmul.f32 %v10255_v28, %v9586_v51  ;;  %10266 = vrsqrt.f32 %v9608_v38  ;;  %v9610_v45 = vadd.f32 1e-05, %v9578_v5 }
 0xa91   : > { %v9695_v49 = vmax.f32 %v9679_v15, 0.0  ;;  %v9658_v60 = vmul.f32 %v16440_v53, %v9635_v36  ;;  %v9588_v7 = vsub.f32 %v17601_v42, %v16406_v9  ;;  %v9591_v42 = vsub.f32 %v16303_v35, %v16425_v57 }
 0xa92   : > { %v10257_v31 = vpop.eup %10256  ;;  %v9694_v50 = vmax.f32 %v9678_v41, 0.0  ;;  %v9657_v13 = vmul.f32 %v16440_v53, %v9634_v58  ;;  %10268 = vrsqrt.f32 %v9610_v45  ;;  %v9590_v11 = vsub.f32 %v17602_v26, %v16418_v12 }
 0xa93   : > { %v10259_v63 = vpop.eup %10258  ;;  %9712 = vst [vmem:[#allocation2 + $0x30] sm:$0xff] %v9695_v49  ;;  %9728 = vst [vmem:[#allocation14 + $0x30] sm:$0xff] %v9695_v49  ;;  %v9681_v59 = vadd.f32 %v16454_v43, %v9658_v60  ;;  %v9637_v22 = vmul.f32 %v10257_v31, %v9589_v37  ;;  %v9593_v35 = vsub.f32 %v16307_v6, %v16428_v20 }
 0xa94   : > { %9711 = vst [vmem:[#allocation2 + $0x28] sm:$0xff] %v9694_v50  ;;  %9727 = vst [vmem:[#allocation14 + $0x28] sm:$0xff] %v9694_v50  ;;  %v9680_v16 = vadd.f32 %v16454_v43, %v9657_v13  ;;  %v9636_v54 = vmul.f32 %v10259_v63, %v9588_v7  ;;  %v9592_v29 = vsub.f32 %v16309_v47, %v16433_v61 }
 0xa95   : > { %v9697_v51 = vmax.f32 %v9681_v59, 0.0  ;;  %v9660_v39 = vmul.f32 %v16440_v53, %v9637_v22  ;;  %v9594_v19 = vsub.f32 %v16313_v56, %v16457_v34 }
 0xa96   : > { %v9696_v9 = vmax.f32 %v9680_v16, 0.0  ;;  %v9659_v1 = vmul.f32 %v16440_v53, %v9636_v54 }
 0xa97   : > { %v10261_v40 = vpop.eup %10260  ;;  %9714 = vst [vmem:[#allocation2 + $0x40] sm:$0xff] %v9697_v51  ;;  %9730 = vst [vmem:[#allocation14 + $0x40] sm:$0xff] %v9697_v51  ;;  %v9683_v23 = vadd.f32 %v16454_v43, %v9660_v39 }
 0xa98   : > { %v10263_v32 = vpop.eup %10262  ;;  %9713 = vst [vmem:[#allocation2 + $0x38] sm:$0xff] %v9696_v9  ;;  %9729 = vst [vmem:[#allocation14 + $0x38] sm:$0xff] %v9696_v9  ;;  %v9682_v27 = vadd.f32 %v16454_v43, %v9659_v1  ;;  %v9639_v17 = vmul.f32 %v10261_v40, %v9591_v42 }
 0xa99   : > { %v9699_v57 = vmax.f32 %v9683_v23, 0.0  ;;  %v9638_v24 = vmul.f32 %v10263_v32, %v9590_v11 }
 0xa9a   : > { %v10265_v3 = vpop.eup %10264  ;;  %v9698_v10 = vmax.f32 %v9682_v27, 0.0  ;;  %v9662_v46 = vmul.f32 %v16440_v53, %v9639_v17 }
 0xa9b   : > { %9716 = vst [vmem:[#allocation2 + $0x50] sm:$0xff] %v9699_v57  ;;  %9732 = vst [vmem:[#allocation14 + $0x50] sm:$0xff] %v9699_v57  ;;  %v9661_v26 = vmul.f32 %v16440_v53, %v9638_v24  ;;  %v9641_v12 = vmul.f32 %v10265_v3, %v9593_v35 }
 0xa9c   : > { %9715 = vst [vmem:[#allocation2 + $0x48] sm:$0xff] %v9698_v10  ;;  %9731 = vst [vmem:[#allocation14 + $0x48] sm:$0xff] %v9698_v10  ;;  %v9685_v33 = vadd.f32 %v16454_v43, %v9662_v46 }
 0xa9d   : > { %v10267_v52 = vpop.eup %10266  ;;  %v9684_v6 = vadd.f32 %v16454_v43, %v9661_v26  ;;  %v9664_v20 = vmul.f32 %v16440_v53, %v9641_v12 }
 0xa9e   : > { %v9701_v25 = vmax.f32 %v9685_v33, 0.0  ;;  %v9640_v14 = vmul.f32 %v10267_v52, %v9592_v29 }
 0xa9f   : > { %v10269_v44 = vpop.eup %10268  ;;  %v9700_v8 = vmax.f32 %v9684_v6, 0.0  ;;  %v9687_v0 = vadd.f32 %v16454_v43, %v9664_v20 }
 0xaa0   : > { %9718 = vst [vmem:[#allocation2 + $0x60] sm:$0xff] %v9701_v25  ;;  %9734 = vst [vmem:[#allocation14 + $0x60] sm:$0xff] %v9701_v25  ;;  %v9663_v47 = vmul.f32 %v16440_v53, %v9640_v14  ;;  %v9642_v61 = vmul.f32 %v10269_v44, %v9594_v19 }
 0xaa1   : > { %9717 = vst [vmem:[#allocation2 + $0x58] sm:$0xff] %v9700_v8  ;;  %9733 = vst [vmem:[#allocation14 + $0x58] sm:$0xff] %v9700_v8  ;;  %v9703_v4 = vmax.f32 %v9687_v0, 0.0 }
 0xaa2   : > { %v9686_v18 = vadd.f32 %v16454_v43, %v9663_v47  ;;  %v9665_v2 = vmul.f32 %v16440_v53, %v9642_v61 }
 0xaa3   : > { %9720 = vst [vmem:[#allocation2 + $0x70] sm:$0xff] %v9703_v4  ;;  %9736 = vst [vmem:[#allocation14 + $0x70] sm:$0xff] %v9703_v4 }
 0xaa4   : > { %v9702_v56 = vmax.f32 %v9686_v18, 0.0  ;;  %v9688_v34 = vadd.f32 %v16454_v43, %v9665_v2 }
 0xaa6   : > { %9719 = vst [vmem:[#allocation2 + $0x68] sm:$0xff] %v9702_v56  ;;  %9735 = vst [vmem:[#allocation14 + $0x68] sm:$0xff] %v9702_v56  ;;  %v9704_v62 = vmax.f32 %v9688_v34, 0.0 }
 0xaa8   : > { %9721 = vst [vmem:[#allocation2 + $0x78] sm:$0xff] %v9704_v62  ;;  %9737 = vst [vmem:[#allocation14 + $0x78] sm:$0xff] %v9704_v62 }
 0xaa9   : > { %10474 = shalt.err (!%p10471_p5)
}
 0xaaa   : > { %s10564_s27 = smov 128   ;;  %s10565_s13 = smov 8  }
 0xaab   : > { %10110 = dma.vmem_to_hbm [thread:$0]  (%p10130_p11), %s9748_s26, 2048, %s16570_s8, [#allocation8], %s10564_s27, %s10564_s27, %s10565_s13  }
 0xaac   : > { %10526 = dma.done.wait (%p10130_p11), [#allocation8], 2048  }
 0xaad   : > { %10528 = vsyncadd (%p10130_p11), [#allocation8], 4294965248 }
 0xaae PF: > { %s26_s10 = sadd.s32 1, %s10551_s10   ;;  %s17603_s20 = sld [smem:[#allocation24_spill]] }
 0xaaf   : > { %p23_p1 = scmp.ge.s32.totalorder %s26_s10, 4   ;;  %s17604_s29 = sld [smem:[#allocation26_spill]] }
 0xab0   : > { %s17605_s21 = sld [smem:[#allocation25_spill]]  ;;  %s17606_s27 = smov %s10535_s28 }
 0xab1   : > { %s17608_s30 = smov %s10547_s9 }
 0xab2   :  { %25 = sbr.rel (!%p23_p1) target bundleno = 12 (0xc), region = 139 }
 0xab4   : > { %s17607_s28 = smov %s17603_s20 }
 0xab6   : > { %s17609_s9 = smov %s17605_s21 }
 0xab7   :  { %9763 = vsyncpa [#allocation7], 1 }
 0xab8   :  { %9765 = vsyncpa [#allocation7 + $0x1], 1 }
 0xab9   :  { %9766 = vsyncpa [#allocation10], 1 }
 0xaba   :  { %9768 = vsyncpa [#allocation10 + $0x1], 1 }
 0xabb   :  { %9769 = vsyncpa [#allocation13], 1 }
 0xabc   :  { %9771 = vsyncpa [#allocation13 + $0x1], 1 }
 0xabd   :  { %9772 = vsyncpa [#allocation8], 1 }
 0xabe   :  { %9774 = vsyncpa [#allocation8 + $0x1], 1 }
 0xabf   :  { %9775 = vsyncmov [#allocation5] }
 0xac2   :  { %s9776_s19 = vpop.sfrf %9775 }
 0xac3   :  { %p9982_p3 = scmp.ne.s32.totalorder %s9776_s19, 0 }
 0xac5   :  { %9780 = shalt.err (%p9982_p3)  }

</bundles_post_ra>
